<compile_context>
chip_gen: v7x
topology: tpu7x:2x2x1
jax: 0.10.0
libtpu: 0.0.40
codegen_flags: <defaults>
</compile_context>

<pallas_src>
import functools

import jax
import jax.numpy as jnp
from jax.experimental import pallas as pl
from jax.experimental.pallas import tpu as pltpu

_EPS = 1e-5
_LANE = 128


# ---------------------------------------------------------------------------
# In-kernel helpers
# ---------------------------------------------------------------------------
def _im2col_3x3(xp, ho, wo, stride):
    """xp: (Hp, Wp, C) padded input -> (ho*wo, 9*C) patch matrix (dy-major)."""
    c = xp.shape[-1]
    cols = []
    for dy in range(3):
        for dx in range(3):
            tap = jax.lax.slice(
                xp,
                (dy, dx, 0),
                (dy + (ho - 1) * stride + 1, dx + (wo - 1) * stride + 1, c),
                (stride, stride, 1))
            cols.append(tap.reshape(ho * wo, c))
    return jnp.concatenate(cols, axis=1)          # lane-dense: multiples of 128


def _pad_into_scratch(pad_ref, interior, h, w):
    """Zero a (h+2, w+2, C) VMEM scratch and write `interior` at offset (1,1)."""
    pad_ref[...] = jnp.zeros_like(pad_ref)
    pad_ref[1:h + 1, 1:w + 1, :] = interior
    return pad_ref[...]


# ---------------------------------------------------------------------------
# Pallas kernels
# ---------------------------------------------------------------------------
def _conv_stats_kernel(x_ref, w_ref, y_ref, sum_ref, ssq_ref, xp_ref, *, stride):
    """conv1: 3x3 conv (padding=1, stride) + per-tile BN partial sums."""
    h, wdt = x_ref.shape[1], x_ref.shape[2]
    ho, wo, cout = y_ref.shape[1], y_ref.shape[2], y_ref.shape[3]
    xp = _pad_into_scratch(xp_ref, x_ref[0], h, wdt)
    patches = _im2col_3x3(xp, ho, wo, stride)              # (ho*wo, 9*cin)
    acc = jnp.dot(patches, w_ref[...], preferred_element_type=jnp.float32)
    y_ref[...] = acc.reshape(1, ho, wo, cout)
    sum_ref[...] = jnp.sum(acc, axis=0, keepdims=True).reshape(1, 1, cout)
    ssq_ref[...] = jnp.sum(acc * acc, axis=0, keepdims=True).reshape(1, 1, cout)


def _bn_relu_conv_stats_kernel(y_ref, scale_ref, shift_ref, w_ref,
                               out_ref, sum_ref, ssq_ref, zp_ref):
    """bn1-apply + ReLU + conv2 (3x3, stride 1) + BN2 partial sums, fused."""
    ho, wo, cout = out_ref.shape[1], out_ref.shape[2], out_ref.shape[3]
    z = jnp.maximum(y_ref[0] * scale_ref[...] + shift_ref[...], 0.0)  # (ho,wo,c)
    zp = _pad_into_scratch(zp_ref, z, ho, wo)
    patches = _im2col_3x3(zp, ho, wo, 1)
    acc = jnp.dot(patches, w_ref[...], preferred_element_type=jnp.float32)
    out_ref[...] = acc.reshape(1, ho, wo, cout)
    sum_ref[...] = jnp.sum(acc, axis=0, keepdims=True).reshape(1, 1, cout)
    ssq_ref[...] = jnp.sum(acc * acc, axis=0, keepdims=True).reshape(1, 1, cout)


def _bn_add_relu_kernel(y_ref, skip_ref, scale_ref, shift_ref, out_ref):
    """bn2-apply + identity skip + final ReLU."""
    bn = y_ref[...] * scale_ref[...] + shift_ref[...]
    out_ref[...] = jnp.maximum(bn + skip_ref[...], 0.0)


def _bn_convskip_add_relu_kernel(y_ref, x_ref, scale_ref, shift_ref, w_ref,
                                 b_ref, out_ref, xp_ref, *, stride):
    """bn2-apply + fused conv3 skip (3x3, padding=1, stride, with bias) + ReLU."""
    h, wdt = x_ref.shape[1], x_ref.shape[2]
    ho, wo, cout = out_ref.shape[1], out_ref.shape[2], out_ref.shape[3]
    bn = y_ref[0] * scale_ref[...] + shift_ref[...]              # (ho, wo, c)
    xp = _pad_into_scratch(xp_ref, x_ref[0], h, wdt)
    patches = _im2col_3x3(xp, ho, wo, stride)
    skip = jnp.dot(patches, w_ref[...],
                   preferred_element_type=jnp.float32) + b_ref[...]
    out = jnp.maximum(bn + skip.reshape(ho, wo, cout), 0.0)
    out_ref[...] = out.reshape(1, ho, wo, cout)


# ---------------------------------------------------------------------------
# Host-side plumbing
# ---------------------------------------------------------------------------
def _round_up(x, m):
    return (x + m - 1) // m * m


def _pad_channels(a, c_to):
    pad = c_to - a.shape[-1]
    if pad == 0:
        return a
    widths = [(0, 0)] * (a.ndim - 1) + [(0, pad)]
    return jnp.pad(a, widths)


def _prep_weight(w, cin_p, cout_p):
    """(3,3,Cin,Cout) -> zero-padded, reshaped (9*Cin_p, Cout_p) im2col weight."""
    kh, kw, cin, cout = w.shape
    w = jnp.pad(w, ((0, 0), (0, 0), (0, cin_p - cin), (0, cout_p - cout)))
    return w.reshape(kh * kw * cin_p, cout_p).astype(jnp.float32)


def _compiler_params():
    return pltpu.CompilerParams(
        dimension_semantics=("parallel",),        # shards batch across TCs (v7x)
        vmem_limit_bytes=64 * 1024 * 1024)


def _bn_affine(s, q, count, gamma, beta, c_p):
    """Reduce per-tile (sum, sumsq) partials -> folded BN scale/shift (1,1,Cp)."""
    total = jnp.sum(s, axis=0, keepdims=True)                 # (1, 1, Cp)
    total_sq = jnp.sum(q, axis=0, keepdims=True)
    mean = total / count
    var = jnp.maximum(total_sq / count - mean * mean, 0.0)    # biased (PyTorch)
    g = _pad_channels(gamma.astype(jnp.float32), c_p).reshape(1, 1, c_p)
    b = _pad_channels(beta.astype(jnp.float32), c_p).reshape(1, 1, c_p)
    scale = g * jax.lax.rsqrt(var + _EPS)
    shift = b - mean * scale
    return scale, shift


def _conv_stats(x, w, ho, wo, stride):
    n, h, wdt, cin_p = x.shape
    cout_p = w.shape[-1]
    kernel = functools.partial(_conv_stats_kernel, stride=stride)
    flops = 2 * n * ho * wo * w.shape[0] * cout_p
    bytes_acc = 4 * (x.size + w.size + n * ho * wo * cout_p + 2 * n * cout_p)
    return pl.pallas_call(
        kernel,
        grid=(n,),
        in_specs=[
            pl.BlockSpec((1, h, wdt, cin_p), lambda i: (i, 0, 0, 0)),
            pl.BlockSpec((w.shape[0], cout_p), lambda i: (0, 0)),
        ],
        out_specs=[
            pl.BlockSpec((1, ho, wo, cout_p), lambda i: (i, 0, 0, 0)),
            pl.BlockSpec((1, 1, cout_p), lambda i: (i, 0, 0)),
            pl.BlockSpec((1, 1, cout_p), lambda i: (i, 0, 0)),
        ],
        out_shape=(
            jax.ShapeDtypeStruct((n, ho, wo, cout_p), jnp.float32),
            jax.ShapeDtypeStruct((n, 1, cout_p), jnp.float32),
            jax.ShapeDtypeStruct((n, 1, cout_p), jnp.float32),
        ),
        scratch_shapes=[pltpu.VMEM((h + 2, wdt + 2, cin_p), jnp.float32)],
        compiler_params=_compiler_params(),
        cost_estimate=pl.CostEstimate(flops=flops, transcendentals=0,
                                      bytes_accessed=bytes_acc),
    )(x, w)


def _bn_relu_conv_stats(y1, scale, shift, w):
    n, ho, wo, c = y1.shape
    flops = 2 * n * ho * wo * w.shape[0] * c
    bytes_acc = 4 * (2 * y1.size + w.size + 2 * n * c + 2 * c)
    return pl.pallas_call(
        _bn_relu_conv_stats_kernel,
        grid=(n,),
        in_specs=[
            pl.BlockSpec((1, ho, wo, c), lambda i: (i, 0, 0, 0)),
            pl.BlockSpec((1, 1, c), lambda i: (0, 0, 0)),
            pl.BlockSpec((1, 1, c), lambda i: (0, 0, 0)),
            pl.BlockSpec((w.shape[0], c), lambda i: (0, 0)),
        ],
        out_specs=[
            pl.BlockSpec((1, ho, wo, c), lambda i: (i, 0, 0, 0)),
            pl.BlockSpec((1, 1, c), lambda i: (i, 0, 0)),
            pl.BlockSpec((1, 1, c), lambda i: (i, 0, 0)),
        ],
        out_shape=(
            jax.ShapeDtypeStruct((n, ho, wo, c), jnp.float32),
            jax.ShapeDtypeStruct((n, 1, c), jnp.float32),
            jax.ShapeDtypeStruct((n, 1, c), jnp.float32),
        ),
        scratch_shapes=[pltpu.VMEM((ho + 2, wo + 2, c), jnp.float32)],
        compiler_params=_compiler_params(),
        cost_estimate=pl.CostEstimate(flops=flops, transcendentals=0,
                                      bytes_accessed=bytes_acc),
    )(y1, scale, shift, w)


def _bn_add_relu(y2, x, scale, shift):
    n, ho, wo, c = y2.shape
    return pl.pallas_call(
        _bn_add_relu_kernel,
        grid=(n,),
        in_specs=[
            pl.BlockSpec((1, ho, wo, c), lambda i: (i, 0, 0, 0)),
            pl.BlockSpec((1, ho, wo, c), lambda i: (i, 0, 0, 0)),
            pl.BlockSpec((1, 1, c), lambda i: (0, 0, 0)),
            pl.BlockSpec((1, 1, c), lambda i: (0, 0, 0)),
        ],
        out_specs=pl.BlockSpec((1, ho, wo, c), lambda i: (i, 0, 0, 0)),
        out_shape=jax.ShapeDtypeStruct((n, ho, wo, c), jnp.float32),
        input_output_aliases={0: 0},              # write over the y2 buffer
        compiler_params=_compiler_params(),
        cost_estimate=pl.CostEstimate(flops=4 * y2.size, transcendentals=0,
                                      bytes_accessed=4 * 3 * y2.size),
    )(y2, x, scale, shift)


def _bn_convskip_add_relu(y2, x, scale, shift, w3, b3, stride):
    n, ho, wo, c = y2.shape
    _, h, wdt, cin_p = x.shape
    kernel = functools.partial(_bn_convskip_add_relu_kernel, stride=stride)
    flops = 2 * n * ho * wo * w3.shape[0] * c
    bytes_acc = 4 * (2 * y2.size + x.size + w3.size)
    return pl.pallas_call(
        kernel,
        grid=(n,),
        in_specs=[
            pl.BlockSpec((1, ho, wo, c), lambda i: (i, 0, 0, 0)),
            pl.BlockSpec((1, h, wdt, cin_p), lambda i: (i, 0, 0, 0)),
            pl.BlockSpec((1, 1, c), lambda i: (0, 0, 0)),
            pl.BlockSpec((1, 1, c), lambda i: (0, 0, 0)),
            pl.BlockSpec((w3.shape[0], c), lambda i: (0, 0)),
            pl.BlockSpec((1, c), lambda i: (0, 0)),
        ],
        out_specs=pl.BlockSpec((1, ho, wo, c), lambda i: (i, 0, 0, 0)),
        out_shape=jax.ShapeDtypeStruct((n, ho, wo, c), jnp.float32),
        scratch_shapes=[pltpu.VMEM((h + 2, wdt + 2, cin_p), jnp.float32)],
        input_output_aliases={0: 0},
        compiler_params=_compiler_params(),
        cost_estimate=pl.CostEstimate(flops=flops, transcendentals=0,
                                      bytes_accessed=bytes_acc),
    )(y2, x, scale, shift, w3, b3)


def residual_forward(x_nhwc, params, stride=1, use_1x1conv=False):
    """relu(bn2(conv2(relu(bn1(conv1(x))))) + (conv3(x) if use_1x1conv else x))."""
    n, h, wdt, cin = x_nhwc.shape
    cout = params["w1"].shape[-1]
    cin_p = _round_up(cin, _LANE)
    cout_p = _round_up(cout, _LANE)
    ho = (h - 1) // stride + 1
    wo = (wdt - 1) // stride + 1

    x_p = _pad_channels(x_nhwc.astype(jnp.float32), cin_p)
    w1 = _prep_weight(params["w1"], cin_p, cout_p)
    w2 = _prep_weight(params["w2"], cout_p, cout_p)
    # conv1/conv2 biases are omitted: exactly cancelled by training-mode BN.

    # K1: conv1 + bn1 partial sums.
    y1, s1, q1 = _conv_stats(x_p, w1, ho, wo, stride)
    scale1, shift1 = _bn_affine(s1, q1, n * ho * wo,
                                params["g1"], params["be1"], cout_p)

    # K2: bn1 + relu + conv2 + bn2 partial sums (intermediate stays in VMEM).
    y2, s2, q2 = _bn_relu_conv_stats(y1, scale1, shift1, w2)
    scale2, shift2 = _bn_affine(s2, q2, n * ho * wo,
                                params["g2"], params["be2"], cout_p)

    # K3: bn2 + skip + add + relu, output aliased onto y2's buffer.
    if use_1x1conv:
        w3 = _prep_weight(params["w3"], cin_p, cout_p)
        b3 = _pad_channels(params["b3"].astype(jnp.float32), cout_p).reshape(1, cout_p)
        out = _bn_convskip_add_relu(y2, x_p, scale2, shift2, w3, b3, stride)
    else:
        assert stride == 1 and cin == cout, "identity skip needs stride=1, cin==cout"
        out = _bn_add_relu(y2, x_p, scale2, shift2)

    return out[..., :cout]


# ---------------------------------------------------------------------------
# Pure-JAX reference (with conv biases, two-pass BN) for correctness check.
# ---------------------------------------------------------------------------
def _ref_conv(x, w, b, stride):
    out = jax.lax.conv_general_dilated(
        x, w, (stride, stride), ((1, 1), (1, 1)),
        dimension_numbers=("NHWC", "HWIO", "NHWC"))
    return out + b.reshape(1, 1, 1, -1)


def _ref_bn(y, g, b):
    mean = y.mean(axis=(0, 1, 2), keepdims=True)
    var = jnp.square(y - mean).mean(axis=(0, 1, 2), keepdims=True)
    return (y - mean) / jnp.sqrt(var + _EPS) * g.reshape(1, 1, 1, -1) + b.reshape(1, 1, 1, -1)


def _ref_forward(x, p, stride, use_1x1conv):
    y = jax.nn.relu(_ref_bn(_ref_conv(x, p["w1"], p["b1"], stride), p["g1"], p["be1"]))
    y = _ref_bn(_ref_conv(y, p["w2"], p["b2"], 1), p["g2"], p["be2"])
    skip = _ref_conv(x, p["w3"], p["b3"], stride) if use_1x1conv else x
    return jax.nn.relu(y + skip)


# ---------------------------------------------------------------------------
if __name__ == "__main__":
    key = jax.random.PRNGKey(0)
    in_ch = out_ch = 4
    N, H, W = 2, 16, 16

    k = jax.random.split(key, 8)
    x_nchw = jax.random.normal(k[0], (N, in_ch, H, W), jnp.float32)  # PyTorch NCHW
    params = {
        "w1": jax.random.normal(k[1], (3, 3, in_ch, out_ch), jnp.float32) * 0.1,
        "b1": jax.random.normal(k[2], (out_ch,), jnp.float32) * 0.1,
        "w2": jax.random.normal(k[3], (3, 3, out_ch, out_ch), jnp.float32) * 0.1,
        "b2": jax.random.normal(k[4], (out_ch,), jnp.float32) * 0.1,
        "w3": jax.random.normal(k[5], (3, 3, in_ch, out_ch), jnp.float32) * 0.1,
        "b3": jax.random.normal(k[6], (out_ch,), jnp.float32) * 0.1,
        "g1": jnp.ones((out_ch,), jnp.float32) * 1.2,
        "be1": jnp.ones((out_ch,), jnp.float32) * 0.05,
        "g2": jnp.ones((out_ch,), jnp.float32) * 0.9,
        "be2": jnp.ones((out_ch,), jnp.float32) * -0.02,
    }

    x_nhwc = jnp.transpose(x_nchw, (0, 2, 3, 1))     # NCHW -> NHWC for the kernels

    # TODO(synk): stride=2 is implemented (strided im2col taps) but not
    # exercised here; the demo covers identity-skip and conv3-skip at stride 1.
    for use_1x1conv in (False, True):
        fwd = jax.jit(functools.partial(residual_forward, stride=1,
                                        use_1x1conv=use_1x1conv))
        out_nhwc = jax.block_until_ready(fwd(x_nhwc, params))
        out_nchw = jnp.transpose(out_nhwc, (0, 3, 1, 2))   # back to PyTorch NCHW

        ref = _ref_forward(x_nhwc, params, 1, use_1x1conv)
        assert out_nhwc.shape == ref.shape
        err = float(jnp.max(jnp.abs(out_nhwc - ref)))
        assert jnp.allclose(out_nhwc, ref, atol=1e-3, rtol=1e-3), (
            f"mismatch vs JAX reference (use_1x1conv={use_1x1conv}, max err {err})")

    print("KERNEL_OK")
</pallas_src>

<mosaic_0001>
module attributes {stable_mosaic.version = 11 : i64} {
  func.func @_conv_stats_kernel(%arg0: i32, %arg1: memref<1x16x16x128xf32, #tpu.memory_space<vmem>>, %arg2: memref<1152x128xf32, #tpu.memory_space<vmem>>, %arg3: memref<1x16x16x128xf32, #tpu.memory_space<vmem>>, %arg4: memref<1x1x128xf32, #tpu.memory_space<vmem>>, %arg5: memref<1x1x128xf32, #tpu.memory_space<vmem>>, %arg6: memref<18x18x128xf32, #tpu.memory_space<vmem>>) attributes {dimension_semantics = [#tpu.dimension_semantics<parallel>], iteration_bounds = array<i64: 2>, scalar_prefetch = 0 : i64, scratch_operands = 1 : i64, tpu.core_type = #tpu.core_type<tc>, window_params = [{transform_indices = @transform_0, window_bounds = array<i64: 1, 16, 16, 128>}, {pipeline_mode = #tpu.pipeline_mode<synchronous>, transform_indices = @transform_1, window_bounds = array<i64: 1152, 128>}, {transform_indices = @transform_2, window_bounds = array<i64: 1, 16, 16, 128>}, {transform_indices = @transform_3, window_bounds = array<i64: 1, 1, 128>}, {transform_indices = @transform_4, window_bounds = array<i64: 1, 1, 128>}]} {
    %c0 = arith.constant 0 : index
    %c0_0 = arith.constant 0 : index
    %c0_1 = arith.constant 0 : index
    %c0_2 = arith.constant 0 : index
    %0 = vector.load %arg1[%c0, %c0_0, %c0_1, %c0_2] : memref<1x16x16x128xf32, #tpu.memory_space<vmem>>, vector<1x16x16x128xf32>
    %1 = vector.shape_cast %0 : vector<1x16x16x128xf32> to vector<16x16x128xf32>
    %cst = arith.constant 0.000000e+00 : f32
    %2 = vector.broadcast %cst : f32 to vector<18x18x128xf32>
    %c0_3 = arith.constant 0 : index
    %c0_4 = arith.constant 0 : index
    %c0_5 = arith.constant 0 : index
    %3 = vector.load %arg6[%c0_3, %c0_4, %c0_5] : memref<18x18x128xf32, #tpu.memory_space<vmem>>, vector<18x18x128xf32>
    tpu.vector_store %arg6[%c0_3, %c0_4, %c0_5], %2 {strides = array<i32>} : memref<18x18x128xf32, #tpu.memory_space<vmem>>, vector<18x18x128xf32>,
    %c1 = arith.constant 1 : index
    %c1_6 = arith.constant 1 : index
    %c0_7 = arith.constant 0 : index
    %4 = vector.load %arg6[%c1, %c1_6, %c0_7] : memref<18x18x128xf32, #tpu.memory_space<vmem>>, vector<16x16x128xf32>
    tpu.vector_store %arg6[%c1, %c1_6, %c0_7], %1 {strides = array<i32>} : memref<18x18x128xf32, #tpu.memory_space<vmem>>, vector<16x16x128xf32>,
    %c0_8 = arith.constant 0 : index
    %c0_9 = arith.constant 0 : index
    %c0_10 = arith.constant 0 : index
    %5 = vector.load %arg6[%c0_8, %c0_9, %c0_10] : memref<18x18x128xf32, #tpu.memory_space<vmem>>, vector<18x18x128xf32>
    %6 = vector.extract_strided_slice %5 {offsets = [0, 0, 0], sizes = [16, 16, 128], strides = [1, 1, 1]} : vector<18x18x128xf32> to vector<16x16x128xf32>
    %7 = vector.shape_cast %6 : vector<16x16x128xf32> to vector<256x128xf32>
    %8 = vector.extract_strided_slice %5 {offsets = [0, 1, 0], sizes = [16, 16, 128], strides = [1, 1, 1]} : vector<18x18x128xf32> to vector<16x16x128xf32>
    %9 = vector.shape_cast %8 : vector<16x16x128xf32> to vector<256x128xf32>
    %10 = vector.extract_strided_slice %5 {offsets = [0, 2, 0], sizes = [16, 16, 128], strides = [1, 1, 1]} : vector<18x18x128xf32> to vector<16x16x128xf32>
    %11 = vector.shape_cast %10 : vector<16x16x128xf32> to vector<256x128xf32>
    %12 = vector.extract_strided_slice %5 {offsets = [1, 0, 0], sizes = [16, 16, 128], strides = [1, 1, 1]} : vector<18x18x128xf32> to vector<16x16x128xf32>
    %13 = vector.shape_cast %12 : vector<16x16x128xf32> to vector<256x128xf32>
    %14 = vector.extract_strided_slice %5 {offsets = [1, 1, 0], sizes = [16, 16, 128], strides = [1, 1, 1]} : vector<18x18x128xf32> to vector<16x16x128xf32>
    %15 = vector.shape_cast %14 : vector<16x16x128xf32> to vector<256x128xf32>
    %16 = vector.extract_strided_slice %5 {offsets = [1, 2, 0], sizes = [16, 16, 128], strides = [1, 1, 1]} : vector<18x18x128xf32> to vector<16x16x128xf32>
    %17 = vector.shape_cast %16 : vector<16x16x128xf32> to vector<256x128xf32>
    %18 = vector.extract_strided_slice %5 {offsets = [2, 0, 0], sizes = [16, 16, 128], strides = [1, 1, 1]} : vector<18x18x128xf32> to vector<16x16x128xf32>
    %19 = vector.shape_cast %18 : vector<16x16x128xf32> to vector<256x128xf32>
    %20 = vector.extract_strided_slice %5 {offsets = [2, 1, 0], sizes = [16, 16, 128], strides = [1, 1, 1]} : vector<18x18x128xf32> to vector<16x16x128xf32>
    %21 = vector.shape_cast %20 : vector<16x16x128xf32> to vector<256x128xf32>
    %22 = vector.extract_strided_slice %5 {offsets = [2, 2, 0], sizes = [16, 16, 128], strides = [1, 1, 1]} : vector<18x18x128xf32> to vector<16x16x128xf32>
    %23 = vector.shape_cast %22 : vector<16x16x128xf32> to vector<256x128xf32>
    %24 = tpu.concatenate %7, %9, %11, %13, %15, %17, %19, %21, %23 in 1 : vector<256x128xf32>, vector<256x128xf32>, vector<256x128xf32>, vector<256x128xf32>, vector<256x128xf32>, vector<256x128xf32>, vector<256x128xf32>, vector<256x128xf32>, vector<256x128xf32> -> vector<256x1152xf32>
    %c0_11 = arith.constant 0 : index
    %c0_12 = arith.constant 0 : index
    %25 = vector.load %arg2[%c0_11, %c0_12] : memref<1152x128xf32, #tpu.memory_space<vmem>>, vector<1152x128xf32>
    %cst_13 = arith.constant dense<0.000000e+00> : vector<256x128xf32>
    %26 = tpu.matmul %24, %25, %cst_13 {dimension_numbers = #tpu.dot_dimension_numbers<[1], [0], [0], [1], [0, 0, 1, 1], [], []>} : vector<256x1152xf32>, vector<1152x128xf32>, vector<256x128xf32> -> vector<256x128xf32>
    %27 = vector.shape_cast %26 : vector<256x128xf32> to vector<1x16x16x128xf32>
    %c0_14 = arith.constant 0 : index
    %c0_15 = arith.constant 0 : index
    %c0_16 = arith.constant 0 : index
    %c0_17 = arith.constant 0 : index
    %28 = vector.load %arg3[%c0_14, %c0_15, %c0_16, %c0_17] : memref<1x16x16x128xf32, #tpu.memory_space<vmem>>, vector<1x16x16x128xf32>
    tpu.vector_store %arg3[%c0_14, %c0_15, %c0_16, %c0_17], %27 {strides = array<i32>} : memref<1x16x16x128xf32, #tpu.memory_space<vmem>>, vector<1x16x16x128xf32>,
    %cst_18 = arith.constant dense<0.000000e+00> : vector<128xf32>
    %29 = vector.multi_reduction <add>, %26, %cst_18 [0] : vector<256x128xf32> to vector<128xf32>
    %30 = vector.shape_cast %29 : vector<128xf32> to vector<1x128xf32>
    %31 = vector.shape_cast %30 : vector<1x128xf32> to vector<1x1x128xf32>
    %c0_19 = arith.constant 0 : index
    %c0_20 = arith.constant 0 : index
    %c0_21 = arith.constant 0 : index
    %32 = vector.load %arg4[%c0_19, %c0_20, %c0_21] : memref<1x1x128xf32, #tpu.memory_space<vmem>>, vector<1x1x128xf32>
    tpu.vector_store %arg4[%c0_19, %c0_20, %c0_21], %31 {strides = array<i32>} : memref<1x1x128xf32, #tpu.memory_space<vmem>>, vector<1x1x128xf32>,
    %33 = arith.mulf %26, %26 : vector<256x128xf32>
    %cst_22 = arith.constant dense<0.000000e+00> : vector<128xf32>
    %34 = vector.multi_reduction <add>, %33, %cst_22 [0] : vector<256x128xf32> to vector<128xf32>
    %35 = vector.shape_cast %34 : vector<128xf32> to vector<1x128xf32>
    %36 = vector.shape_cast %35 : vector<1x128xf32> to vector<1x1x128xf32>
    %c0_23 = arith.constant 0 : index
    %c0_24 = arith.constant 0 : index
    %c0_25 = arith.constant 0 : index
    %37 = vector.load %arg5[%c0_23, %c0_24, %c0_25] : memref<1x1x128xf32, #tpu.memory_space<vmem>>, vector<1x1x128xf32>
    tpu.vector_store %arg5[%c0_23, %c0_24, %c0_25], %36 {strides = array<i32>} : memref<1x1x128xf32, #tpu.memory_space<vmem>>, vector<1x1x128xf32>,
    return
  }
  func.func @transform_0(%arg0: i32) -> (i32, i32, i32, i32) {
    %c0_i32 = arith.constant 0 : i32
    %c0_i32_0 = arith.constant 0 : i32
    %c0_i32_1 = arith.constant 0 : i32
    %c0_i32_2 = arith.constant 0 : i32
    return %arg0, %c0_i32, %c0_i32_0, %c0_i32_1 : i32, i32, i32, i32
  }
  func.func @transform_1(%arg0: i32) -> (i32, i32) {
    %c0_i32 = arith.constant 0 : i32
    %c0_i32_0 = arith.constant 0 : i32
    %c0_i32_1 = arith.constant 0 : i32
    return %c0_i32, %c0_i32_0 : i32, i32
  }
  func.func @transform_2(%arg0: i32) -> (i32, i32, i32, i32) {
    %c0_i32 = arith.constant 0 : i32
    %c0_i32_0 = arith.constant 0 : i32
    %c0_i32_1 = arith.constant 0 : i32
    %c0_i32_2 = arith.constant 0 : i32
    return %arg0, %c0_i32, %c0_i32_0, %c0_i32_1 : i32, i32, i32, i32
  }
  func.func @transform_3(%arg0: i32) -> (i32, i32, i32) {
    %c0_i32 = arith.constant 0 : i32
    %c0_i32_0 = arith.constant 0 : i32
    %c0_i32_1 = arith.constant 0 : i32
    return %arg0, %c0_i32, %c0_i32_0 : i32, i32, i32
  }
  func.func @transform_4(%arg0: i32) -> (i32, i32, i32) {
    %c0_i32 = arith.constant 0 : i32
    %c0_i32_0 = arith.constant 0 : i32
    %c0_i32_1 = arith.constant 0 : i32
    return %arg0, %c0_i32, %c0_i32_0 : i32, i32, i32
  }
}

module attributes {stable_mosaic.version = 11 : i64} {
  func.func @_bn_relu_conv_stats_kernel(%arg0: i32, %arg1: memref<1x16x16x128xf32, #tpu.memory_space<vmem>>, %arg2: memref<1x1x128xf32, #tpu.memory_space<vmem>>, %arg3: memref<1x1x128xf32, #tpu.memory_space<vmem>>, %arg4: memref<1152x128xf32, #tpu.memory_space<vmem>>, %arg5: memref<1x16x16x128xf32, #tpu.memory_space<vmem>>, %arg6: memref<1x1x128xf32, #tpu.memory_space<vmem>>, %arg7: memref<1x1x128xf32, #tpu.memory_space<vmem>>, %arg8: memref<18x18x128xf32, #tpu.memory_space<vmem>>) attributes {dimension_semantics = [#tpu.dimension_semantics<parallel>], iteration_bounds = array<i64: 2>, scalar_prefetch = 0 : i64, scratch_operands = 1 : i64, tpu.core_type = #tpu.core_type<tc>, window_params = [{transform_indices = @transform_0, window_bounds = array<i64: 1, 16, 16, 128>}, {pipeline_mode = #tpu.pipeline_mode<synchronous>, transform_indices = @transform_1, window_bounds = array<i64: 1, 1, 128>}, {pipeline_mode = #tpu.pipeline_mode<synchronous>, transform_indices = @transform_2, window_bounds = array<i64: 1, 1, 128>}, {pipeline_mode = #tpu.pipeline_mode<synchronous>, transform_indices = @transform_3, window_bounds = array<i64: 1152, 128>}, {transform_indices = @transform_4, window_bounds = array<i64: 1, 16, 16, 128>}, {transform_indices = @transform_5, window_bounds = array<i64: 1, 1, 128>}, {transform_indices = @transform_6, window_bounds = array<i64: 1, 1, 128>}]} {
    %c0 = arith.constant 0 : index
    %c0_0 = arith.constant 0 : index
    %c0_1 = arith.constant 0 : index
    %c0_2 = arith.constant 0 : index
    %0 = vector.load %arg1[%c0, %c0_0, %c0_1, %c0_2] : memref<1x16x16x128xf32, #tpu.memory_space<vmem>>, vector<1x16x16x128xf32>
    %1 = vector.shape_cast %0 : vector<1x16x16x128xf32> to vector<16x16x128xf32>
    %c0_3 = arith.constant 0 : index
    %c0_4 = arith.constant 0 : index
    %c0_5 = arith.constant 0 : index
    %2 = vector.load %arg2[%c0_3, %c0_4, %c0_5] : memref<1x1x128xf32, #tpu.memory_space<vmem>>, vector<1x1x128xf32>
    %3 = vector.broadcast %2 : vector<1x1x128xf32> to vector<16x16x128xf32>
    %4 = arith.mulf %1, %3 : vector<16x16x128xf32>
    %c0_6 = arith.constant 0 : index
    %c0_7 = arith.constant 0 : index
    %c0_8 = arith.constant 0 : index
    %5 = vector.load %arg3[%c0_6, %c0_7, %c0_8] : memref<1x1x128xf32, #tpu.memory_space<vmem>>, vector<1x1x128xf32>
    %6 = vector.broadcast %5 : vector<1x1x128xf32> to vector<16x16x128xf32>
    %7 = arith.addf %4, %6 : vector<16x16x128xf32>
    %cst = arith.constant 0.000000e+00 : f32
    %8 = vector.broadcast %cst : f32 to vector<16x16x128xf32>
    %9 = arith.maximumf %7, %8 : vector<16x16x128xf32>
    %cst_9 = arith.constant 0.000000e+00 : f32
    %10 = vector.broadcast %cst_9 : f32 to vector<18x18x128xf32>
    %c0_10 = arith.constant 0 : index
    %c0_11 = arith.constant 0 : index
    %c0_12 = arith.constant 0 : index
    %11 = vector.load %arg8[%c0_10, %c0_11, %c0_12] : memref<18x18x128xf32, #tpu.memory_space<vmem>>, vector<18x18x128xf32>
    tpu.vector_store %arg8[%c0_10, %c0_11, %c0_12], %10 {strides = array<i32>} : memref<18x18x128xf32, #tpu.memory_space<vmem>>, vector<18x18x128xf32>,
    %c1 = arith.constant 1 : index
    %c1_13 = arith.constant 1 : index
    %c0_14 = arith.constant 0 : index
    %12 = vector.load %arg8[%c1, %c1_13, %c0_14] : memref<18x18x128xf32, #tpu.memory_space<vmem>>, vector<16x16x128xf32>
    tpu.vector_store %arg8[%c1, %c1_13, %c0_14], %9 {strides = array<i32>} : memref<18x18x128xf32, #tpu.memory_space<vmem>>, vector<16x16x128xf32>,
    %c0_15 = arith.constant 0 : index
    %c0_16 = arith.constant 0 : index
    %c0_17 = arith.constant 0 : index
    %13 = vector.load %arg8[%c0_15, %c0_16, %c0_17] : memref<18x18x128xf32, #tpu.memory_space<vmem>>, vector<18x18x128xf32>
    %14 = vector.extract_strided_slice %13 {offsets = [0, 0, 0], sizes = [16, 16, 128], strides = [1, 1, 1]} : vector<18x18x128xf32> to vector<16x16x128xf32>
    %15 = vector.shape_cast %14 : vector<16x16x128xf32> to vector<256x128xf32>
    %16 = vector.extract_strided_slice %13 {offsets = [0, 1, 0], sizes = [16, 16, 128], strides = [1, 1, 1]} : vector<18x18x128xf32> to vector<16x16x128xf32>
    %17 = vector.shape_cast %16 : vector<16x16x128xf32> to vector<256x128xf32>
    %18 = vector.extract_strided_slice %13 {offsets = [0, 2, 0], sizes = [16, 16, 128], strides = [1, 1, 1]} : vector<18x18x128xf32> to vector<16x16x128xf32>
    %19 = vector.shape_cast %18 : vector<16x16x128xf32> to vector<256x128xf32>
    %20 = vector.extract_strided_slice %13 {offsets = [1, 0, 0], sizes = [16, 16, 128], strides = [1, 1, 1]} : vector<18x18x128xf32> to vector<16x16x128xf32>
    %21 = vector.shape_cast %20 : vector<16x16x128xf32> to vector<256x128xf32>
    %22 = vector.extract_strided_slice %13 {offsets = [1, 1, 0], sizes = [16, 16, 128], strides = [1, 1, 1]} : vector<18x18x128xf32> to vector<16x16x128xf32>
    %23 = vector.shape_cast %22 : vector<16x16x128xf32> to vector<256x128xf32>
    %24 = vector.extract_strided_slice %13 {offsets = [1, 2, 0], sizes = [16, 16, 128], strides = [1, 1, 1]} : vector<18x18x128xf32> to vector<16x16x128xf32>
    %25 = vector.shape_cast %24 : vector<16x16x128xf32> to vector<256x128xf32>
    %26 = vector.extract_strided_slice %13 {offsets = [2, 0, 0], sizes = [16, 16, 128], strides = [1, 1, 1]} : vector<18x18x128xf32> to vector<16x16x128xf32>
    %27 = vector.shape_cast %26 : vector<16x16x128xf32> to vector<256x128xf32>
    %28 = vector.extract_strided_slice %13 {offsets = [2, 1, 0], sizes = [16, 16, 128], strides = [1, 1, 1]} : vector<18x18x128xf32> to vector<16x16x128xf32>
    %29 = vector.shape_cast %28 : vector<16x16x128xf32> to vector<256x128xf32>
    %30 = vector.extract_strided_slice %13 {offsets = [2, 2, 0], sizes = [16, 16, 128], strides = [1, 1, 1]} : vector<18x18x128xf32> to vector<16x16x128xf32>
    %31 = vector.shape_cast %30 : vector<16x16x128xf32> to vector<256x128xf32>
    %32 = tpu.concatenate %15, %17, %19, %21, %23, %25, %27, %29, %31 in 1 : vector<256x128xf32>, vector<256x128xf32>, vector<256x128xf32>, vector<256x128xf32>, vector<256x128xf32>, vector<256x128xf32>, vector<256x128xf32>, vector<256x128xf32>, vector<256x128xf32> -> vector<256x1152xf32>
    %c0_18 = arith.constant 0 : index
    %c0_19 = arith.constant 0 : index
    %33 = vector.load %arg4[%c0_18, %c0_19] : memref<1152x128xf32, #tpu.memory_space<vmem>>, vector<1152x128xf32>
    %cst_20 = arith.constant dense<0.000000e+00> : vector<256x128xf32>
    %34 = tpu.matmul %32, %33, %cst_20 {dimension_numbers = #tpu.dot_dimension_numbers<[1], [0], [0], [1], [0, 0, 1, 1], [], []>} : vector<256x1152xf32>, vector<1152x128xf32>, vector<256x128xf32> -> vector<256x128xf32>
    %35 = vector.shape_cast %34 : vector<256x128xf32> to vector<1x16x16x128xf32>
    %c0_21 = arith.constant 0 : index
    %c0_22 = arith.constant 0 : index
    %c0_23 = arith.constant 0 : index
    %c0_24 = arith.constant 0 : index
    %36 = vector.load %arg5[%c0_21, %c0_22, %c0_23, %c0_24] : memref<1x16x16x128xf32, #tpu.memory_space<vmem>>, vector<1x16x16x128xf32>
    tpu.vector_store %arg5[%c0_21, %c0_22, %c0_23, %c0_24], %35 {strides = array<i32>} : memref<1x16x16x128xf32, #tpu.memory_space<vmem>>, vector<1x16x16x128xf32>,
    %cst_25 = arith.constant dense<0.000000e+00> : vector<128xf32>
    %37 = vector.multi_reduction <add>, %34, %cst_25 [0] : vector<256x128xf32> to vector<128xf32>
    %38 = vector.shape_cast %37 : vector<128xf32> to vector<1x128xf32>
    %39 = vector.shape_cast %38 : vector<1x128xf32> to vector<1x1x128xf32>
    %c0_26 = arith.constant 0 : index
    %c0_27 = arith.constant 0 : index
    %c0_28 = arith.constant 0 : index
    %40 = vector.load %arg6[%c0_26, %c0_27, %c0_28] : memref<1x1x128xf32, #tpu.memory_space<vmem>>, vector<1x1x128xf32>
    tpu.vector_store %arg6[%c0_26, %c0_27, %c0_28], %39 {strides = array<i32>} : memref<1x1x128xf32, #tpu.memory_space<vmem>>, vector<1x1x128xf32>,
    %41 = arith.mulf %34, %34 : vector<256x128xf32>
    %cst_29 = arith.constant dense<0.000000e+00> : vector<128xf32>
    %42 = vector.multi_reduction <add>, %41, %cst_29 [0] : vector<256x128xf32> to vector<128xf32>
    %43 = vector.shape_cast %42 : vector<128xf32> to vector<1x128xf32>
    %44 = vector.shape_cast %43 : vector<1x128xf32> to vector<1x1x128xf32>
    %c0_30 = arith.constant 0 : index
    %c0_31 = arith.constant 0 : index
    %c0_32 = arith.constant 0 : index
    %45 = vector.load %arg7[%c0_30, %c0_31, %c0_32] : memref<1x1x128xf32, #tpu.memory_space<vmem>>, vector<1x1x128xf32>
    tpu.vector_store %arg7[%c0_30, %c0_31, %c0_32], %44 {strides = array<i32>} : memref<1x1x128xf32, #tpu.memory_space<vmem>>, vector<1x1x128xf32>,
    return
  }
  func.func @transform_0(%arg0: i32) -> (i32, i32, i32, i32) {
    %c0_i32 = arith.constant 0 : i32
    %c0_i32_0 = arith.constant 0 : i32
    %c0_i32_1 = arith.constant 0 : i32
    %c0_i32_2 = arith.constant 0 : i32
    return %arg0, %c0_i32, %c0_i32_0, %c0_i32_1 : i32, i32, i32, i32
  }
  func.func @transform_1(%arg0: i32) -> (i32, i32, i32) {
    %c0_i32 = arith.constant 0 : i32
    %c0_i32_0 = arith.constant 0 : i32
    %c0_i32_1 = arith.constant 0 : i32
    %c0_i32_2 = arith.constant 0 : i32
    return %c0_i32, %c0_i32_0, %c0_i32_1 : i32, i32, i32
  }
  func.func @transform_2(%arg0: i32) -> (i32, i32, i32) {
    %c0_i32 = arith.constant 0 : i32
    %c0_i32_0 = arith.constant 0 : i32
    %c0_i32_1 = arith.constant 0 : i32
    %c0_i32_2 = arith.constant 0 : i32
    return %c0_i32, %c0_i32_0, %c0_i32_1 : i32, i32, i32
  }
  func.func @transform_3(%arg0: i32) -> (i32, i32) {
    %c0_i32 = arith.constant 0 : i32
    %c0_i32_0 = arith.constant 0 : i32
    %c0_i32_1 = arith.constant 0 : i32
    return %c0_i32, %c0_i32_0 : i32, i32
  }
  func.func @transform_4(%arg0: i32) -> (i32, i32, i32, i32) {
    %c0_i32 = arith.constant 0 : i32
    %c0_i32_0 = arith.constant 0 : i32
    %c0_i32_1 = arith.constant 0 : i32
    %c0_i32_2 = arith.constant 0 : i32
    return %arg0, %c0_i32, %c0_i32_0, %c0_i32_1 : i32, i32, i32, i32
  }
  func.func @transform_5(%arg0: i32) -> (i32, i32, i32) {
    %c0_i32 = arith.constant 0 : i32
    %c0_i32_0 = arith.constant 0 : i32
    %c0_i32_1 = arith.constant 0 : i32
    return %arg0, %c0_i32, %c0_i32_0 : i32, i32, i32
  }
  func.func @transform_6(%arg0: i32) -> (i32, i32, i32) {
    %c0_i32 = arith.constant 0 : i32
    %c0_i32_0 = arith.constant 0 : i32
    %c0_i32_1 = arith.constant 0 : i32
    return %arg0, %c0_i32, %c0_i32_0 : i32, i32, i32
  }
}

module attributes {stable_mosaic.version = 11 : i64} {
  func.func @_bn_add_relu_kernel(%arg0: i32, %arg1: memref<1x16x16x128xf32, #tpu.memory_space<vmem>>, %arg2: memref<1x16x16x128xf32, #tpu.memory_space<vmem>>, %arg3: memref<1x1x128xf32, #tpu.memory_space<vmem>>, %arg4: memref<1x1x128xf32, #tpu.memory_space<vmem>>, %arg5: memref<1x16x16x128xf32, #tpu.memory_space<vmem>>) attributes {dimension_semantics = [#tpu.dimension_semantics<parallel>], iteration_bounds = array<i64: 2>, scalar_prefetch = 0 : i64, scratch_operands = 0 : i64, tpu.core_type = #tpu.core_type<tc>, window_params = [{transform_indices = @transform_0, window_bounds = array<i64: 1, 16, 16, 128>}, {transform_indices = @transform_1, window_bounds = array<i64: 1, 16, 16, 128>}, {pipeline_mode = #tpu.pipeline_mode<synchronous>, transform_indices = @transform_2, window_bounds = array<i64: 1, 1, 128>}, {pipeline_mode = #tpu.pipeline_mode<synchronous>, transform_indices = @transform_3, window_bounds = array<i64: 1, 1, 128>}, {transform_indices = @transform_4, window_bounds = array<i64: 1, 16, 16, 128>}]} {
    %c0 = arith.constant 0 : index
    %c0_0 = arith.constant 0 : index
    %c0_1 = arith.constant 0 : index
    %c0_2 = arith.constant 0 : index
    %0 = vector.load %arg1[%c0, %c0_0, %c0_1, %c0_2] : memref<1x16x16x128xf32, #tpu.memory_space<vmem>>, vector<1x16x16x128xf32>
    %c0_3 = arith.constant 0 : index
    %c0_4 = arith.constant 0 : index
    %c0_5 = arith.constant 0 : index
    %1 = vector.load %arg3[%c0_3, %c0_4, %c0_5] : memref<1x1x128xf32, #tpu.memory_space<vmem>>, vector<1x1x128xf32>
    %2 = vector.shape_cast %1 : vector<1x1x128xf32> to vector<1x1x1x128xf32>
    %3 = vector.broadcast %2 : vector<1x1x1x128xf32> to vector<1x16x16x128xf32>
    %4 = arith.mulf %0, %3 : vector<1x16x16x128xf32>
    %c0_6 = arith.constant 0 : index
    %c0_7 = arith.constant 0 : index
    %c0_8 = arith.constant 0 : index
    %5 = vector.load %arg4[%c0_6, %c0_7, %c0_8] : memref<1x1x128xf32, #tpu.memory_space<vmem>>, vector<1x1x128xf32>
    %6 = vector.shape_cast %5 : vector<1x1x128xf32> to vector<1x1x1x128xf32>
    %7 = vector.broadcast %6 : vector<1x1x1x128xf32> to vector<1x16x16x128xf32>
    %8 = arith.addf %4, %7 : vector<1x16x16x128xf32>
    %c0_9 = arith.constant 0 : index
    %c0_10 = arith.constant 0 : index
    %c0_11 = arith.constant 0 : index
    %c0_12 = arith.constant 0 : index
    %9 = vector.load %arg2[%c0_9, %c0_10, %c0_11, %c0_12] : memref<1x16x16x128xf32, #tpu.memory_space<vmem>>, vector<1x16x16x128xf32>
    %10 = arith.addf %8, %9 : vector<1x16x16x128xf32>
    %cst = arith.constant 0.000000e+00 : f32
    %11 = vector.broadcast %cst : f32 to vector<1x16x16x128xf32>
    %12 = arith.maximumf %10, %11 : vector<1x16x16x128xf32>
    %c0_13 = arith.constant 0 : index
    %c0_14 = arith.constant 0 : index
    %c0_15 = arith.constant 0 : index
    %c0_16 = arith.constant 0 : index
    %13 = vector.load %arg5[%c0_13, %c0_14, %c0_15, %c0_16] : memref<1x16x16x128xf32, #tpu.memory_space<vmem>>, vector<1x16x16x128xf32>
    tpu.vector_store %arg5[%c0_13, %c0_14, %c0_15, %c0_16], %12 {strides = array<i32>} : memref<1x16x16x128xf32, #tpu.memory_space<vmem>>, vector<1x16x16x128xf32>,
    return
  }
  func.func @transform_0(%arg0: i32) -> (i32, i32, i32, i32) {
    %c0_i32 = arith.constant 0 : i32
    %c0_i32_0 = arith.constant 0 : i32
    %c0_i32_1 = arith.constant 0 : i32
    %c0_i32_2 = arith.constant 0 : i32
    return %arg0, %c0_i32, %c0_i32_0, %c0_i32_1 : i32, i32, i32, i32
  }
  func.func @transform_1(%arg0: i32) -> (i32, i32, i32, i32) {
    %c0_i32 = arith.constant 0 : i32
    %c0_i32_0 = arith.constant 0 : i32
    %c0_i32_1 = arith.constant 0 : i32
    %c0_i32_2 = arith.constant 0 : i32
    return %arg0, %c0_i32, %c0_i32_0, %c0_i32_1 : i32, i32, i32, i32
  }
  func.func @transform_2(%arg0: i32) -> (i32, i32, i32) {
    %c0_i32 = arith.constant 0 : i32
    %c0_i32_0 = arith.constant 0 : i32
    %c0_i32_1 = arith.constant 0 : i32
    %c0_i32_2 = arith.constant 0 : i32
    return %c0_i32, %c0_i32_0, %c0_i32_1 : i32, i32, i32
  }
  func.func @transform_3(%arg0: i32) -> (i32, i32, i32) {
    %c0_i32 = arith.constant 0 : i32
    %c0_i32_0 = arith.constant 0 : i32
    %c0_i32_1 = arith.constant 0 : i32
    %c0_i32_2 = arith.constant 0 : i32
    return %c0_i32, %c0_i32_0, %c0_i32_1 : i32, i32, i32
  }
  func.func @transform_4(%arg0: i32) -> (i32, i32, i32, i32) {
    %c0_i32 = arith.constant 0 : i32
    %c0_i32_0 = arith.constant 0 : i32
    %c0_i32_1 = arith.constant 0 : i32
    %c0_i32_2 = arith.constant 0 : i32
    return %arg0, %c0_i32, %c0_i32_0, %c0_i32_1 : i32, i32, i32, i32
  }
}

</mosaic_0001>

<bundles_post_ra>
// kernel: residual_forward.5
= control target key start
LH: loop header
LB: loop body
LE: loop exit
PB: predicated region body
PF: predicated region fallthrough
CT: control target
= control target key end

     0   :  { %s1446_s0 = inlined_call_operand.hbm [shape: f32[2,16,16,128], index: 0, kind: input, shape index: {}, may-alias: {0,4}]   ;;  %s1447_s1 = inlined_call_operand.hbm [shape: f32[2,16,16,128], index: 1, kind: input, shape index: {}]   ;;  %s1448_s2 = inlined_call_operand.hbm [shape: f32[1,1,128], index: 2, kind: input, shape index: {}]   ;;  %s1449_s3 = inlined_call_operand.hbm [shape: f32[1,1,128], index: 3, kind: input, shape index: {}]   ;;  %s1450_s4 = inlined_call_operand.hbm [shape: f32[2,16,16,128], index: 4, kind: output, shape index: {}, may-alias: {0,4}]  }
   0x1   :  { %1456 = sst [smem:[#allocation16_spill]] %s1446_s0 }
   0x2   :  { %9 = vsyncpa [#allocation3], 0 }
   0x3   :  { %11 = vsyncpa [#allocation3 + $0x1], 0 }
   0x4   :  { %12 = vsyncpa [#allocation6], 0 }
   0x5   :  { %14 = vsyncpa [#allocation6 + $0x1], 0 }
   0x6   :  { %15 = vsyncpa [#allocation9], 0 }
   0x7   :  { %16 = vsyncpa [#allocation4], 0 }
   0x8   :  { %18 = vsyncpa [#allocation4 + $0x1], 0  ;;  %s981_s15 = smov 0   ;;  %s983_s16 = smov 0  }
   0x9   :  { %s985_s17 = smov 0   ;;  %s987_s18 = smov 0  }
   0xa LB: > { %s1002_s19 = sadd.s32 4294967295, %s945_s18   ;;  %s648_s20 = sadd.s32 4294967294, %s945_s18   ;;  %s945_s18 = sphi %s987_s18, %s1479_s18   ;;  %s941_s17 = sphi %s985_s17, %s1478_s17   ;;  %s937_s16 = sphi %s983_s16, %s1477_s16   ;;  %s933_s15 = sphi %s981_s15, %s1476_s15  }
   0xb   : > { %s1006_s21 = sadd.s32 1, %s945_s18   ;;  %s31_s22 = sadd.s32 1, %s941_s17 }
   0xc   : > { %s28_s23 = ssub.s32 %s945_s18, %s1006_s21  ;;  %p38_p0 = scmp.ne.s32.totalorder %s941_s17, %s937_s16 }
   0xd   : > { %p29_p1 = scmp.eq.s32.totalorder %s28_s23, 0  ;;  %p39_p2 = scmp.eq.s32.totalorder %s945_s18, 0 }
   0xe   : > { %p44_p3 = scmp.ne.s32.totalorder %s937_s16, %s933_s15  ;;  %p1451_p4 = scmp.eq.s32.totalorder %s1002_s19, 0 }
   0xf   : > { %s1018_s24 = scalar_select %p29_p1, %s941_s17, %s31_s22  }
  0x10   : > { %p1020_p5 = por %p39_p2, %p38_p0  ;;  %p1026_p6 = por %p1451_p4, %p44_p3 }
  0x11   : > { %p136_p7 = scmp.eq.s32.totalorder %s1002_s19, 1  ;;  %p142_p8 = scmp.eq.s32.totalorder %s648_s20, 1 }
  0x12   : > { %s1458_s26 = scalar_select %p1026_p6, 1, 0 }
  0x13   : > { %p649_p9 = scmp.ge.s32.totalorder %s945_s18, 1  ;;  %p149_p10 = scmp.lt.s32.totalorder %s945_s18, 3 }
  0x14   : > { %p1033_p11 = por %p136_p7, %p38_p0  ;;  %p1037_p12 = por %p142_p8, %p44_p3 }
  0x15   : > { %p1041_p13 = pnand %p649_p9, %p149_p10  ;;  %s947_s30 = smov [#allocation7]  }
  0x16   : > { %s1459_s27 = scalar_select %p1033_p11, 1, 0 }
  0x17   : > { %s1460_s28 = scalar_select %p1037_p12, 1, 0 }
  0x18   : > { %s1461_s29 = scalar_select %p1041_p13, 1, 0 }
  0x19   : > { %p689_p2 = pneg %p1041_p13  ;;  %s162_s5 = sshll.u32 %s947_s30, 4  ;;  %s163_s5 = int_to_ptr.vmem [resolvable:$true] %s162_s5 }
  0x1a   : > { %p709_p4 = scmp.lt.s32.totalorder %s945_s18, 2  ;;  %p1462_p0 = scmp.eq.s32.totalorder %s1002_s19, 0 }
  0x1b   : > { %s948_s8 = smov [#allocation8]   ;;  %s751_s12 = scalar_lea.hbm %s1448_s2, 16 }
  0x1c   : > { %p1051_p7 = pnand %p689_p2, %p1462_p0  ;;  %p1057_p3 = pnand %p709_p4, %p1020_p5 }
  0x1d   : > { %s173_s9 = sshll.u32 %s948_s8, 4  ;;  %p752_p8 = scmp.ne.s32.totalorder %s1448_s2, %s751_s12  ;;  %s1061_s9 = int_to_ptr.vmem [resolvable:$true] %s173_s9 }
  0x1e   : > { %s1464_s7 = scalar_select %p1057_p3, 1, 0 }
  0x1f   : > { %p753_p9 = pneg %p1051_p7  ;;  %p758_p10 = scmp.lt.u32.totalorder %s751_s12, %s1448_s2 }
  0x21   : > { %p754_p4 = pnand %p753_p9, %p752_p8 }
  0x23   : > { %p755_p5 = pneg %p754_p4 }
  0x25   : > { %p760_p2 = pnand %p758_p10, %p755_p5 }
  0x27   : > { %763 = shalt.err (!%p760_p2)
}
  0x28   : > { %s764_s23 = scalar_lea.vmem %s163_s5, 16  ;;  %s771_s25 = scalar_lea.vmem %s163_s5, 32 }
  0x29   : > { %p765_p0 = scmp.ne.s32.totalorder %s163_s5, %s764_s23  ;;  %p772_p11 = scmp.lt.s32.totalorder %s163_s5, %s163_s5 }
  0x2a   : > { %p773_p6 = scmp.lt.s32.totalorder %s771_s25, %s764_s23 }
  0x2b   : > { %p767_p1 = pnand %p765_p0, %p753_p9 }
  0x2c   : > { %p774_p13 = por %p773_p6, %p772_p11 }
  0x2d   : > { %p768_p12 = pneg %p767_p1 }
  0x2f   : > { %p775_p3 = pnand %p774_p13, %p768_p12 }
  0x31   : > { %778 = shalt.err (!%p775_p3)
}
  0x32   : > { %692 = dma.hbm_to_vmem [thread:$0]  (!%p1051_p7), %s1448_s2, 16, %s163_s5, [#allocation6]  }
  0x33   : > { %s184_s10 = sand.u32 1, %s941_s17   ;;  %s779_s13 = scalar_lea.hbm %s1449_s3, 16 }
  0x34   : > { %p780_p1 = scmp.ne.s32.totalorder %s1449_s3, %s779_s13  ;;  %p786_p12 = scmp.lt.u32.totalorder %s779_s13, %s1449_s3 }
  0x36   : > { %p782_p6 = pnand %p780_p1, %p753_p9 }
  0x38   : > { %p783_p11 = pneg %p782_p6 }
  0x3a   : > { %p788_p13 = pnand %p786_p12, %p783_p11 }
  0x3c   : > { %791 = shalt.err (!%p788_p13)
}
  0x3d   : > { %s792_s5 = scalar_lea.vmem %s1061_s9, 16  ;;  %s799_s25 = scalar_lea.vmem %s1061_s9, 32 }
  0x3e   : > { %p793_p3 = scmp.ne.s32.totalorder %s1061_s9, %s792_s5  ;;  %p800_p5 = scmp.lt.s32.totalorder %s1061_s9, %s1061_s9 }
  0x3f   : > { %p801_p10 = scmp.lt.s32.totalorder %s799_s25, %s792_s5 }
  0x40   : > { %p795_p8 = pnand %p793_p3, %p753_p9 }
  0x41   : > { %p802_p2 = por %p801_p10, %p800_p5 }
  0x42   : > { %p796_p4 = pneg %p795_p8 }
  0x44   : > { %p803_p0 = pnand %p802_p2, %p796_p4 }
  0x46   : > { %806 = shalt.err (!%p803_p0)
}
  0x47   : > { %695 = dma.hbm_to_vmem [thread:$0]  (!%p1051_p7), %s1449_s3, 16, %s1061_s9, [#allocation9]  }
  0x48   : > { %s1112_s11 = sshll.u32 %s184_s10, 8  ;;  %s672_s12 = sshll.u32 %s945_s18, 12 }
  0x49   : > { %s1465_s0 = sld [smem:[#allocation16_spill]]  ;;  %s188_s6 = scalar_lea.vmem [#allocation2], %s1112_s11 }
  0x4a   : > { %s195_s22 = sshll.u32 %s188_s6, 4  ;;  %s1125_s23 = scalar_lea.sflag [#allocation3], %s184_s10  ;;  %s1123_s22 = int_to_ptr.vmem [resolvable:$true] %s195_s22 }
  0x4b   : > { %p1466_p9 = scmp.ne.s32.totalorder %s1464_s7, 0 }
  0x4d   : > { %p809_p1 = pneg %p1466_p9 }
  0x4f   : > { %s1120_s20 = scalar_lea.hbm %s1465_s0, %s672_s12  ;;  %s812_s30 = scalar_lea.hbm %s1465_s0, 8192 }
  0x50   : > { %s807_s9 = scalar_lea.hbm %s1120_s20, 4096  ;;  %p813_p12 = scmp.lt.u32.totalorder %s1120_s20, %s1465_s0 }
  0x51   : > { %p808_p7 = scmp.ne.s32.totalorder %s1120_s20, %s807_s9  ;;  %p814_p13 = scmp.lt.u32.totalorder %s812_s30, %s807_s9 }
  0x52   : > { %p816_p8 = scmp.lt.u32.totalorder %s807_s9, %s1120_s20 }
  0x53   : > { %p810_p6 = pnand %p809_p1, %p808_p7  ;;  %p815_p3 = por %p814_p13, %p813_p12 }
  0x55   : > { %p811_p11 = pneg %p810_p6  ;;  %p817_p4 = por %p816_p8, %p815_p3 }
  0x57   : > { %p818_p5 = pnand %p817_p4, %p811_p11 }
  0x59   : > { %821 = shalt.err (!%p818_p5)
}
  0x5a   : > { %s822_s10 = scalar_lea.vmem %s1123_s22, 4096  ;;  %s949_s14 = smov [#allocation2]  }
  0x5b   : > { %p823_p10 = scmp.ne.s32.totalorder %s1123_s22, %s822_s10  ;;  %s827_s6 = sshll.u32 %s949_s14, 4  ;;  %s828_s6 = int_to_ptr.vmem [resolvable:$false] %s827_s6 }
  0x5c   : > { %s829_s5 = scalar_lea.vmem %s828_s6, 8192  ;;  %p830_p7 = scmp.lt.s32.totalorder %s1123_s22, %s828_s6 }
  0x5d   : > { %p825_p2 = pnand %p823_p10, %p809_p1  ;;  %p831_p6 = scmp.lt.s32.totalorder %s829_s5, %s822_s10 }
  0x5f   : > { %p826_p0 = pneg %p825_p2  ;;  %p832_p12 = por %p831_p6, %p830_p7 }
  0x61   : > { %p833_p13 = pnand %p832_p12, %p826_p0 }
  0x63   : > { %836 = shalt.err (!%p833_p13)
}
  0x64   : > { %s950_s9 = smov 128   ;;  %s951_s25 = smov 8  }
  0x65   : > { %699 = dma.hbm_to_vmem [thread:$0]  (!%p1466_p9), %s1120_s20, 4096, %s1123_s22, %s1125_s23, %s950_s9, %s950_s9, %s951_s25  }
  0x66   : > { %s1161_s13 = scalar_lea.hbm %s1447_s1, %s672_s12  ;;  %s209_s10 = scalar_lea.vmem [#allocation5], %s1112_s11 }
  0x67   : > { %s216_s14 = sshll.u32 %s209_s10, 4  ;;  %s205_s6 = sand.u32 1, %s945_s18   ;;  %s1164_s14 = int_to_ptr.vmem [resolvable:$true] %s216_s14 }
  0x68   : > { %s1167_s5 = scalar_lea.sflag [#allocation6], %s205_s6  ;;  %s837_s0 = scalar_lea.hbm %s1161_s13, 4096 }
  0x69   : > { %p838_p11 = scmp.ne.s32.totalorder %s1161_s13, %s837_s0  ;;  %s842_s22 = scalar_lea.hbm %s1447_s1, 8192 }
  0x6a   : > { %p843_p4 = scmp.lt.u32.totalorder %s1161_s13, %s1447_s1  ;;  %p844_p5 = scmp.lt.u32.totalorder %s842_s22, %s837_s0 }
  0x6b   : > { %p840_p3 = pnand %p838_p11, %p809_p1  ;;  %p846_p2 = scmp.lt.u32.totalorder %s837_s0, %s1161_s13 }
  0x6c   : > { %p845_p10 = por %p844_p5, %p843_p4 }
  0x6d   : > { %p841_p8 = pneg %p840_p3 }
  0x6e   : > { %p847_p0 = por %p846_p2, %p845_p10 }
  0x70   : > { %p848_p7 = pnand %p847_p0, %p841_p8 }
  0x72   : > { %851 = shalt.err (!%p848_p7)
}
  0x73   : > { %s852_s11 = scalar_lea.vmem %s1164_s14, 4096  ;;  %s952_s8 = smov [#allocation5]  }
  0x74   : > { %p853_p6 = scmp.ne.s32.totalorder %s1164_s14, %s852_s11  ;;  %s857_s10 = sshll.u32 %s952_s8, 4  ;;  %s858_s10 = int_to_ptr.vmem [resolvable:$false] %s857_s10 }
  0x75   : > { %s859_s6 = scalar_lea.vmem %s858_s10, 8192  ;;  %p860_p11 = scmp.lt.s32.totalorder %s1164_s14, %s858_s10 }
  0x76   : > { %p855_p12 = pnand %p853_p6, %p809_p1  ;;  %p861_p3 = scmp.lt.s32.totalorder %s859_s6, %s852_s11 }
  0x78   : > { %p856_p13 = pneg %p855_p12  ;;  %p862_p4 = por %p861_p3, %p860_p11 }
  0x7a   : > { %p863_p5 = pnand %p862_p4, %p856_p13 }
  0x7c   : > { %866 = shalt.err (!%p863_p5)
}
  0x7d   : > { %702 = dma.hbm_to_vmem [thread:$0]  (!%p1466_p9), %s1161_s13, 4096, %s1164_s14, %s1167_s5, %s950_s9, %s950_s9, %s951_s25  }
  0x7e   : > { %p1467_p1 = scmp.ne.s32.totalorder %s1461_s29, 0 }
  0x7f   : > { %s1199_s0 = sand.u32 (!%p1467_p1), 1, %s937_s16   ;;  %p1468_p8 = scmp.ne.s32.totalorder (!%p1467_p1), %s1458_s26, 0 }
  0x80   : > { %228 = sbr.rel (%p1467_p1) target bundleno = 199 (0xc7), region = 36  ;;  %s1202_s20 = sshll.u32 (!%p1467_p1), %s1199_s0, 8 }
  0x81   : > { %s231_s7 = scalar_lea.sflag (!%p1467_p1), [#allocation3], %s1199_s0  ;;  %s1206_s12 = scalar_lea.vmem (!%p1467_p1), [#allocation2], %s1202_s20 }
  0x87   : > { %912 = dma.done.wait (%p1468_p8), %s231_s7, 4096  }
  0x88   : > { %914 = vsyncadd (%p1468_p8), %s231_s7, 4294963200  ;;  %s239_s29 = sand.u32 1, %s1002_s19   ;;  %s1214_s25 = scalar_lea.vmem [#allocation5], %s1202_s20 }
  0x89   : > { %s240_s9 = scalar_lea.sflag [#allocation6], %s239_s29 }
  0x8a   : > { %916 = dma.done.wait (%p1468_p8), %s240_s9, 4096  }
  0x8b   : > { %918 = vsyncadd (%p1468_p8), %s240_s9, 4294963200  ;;  %p1469_p9 = scmp.eq.s32.totalorder %s1002_s19, 0 }
  0x8d   : > { %920 = dma.done.wait (%p1469_p9), [#allocation6], 16   ;;  %p1470_p10 = pmov %p1469_p9 }
  0x8e   : > { %p1471_p2 = pmov %p1469_p9 }
  0x8f   : > { %922 = vsyncadd (%p1470_p10), [#allocation6], 4294967280 }
  0x90   : > { %924 = dma.done.wait (%p1471_p2), [#allocation9], 16   ;;  %p1472_p0 = pmov %p1471_p2 }
  0x91   : > { %v281_v0 = vld [vmem:[%s1206_s12] sm:$0xff]  ;;  %v282_v4 = vld [vmem:[%s1206_s12 + $0x8] sm:$0xff]  ;;  %v283_v7 = vld [vmem:[%s1206_s12 + $0x10] sm:$0xff]  ;;  %s1269_s26 = scalar_lea.vmem [#allocation10], %s1202_s20  ;;  %s674_s13 = sshll.u32 %s1002_s19, 12 }
  0x92   : > { %926 = vsyncadd (%p1472_p0), [#allocation9], 4294967280  ;;  %v1229_v1 = vld [vmem:[#allocation7] ss:$0 sm:$0xff]  ;;  %v1231_v2 = vld [vmem:[#allocation8] ss:$0 sm:$0xff]  ;;  %s1396_s19 = scalar_lea.hbm %s1450_s4, %s674_s13 }
  0x93   : > { %v320_v3 = vmul.f32 %v1229_v1, %v281_v0  ;;  %v391_v5 = vld [vmem:[%s1214_s25] sm:$0xff]  ;;  %v321_v6 = vmul.f32 %v1229_v1, %v282_v4  ;;  %v284_v8 = vld [vmem:[%s1206_s12 + $0x18] sm:$0xff]  ;;  %v392_v10 = vld [vmem:[%s1214_s25 + $0x8] sm:$0xff]  ;;  %v322_v11 = vmul.f32 %v1229_v1, %v283_v7  ;;  %s533_s14 = sshll.u32 %s1269_s26, 4  ;;  %s520_s23 = scalar_lea.sflag [#allocation4], %s1199_s0  ;;  %s1398_s14 = int_to_ptr.vmem [resolvable:$true] %s533_s14 }
  0x94   : > { %v393_v12 = vld [vmem:[%s1214_s25 + $0x10] sm:$0xff]  ;;  %v323_v13 = vmul.f32 %v1229_v1, %v284_v8  ;;  %v285_v14 = vld [vmem:[%s1206_s12 + $0x20] sm:$0xff]  ;;  %v394_v16 = vld [vmem:[%s1214_s25 + $0x18] sm:$0xff]  ;;  %s867_s30 = scalar_lea.vmem %s1398_s14, 4096  ;;  %p1473_p6 = scmp.ne.s32.totalorder %s1459_s27, 0 }
  0x95   : > { %v359_v9 = vadd.f32 %v1231_v2, %v320_v3  ;;  %v360_v15 = vadd.f32 %v1231_v2, %v321_v6  ;;  %v324_v17 = vmul.f32 %v1229_v1, %v285_v14  ;;  %v286_v18 = vld [vmem:[%s1206_s12 + $0x28] sm:$0xff]  ;;  %v287_v19 = vld [vmem:[%s1206_s12 + $0x30] sm:$0xff]  ;;  %v361_v21 = vadd.f32 %v1231_v2, %v322_v11  ;;  %v395_v23 = vld [vmem:[%s1214_s25 + $0x20] sm:$0xff]  ;;  %p868_p7 = scmp.ne.s32.totalorder %s1398_s14, %s867_s30  ;;  %s953_s11 = smov [#allocation10]  }
  0x96   : > { %v362_v22 = vadd.f32 %v1231_v2, %v323_v13  ;;  %v325_v24 = vmul.f32 %v1229_v1, %v286_v18  ;;  %v288_v25 = vld [vmem:[%s1206_s12 + $0x38] sm:$0xff]  ;;  %v396_v28 = vld [vmem:[%s1214_s25 + $0x28] sm:$0xff]  ;;  %v326_v29 = vmul.f32 %v1229_v1, %v287_v19  ;;  %v289_v31 = vld [vmem:[%s1206_s12 + $0x40] sm:$0xff]  ;;  %s871_s8 = sshll.u32 %s953_s11, 4  ;;  %s872_s8 = int_to_ptr.vmem [resolvable:$false] %s871_s8 }
  0x97   : > { %v423_v20 = vadd.f32 %v391_v5, %v359_v9  ;;  %v424_v26 = vadd.f32 %v392_v10, %v360_v15  ;;  %v363_v27 = vadd.f32 %v1231_v2, %v324_v17  ;;  %v327_v30 = vmul.f32 %v1229_v1, %v288_v25  ;;  %v397_v36 = vld [vmem:[%s1214_s25 + $0x30] sm:$0xff]  ;;  %v398_v37 = vld [vmem:[%s1214_s25 + $0x38] sm:$0xff]  ;;  %v290_v38 = vld [vmem:[%s1206_s12 + $0x48] sm:$0xff]  ;;  %p869_p12 = pnand %p868_p7, %p1473_p6  ;;  %s873_s10 = scalar_lea.vmem %s872_s8, 8192 }
  0x98   : > { %v425_v33 = vadd.f32 %v393_v12, %v361_v21  ;;  %v426_v34 = vadd.f32 %v394_v16, %v362_v22  ;;  %v364_v35 = vadd.f32 %v1231_v2, %v325_v24  ;;  %v365_v41 = vadd.f32 %v1231_v2, %v326_v29  ;;  %v291_v43 = vld [vmem:[%s1206_s12 + $0x50] sm:$0xff]  ;;  %v292_v44 = vld [vmem:[%s1206_s12 + $0x58] sm:$0xff]  ;;  %v293_v49 = vld [vmem:[%s1206_s12 + $0x60] sm:$0xff]  ;;  %p874_p11 = scmp.lt.s32.totalorder %s1398_s14, %s872_s8  ;;  %p875_p3 = scmp.lt.s32.totalorder %s873_s10, %s867_s30 }
  0x99   : > { %v455_v32 = vmax.f32 %v423_v20, 0.0  ;;  %v456_v39 = vmax.f32 %v424_v26, 0.0  ;;  %v427_v40 = vadd.f32 %v395_v23, %v363_v27  ;;  %v366_v42 = vadd.f32 %v1231_v2, %v327_v30  ;;  %v399_v53 = vld [vmem:[%s1214_s25 + $0x40] sm:$0xff]  ;;  %v294_v55 = vld [vmem:[%s1206_s12 + $0x68] sm:$0xff]  ;;  %v295_v61 = vld [vmem:[%s1206_s12 + $0x70] sm:$0xff]  ;;  %p870_p13 = pneg %p869_p12 }
  0x9a   : > { %v457_v45 = vmax.f32 %v425_v33, 0.0  ;;  %v458_v46 = vmax.f32 %v426_v34, 0.0  ;;  %v428_v47 = vadd.f32 %v396_v28, %v364_v35  ;;  %v328_v48 = vmul.f32 %v1229_v1, %v289_v31  ;;  %v400_v58 = vld [vmem:[%s1214_s25 + $0x48] sm:$0xff]  ;;  %v296_v62 = vld [vmem:[%s1206_s12 + $0x78] sm:$0xff]  ;;  %v401_v4 = vld [vmem:[%s1214_s25 + $0x50] sm:$0xff]  ;;  %p876_p4 = por %p875_p3, %p874_p11 }
  0x9b   : > { %487 = vst [vmem:[%s1269_s26] sm:$0xff] %v455_v32  ;;  %488 = vst [vmem:[%s1269_s26 + $0x8] sm:$0xff] %v456_v39  ;;  %v459_v50 = vmax.f32 %v427_v40, 0.0  ;;  %v429_v51 = vadd.f32 %v397_v36, %v365_v41  ;;  %v430_v52 = vadd.f32 %v398_v37, %v366_v42  ;;  %v329_v54 = vmul.f32 %v1229_v1, %v290_v38  ;;  %v402_v5 = vld [vmem:[%s1214_s25 + $0x58] sm:$0xff]  ;;  %v403_v10 = vld [vmem:[%s1214_s25 + $0x60] sm:$0xff] }
  0x9c   : > { %489 = vst [vmem:[%s1269_s26 + $0x10] sm:$0xff] %v457_v45  ;;  %490 = vst [vmem:[%s1269_s26 + $0x18] sm:$0xff] %v458_v46  ;;  %v460_v56 = vmax.f32 %v428_v47, 0.0  ;;  %v367_v57 = vadd.f32 %v1231_v2, %v328_v48  ;;  %v330_v59 = vmul.f32 %v1229_v1, %v291_v43  ;;  %v331_v60 = vmul.f32 %v1229_v1, %v292_v44  ;;  %v404_v14 = vld [vmem:[%s1214_s25 + $0x68] sm:$0xff]  ;;  %v297_v17 = vld [vmem:[%s1206_s12 + $0x80] sm:$0xff]  ;;  %p877_p5 = pnand %p876_p4, %p870_p13 }
  0x9d   : > { %491 = vst [vmem:[%s1269_s26 + $0x20] sm:$0xff] %v459_v50  ;;  %v461_v63 = vmax.f32 %v429_v51, 0.0  ;;  %v462_v0 = vmax.f32 %v430_v52, 0.0  ;;  %v368_v3 = vadd.f32 %v1231_v2, %v329_v54  ;;  %v332_v6 = vmul.f32 %v1229_v1, %v293_v49  ;;  %v405_v22 = vld [vmem:[%s1214_s25 + $0x70] sm:$0xff]  ;;  %v406_v23 = vld [vmem:[%s1214_s25 + $0x78] sm:$0xff]  ;;  %v298_v24 = vld [vmem:[%s1206_s12 + $0x88] sm:$0xff] }
  0x9e   : > { %492 = vst [vmem:[%s1269_s26 + $0x28] sm:$0xff] %v460_v56  ;;  %v431_v7 = vadd.f32 %v399_v53, %v367_v57  ;;  %v369_v8 = vadd.f32 %v1231_v2, %v330_v59  ;;  %v370_v9 = vadd.f32 %v1231_v2, %v331_v60  ;;  %v333_v11 = vmul.f32 %v1229_v1, %v294_v55  ;;  %v299_v29 = vld [vmem:[%s1206_s12 + $0x90] sm:$0xff]  ;;  %v300_v30 = vld [vmem:[%s1206_s12 + $0x98] sm:$0xff]  ;;  %v301_v35 = vld [vmem:[%s1206_s12 + $0xa0] sm:$0xff] }
  0x9f   : > { %493 = vst [vmem:[%s1269_s26 + $0x30] sm:$0xff] %v461_v63  ;;  %494 = vst [vmem:[%s1269_s26 + $0x38] sm:$0xff] %v462_v0  ;;  %v432_v12 = vadd.f32 %v400_v58, %v368_v3  ;;  %v371_v13 = vadd.f32 %v1231_v2, %v332_v6  ;;  %v334_v15 = vmul.f32 %v1229_v1, %v295_v61  ;;  %v407_v39 = vld [vmem:[%s1214_s25 + $0x80] sm:$0xff]  ;;  %v302_v41 = vld [vmem:[%s1206_s12 + $0xa8] sm:$0xff] }
  0xa0   : > { %v335_v16 = vmul.f32 %v1229_v1, %v296_v62  ;;  %v463_v18 = vmax.f32 %v431_v7, 0.0  ;;  %v433_v19 = vadd.f32 %v401_v4, %v369_v8  ;;  %v434_v20 = vadd.f32 %v402_v5, %v370_v9  ;;  %v408_v44 = vld [vmem:[%s1214_s25 + $0x88] sm:$0xff]  ;;  %v303_v47 = vld [vmem:[%s1206_s12 + $0xb0] sm:$0xff]  ;;  %v304_v48 = vld [vmem:[%s1206_s12 + $0xb8] sm:$0xff] }
  0xa1   : > { %v372_v21 = vadd.f32 %v1231_v2, %v333_v11  ;;  %v464_v25 = vmax.f32 %v432_v12, 0.0  ;;  %v435_v26 = vadd.f32 %v403_v10, %v371_v13  ;;  %v373_v27 = vadd.f32 %v1231_v2, %v334_v15  ;;  %v409_v52 = vld [vmem:[%s1214_s25 + $0x90] sm:$0xff]  ;;  %v410_v53 = vld [vmem:[%s1214_s25 + $0x98] sm:$0xff]  ;;  %v411_v58 = vld [vmem:[%s1214_s25 + $0xa0] sm:$0xff] }
  0xa2   : > { %v374_v28 = vadd.f32 %v1231_v2, %v335_v16  ;;  %495 = vst [vmem:[%s1269_s26 + $0x40] sm:$0xff] %v463_v18  ;;  %v465_v31 = vmax.f32 %v433_v19, 0.0  ;;  %v466_v32 = vmax.f32 %v434_v20, 0.0  ;;  %v336_v34 = vmul.f32 %v1229_v1, %v297_v17  ;;  %v412_v62 = vld [vmem:[%s1214_s25 + $0xa8] sm:$0xff]  ;;  %v305_v3 = vld [vmem:[%s1206_s12 + $0xc0] sm:$0xff]  ;;  %v413_v8 = vld [vmem:[%s1214_s25 + $0xb0] sm:$0xff] }
  0xa3   : > { %v436_v33 = vadd.f32 %v404_v14, %v372_v21  ;;  %496 = vst [vmem:[%s1269_s26 + $0x48] sm:$0xff] %v464_v25  ;;  %v467_v36 = vmax.f32 %v435_v26, 0.0  ;;  %v437_v37 = vadd.f32 %v405_v22, %v373_v27  ;;  %v337_v40 = vmul.f32 %v1229_v1, %v298_v24  ;;  %v414_v9 = vld [vmem:[%s1214_s25 + $0xb8] sm:$0xff]  ;;  %v306_v10 = vld [vmem:[%s1206_s12 + $0xc8] sm:$0xff]  ;;  %v307_v15 = vld [vmem:[%s1206_s12 + $0xd0] sm:$0xff] }
  0xa4   : > { %v438_v38 = vadd.f32 %v406_v23, %v374_v28  ;;  %497 = vst [vmem:[%s1269_s26 + $0x50] sm:$0xff] %v465_v31  ;;  %498 = vst [vmem:[%s1269_s26 + $0x58] sm:$0xff] %v466_v32  ;;  %v375_v43 = vadd.f32 %v1231_v2, %v336_v34  ;;  %v338_v45 = vmul.f32 %v1229_v1, %v299_v29  ;;  %v308_v16 = vld [vmem:[%s1206_s12 + $0xd8] sm:$0xff]  ;;  %v309_v21 = vld [vmem:[%s1206_s12 + $0xe0] sm:$0xff] }
  0xa5   : > { %v468_v42 = vmax.f32 %v436_v33, 0.0  ;;  %v339_v46 = vmul.f32 %v1229_v1, %v300_v30  ;;  %499 = vst [vmem:[%s1269_s26 + $0x60] sm:$0xff] %v467_v36  ;;  %v469_v49 = vmax.f32 %v437_v37, 0.0  ;;  %v376_v51 = vadd.f32 %v1231_v2, %v337_v40  ;;  %v415_v25 = vld [vmem:[%s1214_s25 + $0xc0] sm:$0xff]  ;;  %v310_v27 = vld [vmem:[%s1206_s12 + $0xe8] sm:$0xff]  ;;  %v311_v33 = vld [vmem:[%s1206_s12 + $0xf0] sm:$0xff] }
  0xa6   : > { %v470_v50 = vmax.f32 %v438_v38, 0.0  ;;  %v340_v54 = vmul.f32 %v1229_v1, %v301_v35  ;;  %v439_v55 = vadd.f32 %v407_v39, %v375_v43  ;;  %v377_v56 = vadd.f32 %v1231_v2, %v338_v45  ;;  %v416_v30 = vld [vmem:[%s1214_s25 + $0xc8] sm:$0xff]  ;;  %v312_v34 = vld [vmem:[%s1206_s12 + $0xf8] sm:$0xff]  ;;  %v417_v38 = vld [vmem:[%s1214_s25 + $0xd0] sm:$0xff] }
  0xa7   : > { %500 = vst [vmem:[%s1269_s26 + $0x68] sm:$0xff] %v468_v42  ;;  %v378_v57 = vadd.f32 %v1231_v2, %v339_v46  ;;  %v341_v59 = vmul.f32 %v1229_v1, %v302_v41  ;;  %501 = vst [vmem:[%s1269_s26 + $0x70] sm:$0xff] %v469_v49  ;;  %v440_v60 = vadd.f32 %v408_v44, %v376_v51  ;;  %v418_v39 = vld [vmem:[%s1214_s25 + $0xd8] sm:$0xff]  ;;  %v419_v44 = vld [vmem:[%s1214_s25 + $0xe0] sm:$0xff] }
  0xa8   : > { %502 = vst [vmem:[%s1269_s26 + $0x78] sm:$0xff] %v470_v50  ;;  %v379_v61 = vadd.f32 %v1231_v2, %v340_v54  ;;  %v342_v63 = vmul.f32 %v1229_v1, %v303_v47  ;;  %v343_v0 = vmul.f32 %v1229_v1, %v304_v48  ;;  %v471_v4 = vmax.f32 %v439_v55, 0.0  ;;  %v420_v48 = vld [vmem:[%s1214_s25 + $0xe8] sm:$0xff]  ;;  %v421_v55 = vld [vmem:[%s1214_s25 + $0xf0] sm:$0xff] }
  0xa9   : > { %v441_v5 = vadd.f32 %v409_v52, %v377_v56  ;;  %v442_v6 = vadd.f32 %v410_v53, %v378_v57  ;;  %v380_v7 = vadd.f32 %v1231_v2, %v341_v59  ;;  %v472_v11 = vmax.f32 %v440_v60, 0.0  ;;  %v422_v56 = vld [vmem:[%s1214_s25 + $0xf8] sm:$0xff] }
  0xaa   : > { %v443_v12 = vadd.f32 %v411_v58, %v379_v61  ;;  %v381_v13 = vadd.f32 %v1231_v2, %v342_v63  ;;  %v382_v14 = vadd.f32 %v1231_v2, %v343_v0  ;;  %503 = vst [vmem:[%s1269_s26 + $0x80] sm:$0xff] %v471_v4  ;;  %v344_v20 = vmul.f32 %v1229_v1, %v305_v3 }
  0xab   : > { %v473_v17 = vmax.f32 %v441_v5, 0.0  ;;  %v474_v18 = vmax.f32 %v442_v6, 0.0  ;;  %v444_v19 = vadd.f32 %v412_v62, %v380_v7  ;;  %504 = vst [vmem:[%s1269_s26 + $0x88] sm:$0xff] %v472_v11  ;;  %v345_v26 = vmul.f32 %v1229_v1, %v306_v10 }
  0xac   : > { %v475_v22 = vmax.f32 %v443_v12, 0.0  ;;  %v445_v23 = vadd.f32 %v413_v8, %v381_v13  ;;  %v446_v24 = vadd.f32 %v414_v9, %v382_v14  ;;  %v383_v29 = vadd.f32 %v1231_v2, %v344_v20 }
  0xad   : > { %505 = vst [vmem:[%s1269_s26 + $0x90] sm:$0xff] %v473_v17  ;;  %506 = vst [vmem:[%s1269_s26 + $0x98] sm:$0xff] %v474_v18  ;;  %v476_v28 = vmax.f32 %v444_v19, 0.0  ;;  %v346_v31 = vmul.f32 %v1229_v1, %v307_v15  ;;  %v347_v32 = vmul.f32 %v1229_v1, %v308_v16  ;;  %v384_v37 = vadd.f32 %v1231_v2, %v345_v26 }
  0xae   : > { %507 = vst [vmem:[%s1269_s26 + $0xa0] sm:$0xff] %v475_v22  ;;  %v477_v35 = vmax.f32 %v445_v23, 0.0  ;;  %v478_v36 = vmax.f32 %v446_v24, 0.0  ;;  %v348_v40 = vmul.f32 %v1229_v1, %v309_v21  ;;  %v447_v41 = vadd.f32 %v415_v25, %v383_v29 }
  0xaf   : > { %508 = vst [vmem:[%s1269_s26 + $0xa8] sm:$0xff] %v476_v28  ;;  %v385_v42 = vadd.f32 %v1231_v2, %v346_v31  ;;  %v386_v43 = vadd.f32 %v1231_v2, %v347_v32  ;;  %v349_v45 = vmul.f32 %v1229_v1, %v310_v27  ;;  %v448_v46 = vadd.f32 %v416_v30, %v384_v37 }
  0xb0   : > { %509 = vst [vmem:[%s1269_s26 + $0xb0] sm:$0xff] %v477_v35  ;;  %510 = vst [vmem:[%s1269_s26 + $0xb8] sm:$0xff] %v478_v36  ;;  %v387_v47 = vadd.f32 %v1231_v2, %v348_v40  ;;  %v350_v49 = vmul.f32 %v1229_v1, %v311_v33  ;;  %v351_v50 = vmul.f32 %v1229_v1, %v312_v34  ;;  %v479_v51 = vmax.f32 %v447_v41, 0.0 }
  0xb1   : > { %v449_v52 = vadd.f32 %v417_v38, %v385_v42  ;;  %v450_v53 = vadd.f32 %v418_v39, %v386_v43  ;;  %v388_v54 = vadd.f32 %v1231_v2, %v349_v45  ;;  %v480_v57 = vmax.f32 %v448_v46, 0.0 }
  0xb2   : > { %v451_v58 = vadd.f32 %v419_v44, %v387_v47  ;;  %v389_v59 = vadd.f32 %v1231_v2, %v350_v49  ;;  %v390_v60 = vadd.f32 %v1231_v2, %v351_v50  ;;  %511 = vst [vmem:[%s1269_s26 + $0xc0] sm:$0xff] %v479_v51 }
  0xb3   : > { %v481_v1 = vmax.f32 %v449_v52, 0.0  ;;  %v482_v61 = vmax.f32 %v450_v53, 0.0  ;;  %v452_v62 = vadd.f32 %v420_v48, %v388_v54  ;;  %512 = vst [vmem:[%s1269_s26 + $0xc8] sm:$0xff] %v480_v57 }
  0xb4   : > { %v483_v63 = vmax.f32 %v451_v58, 0.0  ;;  %v453_v0 = vadd.f32 %v421_v55, %v389_v59  ;;  %v454_v3 = vadd.f32 %v422_v56, %v390_v60 }
  0xb5   : > { %513 = vst [vmem:[%s1269_s26 + $0xd0] sm:$0xff] %v481_v1  ;;  %514 = vst [vmem:[%s1269_s26 + $0xd8] sm:$0xff] %v482_v61  ;;  %v484_v4 = vmax.f32 %v452_v62, 0.0 }
  0xb6   : > { %515 = vst [vmem:[%s1269_s26 + $0xe0] sm:$0xff] %v483_v63  ;;  %v485_v2 = vmax.f32 %v453_v0, 0.0  ;;  %v486_v5 = vmax.f32 %v454_v3, 0.0 }
  0xb7   : > { %516 = vst [vmem:[%s1269_s26 + $0xe8] sm:$0xff] %v484_v4 }
  0xb8   : > { %517 = vst [vmem:[%s1269_s26 + $0xf0] sm:$0xff] %v485_v2  ;;  %518 = vst [vmem:[%s1269_s26 + $0xf8] sm:$0xff] %v486_v5 }
  0xb9   : > { %880 = shalt.err (!%p877_p5)
}
  0xba   : > { %s881_s6 = scalar_lea.hbm %s1396_s19, 4096  ;;  %s885_s12 = scalar_lea.hbm %s1450_s4, 8192 }
  0xbb   : > { %p882_p1 = scmp.ne.s32.totalorder %s1396_s19, %s881_s6  ;;  %p886_p10 = scmp.lt.u32.totalorder %s1396_s19, %s1450_s4 }
  0xbc   : > { %p887_p2 = scmp.lt.u32.totalorder %s885_s12, %s881_s6  ;;  %p889_p7 = scmp.lt.u32.totalorder %s881_s6, %s1396_s19 }
  0xbd   : > { %p883_p8 = pnand %p882_p1, %p1473_p6 }
  0xbe   : > { %p888_p0 = por %p887_p2, %p886_p10 }
  0xbf   : > { %p884_p9 = pneg %p883_p8 }
  0xc0   : > { %p890_p12 = por %p889_p7, %p888_p0 }
  0xc2   : > { %p891_p13 = pnand %p890_p12, %p884_p9 }
  0xc4   : > { %894 = shalt.err (!%p891_p13)
}
  0xc5   : > { %s954_s25 = smov 128   ;;  %s955_s26 = smov 8  }
  0xc6   : > { %687 = dma.vmem_to_hbm [thread:$0]  (%p1473_p6), %s1398_s14, 4096, %s1396_s19, %s520_s23, %s954_s25, %s954_s25, %s955_s26  }
  0xc7 PF: > { %s548_s13 = sand.u32 1, %s933_s15   ;;  %p1474_p11 = scmp.ne.s32.totalorder %s1460_s28, 0 }
  0xc8   : > { %p1475_p3 = scmp.ge.s32.totalorder %s945_s18, 2  ;;  %s549_s5 = scalar_lea.sflag [#allocation4], %s548_s13 }
  0xca   : > { %p704_p4 = pnand %p1475_p3, %p1474_p11 }
  0xcc   : > { %928 = dma.done.wait (!%p704_p4), %s549_s5, 4096  }
  0xcd   : > { %930 = vsyncadd (!%p704_p4), %s549_s5, 4294963200  ;;  %p21_p5 = scmp.ge.s32.totalorder %s1006_s21, 4   ;;  %s1476_s15 = smov %s937_s16 }
  0xce   : > { %s1477_s16 = smov %s941_s17  ;;  %s1478_s17 = smov %s1018_s24 }
  0xcf   : > { %s1479_s18 = smov %s1006_s21  ;;  %23 = sbr.rel (!%p21_p5) target bundleno = 10 (0xa), region = 102 }
  0xd6   :  { %554 = vsyncpa [#allocation3], 1 }
  0xd7   :  { %556 = vsyncpa [#allocation3 + $0x1], 1 }
  0xd8   :  { %557 = vsyncpa [#allocation6], 1 }
  0xd9   :  { %559 = vsyncpa [#allocation6 + $0x1], 1 }
  0xda   :  { %560 = vsyncpa [#allocation9], 1 }
  0xdb   :  { %561 = vsyncpa [#allocation4], 1 }
  0xdc   :  { %563 = vsyncpa [#allocation4 + $0x1], 1 }

// kernel: residual_forward.3
= control target key start
LH: loop header
LB: loop body
LE: loop exit
PB: predicated region body
PF: predicated region fallthrough
CT: control target
= control target key end

     0   :  { %10 = vsyncpa [#allocation4], 0  ;;  %s4671_s0 = inlined_call_operand.hbm [shape: f32[2,16,16,128], index: 0, kind: input, shape index: {}]   ;;  %s4672_s1 = inlined_call_operand.hbm [shape: f32[1152,128], index: 1, kind: input, shape index: {}]   ;;  %s4673_s2 = inlined_call_operand.hbm [shape: f32[2,16,16,128], index: 2, kind: output, shape index: {0}]   ;;  %s4674_s3 = inlined_call_operand.hbm [shape: f32[2,1,128], index: 3, kind: output, shape index: {1}]   ;;  %s4675_s4 = inlined_call_operand.hbm [shape: f32[2,1,128], index: 4, kind: output, shape index: {2}]  }
   0x1   :  { %12 = vsyncpa [#allocation4 + $0x1], 0 }
   0x2   :  { %13 = vsyncpa [#allocation7], 0 }
   0x3   :  { %14 = vsyncpa [#allocation5], 0 }
   0x4   :  { %16 = vsyncpa [#allocation5 + $0x1], 0 }
   0x5   :  { %17 = vsyncpa [#allocation10], 0 }
   0x6   :  { %19 = vsyncpa [#allocation10 + $0x1], 0  ;;  %s3169_s15 = smov 0   ;;  %s3171_s16 = smov 0  }
   0x7   :  { %s3173_s17 = smov 0   ;;  %s3175_s18 = smov 0  }
   0x8 LB: > { %s3190_s19 = sadd.s32 4294967295, %s3131_s18   ;;  %s2321_s20 = sadd.s32 4294967294, %s3131_s18   ;;  %s3131_s18 = sphi %s3175_s18, %s4852_s18   ;;  %s3127_s17 = sphi %s3173_s17, %s4851_s17   ;;  %s3123_s16 = sphi %s3171_s16, %s4850_s16   ;;  %s3119_s15 = sphi %s3169_s15, %s4849_s15  }
   0x9   : > { %p45_p0 = scmp.ne.s32.totalorder %s3123_s16, %s3119_s15  ;;  %p4676_p1 = scmp.eq.s32.totalorder %s3190_s19, 0 }
   0xa   : > { %p96_p3 = scmp.eq.s32.totalorder %s2321_s20, 1  ;;  %p2322_p5 = scmp.ge.s32.totalorder %s3131_s18, 1 }
   0xb   : > { %p3201_p4 = por %p4676_p1, %p45_p0  ;;  %p155_p7 = scmp.lt.s32.totalorder %s3131_s18, 3 }
   0xc   : > { %p3206_p6 = por %p96_p3, %p45_p0  ;;  %s3133_s24 = smov [#allocation6]  }
   0xd   : > { %s4751_s21 = scalar_select %p3201_p4, 1, 0 }
   0xe   : > { %s4752_s22 = scalar_select %p3206_p6, 1, 0 }
   0xf   : > { %p3211_p8 = pnand %p2322_p5, %p155_p7  ;;  %s167_s25 = sshll.u32 %s3133_s24, 4  ;;  %s3215_s25 = int_to_ptr.vmem [resolvable:$true] %s167_s25 }
  0x10   : > { %s3227_s27 = sadd.s32 1, %s3131_s18   ;;  %s32_s28 = sadd.s32 1, %s3127_s17 }
  0x11   : > { %s4753_s23 = scalar_select %p3211_p8, 1, 0 }
  0x12   : > { %p2873_p9 = pneg %p3211_p8  ;;  %s29_s29 = ssub.s32 %s3131_s18, %s3227_s27 }
  0x13   : > { %s2943_s6 = scalar_lea.hbm %s4672_s1, 18432 }
  0x14   : > { %p3222_p11 = pnand %p2873_p9, %p4676_p1  ;;  %p2944_p12 = scmp.ne.s32.totalorder %s4672_s1, %s2943_s6 }
  0x15   : > { %p2950_p5 = scmp.lt.u32.totalorder %s2943_s6, %s4672_s1 }
  0x16   : > { %p2945_p13 = pneg %p3222_p11 }
  0x18   : > { %p2946_p0 = pnand %p2945_p13, %p2944_p12 }
  0x1a   : > { %p2947_p3 = pneg %p2946_p0 }
  0x1c   : > { %p2952_p7 = pnand %p2950_p5, %p2947_p3 }
  0x1e   : > { %2955 = shalt.err (!%p2952_p7)
}
  0x1f   : > { %s2956_s11 = scalar_lea.vmem %s3215_s25, 18432  ;;  %p2964_p2 = scmp.lt.s32.totalorder %s3215_s25, %s3215_s25 }
  0x20   : > { %p2957_p9 = scmp.ne.s32.totalorder %s3215_s25, %s2956_s11  ;;  %p2965_p6 = scmp.lt.s32.totalorder %s2956_s11, %s2956_s11 }
  0x22   : > { %p2959_p10 = pnand %p2957_p9, %p2945_p13  ;;  %p2966_p4 = por %p2965_p6, %p2964_p2 }
  0x24   : > { %p2960_p1 = pneg %p2959_p10 }
  0x26   : > { %p2967_p8 = pnand %p2966_p4, %p2960_p1 }
  0x28   : > { %2970 = shalt.err (!%p2967_p8)
}
  0x29   : > { %s3134_s12 = smov 128   ;;  %s3135_s13 = smov 8  }
  0x2a   : > { %2876 = dma.hbm_to_vmem [thread:$0]  (!%p3222_p11), %s4672_s1, 18432, %s3215_s25, [#allocation7], %s3134_s12, %s3134_s12, %s3135_s13  }
  0x2b   : > { %p30_p1 = scmp.eq.s32.totalorder %s29_s29, 0  ;;  %p39_p2 = scmp.ne.s32.totalorder %s3127_s17, %s3123_s16 }
  0x2c   : > { %p40_p4 = scmp.eq.s32.totalorder %s3131_s18, 0  ;;  %p2892_p6 = scmp.lt.s32.totalorder %s3131_s18, 2 }
  0x2d   : > { %s3261_s30 = scalar_select %p30_p1, %s3127_s17, %s32_s28  }
  0x2e   : > { %p41_p8 = por %p40_p4, %p39_p2  ;;  %p4755_p10 = scmp.eq.s32.totalorder %s3190_s19, 1 }
  0x2f   : > { %s181_s26 = sand.u32 1, %s3127_s17   ;;  %s2339_s6 = sshll.u32 %s3131_s18, 12 }
  0x30   : > { %p3265_p12 = por %p4755_p10, %p39_p2  ;;  %s2325_s7 = sshll.u32 %s181_s26, 8 }
  0x31   : > { %s3274_s10 = scalar_lea.hbm %s4671_s0, %s2339_s6  ;;  %s185_s25 = scalar_lea.vmem [#allocation3], %s2325_s7 }
  0x32   : > { %s192_s28 = sshll.u32 %s185_s25, 4  ;;  %p3276_p11 = pnand %p2892_p6, %p41_p8  ;;  %s3280_s28 = int_to_ptr.vmem [resolvable:$true] %s192_s28 }
  0x33   : > { %s3282_s11 = scalar_lea.sflag [#allocation4], %s181_s26  ;;  %s2971_s14 = scalar_lea.hbm %s3274_s10, 4096 }
  0x34   : > { %p2972_p13 = scmp.ne.s32.totalorder %s3274_s10, %s2971_s14  ;;  %p2973_p0 = pneg %p3276_p11 }
  0x35   : > { %s2976_s7 = scalar_lea.hbm %s4671_s0, 8192  ;;  %p2977_p7 = scmp.lt.u32.totalorder %s3274_s10, %s4671_s0 }
  0x36   : > { %p2974_p3 = pnand %p2973_p0, %p2972_p13  ;;  %p2978_p9 = scmp.lt.u32.totalorder %s2976_s7, %s2971_s14 }
  0x37   : > { %p2980_p2 = scmp.lt.u32.totalorder %s2971_s14, %s3274_s10 }
  0x38   : > { %p2975_p5 = pneg %p2974_p3  ;;  %p2979_p1 = por %p2978_p9, %p2977_p7 }
  0x3a   : > { %p2981_p4 = por %p2980_p2, %p2979_p1 }
  0x3c   : > { %p2982_p6 = pnand %p2981_p4, %p2975_p5 }
  0x3e   : > { %2985 = shalt.err (!%p2982_p6)
}
  0x3f   : > { %s2986_s26 = scalar_lea.vmem %s3280_s28, 4096  ;;  %s3136_s25 = smov [#allocation3]  }
  0x40   : > { %p2987_p8 = scmp.ne.s32.totalorder %s3280_s28, %s2986_s26  ;;  %s2991_s24 = sshll.u32 %s3136_s25, 4  ;;  %s2992_s24 = int_to_ptr.vmem [resolvable:$false] %s2991_s24 }
  0x41   : > { %s2993_s6 = scalar_lea.vmem %s2992_s24, 8192  ;;  %p2994_p3 = scmp.lt.s32.totalorder %s3280_s28, %s2992_s24 }
  0x42   : > { %p2989_p10 = pnand %p2987_p8, %p2973_p0  ;;  %p2995_p7 = scmp.lt.s32.totalorder %s2993_s6, %s2986_s26 }
  0x44   : > { %p2990_p13 = pneg %p2989_p10  ;;  %p2996_p9 = por %p2995_p7, %p2994_p3 }
  0x46   : > { %p2997_p1 = pnand %p2996_p9, %p2990_p13 }
  0x48   : > { %3000 = shalt.err (!%p2997_p1)
}
  0x49   : > { %2880 = dma.hbm_to_vmem [thread:$0]  (!%p3276_p11), %s3274_s10, 4096, %s3280_s28, %s3282_s11, %s3134_s12, %s3134_s12, %s3135_s13  }
  0x4a   : > { %p4758_p0 = scmp.ne.s32.totalorder %s4753_s23, 0 }
  0x4c   : > { %204 = sbr.rel (%p4758_p0) target bundleno = 766 (0x2fe), region = 28 }
  0x53   : > { %s3316_s14 = sand.u32 1, %s3123_s16   ;;  %p4759_p5 = scmp.ne.s32.totalorder %s4751_s21, 0 }
  0x54   : > { %s2329_s7 = sshll.u32 %s3316_s14, 8  ;;  %s207_s8 = scalar_lea.sflag [#allocation4], %s3316_s14 }
  0x55   : > { %s3322_s29 = scalar_lea.vmem [#allocation3], %s2329_s7 }
  0x56   : > { %3102 = dma.done.wait (%p4759_p5), %s207_s8, 4096  }
  0x57   : > { %3104 = vsyncadd (%p4759_p5), %s207_s8, 4294963200  ;;  %p4760_p11 = scmp.eq.s32.totalorder %s3190_s19, 0 }
  0x59   : > { %3106 = dma.done.wait (%p4760_p11), [#allocation7], 18432   ;;  %p4761_p2 = pmov %p4760_p11 }
  0x5a   : > { %vm468_vm0 = vcmask 1046528   ;;  %v4680_v0 = vmov 0.0|0.0   ;;  %v3138_v1 = vmov 0.0   ;;  %v728_v3 = vld [vmem:[#allocation6] sm:$0xff]  ;;  %v729_v4 = vld [vmem:[#allocation6 + $0x8] sm:$0xff]  ;;  %v730_v8 = vld [vmem:[#allocation6 + $0x10] sm:$0xff] }
  0x5b   : > { %3108 = vsyncadd (%p4761_p2), [#allocation7], 4294948864  ;;  %2469 = vmatprep.subr.bf16.mxu1 %v4680_v0  ;;  %2517 = vmatprep.subr.bf16.mxu0 %v4680_v0  ;;  %279 = vst [vmem:[#allocation2] sm:$0xff] %v3138_v1  ;;  %v3336_v2 = vrot.slane %v3138_v1, 1  ;;  %v760_v5 = vld [vmem:[#allocation6 + $0x100] sm:$0xff]  ;;  %v2470_v6 = vpack.c.bf16 %v729_v4, %v728_v3  ;;  %v761_v7 = vld [vmem:[#allocation6 + $0x108] sm:$0xff] }
  0x5c   : > { %281 = vst [vmem:[#allocation2 + $0x10] sm:$0x3] %v3138_v1  ;;  %282 = vst [vmem:[#allocation2 + $0x18] sm:$0xff] %v3138_v1  ;;  %v731_v9 = vld [vmem:[#allocation6 + $0x18] sm:$0xff]  ;;  %v2518_v10 = vpack.c.bf16 %v761_v7, %v760_v5  ;;  %v762_v11 = vld [vmem:[#allocation6 + $0x110] sm:$0xff]  ;;  %vm581_vm1 = vcmask 1045504  }
  0x5d   : > { %283 = vst [vmem:[#allocation2 + $0x20] sm:$0xff] %v3138_v1  ;;  %284 = vst [vmem:[#allocation2 + $0x28] sm:$0x3] %v3138_v1  ;;  %936 = vmatprep.mubr.f32.mxu1 %v3336_v2  ;;  %v763_v12 = vld [vmem:[#allocation6 + $0x118] sm:$0xff]  ;;  %2471 = vmatpush1.bf16.msra.mxu1 %v2470_v6  ;;  %v2473_v13 = vpack.c.bf16 %v731_v9, %v730_v8  ;;  %v732_v15 = vld [vmem:[#allocation6 + $0x20] sm:$0xff]  ;;  %s4324_s21 = scalar_lea.vmem [#allocation8], %s2329_s7 }
  0x5e   : > { %285 = vst [vmem:[#allocation2 + $0x30] sm:$0xff] %v3138_v1  ;;  %286 = vst [vmem:[#allocation2 + $0x38] sm:$0xff] %v3138_v1  ;;  %2519 = vmatpush1.bf16.msra.mxu0 %v2518_v10  ;;  %2472 = vmatprep.subr.bf16.mxu1 %v4680_v0  ;;  %v2521_v14 = vpack.c.bf16 %v763_v12, %v762_v11  ;;  %v733_v16 = vld [vmem:[#allocation6 + $0x28] sm:$0xff]  ;;  %v764_v17 = vld [vmem:[#allocation6 + $0x120] sm:$0xff]  ;;  %s2340_s23 = sshll.u32 %s3190_s19, 12  ;;  %s2159_s12 = sshll.u32 %s4324_s21, 4  ;;  %s4481_s12 = int_to_ptr.vmem [resolvable:$true] %s2159_s12 }
  0x5f   : > { %287 = vst [vmem:[#allocation2 + $0x40] sm:$0x3] %v3138_v1  ;;  %288 = vst [vmem:[#allocation2 + $0x48] sm:$0xff] %v3138_v1  ;;  %2520 = vmatprep.subr.bf16.mxu0 %v4680_v0  ;;  %v765_v18 = vld [vmem:[#allocation6 + $0x128] sm:$0xff]  ;;  %v2476_v19 = vpack.c.bf16 %v733_v16, %v732_v15  ;;  %v734_v21 = vld [vmem:[#allocation6 + $0x30] sm:$0xff]  ;;  %s4479_s28 = scalar_lea.hbm %s4673_s2, %s2340_s23  ;;  %s2138_s11 = scalar_lea.sflag [#allocation5], %s3316_s14 }
  0x60   : > { %289 = vst [vmem:[#allocation2 + $0x50] sm:$0xff] %v3138_v1  ;;  %290 = vst [vmem:[#allocation2 + $0x58] sm:$0x3] %v3138_v1  ;;  %v2524_v20 = vpack.c.bf16 %v765_v18, %v764_v17  ;;  %v735_v22 = vld [vmem:[#allocation6 + $0x38] sm:$0xff]  ;;  %v766_v23 = vld [vmem:[#allocation6 + $0x130] sm:$0xff]  ;;  %s3001_s9 = scalar_lea.vmem %s4481_s12, 4096 }
  0x61   : > { %291 = vst [vmem:[#allocation2 + $0x60] sm:$0xff] %v3138_v1  ;;  %292 = vst [vmem:[#allocation2 + $0x68] sm:$0xff] %v3138_v1  ;;  %2474 = vmatpush1.bf16.msra.mxu1 %v2473_v13  ;;  %v767_v24 = vld [vmem:[#allocation6 + $0x138] sm:$0xff]  ;;  %v2479_v25 = vpack.c.bf16 %v735_v22, %v734_v21  ;;  %v736_v27 = vld [vmem:[#allocation6 + $0x40] sm:$0xff]  ;;  %p3002_p4 = scmp.ne.s32.totalorder %s4481_s12, %s3001_s9  ;;  %s3139_s26 = smov [#allocation8]  }
  0x62   : > { %293 = vst [vmem:[#allocation2 + $0x70] sm:$0x3] %v3138_v1  ;;  %294 = vst [vmem:[#allocation2 + $0x78] sm:$0xff] %v3138_v1  ;;  %2522 = vmatpush1.bf16.msra.mxu0 %v2521_v14  ;;  %2475 = vmatprep.subr.bf16.mxu1 %v4680_v0  ;;  %v2527_v26 = vpack.c.bf16 %v767_v24, %v766_v23  ;;  %v737_v28 = vld [vmem:[#allocation6 + $0x48] sm:$0xff]  ;;  %v768_v29 = vld [vmem:[#allocation6 + $0x140] sm:$0xff]  ;;  %s3005_s25 = sshll.u32 %s3139_s26, 4  ;;  %s3006_s25 = int_to_ptr.vmem [resolvable:$false] %s3005_s25 }
  0x63   : > { %295 = vst [vmem:[#allocation2 + $0x80] sm:$0xff] %v3138_v1  ;;  %296 = vst [vmem:[#allocation2 + $0x88] sm:$0x3] %v3138_v1  ;;  %2523 = vmatprep.subr.bf16.mxu0 %v4680_v0  ;;  %v769_v30 = vld [vmem:[#allocation6 + $0x148] sm:$0xff]  ;;  %v2482_v31 = vpack.c.bf16 %v737_v28, %v736_v27  ;;  %v738_v33 = vld [vmem:[#allocation6 + $0x50] sm:$0xff]  ;;  %p3003_p6 = pnand %p3002_p4, %p3265_p12  ;;  %s3007_s24 = scalar_lea.vmem %s3006_s25, 8192 }
  0x64   : > { %297 = vst [vmem:[#allocation2 + $0x90] sm:$0xff] %v3138_v1  ;;  %298 = vst [vmem:[#allocation2 + $0x98] sm:$0xff] %v3138_v1  ;;  %v2530_v32 = vpack.c.bf16 %v769_v30, %v768_v29  ;;  %v739_v34 = vld [vmem:[#allocation6 + $0x58] sm:$0xff]  ;;  %v770_v35 = vld [vmem:[#allocation6 + $0x150] sm:$0xff]  ;;  %p3008_p10 = scmp.lt.s32.totalorder %s4481_s12, %s3006_s25  ;;  %p3009_p13 = scmp.lt.s32.totalorder %s3007_s24, %s3001_s9 }
  0x65   : > { %299 = vst [vmem:[#allocation2 + $0xa0] sm:$0x3] %v3138_v1  ;;  %300 = vst [vmem:[#allocation2 + $0xa8] sm:$0xff] %v3138_v1  ;;  %2477 = vmatpush1.bf16.msra.mxu1 %v2476_v19  ;;  %v771_v36 = vld [vmem:[#allocation6 + $0x158] sm:$0xff]  ;;  %v2485_v37 = vpack.c.bf16 %v739_v34, %v738_v33  ;;  %v740_v39 = vld [vmem:[#allocation6 + $0x60] sm:$0xff]  ;;  %p3004_p8 = pneg %p3003_p6 }
  0x66   : > { %301 = vst [vmem:[#allocation2 + $0xb0] sm:$0xff] %v3138_v1  ;;  %302 = vst [vmem:[#allocation2 + $0xb8] sm:$0x3] %v3138_v1  ;;  %2525 = vmatpush1.bf16.msra.mxu0 %v2524_v20  ;;  %2478 = vmatprep.subr.bf16.mxu1 %v4680_v0  ;;  %v2533_v38 = vpack.c.bf16 %v771_v36, %v770_v35  ;;  %v741_v40 = vld [vmem:[#allocation6 + $0x68] sm:$0xff]  ;;  %v772_v41 = vld [vmem:[#allocation6 + $0x160] sm:$0xff]  ;;  %p3010_p3 = por %p3009_p13, %p3008_p10 }
  0x67   : > { %303 = vst [vmem:[#allocation2 + $0xc0] sm:$0xff] %v3138_v1  ;;  %304 = vst [vmem:[#allocation2 + $0xc8] sm:$0xff] %v3138_v1  ;;  %2526 = vmatprep.subr.bf16.mxu0 %v4680_v0  ;;  %v773_v42 = vld [vmem:[#allocation6 + $0x168] sm:$0xff]  ;;  %v247_v43 = vld [vmem:[%s3322_s29] sm:$0xff]  ;;  %v2488_v45 = vpack.c.bf16 %v741_v40, %v740_v39 }
  0x68   : > { %305 = vst [vmem:[#allocation2 + $0xd0] sm:$0x3] %v3138_v1  ;;  %306 = vst [vmem:[#allocation2 + $0xd8] sm:$0xff] %v3138_v1  ;;  %v248_v44 = vld [vmem:[%s3322_s29 + $0x8] sm:$0xff]  ;;  %v742_v46 = vld [vmem:[#allocation6 + $0x70] sm:$0xff]  ;;  %v2536_v49 = vpack.c.bf16 %v773_v42, %v772_v41  ;;  %p3011_p7 = pnand %p3010_p3, %p3004_p8 }
  0x69   : > { %307 = vst [vmem:[#allocation2 + $0xe0] sm:$0xff] %v3138_v1  ;;  %308 = vst [vmem:[#allocation2 + $0xe8] sm:$0x3] %v3138_v1  ;;  %2480 = vmatpush1.bf16.msra.mxu1 %v2479_v25  ;;  %v743_v47 = vld [vmem:[#allocation6 + $0x78] sm:$0xff]  ;;  %v249_v48 = vld [vmem:[%s3322_s29 + $0x10] sm:$0xff] }
  0x6a   : > { %309 = vst [vmem:[#allocation2 + $0xf0] sm:$0xff] %v3138_v1  ;;  %310 = vst [vmem:[#allocation2 + $0xf8] sm:$0xff] %v3138_v1  ;;  %2528 = vmatpush1.bf16.msra.mxu0 %v2527_v26  ;;  %2481 = vmatprep.subr.bf16.mxu1 %v4680_v0  ;;  %v774_v50 = vld [vmem:[#allocation6 + $0x170] sm:$0xff]  ;;  %v250_v51 = vld [vmem:[%s3322_s29 + $0x18] sm:$0xff]  ;;  %v2491_v57 = vpack.c.bf16 %v743_v47, %v742_v46 }
  0x6b   : > { %311 = vst [vmem:[#allocation2 + $0x100] sm:$0x3] %v3138_v1  ;;  %312 = vst [vmem:[#allocation2 + $0x108] sm:$0xff] %v3138_v1  ;;  %2529 = vmatprep.subr.bf16.mxu0 %v4680_v0  ;;  %v251_v52 = vld [vmem:[%s3322_s29 + $0x20] sm:$0xff]  ;;  %v775_v53 = vld [vmem:[#allocation6 + $0x178] sm:$0xff] }
  0x6c   : > { %313 = vst [vmem:[#allocation2 + $0x110] sm:$0xff] %v3138_v1  ;;  %314 = vst [vmem:[#allocation2 + $0x118] sm:$0x3] %v3138_v1  ;;  %v252_v54 = vld [vmem:[%s3322_s29 + $0x28] sm:$0xff]  ;;  %v253_v55 = vld [vmem:[%s3322_s29 + $0x30] sm:$0xff]  ;;  %v2539_v61 = vpack.c.bf16 %v775_v53, %v774_v50 }
  0x6d   : > { %315 = vst [vmem:[#allocation2 + $0x120] sm:$0xff] %v3138_v1  ;;  %316 = vst [vmem:[#allocation2 + $0x128] sm:$0xff] %v3138_v1  ;;  %2483 = vmatpush1.bf16.msra.mxu1 %v2482_v31  ;;  %v254_v56 = vld [vmem:[%s3322_s29 + $0x38] sm:$0xff]  ;;  %v744_v58 = vld [vmem:[#allocation6 + $0x80] sm:$0xff] }
  0x6e   : > { %317 = vst [vmem:[#allocation2 + $0x130] sm:$0x3] %v3138_v1  ;;  %318 = vst [vmem:[#allocation2 + $0x138] sm:$0xff] %v3138_v1  ;;  %2531 = vmatpush1.bf16.msra.mxu0 %v2530_v32  ;;  %2484 = vmatprep.subr.bf16.mxu1 %v4680_v0  ;;  %v745_v59 = vld [vmem:[#allocation6 + $0x88] sm:$0xff]  ;;  %v255_v60 = vld [vmem:[%s3322_s29 + $0x40] sm:$0xff] }
  0x6f   : > { %319 = vst [vmem:[#allocation2 + $0x140] sm:$0xff] %v3138_v1  ;;  %320 = vst [vmem:[#allocation2 + $0x148] sm:$0x3] %v3138_v1  ;;  %2532 = vmatprep.subr.bf16.mxu0 %v4680_v0  ;;  %v776_v62 = vld [vmem:[#allocation6 + $0x180] sm:$0xff]  ;;  %v256_v63 = vld [vmem:[%s3322_s29 + $0x48] sm:$0xff]  ;;  %v2494_v8 = vpack.c.bf16 %v745_v59, %v744_v58 }
  0x70   : > { %321 = vst [vmem:[#allocation2 + $0x150] sm:$0xff] %v3138_v1  ;;  %322 = vst [vmem:[#allocation2 + $0x158] sm:$0xff] %v3138_v1  ;;  %v257_v3 = vld [vmem:[%s3322_s29 + $0x50] sm:$0xff]  ;;  %v777_v4 = vld [vmem:[#allocation6 + $0x188] sm:$0xff] }
  0x71   : > { %323 = vst [vmem:[#allocation2 + $0x160] sm:$0x3] %v3138_v1  ;;  %324 = vst [vmem:[#allocation2 + $0x168] sm:$0xff] %v3138_v1  ;;  %2486 = vmatpush1.bf16.msra.mxu1 %v2485_v37  ;;  %v258_v6 = vld [vmem:[%s3322_s29 + $0x58] sm:$0xff]  ;;  %v259_v7 = vld [vmem:[%s3322_s29 + $0x60] sm:$0xff]  ;;  %v2542_v9 = vpack.c.bf16 %v777_v4, %v776_v62 }
  0x72   : > { %325 = vst [vmem:[#allocation2 + $0x170] sm:$0xff] %v3138_v1  ;;  %326 = vst [vmem:[#allocation2 + $0x178] sm:$0x3] %v3138_v1  ;;  %2534 = vmatpush1.bf16.msra.mxu0 %v2533_v38  ;;  %2487 = vmatprep.subr.bf16.mxu1 %v4680_v0  ;;  %v746_v10 = vld [vmem:[#allocation6 + $0x90] sm:$0xff]  ;;  %v747_v11 = vld [vmem:[#allocation6 + $0x98] sm:$0xff] }
  0x73   : > { %327 = vst [vmem:[#allocation2 + $0x180] sm:$0xff] %v3138_v1  ;;  %328 = vst [vmem:[#allocation2 + $0x188] sm:$0xff] %v3138_v1  ;;  %2535 = vmatprep.subr.bf16.mxu0 %v4680_v0  ;;  %v778_v12 = vld [vmem:[#allocation6 + $0x190] sm:$0xff]  ;;  %v779_v13 = vld [vmem:[#allocation6 + $0x198] sm:$0xff]  ;;  %v2497_v14 = vpack.c.bf16 %v747_v11, %v746_v10 }
  0x74   : > { %329 = vst [vmem:[#allocation2 + $0x190] sm:$0x3] %v3138_v1  ;;  %332 = vst [vmem:[#allocation2 + $0x1a8] sm:$0x3] %v3138_v1  ;;  %v2545_v15 = vpack.c.bf16 %v779_v13, %v778_v12  ;;  %v748_v16 = vld [vmem:[#allocation6 + $0xa0] sm:$0xff]  ;;  %v749_v17 = vld [vmem:[#allocation6 + $0xa8] sm:$0xff] }
  0x75   : > { %334 = vst [vmem:[#allocation2 + $0x19] sm:$0xff] %v247_v43  ;;  %335 = vst [vmem:[#allocation2 + $0x21] sm:$0xff] %v248_v44  ;;  %2489 = vmatpush1.bf16.msra.mxu1 %v2488_v45  ;;  %v780_v18 = vld [vmem:[#allocation6 + $0x1a0] sm:$0xff]  ;;  %v781_v19 = vld [vmem:[#allocation6 + $0x1a8] sm:$0xff]  ;;  %v2500_v20 = vpack.c.bf16 %v749_v17, %v748_v16 }
  0x76   : > { %336 = vst [vmem:[#allocation2 + $0x31] sm:$0xff] %v249_v48  ;;  %337 = vst [vmem:[#allocation2 + $0x39] sm:$0xff] %v250_v51  ;;  %2537 = vmatpush1.bf16.msra.mxu0 %v2536_v49  ;;  %2490 = vmatprep.subr.bf16.mxu1 %v4680_v0  ;;  %v260_v21 = vld [vmem:[%s3322_s29 + $0x68] sm:$0xff]  ;;  %v261_v22 = vld [vmem:[%s3322_s29 + $0x70] sm:$0xff]  ;;  %v2548_v23 = vpack.c.bf16 %v781_v19, %v780_v18 }
  0x77   : > { %338 = vst [vmem:[#allocation2 + $0x49] sm:$0xff] %v251_v52  ;;  %339 = vst [vmem:[#allocation2 + $0x51] sm:$0xff] %v252_v54  ;;  %2538 = vmatprep.subr.bf16.mxu0 %v4680_v0  ;;  %v750_v24 = vld [vmem:[#allocation6 + $0xb0] sm:$0xff]  ;;  %v751_v25 = vld [vmem:[#allocation6 + $0xb8] sm:$0xff] }
  0x78   : > { %340 = vst [vmem:[#allocation2 + $0x61] sm:$0xff] %v253_v55  ;;  %341 = vst [vmem:[#allocation2 + $0x69] sm:$0xff] %v254_v56  ;;  %v782_v26 = vld [vmem:[#allocation6 + $0x1b0] sm:$0xff]  ;;  %v783_v27 = vld [vmem:[#allocation6 + $0x1b8] sm:$0xff]  ;;  %v2503_v30 = vpack.c.bf16 %v751_v25, %v750_v24 }
  0x79   : > { %342 = vst [vmem:[#allocation2 + $0x79] sm:$0xff] %v255_v60  ;;  %343 = vst [vmem:[#allocation2 + $0x81] sm:$0xff] %v256_v63  ;;  %2492 = vmatpush1.bf16.msra.mxu1 %v2491_v57  ;;  %v262_v28 = vld [vmem:[%s3322_s29 + $0x78] sm:$0xff]  ;;  %v263_v29 = vld [vmem:[%s3322_s29 + $0x80] sm:$0xff]  ;;  %v2551_v33 = vpack.c.bf16 %v783_v27, %v782_v26 }
  0x7a   : > { %344 = vst [vmem:[#allocation2 + $0x91] sm:$0xff] %v257_v3  ;;  %345 = vst [vmem:[#allocation2 + $0x99] sm:$0xff] %v258_v6  ;;  %2540 = vmatpush1.bf16.msra.mxu0 %v2539_v61  ;;  %2493 = vmatprep.subr.bf16.mxu1 %v4680_v0  ;;  %v264_v31 = vld [vmem:[%s3322_s29 + $0x88] sm:$0xff]  ;;  %v265_v32 = vld [vmem:[%s3322_s29 + $0x90] sm:$0xff]  ;;  %v582_v3 = vrot.slane %v3138_v1, 2 }
  0x7b   : > { %346 = vst [vmem:[#allocation2 + $0xa9] sm:$0xff] %v259_v7  ;;  %2541 = vmatprep.subr.bf16.mxu0 %v4680_v0  ;;  %347 = vst [vmem:[#allocation2 + $0xb1] sm:$0xff] %v260_v21  ;;  %v752_v34 = vld [vmem:[#allocation6 + $0xc0] sm:$0xff]  ;;  %v753_v35 = vld [vmem:[#allocation6 + $0xc8] sm:$0xff] }
  0x7c   : > { %v3414_v5 = vld [vmem:[#allocation2 + $0x18] sm:$0xff]  ;;  %348 = vst [vmem:[#allocation2 + $0xc1] sm:$0xff] %v261_v22  ;;  %349 = vst [vmem:[#allocation2 + $0xc9] sm:$0xff] %v262_v28  ;;  %v784_v36 = vld [vmem:[#allocation6 + $0x1c0] sm:$0xff]  ;;  %v2506_v40 = vpack.c.bf16 %v753_v35, %v752_v34 }
  0x7d   : > { %1161 = vmatprep.mubr.f32.mxu0 %v3414_v5  ;;  %2495 = vmatpush1.bf16.msra.mxu1 %v2494_v8  ;;  %350 = vst [vmem:[#allocation2 + $0xd9] sm:$0xff] %v263_v29  ;;  %351 = vst [vmem:[#allocation2 + $0xe1] sm:$0xff] %v264_v31  ;;  %v785_v37 = vld [vmem:[#allocation6 + $0x1c8] sm:$0xff]  ;;  %v266_v38 = vld [vmem:[%s3322_s29 + $0x98] sm:$0xff]  ;;  %v474_v19 = vrot.slane %v3414_v5, 1  ;;  %v587_v31 = vrot.slane %v3414_v5, 2 }
  0x7e   : > { %2543 = vmatpush1.bf16.msra.mxu0 %v2542_v9  ;;  %2496 = vmatprep.subr.bf16.mxu1 %v4680_v0  ;;  %352 = vst [vmem:[#allocation2 + $0xf1] sm:$0xff] %v265_v32  ;;  %v267_v39 = vld [vmem:[%s3322_s29 + $0xa0] sm:$0xff]  ;;  %353 = vst [vmem:[#allocation2 + $0xf9] sm:$0xff] %v266_v38  ;;  %v2554_v41 = vpack.c.bf16 %v785_v37, %v784_v36  ;;  %v754_v42 = vld [vmem:[#allocation6 + $0xd0] sm:$0xff] }
  0x7f   : > { %2544 = vmatprep.subr.bf16.mxu0 %v4680_v0  ;;  %354 = vst [vmem:[#allocation2 + $0x109] sm:$0xff] %v267_v39  ;;  %v755_v43 = vld [vmem:[#allocation6 + $0xd8] sm:$0xff]  ;;  %v268_v44 = vld [vmem:[%s3322_s29 + $0xa8] sm:$0xff]  ;;  %v786_v45 = vld [vmem:[#allocation6 + $0x1d0] sm:$0xff] }
  0x80   : > { %v787_v46 = vld [vmem:[#allocation6 + $0x1d8] sm:$0xff]  ;;  %355 = vst [vmem:[#allocation2 + $0x111] sm:$0xff] %v268_v44  ;;  %v269_v47 = vld [vmem:[%s3322_s29 + $0xb0] sm:$0xff]  ;;  %v2509_v48 = vpack.c.bf16 %v755_v43, %v754_v42  ;;  %v756_v50 = vld [vmem:[#allocation6 + $0xe0] sm:$0xff] }
  0x81   : > { %2498 = vmatpush1.bf16.msra.mxu1 %v2497_v14  ;;  %356 = vst [vmem:[#allocation2 + $0x121] sm:$0xff] %v269_v47  ;;  %v2557_v49 = vpack.c.bf16 %v787_v46, %v786_v45  ;;  %v757_v51 = vld [vmem:[#allocation6 + $0xe8] sm:$0xff]  ;;  %v788_v52 = vld [vmem:[#allocation6 + $0x1e0] sm:$0xff]  ;;  %v270_v55 = vld [vmem:[%s3322_s29 + $0xb8] sm:$0xff] }
  0x82   : > { %2546 = vmatpush1.bf16.msra.mxu0 %v2545_v15  ;;  %2499 = vmatprep.subr.bf16.mxu1 %v4680_v0  ;;  %v789_v53 = vld [vmem:[#allocation6 + $0x1e8] sm:$0xff]  ;;  %v2512_v54 = vpack.c.bf16 %v757_v51, %v756_v50  ;;  %v758_v57 = vld [vmem:[#allocation6 + $0xf0] sm:$0xff]  ;;  %v759_v58 = vld [vmem:[#allocation6 + $0xf8] sm:$0xff]  ;;  %357 = vst [vmem:[#allocation2 + $0x129] sm:$0xff] %v270_v55 }
  0x83   : > { %2547 = vmatprep.subr.bf16.mxu0 %v4680_v0  ;;  %v2560_v56 = vpack.c.bf16 %v789_v53, %v788_v52  ;;  %v790_v59 = vld [vmem:[#allocation6 + $0x1f0] sm:$0xff]  ;;  %v791_v60 = vld [vmem:[#allocation6 + $0x1f8] sm:$0xff]  ;;  %v368_v61 = vld [vmem:[#allocation2 + $0x10] sm:$0x3]  ;;  %v2515_v63 = vpack.c.bf16 %v759_v58, %v758_v57 }
  0x84   : > { %v271_v62 = vld [vmem:[%s3322_s29 + $0xc0] sm:$0xff]  ;;  %v272_v4 = vld [vmem:[%s3322_s29 + $0xc8] sm:$0xff]  ;;  %v2563_v6 = vpack.c.bf16 %v791_v60, %v790_v59  ;;  %v472_v8 = vrot.slane %v368_v61, 1  ;;  %v273_v9 = vld [vmem:[%s3322_s29 + $0xd0] sm:$0xff]  ;;  %v585_v16 = vrot.slane %v368_v61, 2 }
  0x85   : > { %2501 = vmatpush1.bf16.msra.mxu1 %v2500_v20  ;;  %358 = vst [vmem:[#allocation2 + $0x139] sm:$0xff] %v271_v62  ;;  %v792_v7 = vld [vmem:[#allocation6 + $0x200] sm:$0xff]  ;;  %359 = vst [vmem:[#allocation2 + $0x141] sm:$0xff] %v272_v4  ;;  %v793_v10 = vld [vmem:[#allocation6 + $0x208] sm:$0xff] }
  0x86   : > { %2549 = vmatpush1.bf16.msra.mxu0 %v2548_v23  ;;  %2502 = vmatprep.subr.bf16.mxu1 %v4680_v0  ;;  %v3450_v11 = vld [vmem:[#allocation2 + $0x20] sm:$0xff]  ;;  %360 = vst [vmem:[#allocation2 + $0x151] sm:$0xff] %v273_v9  ;;  %v274_v12 = vld [vmem:[%s3322_s29 + $0xd8] sm:$0xff]  ;;  %v824_v13 = vld [vmem:[#allocation6 + $0x300] sm:$0xff]  ;;  %v2566_v17 = vpack.c.bf16 %v793_v10, %v792_v7  ;;  %v473_v18 = vsel %vm468_vm0, %v3336_v2, %v472_v8 }
  0x87   : > { %2550 = vmatprep.subr.bf16.mxu0 %v4680_v0  ;;  %v825_v14 = vld [vmem:[#allocation6 + $0x308] sm:$0xff]  ;;  %361 = vst [vmem:[#allocation2 + $0x159] sm:$0xff] %v274_v12  ;;  %v275_v15 = vld [vmem:[%s3322_s29 + $0xe0] sm:$0xff]  ;;  %v475_v20 = vrot.slane %v3450_v11, 1  ;;  %v794_v21 = vld [vmem:[#allocation6 + $0x210] sm:$0xff]  ;;  %v586_v28 = vsel %vm581_vm1, %v582_v3, %v585_v16  ;;  %v588_v32 = vrot.slane %v3450_v11, 2 }
  0x88   : > { %362 = vst [vmem:[#allocation2 + $0x169] sm:$0xff] %v275_v15  ;;  %v795_v22 = vld [vmem:[#allocation6 + $0x218] sm:$0xff]  ;;  %v3460_v24 = vpack.c.bf16 %v825_v14, %v824_v13  ;;  %v276_v25 = vld [vmem:[%s3322_s29 + $0xe8] sm:$0xff]  ;;  %v826_v26 = vld [vmem:[#allocation6 + $0x310] sm:$0xff] }
  0x89   : > { %2504 = vmatpush1.bf16.msra.mxu1 %v2503_v30  ;;  %v371_v23 = vld [vmem:[#allocation2 + $0x28] sm:$0x3]  ;;  %363 = vst [vmem:[#allocation2 + $0x171] sm:$0xff] %v276_v25  ;;  %v277_v2 = vld [vmem:[%s3322_s29 + $0xf0] sm:$0xff]  ;;  %v2569_v29 = vpack.c.bf16 %v795_v22, %v794_v21  ;;  %v3468_v30 = vsel %vm468_vm0, %v474_v19, %v475_v20  ;;  %v796_v34 = vld [vmem:[#allocation6 + $0x220] sm:$0xff]  ;;  %v3486_v44 = vsel %vm581_vm1, %v587_v31, %v588_v32 }
  0x8a   : > { %2552 = vmatpush1.bf16.msra.mxu0 %v2551_v33  ;;  %2505 = vmatprep.subr.bf16.mxu1 %v4680_v0  ;;  %v827_v27 = vld [vmem:[#allocation6 + $0x318] sm:$0xff]  ;;  %364 = vst [vmem:[#allocation2 + $0x181] sm:$0xff] %v277_v2  ;;  %v477_v33 = vrot.slane %v371_v23, 1  ;;  %v797_v35 = vld [vmem:[#allocation6 + $0x228] sm:$0xff]  ;;  %v3472_v36 = vld [vmem:[#allocation2 + $0x30] sm:$0xff]  ;;  %v590_v42 = vrot.slane %v371_v23, 2 }
  0x8b   : > { %2553 = vmatprep.subr.bf16.mxu0 %v4680_v0  ;;  %v3475_v37 = vld [vmem:[#allocation2 + $0x38] sm:$0xff]  ;;  %v3478_v38 = vpack.c.bf16 %v827_v27, %v826_v26  ;;  %v828_v39 = vld [vmem:[#allocation6 + $0x320] sm:$0xff]  ;;  %v2572_v43 = vpack.c.bf16 %v797_v35, %v796_v34  ;;  %v798_v47 = vld [vmem:[#allocation6 + $0x230] sm:$0xff]  ;;  %v592_v53 = vrot.slane %v3472_v36, 2 }
  0x8c   : > { %v3489_v45 = vsel %vm468_vm0, %v475_v20, %v477_v33  ;;  %v480_v46 = vrot.slane %v3475_v37, 1  ;;  %v830_v51 = vld [vmem:[#allocation6 + $0x330] sm:$0xff]  ;;  %v831_v52 = vld [vmem:[#allocation6 + $0x338] sm:$0xff]  ;;  %v3504_v55 = vsel %vm581_vm1, %v588_v32, %v590_v42  ;;  %v800_v58 = vld [vmem:[#allocation6 + $0x240] sm:$0xff] }
  0x8d   : > { %2507 = vmatpush1.bf16.msra.mxu1 %v2506_v40  ;;  %v829_v40 = vld [vmem:[#allocation6 + $0x328] sm:$0xff]  ;;  %v3510_v60 = vld [vmem:[#allocation2 + $0x48] sm:$0xff]  ;;  %v3512_v61 = vld [vmem:[#allocation2 + $0x50] sm:$0xff]  ;;  %v3516_v62 = vpack.c.bf16 %v831_v52, %v830_v51 }
  0x8e   : > { %2555 = vmatpush1.bf16.msra.mxu0 %v2554_v41  ;;  %2508 = vmatprep.subr.bf16.mxu1 %v4680_v0  ;;  %v278_v41 = vld [vmem:[%s3322_s29 + $0xf8] sm:$0xff]  ;;  %v3495_v50 = vpack.c.bf16 %v829_v40, %v828_v39  ;;  %v801_v59 = vld [vmem:[#allocation6 + $0x248] sm:$0xff]  ;;  %v484_v9 = vrot.slane %v3510_v60, 1  ;;  %v485_v10 = vrot.slane %v3512_v61, 1  ;;  %v802_v12 = vld [vmem:[#allocation6 + $0x250] sm:$0xff] }
  0x8f   : > { %2556 = vmatprep.subr.bf16.mxu0 %v4680_v0  ;;  %365 = vst [vmem:[#allocation2 + $0x189] sm:$0xff] %v278_v41  ;;  %v803_v13 = vld [vmem:[#allocation6 + $0x258] sm:$0xff]  ;;  %v834_v15 = vld [vmem:[#allocation6 + $0x350] sm:$0xff]  ;;  %v804_v26 = vld [vmem:[#allocation6 + $0x260] sm:$0xff] }
  0x90   : > { %v835_v16 = vld [vmem:[#allocation6 + $0x358] sm:$0xff]  ;;  %v3546_v20 = vsel %vm468_vm0, %v484_v9, %v485_v10  ;;  %v3548_v21 = vld [vmem:[#allocation2 + $0x60] sm:$0xff]  ;;  %v2581_v23 = vpack.c.bf16 %v803_v13, %v802_v12  ;;  %v805_v27 = vld [vmem:[#allocation6 + $0x268] sm:$0xff] }
  0x91   : > { %2510 = vmatpush1.bf16.msra.mxu1 %v2509_v48  ;;  %v799_v48 = vld [vmem:[#allocation6 + $0x238] sm:$0xff]  ;;  %v3554_v2 = vpack.c.bf16 %v835_v16, %v834_v15  ;;  %v489_v34 = vrot.slane %v3548_v21, 1  ;;  %v806_v39 = vld [vmem:[#allocation6 + $0x270] sm:$0xff] }
  0x92   : > { %2558 = vmatpush1.bf16.msra.mxu0 %v2557_v49  ;;  %2511 = vmatprep.subr.bf16.mxu1 %v4680_v0  ;;  %v374_v49 = vld [vmem:[#allocation2 + $0x40] sm:$0x3]  ;;  %v3550_v25 = vld [vmem:[#allocation2 + $0x68] sm:$0xff] }
  0x93   : > { %2559 = vmatprep.subr.bf16.mxu0 %v4680_v0  ;;  %v482_v57 = vrot.slane %v374_v49, 1  ;;  %v595_v4 = vrot.slane %v374_v49, 2  ;;  %v490_v35 = vrot.slane %v3550_v25, 1  ;;  %v807_v40 = vld [vmem:[#allocation6 + $0x278] sm:$0xff]  ;;  %v838_v42 = vld [vmem:[#allocation6 + $0x370] sm:$0xff]  ;;  %v603_v49 = vrot.slane %v3550_v25, 2 }
  0x94   : > { %v2587_v52 = vpack.c.bf16 %v807_v40, %v806_v39  ;;  %v383_v9 = vld [vmem:[#allocation2 + $0x88] sm:$0x3]  ;;  %v842_v13 = vld [vmem:[#allocation6 + $0x390] sm:$0xff] }
  0x95   : > { %2513 = vmatpush1.bf16.msra.mxu1 %v2512_v54  ;;  %v2575_v54 = vpack.c.bf16 %v799_v48, %v798_v47  ;;  %v3527_v8 = vsel %vm468_vm0, %v480_v46, %v482_v57  ;;  %v3583_v47 = vsel %vm468_vm0, %v489_v34, %v490_v35  ;;  %v3585_v48 = vld [vmem:[#allocation2 + $0x78] sm:$0xff]  ;;  %v843_v15 = vld [vmem:[#allocation6 + $0x398] sm:$0xff]  ;;  %v844_v34 = vld [vmem:[#allocation6 + $0x3a0] sm:$0xff] }
  0x96   : > { %2561 = vmatpush1.bf16.msra.mxu0 %v2560_v56  ;;  %2514 = vmatprep.subr.bf16.mxu1 %v4680_v0 }
  0x97   : > { %2562 = vmatprep.subr.bf16.mxu0 %v4680_v0 }
  0x99   : > { %2516 = vmatpush1.bf16.msra.mxu1 %v2515_v63  ;;  %v832_v63 = vld [vmem:[#allocation6 + $0x340] sm:$0xff] }
  0x9a   : > { %2564 = vmatpush1.bf16.msra.mxu0 %v2563_v6  ;;  %2693 = vmatprep.subr.bf16.mxu1 %v4680_v0  ;;  %v2578_v6 = vpack.c.bf16 %v801_v59, %v800_v58  ;;  %v840_v58 = vld [vmem:[#allocation6 + $0x380] sm:$0xff]  ;;  %v841_v59 = vld [vmem:[#allocation6 + $0x388] sm:$0xff] }
  0x9b   : > { %2565 = vmatprep.subr.bf16.mxu0 %v4680_v0  ;;  %v3609_v12 = vpack.c.bf16 %v841_v59, %v840_v58 }
  0x9c   : > { %937 = vmatmul.mubr.f32.vlgmr.msra.gmra.mrb[0].mxu1 %v3138_v1 }
  0x9d   : > { %1162 = vmatmul.mubr.f32.vlgmr.msra.gmra.mrb[0].mxu0 %v582_v3  ;;  %941 = vmatprep.mubr.f32.mxu1 %v473_v18  ;;  %v833_v3 = vld [vmem:[#allocation6 + $0x348] sm:$0xff]  ;;  %v598_v18 = vrot.slane %v3512_v61, 2  ;;  %4762 = vst [vmem:[#allocation16_spill] sm:$0xff] %v3609_v12 }
  0x9e   : > { %2567 = vmatpush1.bf16.msra.mxu0 %v2566_v17  ;;  %1166 = vmatprep.mubr.f32.mxu0 %v3450_v11  ;;  %v3533_v14 = vpack.c.bf16 %v833_v3, %v832_v63  ;;  %v597_v17 = vrot.slane %v3510_v60, 2  ;;  %v494_v63 = vrot.slane %v3585_v48, 1 }
  0x9f   : > { %2568 = vmatprep.subr.bf16.mxu0 %v4680_v0  ;;  %2709 = vmatpush1.bf16.msra.mxu1 %v3460_v24 }
  0xa0   : > { %942 = vmatmul.mubr.f32.gmra.mrb[2].mxu1 %v3138_v1  ;;  %2694 = vmatprep.subr.bf16.mxu1 %v4680_v0  ;;  %v479_v1 = vrot.slane %v3472_v36, 1  ;;  %v3561_v31 = vsel %vm581_vm1, %v597_v17, %v598_v18  ;;  %v607_v17 = vrot.slane %v3585_v48, 2 }
  0xa1   : > { %1167 = vmatmul.mubr.f32.gmra.mrb[2].mxu0 %v586_v28  ;;  %946 = vmatprep.mubr.f32.mxu1 %v3468_v30  ;;  %v836_v28 = vld [vmem:[#allocation6 + $0x360] sm:$0xff] }
  0xa2   : > { %1171 = vmatprep.mubr.f32.mxu0 %v3472_v36  ;;  %2570 = vmatpush1.bf16.msra.mxu0 %v2569_v29  ;;  %v3507_v56 = vsel %vm468_vm0, %v479_v1, %v480_v46  ;;  %v837_v29 = vld [vmem:[#allocation6 + $0x368] sm:$0xff]  ;;  %v602_v46 = vrot.slane %v3548_v21, 2 }
  0xa3   : > { %2571 = vmatprep.subr.bf16.mxu0 %v4680_v0  ;;  %2710 = vmatpush1.bf16.msra.mxu1 %v3478_v38  ;;  %v3571_v41 = vpack.c.bf16 %v837_v29, %v836_v28  ;;  %v812_v28 = vld [vmem:[#allocation6 + $0x2a0] sm:$0xff]  ;;  %v813_v29 = vld [vmem:[#allocation6 + $0x2a8] sm:$0xff] }
  0xa4   : > { %947 = vmatmul.mubr.f32.gmra.mrb[4].mxu1 %v3414_v5  ;;  %2695 = vmatprep.subr.bf16.mxu1 %v4680_v0  ;;  %v593_v5 = vrot.slane %v3475_v37, 2  ;;  %v3601_v3 = vsel %vm581_vm1, %v602_v46, %v603_v49  ;;  %v814_v46 = vld [vmem:[#allocation6 + $0x2b0] sm:$0xff] }
  0xa5   : > { %1172 = vmatmul.mubr.f32.gmra.mrb[4].mxu0 %v3486_v44  ;;  %951 = vmatprep.mubr.f32.mxu1 %v3489_v45 }
  0xa6   : > { %1176 = vmatprep.mubr.f32.mxu0 %v3475_v37  ;;  %2573 = vmatpush1.bf16.msra.mxu0 %v2572_v43  ;;  %v3524_v7 = vsel %vm581_vm1, %v592_v53, %v593_v5  ;;  %v3543_v19 = vsel %vm581_vm1, %v593_v5, %v595_v4  ;;  %v839_v43 = vld [vmem:[#allocation6 + $0x378] sm:$0xff]  ;;  %v3588_v53 = vld [vmem:[#allocation2 + $0x80] sm:$0xff]  ;;  %v809_v5 = vld [vmem:[#allocation6 + $0x288] sm:$0xff] }
  0xa7   : > { %2574 = vmatprep.subr.bf16.mxu0 %v4680_v0  ;;  %2711 = vmatpush1.bf16.msra.mxu1 %v3495_v50  ;;  %v3592_v57 = vpack.c.bf16 %v839_v43, %v838_v42  ;;  %v2596_v42 = vpack.c.bf16 %v813_v29, %v812_v28  ;;  %v386_v43 = vld [vmem:[#allocation2 + $0xa0] sm:$0x3]  ;;  %v389_v29 = vld [vmem:[#allocation2 + $0xb8] sm:$0x3] }
  0xa8   : > { %952 = vmatmul.mubr.f32.gmra.mrb[6].mxu1 %v3450_v11  ;;  %2696 = vmatprep.subr.bf16.mxu1 %v4680_v0  ;;  %v377_v11 = vld [vmem:[#allocation2 + $0x58] sm:$0x3] }
  0xa9   : > { %1177 = vmatmul.mubr.f32.gmra.mrb[6].mxu0 %v3504_v55  ;;  %956 = vmatprep.mubr.f32.mxu1 %v3507_v56  ;;  %v487_v22 = vrot.slane %v377_v11, 1  ;;  %v600_v32 = vrot.slane %v377_v11, 2  ;;  %v811_v11 = vld [vmem:[#allocation6 + $0x298] sm:$0xff] }
  0xaa   : > { %1181 = vmatprep.mubr.f32.mxu0 %v3510_v60  ;;  %2576 = vmatpush1.bf16.msra.mxu0 %v2575_v54  ;;  %v808_v54 = vld [vmem:[#allocation6 + $0x280] sm:$0xff] }
  0xab   : > { %2577 = vmatprep.subr.bf16.mxu0 %v4680_v0  ;;  %2712 = vmatpush1.bf16.msra.mxu1 %v3516_v62  ;;  %v3565_v33 = vsel %vm468_vm0, %v485_v10, %v487_v22  ;;  %v3578_v1 = vsel %vm581_vm1, %v598_v18, %v600_v32  ;;  %v810_v10 = vld [vmem:[#allocation6 + $0x290] sm:$0xff]  ;;  %v3623_v22 = vld [vmem:[#allocation2 + $0x90] sm:$0xff]  ;;  %v3630_v32 = vpack.c.bf16 %v843_v15, %v842_v13  ;;  %v849_v15 = vld [vmem:[#allocation6 + $0x3c8] sm:$0xff] }
  0xac   : > { %957 = vmatmul.mubr.f32.gmra.mrb[8].mxu1 %v3472_v36  ;;  %2697 = vmatprep.subr.bf16.mxu1 %v4680_v0  ;;  %v2584_v36 = vpack.c.bf16 %v805_v27, %v804_v26  ;;  %v2593_v26 = vpack.c.bf16 %v811_v11, %v810_v10  ;;  %v3626_v27 = vld [vmem:[#allocation2 + $0x98] sm:$0xff]  ;;  %v848_v13 = vld [vmem:[#allocation6 + $0x3c0] sm:$0xff] }
  0xad   : > { %1182 = vmatmul.mubr.f32.gmra.mrb[8].mxu0 %v3524_v7  ;;  %961 = vmatprep.mubr.f32.mxu1 %v3527_v8  ;;  %4763 = vst [vmem:[#allocation17_spill] sm:$0xff] %v3630_v32  ;;  %v613_v58 = vrot.slane %v3626_v27, 2  ;;  %v817_v10 = vld [vmem:[#allocation6 + $0x2c8] sm:$0xff] }
  0xae   : > { %1186 = vmatprep.mubr.f32.mxu0 %v3512_v61  ;;  %2579 = vmatpush1.bf16.msra.mxu0 %v2578_v6  ;;  %v2590_v6 = vpack.c.bf16 %v809_v5, %v808_v54  ;;  %v847_v54 = vld [vmem:[#allocation6 + $0x3b8] sm:$0xff]  ;;  %v612_v5 = vrot.slane %v3623_v22, 2 }
  0xaf   : > { %2580 = vmatprep.subr.bf16.mxu0 %v4680_v0  ;;  %2713 = vmatpush1.bf16.msra.mxu1 %v3533_v14 }
  0xb0   : > { %962 = vmatmul.mubr.f32.gmra.mrb[10].mxu1 %v3475_v37  ;;  %2698 = vmatprep.subr.bf16.mxu1 %v4680_v0  ;;  %v380_v37 = vld [vmem:[#allocation2 + $0x70] sm:$0x3] }
  0xb1   : > { %1187 = vmatmul.mubr.f32.gmra.mrb[10].mxu0 %v3543_v19  ;;  %966 = vmatprep.mubr.f32.mxu1 %v3546_v20  ;;  %v492_v51 = vrot.slane %v380_v37, 1 }
  0xb2   : > { %1191 = vmatprep.mubr.f32.mxu0 %v3548_v21  ;;  %2582 = vmatpush1.bf16.msra.mxu0 %v2581_v23  ;;  %v497_v23 = vrot.slane %v383_v9, 1 }
  0xb3   : > { %2583 = vmatprep.subr.bf16.mxu0 %v4680_v0  ;;  %2714 = vmatpush1.bf16.msra.mxu1 %v3554_v2  ;;  %v3604_v4 = vsel %vm468_vm0, %v490_v35, %v492_v51  ;;  %v845_v35 = vld [vmem:[#allocation6 + $0x3a8] sm:$0xff] }
  0xb4   : > { %967 = vmatmul.mubr.f32.gmra.mrb[12].mxu1 %v3510_v60  ;;  %2699 = vmatprep.subr.bf16.mxu1 %v4680_v0  ;;  %v605_v60 = vrot.slane %v380_v37, 2  ;;  %v499_v37 = vrot.slane %v3623_v22, 1  ;;  %v3647_v51 = vpack.c.bf16 %v845_v35, %v844_v34  ;;  %v818_v34 = vld [vmem:[#allocation6 + $0x2d0] sm:$0xff]  ;;  %v819_v35 = vld [vmem:[#allocation6 + $0x2d8] sm:$0xff] }
  0xb5   : > { %1192 = vmatmul.mubr.f32.gmra.mrb[12].mxu0 %v3561_v31  ;;  %971 = vmatprep.mubr.f32.mxu1 %v3565_v33 }
  0xb6   : > { %1196 = vmatprep.mubr.f32.mxu0 %v3550_v25  ;;  %2585 = vmatpush1.bf16.msra.mxu0 %v2584_v36  ;;  %v3616_v16 = vsel %vm581_vm1, %v603_v49, %v605_v60  ;;  %v610_v36 = vrot.slane %v383_v9, 2  ;;  %v815_v49 = vld [vmem:[#allocation6 + $0x2b8] sm:$0xff]  ;;  %4765 = vst [vmem:[#allocation19_spill] sm:$0xff] %v3647_v51  ;;  %v816_v9 = vld [vmem:[#allocation6 + $0x2c0] sm:$0xff] }
  0xb7   : > { %2586 = vmatprep.subr.bf16.mxu0 %v4680_v0  ;;  %2715 = vmatpush1.bf16.msra.mxu1 %v3571_v41  ;;  %v2602_v28 = vpack.c.bf16 %v817_v10, %v816_v9  ;;  %v852_v10 = vld [vmem:[#allocation6 + $0x3e0] sm:$0xff] }
  0xb8   : > { %972 = vmatmul.mubr.f32.gmra.mrb[14].mxu1 %v3512_v61  ;;  %2700 = vmatprep.subr.bf16.mxu1 %v4680_v0  ;;  %v495_v61 = vrot.slane %v3588_v53, 1 }
  0xb9   : > { %1197 = vmatmul.mubr.f32.gmra.mrb[14].mxu0 %v3578_v1  ;;  %976 = vmatprep.mubr.f32.mxu1 %v3583_v47 }
  0xba   : > { %1201 = vmatprep.mubr.f32.mxu0 %v3585_v48  ;;  %2588 = vmatpush1.bf16.msra.mxu0 %v2587_v52  ;;  %v3621_v18 = vsel %vm468_vm0, %v494_v63, %v495_v61  ;;  %v3642_v40 = vsel %vm468_vm0, %v495_v61, %v497_v23  ;;  %v846_v52 = vld [vmem:[#allocation6 + $0x3b0] sm:$0xff]  ;;  %v502_v63 = vrot.slane %v386_v43, 1  ;;  %v2599_v61 = vpack.c.bf16 %v815_v49, %v814_v46 }
  0xbb   : > { %2589 = vmatprep.subr.bf16.mxu0 %v4680_v0  ;;  %2716 = vmatpush1.bf16.msra.mxu1 %v3592_v57  ;;  %4764 = vst [vmem:[#allocation18_spill] sm:$0xff] %v3642_v40  ;;  %v3668_v11 = vpack.c.bf16 %v847_v54, %v846_v52  ;;  %v3699_v49 = vld [vmem:[#allocation2 + $0xc0] sm:$0xff]  ;;  %v507_v54 = vrot.slane %v389_v29, 1 }
  0xbc   : > { %977 = vmatmul.mubr.f32.gmra.mrb[16].mxu1 %v3548_v21  ;;  %2701 = vmatprep.subr.bf16.mxu1 %v4680_v0  ;;  %v608_v21 = vrot.slane %v3588_v53, 2 }
  0xbd   : > { %1202 = vmatmul.mubr.f32.gmra.mrb[16].mxu0 %v3601_v3  ;;  %981 = vmatprep.mubr.f32.mxu1 %v3604_v4  ;;  %4767 = vst [vmem:[#allocation21_spill] sm:$0xff] %v3668_v11 }
  0xbe   : > { %1206 = vmatprep.mubr.f32.mxu0 %v3588_v53  ;;  %2591 = vmatpush1.bf16.msra.mxu0 %v2590_v6  ;;  %v3639_v39 = vsel %vm581_vm1, %v607_v17, %v608_v21  ;;  %v3657_v59 = vsel %vm581_vm1, %v608_v21, %v610_v36  ;;  %v3664_v6 = vld [vmem:[#allocation2 + $0xb0] sm:$0xff]  ;;  %v3675_v17 = vsel %vm581_vm1, %v612_v5, %v613_v58  ;;  %v615_v21 = vrot.slane %v386_v43, 2 }
  0xbf   : > { %2592 = vmatprep.subr.bf16.mxu0 %v4680_v0  ;;  %2717 = vmatpush1.bf16.msra.mxu1 %v3609_v12  ;;  %4766 = vst [vmem:[#allocation20_spill] sm:$0xff] %v3657_v59  ;;  %4768 = vst [vmem:[#allocation22_spill] sm:$0xff] %v3675_v17  ;;  %v3685_v36 = vpack.c.bf16 %v849_v15, %v848_v13  ;;  %v618_v52 = vrot.slane %v3664_v6, 2  ;;  %v2605_v5 = vpack.c.bf16 %v819_v35, %v818_v34  ;;  %v853_v13 = vld [vmem:[#allocation6 + $0x3e8] sm:$0xff]  ;;  %v3834_v12 = vld [vmem:[#allocation2 + $0x128] sm:$0xff] }
  0xc0   : > { %982 = vmatmul.mubr.f32.gmra.mrb[18].mxu1 %v3550_v25  ;;  %2702 = vmatprep.subr.bf16.mxu1 %v4680_v0  ;;  %v500_v25 = vrot.slane %v3626_v27, 1  ;;  %v620_v15 = vrot.slane %v389_v29, 2  ;;  %v822_v29 = vld [vmem:[#allocation6 + $0x2f0] sm:$0xff]  ;;  %4789 = vst [vmem:[#allocation42_spill] sm:$0xff] %v3834_v12 }
  0xc1   : > { %1207 = vmatmul.mubr.f32.gmra.mrb[18].mxu0 %v3616_v16  ;;  %986 = vmatprep.mubr.f32.mxu1 %v3621_v18  ;;  %4769 = vst [vmem:[#allocation23_spill] sm:$0xff] %v3685_v36 }
  0xc2   : > { %1211 = vmatprep.mubr.f32.mxu0 %v3623_v22  ;;  %2594 = vmatpush1.bf16.msra.mxu0 %v2593_v26  ;;  %v3660_v60 = vsel %vm468_vm0, %v499_v37, %v500_v25  ;;  %v3679_v23 = vsel %vm468_vm0, %v500_v25, %v502_v63  ;;  %v850_v37 = vld [vmem:[#allocation6 + $0x3d0] sm:$0xff]  ;;  %v851_v25 = vld [vmem:[#allocation6 + $0x3d8] sm:$0xff] }
  0xc3   : > { %2595 = vmatprep.subr.bf16.mxu0 %v4680_v0  ;;  %2718 = vmatpush1.bf16.msra.mxu1 %v3630_v32  ;;  %v3702_v63 = vld [vmem:[#allocation2 + $0xc8] sm:$0xff]  ;;  %v3706_v9 = vpack.c.bf16 %v851_v25, %v850_v37  ;;  %v392_v37 = vld [vmem:[#allocation2 + $0xd0] sm:$0x3] }
  0xc4   : > { %987 = vmatmul.mubr.f32.gmra.mrb[20].mxu1 %v3585_v48  ;;  %2703 = vmatprep.subr.bf16.mxu1 %v4680_v0  ;;  %v3662_v48 = vld [vmem:[#allocation2 + $0xa8] sm:$0xff]  ;;  %v510_v34 = vrot.slane %v3702_v63, 1 }
  0xc5   : > { %1212 = vmatmul.mubr.f32.gmra.mrb[20].mxu0 %v3639_v39  ;;  %991 = vmatprep.mubr.f32.mxu1 %v3642_v40  ;;  %v504_v26 = vrot.slane %v3662_v48, 1  ;;  %v617_v43 = vrot.slane %v3662_v48, 2  ;;  %4771 = vst [vmem:[#allocation25_spill] sm:$0xff] %v3706_v9  ;;  %v823_v25 = vld [vmem:[#allocation6 + $0x2f8] sm:$0xff]  ;;  %v3832_v40 = vld [vmem:[#allocation2 + $0x120] sm:$0xff] }
  0xc6   : > { %1216 = vmatprep.mubr.f32.mxu0 %v3626_v27  ;;  %2597 = vmatpush1.bf16.msra.mxu0 %v2596_v42  ;;  %v3692_v42 = vsel %vm581_vm1, %v613_v58, %v615_v21  ;;  %v820_v58 = vld [vmem:[#allocation6 + $0x2e0] sm:$0xff]  ;;  %v509_v21 = vrot.slane %v3699_v49, 1  ;;  %4788 = vst [vmem:[#allocation41_spill] sm:$0xff] %v3832_v40 }
  0xc7   : > { %2598 = vmatprep.subr.bf16.mxu0 %v4680_v0  ;;  %2719 = vmatpush1.bf16.msra.mxu1 %v3647_v51  ;;  %4770 = vst [vmem:[#allocation24_spill] sm:$0xff] %v3692_v42  ;;  %v3804_v51 = vld [vmem:[#allocation2 + $0x108] sm:$0xff] }
  0xc8   : > { %992 = vmatmul.mubr.f32.gmra.mrb[22].mxu1 %v3588_v53  ;;  %2704 = vmatprep.subr.bf16.mxu1 %v4680_v0  ;;  %v505_v53 = vrot.slane %v3664_v6, 1  ;;  %4782 = vst [vmem:[#allocation35_spill] sm:$0xff] %v3804_v51 }
  0xc9   : > { %1217 = vmatmul.mubr.f32.gmra.mrb[22].mxu0 %v3657_v59  ;;  %996 = vmatprep.mubr.f32.mxu1 %v3660_v60  ;;  %v530_v59 = vrot.slane %v3834_v12, 1 }
  0xca   : > { %1221 = vmatprep.mubr.f32.mxu0 %v3662_v48  ;;  %2600 = vmatpush1.bf16.msra.mxu0 %v2599_v61  ;;  %v3697_v46 = vsel %vm468_vm0, %v504_v26, %v505_v53  ;;  %v821_v61 = vld [vmem:[#allocation6 + $0x2e8] sm:$0xff]  ;;  %v3715_v26 = vsel %vm581_vm1, %v617_v43, %v618_v52  ;;  %v854_v43 = vld [vmem:[#allocation6 + $0x3f0] sm:$0xff] }
  0xcb   : > { %2601 = vmatprep.subr.bf16.mxu0 %v4680_v0  ;;  %2720 = vmatpush1.bf16.msra.mxu1 %v3668_v11  ;;  %4772 = vst [vmem:[#allocation26_spill] sm:$0xff] %v3715_v26  ;;  %v2608_v35 = vpack.c.bf16 %v821_v61, %v820_v58  ;;  %v856_v58 = vld [vmem:[#allocation6 + $0x400] sm:$0xff]  ;;  %v857_v61 = vld [vmem:[#allocation6 + $0x408] sm:$0xff] }
  0xcc   : > { %997 = vmatmul.mubr.f32.gmra.mrb[24].mxu1 %v3623_v22  ;;  %2705 = vmatprep.subr.bf16.mxu1 %v4680_v0  ;;  %v3738_v11 = vld [vmem:[#allocation2 + $0xd8] sm:$0xff] }
  0xcd   : > { %1222 = vmatmul.mubr.f32.gmra.mrb[24].mxu0 %v3675_v17  ;;  %1001 = vmatprep.mubr.f32.mxu1 %v3679_v23  ;;  %v401_v17 = vld [vmem:[#allocation2 + $0x118] sm:$0x3] }
  0xce   : > { %1226 = vmatprep.mubr.f32.mxu0 %v3664_v6  ;;  %2603 = vmatpush1.bf16.msra.mxu0 %v2602_v28  ;;  %v3718_v28 = vsel %vm468_vm0, %v505_v53, %v507_v54  ;;  %v855_v53 = vld [vmem:[#allocation6 + $0x3f8] sm:$0xff]  ;;  %v3730_v54 = vsel %vm581_vm1, %v618_v52, %v620_v15  ;;  %v4775_v52 = vmov 0.0|0.0  }
  0xcf   : > { %2604 = vmatprep.subr.bf16.mxu0 %v4680_v0  ;;  %2721 = vmatpush1.bf16.msra.mxu1 %v3685_v36  ;;  %v3723_v36 = vpack.c.bf16 %v853_v13, %v852_v10  ;;  %4774 = vst [vmem:[#allocation28_spill] sm:$0xff] %v3730_v54  ;;  %v3735_v10 = vsel %vm468_vm0, %v509_v21, %v510_v34  ;;  %v623_v13 = vrot.slane %v3702_v63, 2 }
  0xd0   : > { %1002 = vmatmul.mubr.f32.gmra.mrb[26].mxu1 %v3626_v27  ;;  %2706 = vmatprep.subr.bf16.mxu1 %v4680_v0  ;;  %v3744_v15 = vpack.c.bf16 %v855_v53, %v854_v43  ;;  %v3748_v21 = vpack.c.bf16 %v857_v61, %v856_v58  ;;  %v514_v43 = vrot.slane %v3738_v11, 1  ;;  %v395_v58 = vld [vmem:[#allocation2 + $0xe8] sm:$0x3]  ;;  %v3776_v61 = vld [vmem:[#allocation2 + $0xf0] sm:$0xff] }
  0xd1   : > { %1227 = vmatmul.mubr.f32.gmra.mrb[26].mxu0 %v3692_v42  ;;  %1006 = vmatprep.mubr.f32.mxu1 %v3697_v46  ;;  %4773 = vst [vmem:[#allocation27_spill] sm:$0xff] %v3723_v36  ;;  %v3806_v42 = vld [vmem:[#allocation2 + $0x110] sm:$0xff] }
  0xd2   : > { %1231 = vmatprep.mubr.f32.mxu0 %v3699_v49  ;;  %2606 = vmatpush1.bf16.msra.mxu0 %v2605_v5  ;;  %v622_v5 = vrot.slane %v3699_v49, 2  ;;  %4776 = vst [vmem:[#allocation29_spill] sm:$0xff] %v3744_v15  ;;  %4783 = vst [vmem:[#allocation36_spill] sm:$0xff] %v3806_v42  ;;  %v525_v32 = vrot.slane %v3806_v42, 1 }
  0xd3   : > { %2607 = vmatprep.subr.bf16.mxu0 %v4680_v0  ;;  %2722 = vmatpush1.bf16.msra.mxu1 %v3706_v9  ;;  %v2611_v9 = vpack.c.bf16 %v823_v25, %v822_v29 }
  0xd4   : > { %1007 = vmatmul.mubr.f32.gmra.mrb[28].mxu1 %v3662_v48  ;;  %2707 = vmatprep.subr.bf16.mxu1 %v4680_v0  ;;  %v512_v0 = vrot.slane %v392_v37, 1  ;;  %v3754_v29 = vsel %vm581_vm1, %v622_v5, %v623_v13  ;;  %v517_v5 = vrot.slane %v395_v58, 1 }
  0xd5   : > { %1232 = vmatmul.mubr.f32.gmra.mrb[28].mxu0 %v3715_v26  ;;  %1011 = vmatprep.mubr.f32.mxu1 %v3718_v28  ;;  %v3740_v26 = vld [vmem:[#allocation2 + $0xe0] sm:$0xff]  ;;  %4777 = vst [vmem:[#allocation30_spill] sm:$0xff] %v3754_v29 }
  0xd6   : > { %1236 = vmatprep.mubr.f32.mxu0 %v3702_v63  ;;  %2609 = vmatpush1.bf16.msra.mxu0 %v2608_v35  ;;  %v625_v35 = vrot.slane %v392_v37, 2  ;;  %v3757_v25 = vsel %vm468_vm0, %v510_v34, %v512_v0  ;;  %v515_v53 = vrot.slane %v3740_v26, 1  ;;  %v627_v0 = vrot.slane %v3738_v11, 2 }
  0xd7   : > { %2610 = vmatprep.subr.bf16.mxu0 %v4775_v52  ;;  %2723 = vmatpush1.bf16.msra.mxu1 %v3723_v36  ;;  %v628_v34 = vrot.slane %v3740_v26, 2 }
  0xd8   : > { %1012 = vmatmul.mubr.f32.gmra.mrb[30].mxu1 %v3664_v6  ;;  %2708 = vmatprep.subr.bf16.mxu1 %v4775_v52  ;;  %v3774_v37 = vsel %vm468_vm0, %v514_v43, %v515_v53  ;;  %v519_v43 = vrot.slane %v3776_v61, 1 }
  0xd9   : > { %1237 = vmatmul.mubr.f32.gmra.mrb[30].mxu0 %v3730_v54  ;;  %1016 = vmatprep.mubr.f32.mxu1 %v3735_v10  ;;  %v3784_v36 = vsel %vm581_vm1, %v627_v0, %v628_v34  ;;  %v398_v54 = vld [vmem:[#allocation2 + $0x100] sm:$0x3]  ;;  %v632_v0 = vrot.slane %v3776_v61, 2 }
  0xda   : > { %1241 = vmatprep.mubr.f32.mxu0 %v3738_v11  ;;  %2612 = vmatpush1.bf16.msra.mxu0 %v2611_v9  ;;  %v3771_v9 = vsel %vm581_vm1, %v623_v13, %v625_v35  ;;  %4780 = vst [vmem:[#allocation33_spill] sm:$0xff] %v3784_v36  ;;  %v3788_v13 = vsel %vm468_vm0, %v515_v53, %v517_v5  ;;  %v630_v35 = vrot.slane %v395_v58, 2  ;;  %v522_v5 = vrot.slane %v398_v54, 1 }
  0xdb   : > { %2724 = vmatpush1.bf16.msra.mxu1 %v3744_v15  ;;  %2613 = vmatprep.subr.bf16.mxu0 %v4775_v52  ;;  %4778 = vst [vmem:[#allocation31_spill] sm:$0xff] %v3771_v9  ;;  %v3778_v15 = vld [vmem:[#allocation2 + $0xf8] sm:$0xff] }
  0xdc   : > { %1017 = vmatmul.mubr.f32.gmra.mrb[32].mxu1 %v3699_v49  ;;  %2662 = vmatprep.subr.bf16.mxu1 %v3748_v21  ;;  %4779 = vst [vmem:[#allocation32_spill] sm:$0xff] %v3778_v15  ;;  %v633_v58 = vrot.slane %v3778_v15, 2 }
  0xdd   : > { %1242 = vmatmul.mubr.f32.gmra.mrb[32].mxu0 %v3754_v29  ;;  %1021 = vmatprep.mubr.f32.mxu1 %v3757_v25  ;;  %v520_v29 = vrot.slane %v3778_v15, 1 }
  0xde   : > { %1246 = vmatprep.mubr.f32.mxu0 %v3740_v26 }
  0xdf   : > { %v3801_v53 = vsel %vm468_vm0, %v519_v43, %v520_v29  ;;  %v524_v43 = vrot.slane %v3804_v51, 1 }
  0xe0   : > { %1022 = vmatmul.mubr.f32.gmra.mrb[34].mxu1 %v3702_v63 }
  0xe1   : > { %1247 = vmatmul.mubr.f32.gmra.mrb[34].mxu0 %v3771_v9  ;;  %1026 = vmatprep.mubr.f32.mxu1 %v3774_v37  ;;  %v3798_v9 = vsel %vm581_vm1, %v628_v34, %v630_v35  ;;  %v3813_v34 = vsel %vm581_vm1, %v632_v0, %v633_v58  ;;  %v3816_v35 = vsel %vm468_vm0, %v520_v29, %v522_v5  ;;  %v637_v29 = vrot.slane %v3804_v51, 2 }
  0xe2   : > { %1251 = vmatprep.mubr.f32.mxu0 %v3776_v61  ;;  %4781 = vst [vmem:[#allocation34_spill] sm:$0xff] %v3798_v9  ;;  %4784 = vst [vmem:[#allocation37_spill] sm:$0xff] %v3813_v34  ;;  %v3828_v0 = vsel %vm468_vm0, %v524_v43, %v525_v32  ;;  %v638_v5 = vrot.slane %v3806_v42, 2 }
  0xe3   : > { %4785 = vst [vmem:[#allocation38_spill] sm:$0xff] %v3816_v35  ;;  %4787 = vst [vmem:[#allocation40_spill] sm:$0xff] %v3828_v0 }
  0xe4   : > { %1027 = vmatmul.mubr.f32.gmra.mrb[36].mxu1 %v3738_v11 }
  0xe5   : > { %1252 = vmatmul.mubr.f32.gmra.mrb[36].mxu0 %v3784_v36  ;;  %1031 = vmatprep.mubr.f32.mxu1 %v3788_v13  ;;  %v635_v36 = vrot.slane %v398_v54, 2 }
  0xe6   : > { %1256 = vmatprep.mubr.f32.mxu0 %v3778_v15 }
  0xe7   : > { %v3824_v54 = vsel %vm581_vm1, %v633_v58, %v635_v36  ;;  %v640_v36 = vrot.slane %v401_v17, 2  ;;  %v3841_v58 = vsel %vm581_vm1, %v637_v29, %v638_v5 }
  0xe8   : > { %1032 = vmatmul.mubr.f32.gmra.mrb[38].mxu1 %v3740_v26  ;;  %4786 = vst [vmem:[#allocation39_spill] sm:$0xff] %v3824_v54  ;;  %4790 = vst [vmem:[#allocation43_spill] sm:$0xff] %v3841_v58 }
  0xe9   : > { %1257 = vmatmul.mubr.f32.gmra.mrb[38].mxu0 %v3798_v9  ;;  %1036 = vmatprep.mubr.f32.mxu1 %v3801_v53  ;;  %v527_v9 = vrot.slane %v401_v17, 1  ;;  %v642_v17 = vrot.slane %v3832_v40, 2  ;;  %v3854_v29 = vsel %vm581_vm1, %v638_v5, %v640_v36 }
  0xea   : > { %1261 = vmatprep.mubr.f32.mxu0 %v3804_v51  ;;  %4792 = vst [vmem:[#allocation45_spill] sm:$0xff] %v3854_v29 }
  0xeb   : > { %v3844_v43 = vsel %vm468_vm0, %v525_v32, %v527_v9  ;;  %v643_v9 = vrot.slane %v3834_v12, 2 }
  0xec   : > { %1037 = vmatmul.mubr.f32.gmra.mrb[40].mxu1 %v3776_v61  ;;  %4791 = vst [vmem:[#allocation44_spill] sm:$0xff] %v3844_v43 }
  0xed   : > { %1262 = vmatmul.mubr.f32.gmra.mrb[40].mxu0 %v3813_v34  ;;  %1041 = vmatprep.mubr.f32.mxu1 %v3816_v35  ;;  %v529_v34 = vrot.slane %v3832_v40, 1  ;;  %v404_v35 = vld [vmem:[#allocation2 + $0x130] sm:$0x3]  ;;  %v3869_v5 = vsel %vm581_vm1, %v642_v17, %v643_v9 }
  0xee   : > { %1266 = vmatprep.mubr.f32.mxu0 %v3806_v42  ;;  %4795 = vst [vmem:[#allocation48_spill] sm:$0xff] %v3869_v5 }
  0xef   : > { %v3857_v32 = vsel %vm468_vm0, %v529_v34, %v530_v59 }
  0xf0   : > { %1042 = vmatmul.mubr.f32.gmra.mrb[42].mxu1 %v3778_v15  ;;  %4793 = vst [vmem:[#allocation46_spill] sm:$0xff] %v3857_v32  ;;  %v407_v15 = vld [vmem:[#allocation2 + $0x148] sm:$0x3] }
  0xf1   : > { %1267 = vmatmul.mubr.f32.gmra.mrb[42].mxu0 %v3824_v54  ;;  %1046 = vmatprep.mubr.f32.mxu1 %v3828_v0  ;;  %v532_v54 = vrot.slane %v404_v35, 1  ;;  %v3860_v0 = vld [vmem:[#allocation2 + $0x138] sm:$0xff] }
  0xf2   : > { %1271 = vmatprep.mubr.f32.mxu0 %v3832_v40  ;;  %4794 = vst [vmem:[#allocation47_spill] sm:$0xff] %v3860_v0  ;;  %v534_v36 = vrot.slane %v3860_v0, 1 }
  0xf3   : > { %v3872_v34 = vsel %vm468_vm0, %v530_v59, %v532_v54  ;;  %v647_v59 = vrot.slane %v3860_v0, 2 }
  0xf4   : > { %1047 = vmatmul.mubr.f32.gmra.mrb[44].mxu1 %v3804_v51  ;;  %v3862_v51 = vld [vmem:[#allocation2 + $0x140] sm:$0xff]  ;;  %4796 = vst [vmem:[#allocation49_spill] sm:$0xff] %v3872_v34 }
  0xf5   : > { %1272 = vmatmul.mubr.f32.gmra.mrb[44].mxu0 %v3841_v58  ;;  %1051 = vmatprep.mubr.f32.mxu1 %v3844_v43  ;;  %v645_v58 = vrot.slane %v404_v35, 2  ;;  %v535_v43 = vrot.slane %v3862_v51, 1  ;;  %v648_v54 = vrot.slane %v3862_v51, 2 }
  0xf6   : > { %1276 = vmatprep.mubr.f32.mxu0 %v3834_v12 }
  0xf7   : > { %v3880_v35 = vsel %vm581_vm1, %v643_v9, %v645_v58  ;;  %v3884_v17 = vsel %vm468_vm0, %v534_v36, %v535_v43  ;;  %v650_v58 = vrot.slane %v407_v15, 2  ;;  %v3897_v9 = vsel %vm581_vm1, %v647_v59, %v648_v54 }
  0xf8   : > { %1052 = vmatmul.mubr.f32.gmra.mrb[46].mxu1 %v3806_v42  ;;  %4797 = vst [vmem:[#allocation50_spill] sm:$0xff] %v3880_v35  ;;  %4798 = vst [vmem:[#allocation51_spill] sm:$0xff] %v3884_v17  ;;  %v410_v42 = vld [vmem:[#allocation2 + $0x160] sm:$0x3] }
  0xf9   : > { %1277 = vmatmul.mubr.f32.gmra.mrb[46].mxu0 %v3854_v29  ;;  %1056 = vmatprep.mubr.f32.mxu1 %v3857_v32  ;;  %v537_v29 = vrot.slane %v407_v15, 1  ;;  %v3888_v32 = vld [vmem:[#allocation2 + $0x150] sm:$0xff]  ;;  %4799 = vst [vmem:[#allocation52_spill] sm:$0xff] %v3897_v9  ;;  %v3910_v59 = vsel %vm581_vm1, %v648_v54, %v650_v58 }
  0xfa   : > { %1281 = vmatprep.mubr.f32.mxu0 %v3860_v0  ;;  %v652_v15 = vrot.slane %v3888_v32, 2  ;;  %4801 = vst [vmem:[#allocation54_spill] sm:$0xff] %v3910_v59 }
  0xfb   : > { %v3900_v36 = vsel %vm468_vm0, %v535_v43, %v537_v29 }
  0xfc   : > { %1057 = vmatmul.mubr.f32.gmra.mrb[48].mxu1 %v3832_v40  ;;  %v3890_v40 = vld [vmem:[#allocation2 + $0x158] sm:$0xff]  ;;  %4800 = vst [vmem:[#allocation53_spill] sm:$0xff] %v3900_v36 }
  0xfd   : > { %1282 = vmatmul.mubr.f32.gmra.mrb[48].mxu0 %v3869_v5  ;;  %1061 = vmatprep.mubr.f32.mxu1 %v3872_v34  ;;  %v539_v5 = vrot.slane %v3888_v32, 1  ;;  %v540_v34 = vrot.slane %v3890_v40, 1  ;;  %v653_v29 = vrot.slane %v3890_v40, 2 }
  0xfe   : > { %1286 = vmatprep.mubr.f32.mxu0 %v3862_v51 }
  0xff   : > { %v3913_v43 = vsel %vm468_vm0, %v539_v5, %v540_v34  ;;  %v3925_v54 = vsel %vm581_vm1, %v652_v15, %v653_v29 }
 0x100   : > { %1062 = vmatmul.mubr.f32.gmra.mrb[50].mxu1 %v3834_v12  ;;  %4802 = vst [vmem:[#allocation55_spill] sm:$0xff] %v3913_v43  ;;  %4803 = vst [vmem:[#allocation56_spill] sm:$0xff] %v3925_v54  ;;  %v413_v12 = vld [vmem:[#allocation2 + $0x178] sm:$0x3] }
 0x101   : > { %1287 = vmatmul.mubr.f32.gmra.mrb[50].mxu0 %v3880_v35  ;;  %1066 = vmatprep.mubr.f32.mxu1 %v3884_v17  ;;  %v542_v35 = vrot.slane %v410_v42, 1  ;;  %v3916_v17 = vld [vmem:[#allocation2 + $0x168] sm:$0xff] }
 0x102   : > { %1291 = vmatprep.mubr.f32.mxu0 %v3888_v32  ;;  %v544_v58 = vrot.slane %v3916_v17, 1 }
 0x103   : > { %v3928_v5 = vsel %vm468_vm0, %v540_v34, %v542_v35 }
 0x104   : > { %1067 = vmatmul.mubr.f32.gmra.mrb[52].mxu1 %v3860_v0  ;;  %v3918_v0 = vld [vmem:[#allocation2 + $0x170] sm:$0xff] }
 0x105   : > { %1292 = vmatmul.mubr.f32.gmra.mrb[52].mxu0 %v3897_v9  ;;  %1071 = vmatprep.mubr.f32.mxu1 %v3900_v36  ;;  %v655_v9 = vrot.slane %v410_v42, 2  ;;  %v545_v36 = vrot.slane %v3918_v0, 1  ;;  %v657_v42 = vrot.slane %v3916_v17, 2  ;;  %v658_v35 = vrot.slane %v3918_v0, 2 }
 0x106   : > { %1296 = vmatprep.mubr.f32.mxu0 %v3890_v40 }
 0x107   : > { %v3938_v15 = vsel %vm581_vm1, %v653_v29, %v655_v9  ;;  %v3941_v34 = vsel %vm468_vm0, %v544_v58, %v545_v36  ;;  %v660_v29 = vrot.slane %v413_v12, 2  ;;  %v3956_v58 = vld [vmem:[#allocation2 + $0x188] sm:$0xff] }
 0x108   : > { %1072 = vmatmul.mubr.f32.gmra.mrb[54].mxu1 %v3862_v51  ;;  %4804 = vst [vmem:[#allocation57_spill] sm:$0xff] %v3938_v15 }
 0x109   : > { %1297 = vmatmul.mubr.f32.gmra.mrb[54].mxu0 %v3910_v59  ;;  %1076 = vmatprep.mubr.f32.mxu1 %v3913_v43  ;;  %v547_v59 = vrot.slane %v413_v12, 1  ;;  %v3944_v43 = vld [vmem:[#allocation2 + $0x180] sm:$0xff] }
 0x10a   : > { %1301 = vmatprep.mubr.f32.mxu0 %v3916_v17  ;;  %v858_v12 = vld [vmem:[#allocation6 + $0x410] sm:$0xff] }
 0x10b   : > { %v3954_v9 = vsel %vm468_vm0, %v545_v36, %v547_v59  ;;  %v859_v36 = vld [vmem:[#allocation6 + $0x418] sm:$0xff] }
 0x10c   : > { %1077 = vmatmul.mubr.f32.gmra.mrb[56].mxu1 %v3888_v32  ;;  %v2665_v59 = vpack.c.bf16 %v859_v36, %v858_v12  ;;  %v4811_v12 = vld [vmem:[#allocation22_spill] sm:$0xff]  ;;  %v4812_v36 = vld [vmem:[#allocation17_spill] sm:$0xff] }
 0x10d   : > { %1302 = vmatmul.mubr.f32.gmra.mrb[56].mxu0 %v3925_v54  ;;  %1081 = vmatprep.mubr.f32.mxu1 %v3928_v5  ;;  %v3951_v54 = vsel %vm581_vm1, %v657_v42, %v658_v35  ;;  %v860_v42 = vld [vmem:[#allocation6 + $0x420] sm:$0xff] }
 0x10e   : > { %1306 = vmatprep.mubr.f32.mxu0 %v3918_v0 }
 0x110   : > { %1082 = vmatmul.mubr.f32.gmra.mrb[58].mxu1 %v3890_v40 }
 0x111   : > { %1307 = vmatmul.mubr.f32.gmra.mrb[58].mxu0 %v3938_v15  ;;  %1086 = vmatprep.mubr.f32.mxu1 %v3941_v34  ;;  %v3963_v15 = vsel %vm581_vm1, %v658_v35, %v660_v29  ;;  %v861_v35 = vld [vmem:[#allocation6 + $0x428] sm:$0xff]  ;;  %v871_v29 = vld [vmem:[#allocation6 + $0x478] sm:$0xff] }
 0x112   : > { %1311 = vmatprep.mubr.f32.mxu0 %v3944_v43 }
 0x114   : > { %1087 = vmatmul.mubr.f32.gmra.mrb[60].mxu1 %v3916_v17 }
 0x115   : > { %1312 = vmatmul.mubr.f32.gmra.mrb[60].mxu0 %v3951_v54  ;;  %1091 = vmatprep.mubr.f32.mxu1 %v3954_v9 }
 0x116   : > { %1316 = vmatprep.mubr.f32.mxu0 %v3956_v58 }
 0x118   : > { %1092 = vmatmul.mubr.f32.gmra.mrb[62].mxu1 %v3918_v0 }
 0x119   : > { %1317 = vmatmul.mubr.f32.gmra.mrb[62].mxu0 %v3963_v15  ;;  %1651 = vmatprep.mubr.f32.mxu1 %v3660_v60 }
 0x11a   : > { %1386 = vmatprep.mubr.f32.mxu0 %v3486_v44  ;;  %v2669_v44 = vpack.c.bf16 %v861_v35, %v860_v42  ;;  %v4815_v42 = vld [vmem:[#allocation24_spill] sm:$0xff]  ;;  %v4816_v35 = vld [vmem:[#allocation19_spill] sm:$0xff] }
 0x11c   : > { %1652 = vmatmul.mubr.f32.vlgmr.msra.gmra.mrb[64].mxu1 %v3623_v22  ;;  %v863_v22 = vld [vmem:[#allocation6 + $0x438] sm:$0xff] }
 0x11d   : > { %1387 = vmatmul.mubr.f32.vlgmr.msra.gmra.mrb[0].mxu0 %v3468_v30  ;;  %1656 = vmatprep.mubr.f32.mxu1 %v3679_v23  ;;  %v862_v30 = vld [vmem:[#allocation6 + $0x430] sm:$0xff] }
 0x11e   : > { %2615 = vmatpush1.bf16.msra.mxu0 %v3460_v24  ;;  %1391 = vmatprep.mubr.f32.mxu0 %v3504_v55  ;;  %v2673_v24 = vpack.c.bf16 %v863_v22, %v862_v30  ;;  %v865_v55 = vld [vmem:[#allocation6 + $0x448] sm:$0xff]  ;;  %v4818_v30 = vld [vmem:[#allocation46_spill] sm:$0xff] }
 0x11f   : > { %2616 = vmatprep.subr.bf16.mxu0 %v4775_v52  ;;  %2664 = vmatpush3.bf16.msra.mxu1 %v3748_v21  ;;  %v869_v21 = vld [vmem:[#allocation6 + $0x468] sm:$0xff]  ;;  %v4819_v22 = vld [vmem:[#allocation26_spill] sm:$0xff] }
 0x120   : > { %1657 = vmatmul.mubr.f32.gmra.mrb[66].mxu1 %v3626_v27  ;;  %2666 = vmatprep.subr.bf16.mxu1 %v2665_v59  ;;  %v866_v27 = vld [vmem:[#allocation6 + $0x450] sm:$0xff] }
 0x121   : > { %1392 = vmatmul.mubr.f32.gmra.mrb[2].mxu0 %v3489_v45  ;;  %1661 = vmatprep.mubr.f32.mxu1 %v3697_v46  ;;  %v864_v45 = vld [vmem:[#allocation6 + $0x440] sm:$0xff] }
 0x122   : > { %1396 = vmatprep.mubr.f32.mxu0 %v3524_v7  ;;  %2618 = vmatpush1.bf16.msra.mxu0 %v3478_v38  ;;  %v2677_v38 = vpack.c.bf16 %v865_v55, %v864_v45  ;;  %v4822_v45 = vld [vmem:[#allocation49_spill] sm:$0xff]  ;;  %v4823_v55 = vld [vmem:[#allocation28_spill] sm:$0xff] }
 0x123   : > { %2619 = vmatprep.subr.bf16.mxu0 %v4775_v52  ;;  %2668 = vmatpush3.bf16.msra.mxu1 %v2665_v59  ;;  %v4814_v59 = vld [vmem:[#allocation44_spill] sm:$0xff] }
 0x124   : > { %1662 = vmatmul.mubr.f32.gmra.mrb[68].mxu1 %v3662_v48  ;;  %2670 = vmatprep.subr.bf16.mxu1 %v2669_v44  ;;  %v867_v48 = vld [vmem:[#allocation6 + $0x458] sm:$0xff] }
 0x125   : > { %1397 = vmatmul.mubr.f32.gmra.mrb[4].mxu0 %v3507_v56  ;;  %1666 = vmatprep.mubr.f32.mxu1 %v3718_v28 }
 0x126   : > { %1401 = vmatprep.mubr.f32.mxu0 %v3543_v19  ;;  %2621 = vmatpush1.bf16.msra.mxu0 %v3495_v50  ;;  %v2681_v50 = vpack.c.bf16 %v867_v48, %v866_v27  ;;  %v4826_v27 = vld [vmem:[#allocation51_spill] sm:$0xff]  ;;  %v4827_v48 = vld [vmem:[#allocation30_spill] sm:$0xff] }
 0x127   : > { %2622 = vmatprep.subr.bf16.mxu0 %v4775_v52  ;;  %2672 = vmatpush3.bf16.msra.mxu1 %v2669_v44  ;;  %v4817_v44 = vld [vmem:[#allocation36_spill] sm:$0xff] }
 0x128   : > { %1667 = vmatmul.mubr.f32.gmra.mrb[70].mxu1 %v3664_v6  ;;  %2674 = vmatprep.subr.bf16.mxu1 %v2673_v24  ;;  %v868_v6 = vld [vmem:[#allocation6 + $0x460] sm:$0xff] }
 0x129   : > { %1402 = vmatmul.mubr.f32.gmra.mrb[6].mxu0 %v3527_v8  ;;  %1671 = vmatprep.mubr.f32.mxu1 %v3735_v10 }
 0x12a   : > { %1406 = vmatprep.mubr.f32.mxu0 %v3561_v31  ;;  %2624 = vmatpush1.bf16.msra.mxu0 %v3516_v62  ;;  %v2685_v62 = vpack.c.bf16 %v869_v21, %v868_v6  ;;  %v4830_v6 = vld [vmem:[#allocation53_spill] sm:$0xff]  ;;  %v4831_v21 = vld [vmem:[#allocation31_spill] sm:$0xff] }
 0x12b   : > { %2625 = vmatprep.subr.bf16.mxu0 %v4775_v52  ;;  %2676 = vmatpush3.bf16.msra.mxu1 %v2673_v24  ;;  %v4820_v24 = vld [vmem:[#allocation21_spill] sm:$0xff] }
 0x12c   : > { %1672 = vmatmul.mubr.f32.gmra.mrb[72].mxu1 %v3699_v49  ;;  %2678 = vmatprep.subr.bf16.mxu1 %v2677_v38  ;;  %v870_v49 = vld [vmem:[#allocation6 + $0x470] sm:$0xff] }
 0x12d   : > { %1407 = vmatmul.mubr.f32.gmra.mrb[8].mxu0 %v3546_v20  ;;  %1676 = vmatprep.mubr.f32.mxu1 %v3757_v25 }
 0x12e   : > { %1411 = vmatprep.mubr.f32.mxu0 %v3578_v1  ;;  %2627 = vmatpush1.bf16.msra.mxu0 %v3533_v14  ;;  %v2689_v14 = vpack.c.bf16 %v871_v29, %v870_v49  ;;  %v4834_v49 = vld [vmem:[#allocation33_spill] sm:$0xff] }
 0x12f   : > { %2628 = vmatprep.subr.bf16.mxu0 %v4775_v52  ;;  %2680 = vmatpush3.bf16.msra.mxu1 %v2677_v38  ;;  %v4824_v38 = vld [vmem:[#allocation23_spill] sm:$0xff]  ;;  %v4835_v29 = vld [vmem:[#allocation29_spill] sm:$0xff] }
 0x130   : > { %1677 = vmatmul.mubr.f32.gmra.mrb[74].mxu1 %v3702_v63  ;;  %2682 = vmatprep.subr.bf16.mxu1 %v2681_v50  ;;  %v4808_v63 = vld [vmem:[#allocation32_spill] sm:$0xff] }
 0x131   : > { %1412 = vmatmul.mubr.f32.gmra.mrb[10].mxu0 %v3565_v33  ;;  %1681 = vmatprep.mubr.f32.mxu1 %v3774_v37 }
 0x132   : > { %1416 = vmatprep.mubr.f32.mxu0 %v3601_v3  ;;  %2630 = vmatpush1.bf16.msra.mxu0 %v3554_v2  ;;  %v4805_v2 = vld [vmem:[#allocation38_spill] sm:$0xff] }
 0x133   : > { %2631 = vmatprep.subr.bf16.mxu0 %v4775_v52  ;;  %2684 = vmatpush3.bf16.msra.mxu1 %v2681_v50  ;;  %v4828_v50 = vld [vmem:[#allocation25_spill] sm:$0xff] }
 0x134   : > { %1682 = vmatmul.mubr.f32.gmra.mrb[76].mxu1 %v3738_v11  ;;  %2686 = vmatprep.subr.bf16.mxu1 %v2685_v62  ;;  %v4807_v11 = vld [vmem:[#allocation16_spill] sm:$0xff] }
 0x135   : > { %1417 = vmatmul.mubr.f32.gmra.mrb[12].mxu0 %v3583_v47  ;;  %1686 = vmatprep.mubr.f32.mxu1 %v3788_v13 }
 0x136   : > { %1421 = vmatprep.mubr.f32.mxu0 %v3616_v16  ;;  %2633 = vmatpush1.bf16.msra.mxu0 %v3571_v41  ;;  %v4806_v41 = vld [vmem:[#allocation20_spill] sm:$0xff] }
 0x137   : > { %2634 = vmatprep.subr.bf16.mxu0 %v4775_v52  ;;  %2688 = vmatpush3.bf16.msra.mxu1 %v2685_v62  ;;  %v4832_v62 = vld [vmem:[#allocation27_spill] sm:$0xff] }
 0x138   : > { %1687 = vmatmul.mubr.f32.gmra.mrb[78].mxu1 %v3740_v26  ;;  %2690 = vmatprep.subr.bf16.mxu1 %v2689_v14  ;;  %v4809_v26 = vld [vmem:[#allocation18_spill] sm:$0xff] }
 0x139   : > { %1422 = vmatmul.mubr.f32.gmra.mrb[14].mxu0 %v3604_v4  ;;  %1691 = vmatprep.mubr.f32.mxu1 %v3801_v53 }
 0x13a   : > { %1426 = vmatprep.mubr.f32.mxu0 %v3639_v39  ;;  %2636 = vmatpush1.bf16.msra.mxu0 %v3592_v57  ;;  %v4810_v57 = vld [vmem:[#allocation40_spill] sm:$0xff] }
 0x13b   : > { %2637 = vmatprep.subr.bf16.mxu0 %v4775_v52  ;;  %2692 = vmatpush3.bf16.msra.mxu1 %v2689_v14  ;;  %v4075_v14 = vld [vmem:[#allocation2 + $0x190] sm:$0x3] }
 0x13c   : > { %1692 = vmatmul.mubr.f32.gmra.mrb[80].mxu1 %v3776_v61  ;;  %v4813_v61 = vld [vmem:[#allocation35_spill] sm:$0xff] }
 0x13d   : > { %1427 = vmatmul.mubr.f32.gmra.mrb[16].mxu0 %v3621_v18  ;;  %1696 = vmatprep.mubr.f32.mxu1 %v4805_v2 }
 0x13e   : > { %1431 = vmatprep.mubr.f32.mxu0 %v4806_v41  ;;  %2639 = vmatpush1.bf16.msra.mxu0 %v4807_v11 }
 0x13f   : > { %2640 = vmatprep.subr.bf16.mxu0 %v4775_v52 }
 0x140   : > { %1697 = vmatmul.mubr.f32.gmra.mrb[82].mxu1 %v4808_v63  ;;  %v4095_v63 = vld [vmem:[#allocation2 + $0x1a8] sm:$0x3] }
 0x141   : > { %1432 = vmatmul.mubr.f32.gmra.mrb[18].mxu0 %v4809_v26  ;;  %1701 = vmatprep.mubr.f32.mxu1 %v4810_v57 }
 0x142   : > { %1436 = vmatprep.mubr.f32.mxu0 %v4811_v12  ;;  %2642 = vmatpush1.bf16.msra.mxu0 %v4812_v36 }
 0x143   : > { %2643 = vmatprep.subr.bf16.mxu0 %v4775_v52 }
 0x144   : > { %1702 = vmatmul.mubr.f32.gmra.mrb[84].mxu1 %v4813_v61 }
 0x145   : > { %1437 = vmatmul.mubr.f32.gmra.mrb[20].mxu0 %v3660_v60  ;;  %1706 = vmatprep.mubr.f32.mxu1 %v4814_v59  ;;  %v4821_v60 = vld [vmem:[#allocation41_spill] sm:$0xff] }
 0x146   : > { %1441 = vmatprep.mubr.f32.mxu0 %v4815_v42  ;;  %2645 = vmatpush1.bf16.msra.mxu0 %v4816_v35  ;;  %v4841_v35 = vld [vmem:[#allocation48_spill] sm:$0xff] }
 0x147   : > { %2646 = vmatprep.subr.bf16.mxu0 %v4775_v52 }
 0x148   : > { %1707 = vmatmul.mubr.f32.gmra.mrb[86].mxu1 %v4817_v44 }
 0x149   : > { %1442 = vmatmul.mubr.f32.gmra.mrb[22].mxu0 %v3679_v23  ;;  %1711 = vmatprep.mubr.f32.mxu1 %v4818_v30  ;;  %v4825_v23 = vld [vmem:[#allocation42_spill] sm:$0xff] }
 0x14a   : > { %1446 = vmatprep.mubr.f32.mxu0 %v4819_v22  ;;  %2648 = vmatpush1.bf16.msra.mxu0 %v4820_v24 }
 0x14b   : > { %2649 = vmatprep.subr.bf16.mxu0 %v4775_v52 }
 0x14c   : > { %1712 = vmatmul.mubr.f32.gmra.mrb[88].mxu1 %v4821_v60  ;;  %v4842_v60 = vld [vmem:[#allocation50_spill] sm:$0xff] }
 0x14d   : > { %1447 = vmatmul.mubr.f32.gmra.mrb[24].mxu0 %v3697_v46  ;;  %1716 = vmatprep.mubr.f32.mxu1 %v4822_v45  ;;  %v4829_v46 = vld [vmem:[#allocation47_spill] sm:$0xff] }
 0x14e   : > { %1451 = vmatprep.mubr.f32.mxu0 %v4823_v55  ;;  %2651 = vmatpush1.bf16.msra.mxu0 %v4824_v38 }
 0x14f   : > { %2652 = vmatprep.subr.bf16.mxu0 %v4775_v52 }
 0x150   : > { %1717 = vmatmul.mubr.f32.gmra.mrb[90].mxu1 %v4825_v23  ;;  %v4843_v23 = vld [vmem:[#allocation52_spill] sm:$0xff] }
 0x151   : > { %1452 = vmatmul.mubr.f32.gmra.mrb[26].mxu0 %v3718_v28  ;;  %1721 = vmatprep.mubr.f32.mxu1 %v4826_v27  ;;  %v4833_v28 = vld [vmem:[#allocation55_spill] sm:$0xff] }
 0x152   : > { %1456 = vmatprep.mubr.f32.mxu0 %v4827_v48  ;;  %2654 = vmatpush1.bf16.msra.mxu0 %v4828_v50 }
 0x153   : > { %2655 = vmatprep.subr.bf16.mxu0 %v4775_v52 }
 0x154   : > { %1722 = vmatmul.mubr.f32.gmra.mrb[92].mxu1 %v4829_v46 }
 0x155   : > { %1457 = vmatmul.mubr.f32.gmra.mrb[28].mxu0 %v3735_v10  ;;  %1726 = vmatprep.mubr.f32.mxu1 %v4830_v6  ;;  %v4836_v10 = vld [vmem:[#allocation34_spill] sm:$0xff] }
 0x156   : > { %1461 = vmatprep.mubr.f32.mxu0 %v4831_v21  ;;  %2657 = vmatpush1.bf16.msra.mxu0 %v4832_v62 }
 0x157   : > { %2658 = vmatprep.subr.bf16.mxu0 %v4775_v52  ;;  %v697_v52 = vrot.slane %v3944_v43, 1 }
 0x158   : > { %1727 = vmatmul.mubr.f32.gmra.mrb[94].mxu1 %v3862_v51  ;;  %v4837_v51 = vld [vmem:[#allocation37_spill] sm:$0xff] }
 0x159   : > { %1462 = vmatmul.mubr.f32.gmra.mrb[30].mxu0 %v3757_v25  ;;  %1731 = vmatprep.mubr.f32.mxu1 %v4833_v28  ;;  %v698_v25 = vrot.slane %v3956_v58, 1 }
 0x15a   : > { %1466 = vmatprep.mubr.f32.mxu0 %v4834_v49  ;;  %2660 = vmatpush1.bf16.msra.mxu0 %v4835_v29 }
 0x15c   : > { %1732 = vmatmul.mubr.f32.gmra.mrb[96].mxu1 %v3888_v32  ;;  %v4839_v32 = vld [vmem:[#allocation43_spill] sm:$0xff] }
 0x15d   : > { %1467 = vmatmul.mubr.f32.gmra.mrb[32].mxu0 %v3774_v37  ;;  %1736 = vmatprep.mubr.f32.mxu1 %v3928_v5  ;;  %v4838_v37 = vld [vmem:[#allocation39_spill] sm:$0xff] }
 0x15e   : > { %1471 = vmatprep.mubr.f32.mxu0 %v4836_v10 }
 0x160   : > { %1737 = vmatmul.mubr.f32.gmra.mrb[98].mxu1 %v3890_v40  ;;  %v4082_v40 = vsel %vm468_vm0, %v697_v52, %v698_v25  ;;  %v2937_v52 = vld [vmem:[#allocation2 + $0x48] sm:$0xff] }
 0x161   : > { %1472 = vmatmul.mubr.f32.gmra.mrb[34].mxu0 %v3788_v13  ;;  %1741 = vmatprep.mubr.f32.mxu1 %v3941_v34  ;;  %v700_v13 = vrot.slane %v4075_v14, 1 }
 0x162   : > { %1476 = vmatprep.mubr.f32.mxu0 %v4837_v51 }
 0x164   : > { %1742 = vmatmul.mubr.f32.gmra.mrb[100].mxu1 %v3916_v17  ;;  %v4090_v17 = vsel %vm468_vm0, %v698_v25, %v700_v13 }
 0x165   : > { %1477 = vmatmul.mubr.f32.gmra.mrb[36].mxu0 %v3801_v53  ;;  %1746 = vmatprep.mubr.f32.mxu1 %v3954_v9  ;;  %v4092_v53 = vld [vmem:[#allocation2] sm:$0xff] }
 0x166   : > { %1481 = vmatprep.mubr.f32.mxu0 %v4838_v37  ;;  %v714_v11 = vrot.slane %v4092_v53, 1 }
 0x168   : > { %1747 = vmatmul.mubr.f32.gmra.mrb[102].mxu1 %v3918_v0  ;;  %v4840_v0 = vld [vmem:[#allocation45_spill] sm:$0xff] }
 0x169   : > { %1482 = vmatmul.mubr.f32.gmra.mrb[38].mxu0 %v4805_v2  ;;  %1751 = vmatprep.mubr.f32.mxu1 %v4082_v40  ;;  %v717_v2 = vrot.slane %v4095_v63, 1 }
 0x16a   : > { %1486 = vmatprep.mubr.f32.mxu0 %v4839_v32 }
 0x16b   : > { %v718_v44 = vsel %vm468_vm0, %v714_v11, %v717_v2  ;;  %v2942_v2 = vld [vmem:[#allocation2 + $0x80] sm:$0xff] }
 0x16c   : > { %1752 = vmatmul.mubr.f32.gmra.mrb[104].mxu1 %v3944_v43 }
 0x16d   : > { %1487 = vmatmul.mubr.f32.gmra.mrb[40].mxu0 %v4810_v57  ;;  %1756 = vmatprep.mubr.f32.mxu1 %v4090_v17 }
 0x16e   : > { %1491 = vmatprep.mubr.f32.mxu0 %v4840_v0 }
 0x16f   : > { %v4102_v36 = vpop.f32.mrb[0].mxu1 }
 0x170   : > { %1757 = vmatmul.mubr.f32.gmra.mrb[106].mxu1 %v3956_v58  ;;  %v940_v61 = vpop.f32.mrb[1].mxu1 }
 0x171   : > { %1492 = vmatmul.mubr.f32.gmra.mrb[42].mxu0 %v4814_v59  ;;  %1761 = vmatprep.mubr.f32.mxu1 %v714_v11 }
 0x172   : > { %1496 = vmatprep.mubr.f32.mxu0 %v4841_v35 }
 0x173   : > { %v4108_v24 = vpop.f32.mrb[2].mxu1 }
 0x174   : > { %1762 = vmatmul.mubr.f32.gmra.mrb[108].mxu1 %v4092_v53  ;;  %v945_v57 = vpop.f32.mrb[3].mxu1 }
 0x175   : > { %1497 = vmatmul.mubr.f32.gmra.mrb[44].mxu0 %v4818_v30  ;;  %1766 = vmatprep.mubr.f32.mxu1 %v718_v44  ;;  %v4844_v30 = vld [vmem:[#allocation54_spill] sm:$0xff] }
 0x176   : > { %1501 = vmatprep.mubr.f32.mxu0 %v4842_v60 }
 0x177   : > { %v4113_v38 = vpop.f32.mrb[4].mxu1 }
 0x178   : > { %1767 = vmatmul.mubr.f32.gmra.mrb[110].mxu1 %v4092_v53  ;;  %v950_v59 = vpop.f32.mrb[5].mxu1 }
 0x179   : > { %1502 = vmatmul.mubr.f32.gmra.mrb[46].mxu0 %v4822_v45  ;;  %2421 = vmatprep.mubr.f32.mxu1 %v3524_v7  ;;  %v4845_v7 = vld [vmem:[#allocation56_spill] sm:$0xff] }
 0x17a   : > { %1506 = vmatprep.mubr.f32.mxu0 %v4843_v23 }
 0x17b   : > { %v4119_v50 = vpop.f32.mrb[6].mxu1 }
 0x17c   : > { %2422 = vmatmul.mubr.f32.vlgmr.msra.gmra.mrb[112].mxu1 %v3543_v19  ;;  %v955_v46 = vpop.f32.mrb[7].mxu1 }
 0x17d   : > { %1507 = vmatmul.mubr.f32.gmra.mrb[48].mxu0 %v4826_v27  ;;  %2424 = vmatprep.mubr.f32.mxu1 %v3561_v31  ;;  %v4846_v31 = vld [vmem:[#allocation57_spill] sm:$0xff] }
 0x17e   : > { %1511 = vmatprep.mubr.f32.mxu0 %v4844_v30 }
 0x17f   : > { %v4125_v62 = vpop.f32.mrb[8].mxu1 }
 0x180   : > { %2425 = vmatmul.mubr.f32.gmra.mrb[114].mxu1 %v3578_v1  ;;  %v960_v45 = vpop.f32.mrb[9].mxu1 }
 0x181   : > { %1512 = vmatmul.mubr.f32.gmra.mrb[50].mxu0 %v4830_v6  ;;  %2427 = vmatprep.mubr.f32.mxu1 %v3601_v3  ;;  %v704_v3 = vrot.slane %v3944_v43, 2 }
 0x182   : > { %1516 = vmatprep.mubr.f32.mxu0 %v4845_v7 }
 0x183   : > { %v4131_v29 = vpop.f32.mrb[10].mxu1 }
 0x184   : > { %2428 = vmatmul.mubr.f32.gmra.mrb[116].mxu1 %v3616_v16  ;;  %v965_v19 = vpop.f32.mrb[11].mxu1  ;;  %v705_v16 = vrot.slane %v3956_v58, 2 }
 0x185   : > { %1517 = vmatmul.mubr.f32.gmra.mrb[52].mxu0 %v4833_v28  ;;  %2430 = vmatprep.mubr.f32.mxu1 %v3639_v39 }
 0x186   : > { %1521 = vmatprep.mubr.f32.mxu0 %v4846_v31 }
 0x187   : > { %v4137_v27 = vpop.f32.mrb[12].mxu1 }
 0x188   : > { %2431 = vmatmul.mubr.f32.gmra.mrb[118].mxu1 %v4806_v41  ;;  %v970_v1 = vpop.f32.mrb[13].mxu1  ;;  %v707_v41 = vrot.slane %v4075_v14, 2  ;;  %v2938_v14 = vld [vmem:[#allocation2 + $0x50] sm:$0xff] }
 0x189   : > { %1522 = vmatmul.mubr.f32.gmra.mrb[54].mxu0 %v3928_v5  ;;  %2433 = vmatprep.mubr.f32.mxu1 %v4811_v12  ;;  %v706_v5 = vsel %vm581_vm1, %v704_v3, %v705_v16 }
 0x18a   : > { %1526 = vmatprep.mubr.f32.mxu0 %v3951_v54 }
 0x18b   : > { %v4145_v6 = vpop.f32.mrb[14].mxu1 }
 0x18c   : > { %2434 = vmatmul.mubr.f32.gmra.mrb[120].mxu1 %v4815_v42  ;;  %v975_v39 = vpop.f32.mrb[15].mxu1 }
 0x18d   : > { %1527 = vmatmul.mubr.f32.gmra.mrb[56].mxu0 %v3941_v34  ;;  %2436 = vmatprep.mubr.f32.mxu1 %v4819_v22  ;;  %v708_v34 = vsel %vm581_vm1, %v705_v16, %v707_v41 }
 0x18e   : > { %1531 = vmatprep.mubr.f32.mxu0 %v3963_v15 }
 0x18f   : > { %v4153_v12 = vpop.f32.mrb[16].mxu1 }
 0x190   : > { %2437 = vmatmul.mubr.f32.gmra.mrb[122].mxu1 %v4823_v55  ;;  %v980_v43 = vpop.f32.mrb[17].mxu1 }
 0x191   : > { %1532 = vmatmul.mubr.f32.gmra.mrb[58].mxu0 %v3954_v9  ;;  %2439 = vmatprep.mubr.f32.mxu1 %v4827_v48 }
 0x192   : > { %1536 = vmatprep.mubr.f32.mxu0 %v706_v5 }
 0x193   : > { %v4159_v58 = vpop.f32.mrb[18].mxu1 }
 0x194   : > { %2440 = vmatmul.mubr.f32.gmra.mrb[124].mxu1 %v4831_v21  ;;  %v985_v42 = vpop.f32.mrb[19].mxu1  ;;  %v2935_v21 = vld [vmem:[#allocation2 + $0x30] sm:$0xff] }
 0x195   : > { %1537 = vmatmul.mubr.f32.gmra.mrb[60].mxu0 %v4082_v40  ;;  %2442 = vmatprep.mubr.f32.mxu1 %v4834_v49  ;;  %v2939_v40 = vld [vmem:[#allocation2 + $0x60] sm:$0xff] }
 0x196   : > { %1541 = vmatprep.mubr.f32.mxu0 %v708_v34 }
 0x197   : > { %v4164_v22 = vpop.f32.mrb[20].mxu1 }
 0x198   : > { %2443 = vmatmul.mubr.f32.gmra.mrb[126].mxu1 %v4836_v10  ;;  %v990_v9 = vpop.f32.mrb[21].mxu1  ;;  %v2936_v10 = vld [vmem:[#allocation2 + $0x38] sm:$0xff] }
 0x199   : > { %1542 = vmatmul.mubr.f32.gmra.mrb[62].mxu0 %v4090_v17  ;;  %2445 = vmatprep.mubr.f32.mxu1 %v4837_v51  ;;  %v2940_v17 = vld [vmem:[#allocation2 + $0x68] sm:$0xff] }
 0x19a   : > { %1611 = vmatprep.mubr.f32.mxu0 %v3507_v56 }
 0x19b   : > { %v4170_v55 = vpop.f32.mrb[22].mxu1 }
 0x19c   : > { %2446 = vmatmul.mubr.f32.gmra.mrb[128].mxu1 %v4838_v37  ;;  %v995_v48 = vpop.f32.mrb[23].mxu1 }
 0x19d   : > { %1612 = vmatmul.mubr.f32.vlgmr.msra.gmra.mrb[0].mxu0 %v2935_v21  ;;  %2448 = vmatprep.mubr.f32.mxu1 %v4839_v32 }
 0x19e   : > { %1616 = vmatprep.mubr.f32.mxu0 %v3527_v8 }
 0x19f   : > { %v4175_v28 = vpop.f32.mrb[24].mxu1 }
 0x1a0   : > { %2449 = vmatmul.mubr.f32.gmra.mrb[130].mxu1 %v4840_v0  ;;  %v1000_v49 = vpop.f32.mrb[25].mxu1  ;;  %v2941_v0 = vld [vmem:[#allocation2 + $0x78] sm:$0xff] }
 0x1a1   : > { %1617 = vmatmul.mubr.f32.gmra.mrb[2].mxu0 %v2936_v10  ;;  %2451 = vmatprep.mubr.f32.mxu1 %v4841_v35 }
 0x1a2   : > { %1621 = vmatprep.mubr.f32.mxu0 %v3546_v20 }
 0x1a3   : > { %v4180_v56 = vpop.f32.mrb[26].mxu1 }
 0x1a4   : > { %2452 = vmatmul.mubr.f32.gmra.mrb[132].mxu1 %v4842_v60  ;;  %v1005_v51 = vpop.f32.mrb[27].mxu1 }
 0x1a5   : > { %1622 = vmatmul.mubr.f32.gmra.mrb[4].mxu0 %v2937_v52  ;;  %2454 = vmatprep.mubr.f32.mxu1 %v4843_v23 }
 0x1a6   : > { %1626 = vmatprep.mubr.f32.mxu0 %v3565_v33  ;;  %v721_v33 = vrot.slane %v4092_v53, 2 }
 0x1a7   : > { %v4185_v8 = vpop.f32.mrb[28].mxu1 }
 0x1a8   : > { %2455 = vmatmul.mubr.f32.gmra.mrb[134].mxu1 %v4844_v30  ;;  %v1010_v25 = vpop.f32.mrb[29].mxu1 }
 0x1a9   : > { %1627 = vmatmul.mubr.f32.gmra.mrb[6].mxu0 %v2938_v14  ;;  %2457 = vmatprep.mubr.f32.mxu1 %v4845_v7 }
 0x1aa   : > { %1631 = vmatprep.mubr.f32.mxu0 %v3583_v47  ;;  %v724_v47 = vrot.slane %v4095_v63, 2 }
 0x1ab   : > { %v4190_v20 = vpop.f32.mrb[30].mxu1 }
 0x1ac   : > { %2458 = vmatmul.mubr.f32.gmra.mrb[136].mxu1 %v4846_v31  ;;  %v1015_v37 = vpop.f32.mrb[31].mxu1 }
 0x1ad   : > { %1632 = vmatmul.mubr.f32.gmra.mrb[8].mxu0 %v2939_v40  ;;  %2460 = vmatprep.mubr.f32.mxu1 %v3951_v54 }
 0x1ae   : > { %1636 = vmatprep.mubr.f32.mxu0 %v3604_v4  ;;  %v725_v4 = vsel %vm581_vm1, %v721_v33, %v724_v47 }
 0x1af   : > { %v4196_v13 = vpop.f32.mrb[32].mxu1 }
 0x1b0   : > { %2461 = vmatmul.mubr.f32.gmra.mrb[138].mxu1 %v3963_v15  ;;  %v1020_v32 = vpop.f32.mrb[33].mxu1 }
 0x1b1   : > { %1637 = vmatmul.mubr.f32.gmra.mrb[10].mxu0 %v2940_v17  ;;  %2463 = vmatprep.mubr.f32.mxu1 %v706_v5 }
 0x1b2   : > { %1641 = vmatprep.mubr.f32.mxu0 %v3621_v18 }
 0x1b3   : > { %v4201_v11 = vpop.f32.mrb[34].mxu1 }
 0x1b4   : > { %2464 = vmatmul.mubr.f32.gmra.mrb[140].mxu1 %v708_v34  ;;  %v1025_v54 = vpop.f32.mrb[35].mxu1 }
 0x1b5   : > { %1642 = vmatmul.mubr.f32.gmra.mrb[12].mxu0 %v2941_v0  ;;  %2466 = vmatprep.mubr.f32.mxu1 %v721_v33 }
 0x1b6   : > { %1646 = vmatprep.mubr.f32.mxu0 %v4809_v26 }
 0x1b7   : > { %v4205_v15 = vpop.f32.mrb[36].mxu1 }
 0x1b8   : > { %2467 = vmatmul.mubr.f32.gmra.mrb[142].mxu1 %v725_v4  ;;  %v1030_v53 = vpop.f32.mrb[37].mxu1 }
 0x1b9   : > { %1647 = vmatmul.mubr.f32.gmra.mrb[14].mxu0 %v2942_v2 }
 0x1bb   : > { %v4207_v63 = vpop.f32.mrb[38].mxu1 }
 0x1bc   : > { %v1035_v18 = vpop.f32.mrb[39].mxu1 }
 0x1bf   : > { %v4209_v61 = vpop.f32.mrb[40].mxu1 }
 0x1c0   : > { %v1040_v35 = vpop.f32.mrb[41].mxu1 }
 0x1c3   : > { %v4211_v44 = vpop.f32.mrb[42].mxu1 }
 0x1c4   : > { %v1045_v57 = vpop.f32.mrb[43].mxu1 }
 0x1c7   : > { %v4213_v60 = vpop.f32.mrb[44].mxu1 }
 0x1c8   : > { %v1050_v59 = vpop.f32.mrb[45].mxu1 }
 0x1cb   : > { %v4215_v23 = vpop.f32.mrb[46].mxu1 }
 0x1cc   : > { %v1055_v26 = vpop.f32.mrb[47].mxu1 }
 0x1cf   : > { %v4217_v46 = vpop.f32.mrb[48].mxu1 }
 0x1d0   : > { %v1060_v30 = vpop.f32.mrb[49].mxu1 }
 0x1d3   : > { %v4219_v45 = vpop.f32.mrb[50].mxu1 }
 0x1d4   : > { %v1065_v7 = vpop.f32.mrb[51].mxu1 }
 0x1d7   : > { %v4221_v19 = vpop.f32.mrb[52].mxu1 }
 0x1d8   : > { %v1070_v31 = vpop.f32.mrb[53].mxu1 }
 0x1db   : > { %v4223_v1 = vpop.f32.mrb[54].mxu1 }
 0x1dc   : > { %v1075_v3 = vpop.f32.mrb[55].mxu1 }
 0x1df   : > { %v4225_v16 = vpop.f32.mrb[56].mxu1 }
 0x1e0   : > { %v1080_v39 = vpop.f32.mrb[57].mxu1 }
 0x1e3   : > { %v4227_v5 = vpop.f32.mrb[58].mxu1 }
 0x1e4   : > { %v1085_v41 = vpop.f32.mrb[59].mxu1 }
 0x1e7   : > { %v4229_v43 = vpop.f32.mrb[60].mxu1 }
 0x1e8   : > { %v1090_v34 = vpop.f32.mrb[61].mxu1 }
 0x1eb   : > { %v4231_v42 = vpop.f32.mrb[62].mxu1 }
 0x1ec   : > { %v1095_v9 = vpop.f32.mrb[63].mxu1 }
 0x1ef   : > { %v1653_v48 = vpop.f32.mrb[64].mxu1 }
 0x1f0   : > { %v1655_v21 = vpop.f32.mrb[65].mxu1 }
 0x1f3   : > { %v1658_v49 = vpop.f32.mrb[66].mxu1 }
 0x1f4   : > { %v1660_v10 = vpop.f32.mrb[67].mxu1 }
 0x1f7   : > { %v1663_v51 = vpop.f32.mrb[68].mxu1 }
 0x1f8   : > { %v1665_v52 = vpop.f32.mrb[69].mxu1 }
 0x1fb   : > { %v1668_v25 = vpop.f32.mrb[70].mxu1 }
 0x1fc   : > { %v1670_v14 = vpop.f32.mrb[71].mxu1 }
 0x1ff   : > { %v1673_v37 = vpop.f32.mrb[72].mxu1 }
 0x200   : > { %v1675_v40 = vpop.f32.mrb[73].mxu1 }
 0x203   : > { %v1678_v33 = vpop.f32.mrb[74].mxu1 }
 0x204   : > { %v1680_v32 = vpop.f32.mrb[75].mxu1 }
 0x207   : > { %v1683_v17 = vpop.f32.mrb[76].mxu1 }
 0x208   : > { %v1685_v47 = vpop.f32.mrb[77].mxu1 }
 0x20b   : > { %v1688_v54 = vpop.f32.mrb[78].mxu1 }
 0x20c   : > { %v1690_v0 = vpop.f32.mrb[79].mxu1 }
 0x20f   : > { %v1693_v4 = vpop.f32.mrb[80].mxu1 }
 0x210   : > { %v1428_v53 = vpop.f32.mrb[16].mxu0  ;;  %v1695_v2 = vpop.f32.mrb[81].mxu1 }
 0x211   : > { %v2733_v18 = vadd.f32 %v1428_v53, %v4153_v12  ;;  %v1430_v35 = vpop.f32.mrb[17].mxu0 }
 0x213   : > { %v4234_v57 = vadd.f32 %v2733_v18, %v1653_v48  ;;  %v1698_v59 = vpop.f32.mrb[82].mxu1 }
 0x214   : > { %v1433_v26 = vpop.f32.mrb[18].mxu0  ;;  %v1700_v30 = vpop.f32.mrb[83].mxu1 }
 0x215   : > { %v2735_v7 = vadd.f32 %v1433_v26, %v4159_v58  ;;  %v1435_v31 = vpop.f32.mrb[19].mxu0 }
 0x217   : > { %v4237_v3 = vadd.f32 %v2735_v7, %v1658_v49  ;;  %v1703_v39 = vpop.f32.mrb[84].mxu1 }
 0x218   : > { %v1438_v41 = vpop.f32.mrb[20].mxu0  ;;  %v1705_v34 = vpop.f32.mrb[85].mxu1 }
 0x219   : > { %v2737_v9 = vadd.f32 %v1438_v41, %v4164_v22  ;;  %v1440_v21 = vpop.f32.mrb[21].mxu0 }
 0x21b   : > { %v4240_v10 = vadd.f32 %v2737_v9, %v1663_v51  ;;  %v1708_v12 = vpop.f32.mrb[86].mxu1 }
 0x21c   : > { %v1443_v52 = vpop.f32.mrb[22].mxu0  ;;  %v1710_v48 = vpop.f32.mrb[87].mxu1 }
 0x21d   : > { %v2739_v14 = vadd.f32 %v1443_v52, %v4170_v55  ;;  %v1445_v40 = vpop.f32.mrb[23].mxu0 }
 0x21f   : > { %v4243_v32 = vadd.f32 %v2739_v14, %v1668_v25  ;;  %v1713_v58 = vpop.f32.mrb[88].mxu1 }
 0x220   : > { %v1448_v47 = vpop.f32.mrb[24].mxu0  ;;  %v1715_v49 = vpop.f32.mrb[89].mxu1 }
 0x221   : > { %v2741_v0 = vadd.f32 %v1448_v47, %v4175_v28  ;;  %v1450_v53 = vpop.f32.mrb[25].mxu0 }
 0x223   : > { %v4246_v2 = vadd.f32 %v2741_v0, %v1673_v37  ;;  %v1718_v22 = vpop.f32.mrb[90].mxu1 }
 0x224   : > { %v1453_v18 = vpop.f32.mrb[26].mxu0  ;;  %v1720_v51 = vpop.f32.mrb[91].mxu1 }
 0x225   : > { %v2743_v35 = vadd.f32 %v1453_v18, %v4180_v56  ;;  %v1455_v26 = vpop.f32.mrb[27].mxu0 }
 0x227   : > { %v4249_v30 = vadd.f32 %v2743_v35, %v1678_v33  ;;  %v1723_v55 = vpop.f32.mrb[92].mxu1 }
 0x228   : > { %v1458_v7 = vpop.f32.mrb[28].mxu0  ;;  %v1725_v25 = vpop.f32.mrb[93].mxu1 }
 0x229   : > { %v2745_v31 = vadd.f32 %v1458_v7, %v4185_v8  ;;  %v1460_v41 = vpop.f32.mrb[29].mxu0 }
 0x22b   : > { %v4252_v34 = vadd.f32 %v2745_v31, %v1683_v17  ;;  %v1728_v28 = vpop.f32.mrb[94].mxu1 }
 0x22c   : > { %v1463_v9 = vpop.f32.mrb[30].mxu0  ;;  %v1730_v37 = vpop.f32.mrb[95].mxu1 }
 0x22d   : > { %v2747_v21 = vadd.f32 %v1463_v9, %v4190_v20  ;;  %v1465_v52 = vpop.f32.mrb[31].mxu0 }
 0x22f   : > { %v4255_v48 = vadd.f32 %v2747_v21, %v1688_v54  ;;  %v1733_v56 = vpop.f32.mrb[96].mxu1 }
 0x230   : > { %v1468_v14 = vpop.f32.mrb[32].mxu0  ;;  %v1735_v33 = vpop.f32.mrb[97].mxu1 }
 0x231   : > { %v2749_v40 = vadd.f32 %v1468_v14, %v4196_v13  ;;  %v1470_v47 = vpop.f32.mrb[33].mxu0 }
 0x233   : > { %v4258_v49 = vadd.f32 %v2749_v40, %v1693_v4  ;;  %v1738_v8 = vpop.f32.mrb[98].mxu1 }
 0x234   : > { %v1473_v0 = vpop.f32.mrb[34].mxu0  ;;  %v1740_v17 = vpop.f32.mrb[99].mxu1 }
 0x235   : > { %v2751_v53 = vadd.f32 %v1473_v0, %v4201_v11  ;;  %v1475_v18 = vpop.f32.mrb[35].mxu0 }
 0x237   : > { %v4261_v51 = vadd.f32 %v2751_v53, %v1698_v59  ;;  %v1743_v20 = vpop.f32.mrb[100].mxu1 }
 0x238   : > { %v1478_v35 = vpop.f32.mrb[36].mxu0  ;;  %v1745_v54 = vpop.f32.mrb[101].mxu1 }
 0x239   : > { %v2753_v26 = vadd.f32 %v1478_v35, %v4205_v15  ;;  %v1480_v7 = vpop.f32.mrb[37].mxu0 }
 0x23b   : > { %v4264_v25 = vadd.f32 %v2753_v26, %v1703_v39  ;;  %v1748_v13 = vpop.f32.mrb[102].mxu1 }
 0x23c   : > { %v1483_v31 = vpop.f32.mrb[38].mxu0  ;;  %v1750_v4 = vpop.f32.mrb[103].mxu1 }
 0x23d   : > { %v2755_v41 = vadd.f32 %v1483_v31, %v4207_v63  ;;  %v1485_v9 = vpop.f32.mrb[39].mxu0 }
 0x23f   : > { %v4267_v37 = vadd.f32 %v2755_v41, %v1708_v12  ;;  %v1753_v11 = vpop.f32.mrb[104].mxu1 }
 0x240   : > { %v1488_v21 = vpop.f32.mrb[40].mxu0  ;;  %v1755_v59 = vpop.f32.mrb[105].mxu1 }
 0x241   : > { %v2757_v52 = vadd.f32 %v1488_v21, %v4209_v61  ;;  %v1490_v14 = vpop.f32.mrb[41].mxu0 }
 0x243   : > { %v4270_v33 = vadd.f32 %v2757_v52, %v1713_v58  ;;  %v4272_v15 = vpop.f32.mrb[106].mxu1 }
 0x244   : > { %v1493_v39 = vpop.f32.mrb[42].mxu0  ;;  %v1760_v40 = vpop.f32.mrb[107].mxu1 }
 0x245   : > { %v2759_v47 = vadd.f32 %v1493_v39, %v4211_v44  ;;  %v1495_v0 = vpop.f32.mrb[43].mxu0 }
 0x247   : > { %v4275_v17 = vpop.f32.mrb[108].mxu1  ;;  %v4277_v63 = vadd.f32 %v2759_v47, %v1718_v22 }
 0x248   : > { %v1498_v12 = vpop.f32.mrb[44].mxu0  ;;  %v1765_v53 = vpop.f32.mrb[109].mxu1 }
 0x249   : > { %v2761_v18 = vadd.f32 %v1498_v12, %v4213_v60  ;;  %v1500_v35 = vpop.f32.mrb[45].mxu0 }
 0x24b   : > { %v4280_v61 = vpop.f32.mrb[110].mxu1  ;;  %v4282_v58 = vadd.f32 %v2761_v18, %v1723_v55 }
 0x24c   : > { %v1503_v54 = vpop.f32.mrb[46].mxu0  ;;  %v1770_v26 = vpop.f32.mrb[111].mxu1 }
 0x24d   : > { %v2763_v7 = vadd.f32 %v1503_v54, %v4215_v23  ;;  %v1505_v31 = vpop.f32.mrb[47].mxu0 }
 0x24f   : > { %v4285_v44 = vpop.f32.mrb[112].mxu1  ;;  %v4287_v4 = vadd.f32 %v2763_v7, %v1728_v28 }
 0x250   : > { %v1508_v22 = vpop.f32.mrb[48].mxu0  ;;  %v4289_v41 = vpop.f32.mrb[113].mxu1 }
 0x251   : > { %v2765_v9 = vadd.f32 %v1508_v22, %v4217_v46  ;;  %v1510_v60 = vpop.f32.mrb[49].mxu0 }
 0x253   : > { %v4292_v21 = vpop.f32.mrb[114].mxu1  ;;  %v4294_v59 = vadd.f32 %v2765_v9, %v1733_v56 }
 0x254   : > { %v1513_v55 = vpop.f32.mrb[50].mxu0  ;;  %v4296_v52 = vpop.f32.mrb[115].mxu1 }
 0x255   : > { %v2767_v23 = vadd.f32 %v1513_v55, %v4219_v45  ;;  %v1515_v14 = vpop.f32.mrb[51].mxu0 }
 0x257   : > { %v4299_v39 = vpop.f32.mrb[116].mxu1  ;;  %v4301_v28 = vadd.f32 %v2767_v23, %v1738_v8 }
 0x258   : > { %v1518_v40 = vpop.f32.mrb[52].mxu0  ;;  %v4303_v47 = vpop.f32.mrb[117].mxu1 }
 0x259   : > { %v2769_v46 = vadd.f32 %v1518_v40, %v4221_v19  ;;  %v1520_v0 = vpop.f32.mrb[53].mxu0 }
 0x25b   : > { %v4306_v12 = vpop.f32.mrb[118].mxu1  ;;  %v4308_v56 = vadd.f32 %v2769_v46, %v1743_v20 }
 0x25c   : > { %v1523_v53 = vpop.f32.mrb[54].mxu0  ;;  %v4310_v18 = vpop.f32.mrb[119].mxu1 }
 0x25d   : > { %v2771_v45 = vadd.f32 %v1523_v53, %v4223_v1  ;;  %v1525_v35 = vpop.f32.mrb[55].mxu0 }
 0x25f   : > { %v2435_v54 = vpop.f32.mrb[120].mxu1  ;;  %v4313_v8 = vadd.f32 %v2771_v45, %v1748_v13 }
 0x260   : > { %v1528_v26 = vpop.f32.mrb[56].mxu0  ;;  %v4316_v7 = vadd.f32 %v4237_v3, %v2435_v54  ;;  %v1878_v19 = vpop.f32.mrb[121].mxu1 }
 0x261   : > { %v2773_v31 = vadd.f32 %v1528_v26, %v4225_v16  ;;  %v1530_v22 = vpop.f32.mrb[57].mxu0  ;;  %v4320_v20 = vadd.f32 %v4234_v57, %v1878_v19 }
 0x262   : > { %2006 = vst [vmem:[%s4324_s21 + $0x48] sm:$0xff] %v4316_v7 }
 0x263   : > { %2005 = vst [vmem:[%s4324_s21 + $0x40] sm:$0xff] %v4320_v20  ;;  %v2438_v1 = vpop.f32.mrb[122].mxu1  ;;  %v4330_v3 = vadd.f32 %v2773_v31, %v1753_v11 }
 0x264   : > { %v1533_v13 = vpop.f32.mrb[58].mxu0  ;;  %v4333_v16 = vadd.f32 %v4243_v32, %v2438_v1  ;;  %v1888_v57 = vpop.f32.mrb[123].mxu1 }
 0x265   : > { %v2775_v9 = vadd.f32 %v1533_v13, %v4227_v5  ;;  %v1535_v60 = vpop.f32.mrb[59].mxu0  ;;  %v4337_v55 = vadd.f32 %v4240_v10, %v1888_v57 }
 0x266   : > { %2008 = vst [vmem:[%s4324_s21 + $0x58] sm:$0xff] %v4333_v16 }
 0x267   : > { %2007 = vst [vmem:[%s4324_s21 + $0x50] sm:$0xff] %v4337_v55  ;;  %v2441_v23 = vpop.f32.mrb[124].mxu1  ;;  %v4344_v11 = vadd.f32 %v2775_v9, %v4272_v15 }
 0x268   : > { %v1538_v14 = vpop.f32.mrb[60].mxu0  ;;  %v4347_v32 = vadd.f32 %v4249_v30, %v2441_v23  ;;  %v1898_v40 = vpop.f32.mrb[125].mxu1 }
 0x269   : > { %v2777_v5 = vadd.f32 %v1538_v14, %v4229_v43  ;;  %v1540_v46 = vpop.f32.mrb[61].mxu0  ;;  %v4351_v10 = vadd.f32 %v4246_v2, %v1898_v40 }
 0x26a   : > { %2010 = vst [vmem:[%s4324_s21 + $0x68] sm:$0xff] %v4347_v32 }
 0x26b   : > { %2009 = vst [vmem:[%s4324_s21 + $0x60] sm:$0xff] %v4351_v10  ;;  %v2444_v0 = vpop.f32.mrb[126].mxu1  ;;  %v4358_v15 = vadd.f32 %v2777_v5, %v4275_v17 }
 0x26c   : > { %v1543_v53 = vpop.f32.mrb[62].mxu0  ;;  %v4361_v30 = vadd.f32 %v4255_v48, %v2444_v0  ;;  %v1908_v45 = vpop.f32.mrb[127].mxu1 }
 0x26d   : > { %v2779_v43 = vadd.f32 %v1543_v53, %v4231_v42  ;;  %v1545_v35 = vpop.f32.mrb[63].mxu0  ;;  %v4365_v2 = vadd.f32 %v4252_v34, %v1908_v45 }
 0x26e   : > { %2012 = vst [vmem:[%s4324_s21 + $0x78] sm:$0xff] %v4361_v30 }
 0x26f   : > { %2011 = vst [vmem:[%s4324_s21 + $0x70] sm:$0xff] %v4365_v2  ;;  %v2447_v17 = vpop.f32.mrb[128].mxu1  ;;  %v4372_v54 = vadd.f32 %v2779_v43, %v4280_v61 }
 0x270   : > { %v1613_v26 = vpop.f32.mrb[0].mxu0  ;;  %v4375_v48 = vadd.f32 %v4261_v51, %v2447_v17  ;;  %v1918_v19 = vpop.f32.mrb[129].mxu1 }
 0x271   : > { %v2725_v42 = vadd.f32 %v1613_v26, %v4102_v36  ;;  %v1615_v34 = vpop.f32.mrb[1].mxu0  ;;  %v4379_v31 = vadd.f32 %v4258_v49, %v1918_v19 }
 0x272   : > { %2014 = vst [vmem:[%s4324_s21 + $0x88] sm:$0xff] %v4375_v48 }
 0x273   : > { %v1839_v22 = vadd.f32 %v2725_v42, %v4289_v41  ;;  %2013 = vst [vmem:[%s4324_s21 + $0x80] sm:$0xff] %v4379_v31  ;;  %v2450_v61 = vpop.f32.mrb[130].mxu1 }
 0x274   : > { %v1618_v1 = vpop.f32.mrb[2].mxu0  ;;  %v4387_v51 = vadd.f32 %v4267_v37, %v2450_v61  ;;  %v1928_v13 = vpop.f32.mrb[131].mxu1 }
 0x275   : > { %1997 = vst [vmem:[%s4324_s21] sm:$0xff] %v1839_v22  ;;  %v2726_v36 = vadd.f32 %v1618_v1, %v4108_v24  ;;  %v1620_v57 = vpop.f32.mrb[3].mxu0  ;;  %v4392_v49 = vadd.f32 %v4264_v25, %v1928_v13  ;;  %v2067_v60 = vmul.f32 %v1839_v22, %v1839_v22 }
 0x276   : > { %2016 = vst [vmem:[%s4324_s21 + $0x98] sm:$0xff] %v4387_v51 }
 0x277   : > { %v1844_v41 = vadd.f32 %v2726_v36, %v4285_v44  ;;  %2015 = vst [vmem:[%s4324_s21 + $0x90] sm:$0xff] %v4392_v49  ;;  %v2453_v9 = vpop.f32.mrb[132].mxu1 }
 0x278   : > { %v1623_v37 = vpop.f32.mrb[4].mxu0  ;;  %v4400_v23 = vadd.f32 %v4277_v63, %v2453_v9  ;;  %v1938_v24 = vpop.f32.mrb[133].mxu1 }
 0x279   : > { %1998 = vst [vmem:[%s4324_s21 + $0x8] sm:$0xff] %v1844_v41  ;;  %v2029_v14 = vadd.f32 %v1844_v41, %v1839_v22  ;;  %v2068_v40 = vmul.f32 %v1844_v41, %v1844_v41  ;;  %v2727_v25 = vadd.f32 %v1623_v37, %v4113_v38  ;;  %v1625_v5 = vpop.f32.mrb[5].mxu0  ;;  %v4405_v44 = vadd.f32 %v4270_v33, %v1938_v24 }
 0x27a   : > { %2018 = vst [vmem:[%s4324_s21 + $0xa8] sm:$0xff] %v4400_v23 }
 0x27b   : > { %v2099_v46 = vadd.f32 %v2068_v40, %v2067_v60  ;;  %v1849_v0 = vadd.f32 %v2727_v25, %v4296_v52  ;;  %2017 = vst [vmem:[%s4324_s21 + $0xa0] sm:$0xff] %v4405_v44  ;;  %v2456_v63 = vpop.f32.mrb[134].mxu1 }
 0x27c   : > { %v1628_v53 = vpop.f32.mrb[6].mxu0  ;;  %v4413_v45 = vadd.f32 %v4287_v4, %v2456_v63  ;;  %v1948_v38 = vpop.f32.mrb[135].mxu1 }
 0x27d   : > { %1999 = vst [vmem:[%s4324_s21 + $0x10] sm:$0xff] %v1849_v0  ;;  %v2030_v43 = vadd.f32 %v2029_v14, %v1849_v0  ;;  %v2069_v35 = vmul.f32 %v1849_v0, %v1849_v0  ;;  %v2728_v33 = vadd.f32 %v1628_v53, %v4119_v50  ;;  %v1630_v17 = vpop.f32.mrb[7].mxu0  ;;  %v4418_v26 = vadd.f32 %v4282_v58, %v1948_v38 }
 0x27e   : > { %2020 = vst [vmem:[%s4324_s21 + $0xb8] sm:$0xff] %v4413_v45 }
 0x27f   : > { %v2100_v52 = vadd.f32 %v2099_v46, %v2069_v35  ;;  %v1854_v19 = vadd.f32 %v2728_v33, %v4292_v21  ;;  %2019 = vst [vmem:[%s4324_s21 + $0xb0] sm:$0xff] %v4418_v26  ;;  %v2459_v4 = vpop.f32.mrb[136].mxu1 }
 0x280   : > { %v1633_v42 = vpop.f32.mrb[8].mxu0  ;;  %v4426_v34 = vadd.f32 %v4301_v28, %v2459_v4  ;;  %v1958_v50 = vpop.f32.mrb[137].mxu1 }
 0x281   : > { %2000 = vst [vmem:[%s4324_s21 + $0x18] sm:$0xff] %v1854_v19  ;;  %v2031_v22 = vadd.f32 %v2030_v43, %v1854_v19  ;;  %v2070_v61 = vmul.f32 %v1854_v19, %v1854_v19  ;;  %v2729_v58 = vadd.f32 %v1633_v42, %v4125_v62  ;;  %v1635_v1 = vpop.f32.mrb[9].mxu0  ;;  %v4431_v13 = vadd.f32 %v4294_v59, %v1958_v50 }
 0x282   : > { %2022 = vst [vmem:[%s4324_s21 + $0xc8] sm:$0xff] %v4426_v34 }
 0x283   : > { %v2101_v21 = vadd.f32 %v2100_v52, %v2070_v61  ;;  %v1859_v36 = vadd.f32 %v2729_v58, %v4303_v47  ;;  %2021 = vst [vmem:[%s4324_s21 + $0xc0] sm:$0xff] %v4431_v13  ;;  %v2462_v28 = vpop.f32.mrb[138].mxu1 }
 0x284   : > { %v1638_v57 = vpop.f32.mrb[10].mxu0  ;;  %v4439_v41 = vadd.f32 %v4313_v8, %v2462_v28  ;;  %v1968_v62 = vpop.f32.mrb[139].mxu1 }
 0x285   : > { %2001 = vst [vmem:[%s4324_s21 + $0x20] sm:$0xff] %v1859_v36  ;;  %v2032_v9 = vadd.f32 %v2031_v22, %v1859_v36  ;;  %v2071_v60 = vmul.f32 %v1859_v36, %v1859_v36  ;;  %v2730_v59 = vadd.f32 %v1638_v57, %v4131_v29  ;;  %v1640_v37 = vpop.f32.mrb[11].mxu0  ;;  %v4444_v24 = vadd.f32 %v4308_v56, %v1968_v62 }
 0x286   : > { %2024 = vst [vmem:[%s4324_s21 + $0xd8] sm:$0xff] %v4439_v41 }
 0x287   : > { %v2102_v47 = vadd.f32 %v2101_v21, %v2071_v60  ;;  %v1864_v14 = vadd.f32 %v2730_v59, %v4299_v39  ;;  %2023 = vst [vmem:[%s4324_s21 + $0xd0] sm:$0xff] %v4444_v24  ;;  %v2465_v8 = vpop.f32.mrb[140].mxu1 }
 0x288   : > { %v1643_v40 = vpop.f32.mrb[12].mxu0  ;;  %v4452_v25 = vadd.f32 %v4344_v11, %v2465_v8  ;;  %v1978_v29 = vpop.f32.mrb[141].mxu1 }
 0x289   : > { %2002 = vst [vmem:[%s4324_s21 + $0x28] sm:$0xff] %v1864_v14  ;;  %v2033_v56 = vadd.f32 %v2032_v9, %v1864_v14  ;;  %v2072_v5 = vmul.f32 %v1864_v14, %v1864_v14  ;;  %v2731_v46 = vadd.f32 %v1643_v40, %v4137_v27  ;;  %v1645_v0 = vpop.f32.mrb[13].mxu0  ;;  %v4457_v63 = vadd.f32 %v4330_v3, %v1978_v29 }
 0x28a   : > { %2026 = vst [vmem:[%s4324_s21 + $0xe8] sm:$0xff] %v4452_v25 }
 0x28b   : > { %v2103_v39 = vadd.f32 %v2102_v47, %v2072_v5  ;;  %v1869_v53 = vadd.f32 %v2731_v46, %v4310_v18  ;;  %2025 = vst [vmem:[%s4324_s21 + $0xe0] sm:$0xff] %v4457_v63  ;;  %v2468_v11 = vpop.f32.mrb[142].mxu1 }
 0x28c   : > { %v1648_v38 = vpop.f32.mrb[14].mxu0  ;;  %v4467_v27 = vadd.f32 %v4372_v54, %v2468_v11  ;;  %v1988_v43 = vpop.f32.mrb[143].mxu1 }
 0x28d   : > { %2003 = vst [vmem:[%s4324_s21 + $0x30] sm:$0xff] %v1869_v53  ;;  %v2034_v3 = vadd.f32 %v2033_v56, %v1869_v53  ;;  %v2073_v35 = vmul.f32 %v1869_v53, %v1869_v53  ;;  %v2732_v33 = vadd.f32 %v1648_v38, %v4145_v6  ;;  %v1650_v18 = vpop.f32.mrb[15].mxu0  ;;  %v4472_v17 = vadd.f32 %v4358_v15, %v1988_v43 }
 0x28e   : > { %2028 = vst [vmem:[%s4324_s21 + $0xf8] sm:$0xff] %v4467_v27 }
 0x28f   : > { %v2104_v54 = vadd.f32 %v2103_v39, %v2073_v35  ;;  %v1874_v52 = vadd.f32 %v2732_v33, %v4306_v12  ;;  %2027 = vst [vmem:[%s4324_s21 + $0xf0] sm:$0xff] %v4472_v17 }
 0x291   : > { %2004 = vst [vmem:[%s4324_s21 + $0x38] sm:$0xff] %v1874_v52  ;;  %v2035_v6 = vadd.f32 %v2034_v3, %v1874_v52  ;;  %v2074_v15 = vmul.f32 %v1874_v52, %v1874_v52 }
 0x292   : > { %3014 = shalt.err (!%p3011_p7)
}
 0x293   : > { %s3015_s6 = scalar_lea.hbm %s4479_s28, 4096  ;;  %s3019_s29 = scalar_lea.hbm %s4673_s2, 8192 }
 0x294   : > { %p3016_p9 = scmp.ne.s32.totalorder %s4479_s28, %s3015_s6  ;;  %p3020_p5 = scmp.lt.u32.totalorder %s4479_s28, %s4673_s2 }
 0x295   : > { %p3021_p11 = scmp.lt.u32.totalorder %s3019_s29, %s3015_s6  ;;  %p3023_p4 = scmp.lt.u32.totalorder %s3015_s6, %s4479_s28 }
 0x296   : > { %p3017_p1 = pnand %p3016_p9, %p3265_p12 }
 0x297   : > { %p3022_p2 = por %p3021_p11, %p3020_p5 }
 0x298   : > { %p3018_p0 = pneg %p3017_p1 }
 0x299   : > { %p3024_p6 = por %p3023_p4, %p3022_p2 }
 0x29b   : > { %p3025_p8 = pnand %p3024_p6, %p3018_p0 }
 0x29d   : > { %3028 = shalt.err (!%p3025_p8)
}
 0x29e   : > { %s3140_s13 = smov 128   ;;  %s3141_s10 = smov 8   ;;  %v2075_v12 = vmul.f32 %v4320_v20, %v4320_v20  ;;  %v2036_v19 = vadd.f32 %v2035_v6, %v4320_v20  ;;  %v2105_v4 = vadd.f32 %v2104_v54, %v2074_v15  ;;  %v2076_v42 = vmul.f32 %v4316_v7, %v4316_v7 }
 0x29f   : > { %2867 = dma.vmem_to_hbm [thread:$0]  (%p3265_p12), %s4481_s12, 4096, %s4479_s28, %s2138_s11, %s3140_s13, %s3140_s13, %s3141_s10   ;;  %v2077_v61 = vmul.f32 %v4337_v55, %v4337_v55  ;;  %v2078_v21 = vmul.f32 %v4333_v16, %v4333_v16  ;;  %v2079_v20 = vmul.f32 %v4351_v10, %v4351_v10 }
 0x2a0   : > { %v2037_v50 = vadd.f32 %v2036_v19, %v4316_v7  ;;  %v2106_v22 = vadd.f32 %v2105_v4, %v2075_v12  ;;  %v2080_v7 = vmul.f32 %v4347_v32, %v4347_v32  ;;  %s2142_s12 = sand.u32 1, %s3190_s19   ;;  %s2335_s28 = sshll.u32 %s3190_s19, 4 }
 0x2a1   : > { %s240_s11 = scalar_lea.vmem [#allocation9], %s3316_s14  ;;  %s246_s26 = scalar_lea.vmem [#allocation11], %s3316_s14 }
 0x2a2   : > { %v2038_v58 = vadd.f32 %v2037_v50, %v4337_v55  ;;  %v2107_v1 = vadd.f32 %v2106_v22, %v2076_v42  ;;  %v2081_v55 = vmul.f32 %v4365_v2, %v4365_v2  ;;  %s2175_s9 = sshll.u32 %s240_s11, 4  ;;  %s2188_s25 = sshll.u32 %s246_s26, 4  ;;  %s4594_s9 = int_to_ptr.vmem [resolvable:$true] %s2175_s9  ;;  %s4601_s25 = int_to_ptr.vmem [resolvable:$true] %s2188_s25 }
 0x2a3   : > { %s4592_s7 = scalar_lea.hbm %s4674_s3, %s2335_s28  ;;  %s4599_s29 = scalar_lea.hbm %s4675_s4, %s2335_s28 }
 0x2a4   : > { %v2039_v36 = vadd.f32 %v2038_v58, %v4333_v16  ;;  %v2108_v28 = vadd.f32 %v2107_v1, %v2077_v61  ;;  %v2082_v16 = vmul.f32 %v4361_v30, %v4361_v30  ;;  %s4603_s21 = scalar_lea.sflag [#allocation10], %s2142_s12  ;;  %s3029_s23 = scalar_lea.vmem %s4594_s9, 16 }
 0x2a5   : > { %p3030_p10 = scmp.ne.s32.totalorder %s4594_s9, %s3029_s23  ;;  %s3142_s13 = smov [#allocation9]  }
 0x2a6   : > { %v2040_v57 = vadd.f32 %v2039_v36, %v4351_v10  ;;  %v2109_v62 = vadd.f32 %v2108_v28, %v2078_v21  ;;  %v2083_v10 = vmul.f32 %v4379_v31, %v4379_v31  ;;  %v2098_v21 = vmul.f32 %v4467_v27, %v4467_v27  ;;  %s3033_s10 = sshll.u32 %s3142_s13, 4  ;;  %s3034_s10 = int_to_ptr.vmem [resolvable:$false] %s3033_s10 }
 0x2a7   : > { %p3031_p13 = pnand %p3030_p10, %p3265_p12  ;;  %s3035_s24 = scalar_lea.vmem %s3034_s10, 32 }
 0x2a8   : > { %v2041_v9 = vadd.f32 %v2040_v57, %v4347_v32  ;;  %v2110_v60 = vadd.f32 %v2109_v62, %v2079_v20  ;;  %v2084_v32 = vmul.f32 %v4375_v48, %v4375_v48  ;;  %p3036_p7 = scmp.lt.s32.totalorder %s4594_s9, %s3034_s10  ;;  %p3037_p9 = scmp.lt.s32.totalorder %s3035_s24, %s3029_s23 }
 0x2a9   : > { %p3032_p3 = pneg %p3031_p13 }
 0x2aa   : > { %v2042_v59 = vadd.f32 %v2041_v9, %v4365_v2  ;;  %v2111_v37 = vadd.f32 %v2110_v60, %v2080_v7  ;;  %v2085_v2 = vmul.f32 %v4392_v49, %v4392_v49  ;;  %p3038_p1 = por %p3037_p9, %p3036_p7 }
 0x2ac   : > { %v2043_v47 = vadd.f32 %v2042_v59, %v4361_v30  ;;  %v2112_v14 = vadd.f32 %v2111_v37, %v2081_v55  ;;  %v2086_v30 = vmul.f32 %v4387_v51, %v4387_v51  ;;  %p3039_p0 = pnand %p3038_p1, %p3032_p3 }
 0x2ae   : > { %v2044_v8 = vadd.f32 %v2043_v47, %v4379_v31  ;;  %v2113_v40 = vadd.f32 %v2112_v14, %v2082_v16  ;;  %v2087_v31 = vmul.f32 %v4405_v44, %v4405_v44 }
 0x2b0   : > { %v2045_v29 = vadd.f32 %v2044_v8, %v4375_v48  ;;  %v2114_v56 = vadd.f32 %v2113_v40, %v2083_v10  ;;  %v2088_v48 = vmul.f32 %v4400_v23, %v4400_v23 }
 0x2b2   : > { %v2115_v5 = vadd.f32 %v2114_v56, %v2084_v32  ;;  %v2046_v46 = vadd.f32 %v2045_v29, %v4392_v49  ;;  %v2089_v49 = vmul.f32 %v4418_v26, %v4418_v26 }
 0x2b4   : > { %v2047_v0 = vadd.f32 %v2046_v46, %v4387_v51  ;;  %v2116_v39 = vadd.f32 %v2115_v5, %v2085_v2  ;;  %v2090_v51 = vmul.f32 %v4413_v45, %v4413_v45 }
 0x2b6   : > { %v2048_v53 = vadd.f32 %v2047_v0, %v4405_v44  ;;  %v2117_v11 = vadd.f32 %v2116_v39, %v2086_v30  ;;  %v2091_v44 = vmul.f32 %v4431_v13, %v4431_v13 }
 0x2b8   : > { %v2049_v38 = vadd.f32 %v2048_v53, %v4400_v23  ;;  %v2118_v43 = vadd.f32 %v2117_v11, %v2087_v31  ;;  %v2092_v23 = vmul.f32 %v4426_v34, %v4426_v34 }
 0x2ba   : > { %v2050_v3 = vadd.f32 %v2049_v38, %v4418_v26  ;;  %v2119_v35 = vadd.f32 %v2118_v43, %v2088_v48  ;;  %v2093_v26 = vmul.f32 %v4444_v24, %v4444_v24 }
 0x2bc   : > { %v2051_v33 = vadd.f32 %v2050_v3, %v4413_v45  ;;  %v2120_v18 = vadd.f32 %v2119_v35, %v2089_v49  ;;  %v2094_v45 = vmul.f32 %v4439_v41, %v4439_v41 }
 0x2be   : > { %v2052_v54 = vadd.f32 %v2051_v33, %v4431_v13  ;;  %v2121_v52 = vadd.f32 %v2120_v18, %v2090_v51  ;;  %v2095_v13 = vmul.f32 %v4457_v63, %v4457_v63 }
 0x2c0   : > { %v2053_v6 = vadd.f32 %v2052_v54, %v4426_v34  ;;  %v2122_v15 = vadd.f32 %v2121_v52, %v2091_v44  ;;  %v2096_v34 = vmul.f32 %v4452_v25, %v4452_v25 }
 0x2c2   : > { %v2054_v12 = vadd.f32 %v2053_v6, %v4444_v24  ;;  %v2123_v19 = vadd.f32 %v2122_v15, %v2092_v23 }
 0x2c4   : > { %v2055_v4 = vadd.f32 %v2054_v12, %v4439_v41  ;;  %v2124_v42 = vadd.f32 %v2123_v19, %v2093_v26  ;;  %v2097_v41 = vmul.f32 %v4472_v17, %v4472_v17 }
 0x2c6   : > { %v2056_v50 = vadd.f32 %v2055_v4, %v4457_v63  ;;  %v2125_v22 = vadd.f32 %v2124_v42, %v2094_v45 }
 0x2c8   : > { %v2057_v61 = vadd.f32 %v2056_v50, %v4452_v25  ;;  %v2126_v24 = vadd.f32 %v2125_v22, %v2095_v13 }
 0x2ca   : > { %v2058_v58 = vadd.f32 %v2057_v61, %v4472_v17  ;;  %v2127_v1 = vadd.f32 %v2126_v24, %v2096_v34 }
 0x2cc   : > { %v2059_v63 = vadd.f32 %v2058_v58, %v4467_v27  ;;  %v2128_v36 = vadd.f32 %v2127_v1, %v2097_v41 }
 0x2ce   : > { %v2060_v28 = vrot.slane %v2059_v63, 4  ;;  %v2129_v25 = vadd.f32 %v2128_v36, %v2098_v21 }
 0x2d0   : > { %v2061_v20 = vadd.f32 %v2060_v28, %v2059_v63  ;;  %v2130_v57 = vrot.slane %v2129_v25, 4 }
 0x2d2   : > { %v2062_v62 = vrot.slane %v2061_v20, 2  ;;  %v2131_v7 = vadd.f32 %v2130_v57, %v2129_v25 }
 0x2d4   : > { %v2063_v9 = vadd.f32 %v2062_v62, %v2061_v20  ;;  %v2132_v60 = vrot.slane %v2131_v7, 2 }
 0x2d6   : > { %v2133_v17 = vadd.f32 %v2132_v60, %v2131_v7  ;;  %v2064_v55 = vrot.slane %v2063_v9, 1 }
 0x2d8   : > { %v2065_v27 = vadd.f32 %v2064_v55, %v2063_v9  ;;  %v2134_v59 = vrot.slane %v2133_v17, 1 }
 0x2da   : > { %2066 = vst [vmem:[%s240_s11] sm:$0x1] %v2065_v27  ;;  %v2135_v37 = vadd.f32 %v2134_v59, %v2133_v17 }
 0x2db   : > { %3042 = shalt.err (!%p3039_p0)
}
 0x2dc   : > { %s3043_s12 = scalar_lea.hbm %s4592_s7, 16  ;;  %s3047_s6 = scalar_lea.hbm %s4674_s3, 32 }
 0x2dd   : > { %p3044_p5 = scmp.ne.s32.totalorder %s4592_s7, %s3043_s12  ;;  %p3048_p4 = scmp.lt.u32.totalorder %s4592_s7, %s4674_s3 }
 0x2de   : > { %p3049_p6 = scmp.lt.u32.totalorder %s3047_s6, %s3043_s12  ;;  %p3051_p10 = scmp.lt.u32.totalorder %s3043_s12, %s4592_s7 }
 0x2df   : > { %p3045_p11 = pnand %p3044_p5, %p3265_p12 }
 0x2e0   : > { %p3050_p8 = por %p3049_p6, %p3048_p4 }
 0x2e1   : > { %p3046_p2 = pneg %p3045_p11 }
 0x2e2   : > { %p3052_p13 = por %p3051_p10, %p3050_p8 }
 0x2e4   : > { %p3053_p3 = pnand %p3052_p13, %p3046_p2 }
 0x2e6   : > { %3056 = shalt.err (!%p3053_p3)
}
 0x2e7   : > { %2868 = dma.vmem_to_hbm [thread:$0]  (%p3265_p12), %s4594_s9, 16, %s4592_s7, %s4603_s21   ;;  %2136 = vst [vmem:[%s246_s26] sm:$0x1] %v2135_v37 }
 0x2e8   : > { %s3057_s23 = scalar_lea.vmem %s4601_s25, 16  ;;  %s3143_s13 = smov [#allocation11]  }
 0x2e9   : > { %p3058_p7 = scmp.ne.s32.totalorder %s4601_s25, %s3057_s23  ;;  %s3061_s10 = sshll.u32 %s3143_s13, 4  ;;  %s3062_s10 = int_to_ptr.vmem [resolvable:$false] %s3061_s10 }
 0x2ea   : > { %s3063_s24 = scalar_lea.vmem %s3062_s10, 32  ;;  %p3064_p0 = scmp.lt.s32.totalorder %s4601_s25, %s3062_s10 }
 0x2eb   : > { %p3059_p9 = pnand %p3058_p7, %p3265_p12  ;;  %p3065_p5 = scmp.lt.s32.totalorder %s3063_s24, %s3057_s23 }
 0x2ed   : > { %p3060_p1 = pneg %p3059_p9  ;;  %p3066_p11 = por %p3065_p5, %p3064_p0 }
 0x2ef   : > { %p3067_p2 = pnand %p3066_p11, %p3060_p1 }
 0x2f1   : > { %3070 = shalt.err (!%p3067_p2)
}
 0x2f2   : > { %s3071_s14 = scalar_lea.hbm %s4599_s29, 16  ;;  %s3075_s7 = scalar_lea.hbm %s4675_s4, 32 }
 0x2f3   : > { %p3072_p4 = scmp.ne.s32.totalorder %s4599_s29, %s3071_s14  ;;  %p3076_p10 = scmp.lt.u32.totalorder %s4599_s29, %s4675_s4 }
 0x2f4   : > { %p3077_p13 = scmp.lt.u32.totalorder %s3075_s7, %s3071_s14  ;;  %p3079_p7 = scmp.lt.u32.totalorder %s3071_s14, %s4599_s29 }
 0x2f5   : > { %p3073_p6 = pnand %p3072_p4, %p3265_p12 }
 0x2f6   : > { %p3078_p3 = por %p3077_p13, %p3076_p10 }
 0x2f7   : > { %p3074_p8 = pneg %p3073_p6 }
 0x2f8   : > { %p3080_p9 = por %p3079_p7, %p3078_p3 }
 0x2fa   : > { %p3081_p1 = pnand %p3080_p9, %p3074_p8 }
 0x2fc   : > { %3084 = shalt.err (!%p3081_p1)
}
 0x2fd   : > { %2869 = dma.vmem_to_hbm [thread:$0]  (%p3265_p12), %s4601_s25, 16, %s4599_s29, %s4603_s21  }
 0x2fe PF: > { %s2200_s11 = sand.u32 1, %s3119_s15   ;;  %p4847_p0 = scmp.ne.s32.totalorder %s4752_s22, 0 }
 0x2ff   : > { %p4848_p5 = scmp.ge.s32.totalorder %s3131_s18, 2  ;;  %s2201_s6 = scalar_lea.sflag [#allocation5], %s2200_s11 }
 0x301   : > { %p2882_p11 = pnand %p4848_p5, %p4847_p0 }
 0x303   : > { %3110 = dma.done.wait (!%p2882_p11), %s2201_s6, 4096  }
 0x304   : > { %3112 = vsyncadd (!%p2882_p11), %s2201_s6, 4294963200  ;;  %s2209_s19 = sand.u32 1, %s2321_s20  }
 0x305   : > { %s2210_s8 = scalar_lea.sflag [#allocation10], %s2209_s19 }
 0x306   : > { %3114 = dma.done.wait (!%p2882_p11), %s2210_s8, 32  }
 0x307   : > { %3116 = vsyncadd (!%p2882_p11), %s2210_s8, 4294967264  ;;  %p22_p12 = scmp.ge.s32.totalorder %s3227_s27, 4   ;;  %s4849_s15 = smov %s3123_s16 }
 0x308   : > { %s4850_s16 = smov %s3127_s17  ;;  %s4851_s17 = smov %s3261_s30 }
 0x309   : > { %s4852_s18 = smov %s3227_s27  ;;  %24 = sbr.rel (!%p22_p12) target bundleno = 8 (0x8), region = 110 }
 0x310   :  { %2222 = vsyncpa [#allocation4], 1 }
 0x311   :  { %2224 = vsyncpa [#allocation4 + $0x1], 1 }
 0x312   :  { %2225 = vsyncpa [#allocation7], 1 }
 0x313   :  { %2226 = vsyncpa [#allocation5], 1 }
 0x314   :  { %2228 = vsyncpa [#allocation5 + $0x1], 1 }
 0x315   :  { %2229 = vsyncpa [#allocation10], 1 }
 0x316   :  { %2231 = vsyncpa [#allocation10 + $0x1], 1 }

// kernel: residual_forward.4
= control target key start
LH: loop header
LB: loop body
LE: loop exit
PB: predicated region body
PF: predicated region fallthrough
CT: control target
= control target key end

     0   :  { %12 = vsyncpa [#allocation4], 0  ;;  %s5128_s0 = inlined_call_operand.hbm [shape: f32[2,16,16,128], index: 0, kind: input, shape index: {}]   ;;  %s5129_s1 = inlined_call_operand.hbm [shape: f32[1,1,128], index: 1, kind: input, shape index: {}]   ;;  %s5130_s2 = inlined_call_operand.hbm [shape: f32[1,1,128], index: 2, kind: input, shape index: {}]   ;;  %s5131_s3 = inlined_call_operand.hbm [shape: f32[1152,128], index: 3, kind: input, shape index: {}]   ;;  %s5132_s4 = inlined_call_operand.hbm [shape: f32[2,16,16,128], index: 4, kind: output, shape index: {0}]   ;;  %s5133_s5 = inlined_call_operand.hbm [shape: f32[2,1,128], index: 5, kind: output, shape index: {1}]   ;;  %s5134_s6 = inlined_call_operand.hbm [shape: f32[2,1,128], index: 6, kind: output, shape index: {2}]  }
   0x1   :  { %14 = vsyncpa [#allocation4 + $0x1], 0 }
   0x2   :  { %15 = vsyncpa [#allocation7], 0 }
   0x3   :  { %16 = vsyncpa [#allocation10], 0 }
   0x4   :  { %17 = vsyncpa [#allocation5], 0 }
   0x5   :  { %19 = vsyncpa [#allocation5 + $0x1], 0 }
   0x6   :  { %20 = vsyncpa [#allocation13], 0 }
   0x7   :  { %22 = vsyncpa [#allocation13 + $0x1], 0  ;;  %s3475_s21 = smov 0   ;;  %s3477_s22 = smov 0  }
   0x8   :  { %s3479_s23 = smov 0   ;;  %s3481_s24 = smov 0  }
   0x9 LB: > { %s3496_s25 = sadd.s32 4294967295, %s3425_s24   ;;  %s5138_s26 = sadd.s32 4294967294, %s3425_s24   ;;  %s3425_s24 = sphi %s3481_s24, %s5316_s24   ;;  %s3421_s23 = sphi %s3479_s23, %s5315_s23   ;;  %s3417_s22 = sphi %s3477_s22, %s5314_s22   ;;  %s3413_s21 = sphi %s3475_s21, %s5313_s21  }
   0xa   : > { %p48_p0 = scmp.ne.s32.totalorder %s3417_s22, %s3413_s21  ;;  %p5135_p1 = scmp.eq.s32.totalorder %s3496_s25, 0 }
   0xb   : > { %p141_p3 = scmp.eq.s32.totalorder %s5138_s26, 1  ;;  %p2530_p5 = scmp.ge.s32.totalorder %s3425_s24, 1 }
   0xc   : > { %p3507_p4 = por %p5135_p1, %p48_p0  ;;  %p200_p7 = scmp.lt.s32.totalorder %s3425_s24, 3 }
   0xd   : > { %p3512_p6 = por %p141_p3, %p48_p0  ;;  %s3427_s30 = smov [#allocation6]  }
   0xe   : > { %s5211_s27 = scalar_select %p3507_p4, 1, 0 }
   0xf   : > { %s5212_s28 = scalar_select %p3512_p6, 1, 0 }
  0x10   : > { %p3517_p8 = pnand %p2530_p5, %p200_p7  ;;  %s213_s7 = sshll.u32 %s3427_s30, 4  ;;  %s214_s7 = int_to_ptr.vmem [resolvable:$true] %s213_s7 }
  0x11   : > { %s3428_s8 = smov [#allocation8]   ;;  %s3429_s11 = smov [#allocation9]  }
  0x12   : > { %s5213_s29 = scalar_select %p3517_p8, 1, 0 }
  0x13   : > { %p3095_p10 = pneg %p3517_p8  ;;  %s224_s9 = sshll.u32 %s3428_s8, 4  ;;  %s3530_s9 = int_to_ptr.vmem [resolvable:$true] %s224_s9 }
  0x14   : > { %s234_s12 = sshll.u32 %s3429_s11, 4  ;;  %s3177_s15 = scalar_lea.hbm %s5129_s1, 16  ;;  %s3532_s12 = int_to_ptr.vmem [resolvable:$true] %s234_s12 }
  0x15   : > { %p3526_p11 = pnand %p3095_p10, %p5135_p1  ;;  %p3178_p12 = scmp.ne.s32.totalorder %s5129_s1, %s3177_s15 }
  0x16   : > { %p3184_p5 = scmp.lt.u32.totalorder %s3177_s15, %s5129_s1 }
  0x17   : > { %p3542_p13 = pneg %p3526_p11 }
  0x19   : > { %p3180_p0 = pnand %p3542_p13, %p3178_p12 }
  0x1b   : > { %p3181_p3 = pneg %p3180_p0 }
  0x1d   : > { %p3186_p7 = pnand %p3184_p5, %p3181_p3 }
  0x1f   : > { %3189 = shalt.err (!%p3186_p7)
}
  0x20   : > { %s3190_s30 = scalar_lea.vmem %s214_s7, 16  ;;  %s3197_s8 = scalar_lea.vmem %s214_s7, 32 }
  0x21   : > { %p3191_p10 = scmp.ne.s32.totalorder %s214_s7, %s3190_s30  ;;  %p3198_p2 = scmp.lt.s32.totalorder %s214_s7, %s214_s7 }
  0x22   : > { %p3199_p6 = scmp.lt.s32.totalorder %s3197_s8, %s3190_s30 }
  0x23   : > { %p3193_p9 = pnand %p3191_p10, %p3542_p13 }
  0x24   : > { %p3200_p4 = por %p3199_p6, %p3198_p2 }
  0x25   : > { %p3194_p1 = pneg %p3193_p9 }
  0x27   : > { %p3201_p8 = pnand %p3200_p4, %p3194_p1 }
  0x29   : > { %3204 = shalt.err (!%p3201_p8)
}
  0x2a   : > { %3098 = dma.hbm_to_vmem [thread:$0]  (!%p3526_p11), %s5129_s1, 16, %s214_s7, [#allocation7]  }
  0x2b   : > { %s3205_s16 = scalar_lea.hbm %s5130_s2, 16 }
  0x2c   : > { %p3206_p9 = scmp.ne.s32.totalorder %s5130_s2, %s3205_s16  ;;  %p3212_p1 = scmp.lt.u32.totalorder %s3205_s16, %s5130_s2 }
  0x2e   : > { %p3208_p12 = pnand %p3206_p9, %p3542_p13 }
  0x30   : > { %p3209_p2 = pneg %p3208_p12 }
  0x32   : > { %p3214_p4 = pnand %p3212_p1, %p3209_p2 }
  0x34   : > { %3217 = shalt.err (!%p3214_p4)
}
  0x35   : > { %s3218_s7 = scalar_lea.vmem %s3530_s9, 16  ;;  %s3225_s8 = scalar_lea.vmem %s3530_s9, 32 }
  0x36   : > { %p3219_p6 = scmp.ne.s32.totalorder %s3530_s9, %s3218_s7  ;;  %p3226_p3 = scmp.lt.s32.totalorder %s3530_s9, %s3530_s9 }
  0x37   : > { %p3227_p5 = scmp.lt.s32.totalorder %s3225_s8, %s3218_s7 }
  0x38   : > { %p3221_p8 = pnand %p3219_p6, %p3542_p13 }
  0x39   : > { %p3228_p7 = por %p3227_p5, %p3226_p3 }
  0x3a   : > { %p3222_p0 = pneg %p3221_p8 }
  0x3c   : > { %p3229_p10 = pnand %p3228_p7, %p3222_p0 }
  0x3e   : > { %3232 = shalt.err (!%p3229_p10)
}
  0x3f   : > { %3101 = dma.hbm_to_vmem [thread:$0]  (!%p3526_p11), %s5130_s2, 16, %s3530_s9, [#allocation7]  }
  0x40   : > { %s3233_s16 = scalar_lea.hbm %s5131_s3, 18432 }
  0x41   : > { %p3234_p9 = scmp.ne.s32.totalorder %s5131_s3, %s3233_s16  ;;  %p3240_p1 = scmp.lt.u32.totalorder %s3233_s16, %s5131_s3 }
  0x43   : > { %p3236_p12 = pnand %p3234_p9, %p3542_p13 }
  0x45   : > { %p3237_p2 = pneg %p3236_p12 }
  0x47   : > { %p3242_p4 = pnand %p3240_p1, %p3237_p2 }
  0x49   : > { %3245 = shalt.err (!%p3242_p4)
}
  0x4a   : > { %s3246_s9 = scalar_lea.vmem %s3532_s12, 18432  ;;  %p3254_p3 = scmp.lt.s32.totalorder %s3532_s12, %s3532_s12 }
  0x4b   : > { %p3247_p6 = scmp.ne.s32.totalorder %s3532_s12, %s3246_s9  ;;  %p3255_p5 = scmp.lt.s32.totalorder %s3246_s9, %s3246_s9 }
  0x4d   : > { %p3249_p8 = pnand %p3247_p6, %p3542_p13  ;;  %p3256_p7 = por %p3255_p5, %p3254_p3 }
  0x4f   : > { %p3250_p0 = pneg %p3249_p8 }
  0x51   : > { %p3257_p10 = pnand %p3256_p7, %p3250_p0 }
  0x53   : > { %3260 = shalt.err (!%p3257_p10)
}
  0x54   : > { %s3430_s7 = smov 128   ;;  %s3431_s18 = smov 8  }
  0x55   : > { %3104 = dma.hbm_to_vmem [thread:$0]  (!%p3526_p11), %s5131_s3, 18432, %s3532_s12, [#allocation10], %s3430_s7, %s3430_s7, %s3431_s18  }
  0x56   : > { %s3609_s13 = sadd.s32 1, %s3425_s24   ;;  %s35_s15 = sadd.s32 1, %s3421_s23 }
  0x57   : > { %s32_s14 = ssub.s32 %s3425_s24, %s3609_s13  ;;  %p42_p9 = scmp.ne.s32.totalorder %s3421_s23, %s3417_s22 }
  0x58   : > { %p33_p13 = scmp.eq.s32.totalorder %s32_s14, 0  ;;  %p43_p12 = scmp.eq.s32.totalorder %s3425_s24, 0 }
  0x59   : > { %p3122_p2 = scmp.lt.s32.totalorder %s3425_s24, 2  ;;  %p5216_p4 = scmp.eq.s32.totalorder %s3496_s25, 1 }
  0x5a   : > { %s3619_s16 = scalar_select %p33_p13, %s3421_s23, %s35_s15  }
  0x5b   : > { %p44_p1 = por %p43_p12, %p42_p9  ;;  %p3623_p6 = por %p5216_p4, %p42_p9 }
  0x5c   : > { %s248_s17 = sand.u32 1, %s3421_s23   ;;  %s2553_s19 = sshll.u32 %s3425_s24, 12 }
  0x5d   : > { %s2535_s12 = sshll.u32 %s248_s17, 8  ;;  %s3632_s9 = scalar_lea.hbm %s5128_s0, %s2553_s19 }
  0x5e   : > { %s252_s8 = scalar_lea.vmem [#allocation3], %s2535_s12  ;;  %p3634_p11 = pnand %p3122_p2, %p44_p1 }
  0x5f   : > { %s259_s11 = sshll.u32 %s252_s8, 4  ;;  %s3640_s15 = scalar_lea.sflag [#allocation4], %s248_s17  ;;  %s3638_s11 = int_to_ptr.vmem [resolvable:$true] %s259_s11 }
  0x60   : > { %s3261_s26 = scalar_lea.hbm %s3632_s9, 4096  ;;  %p3263_p0 = pneg %p3634_p11 }
  0x61   : > { %p3262_p8 = scmp.ne.s32.totalorder %s3632_s9, %s3261_s26  ;;  %s3266_s20 = scalar_lea.hbm %s5128_s0, 8192 }
  0x62   : > { %p3267_p7 = scmp.lt.u32.totalorder %s3632_s9, %s5128_s0  ;;  %p3268_p10 = scmp.lt.u32.totalorder %s3266_s20, %s3261_s26 }
  0x63   : > { %p3264_p3 = pnand %p3263_p0, %p3262_p8  ;;  %p3270_p9 = scmp.lt.u32.totalorder %s3261_s26, %s3632_s9 }
  0x64   : > { %p3269_p13 = por %p3268_p10, %p3267_p7 }
  0x65   : > { %p3265_p5 = pneg %p3264_p3 }
  0x66   : > { %p3271_p12 = por %p3270_p9, %p3269_p13 }
  0x68   : > { %p3272_p2 = pnand %p3271_p12, %p3265_p5 }
  0x6a   : > { %3275 = shalt.err (!%p3272_p2)
}
  0x6b   : > { %s3276_s17 = scalar_lea.vmem %s3638_s11, 4096  ;;  %s3432_s19 = smov [#allocation3]  }
  0x6c   : > { %p3277_p1 = scmp.ne.s32.totalorder %s3638_s11, %s3276_s17  ;;  %s3281_s12 = sshll.u32 %s3432_s19, 4  ;;  %s3282_s12 = int_to_ptr.vmem [resolvable:$false] %s3281_s12 }
  0x6d   : > { %s3283_s30 = scalar_lea.vmem %s3282_s12, 8192  ;;  %p3284_p3 = scmp.lt.s32.totalorder %s3638_s11, %s3282_s12 }
  0x6e   : > { %p3279_p4 = pnand %p3277_p1, %p3263_p0  ;;  %p3285_p7 = scmp.lt.s32.totalorder %s3283_s30, %s3276_s17 }
  0x70   : > { %p3280_p8 = pneg %p3279_p4  ;;  %p3286_p10 = por %p3285_p7, %p3284_p3 }
  0x72   : > { %p3287_p13 = pnand %p3286_p10, %p3280_p8 }
  0x74   : > { %3290 = shalt.err (!%p3287_p13)
}
  0x75   : > { %3108 = dma.hbm_to_vmem [thread:$0]  (!%p3634_p11), %s3632_s9, 4096, %s3638_s11, %s3640_s15, %s3430_s7, %s3430_s7, %s3431_s18  }
  0x76   : > { %p5219_p0 = scmp.ne.s32.totalorder %s5213_s29, 0 }
  0x78   : > { %271 = sbr.rel (%p5219_p0) target bundleno = 815 (0x32f), region = 36 }
  0x7f   : > { %s3674_s26 = sand.u32 1, %s3417_s22   ;;  %p5220_p5 = scmp.ne.s32.totalorder %s5211_s27, 0 }
  0x80   : > { %s2539_s20 = sshll.u32 %s3674_s26, 8  ;;  %s274_s8 = scalar_lea.sflag [#allocation4], %s3674_s26 }
  0x81   : > { %s3680_s14 = scalar_lea.vmem [#allocation3], %s2539_s20 }
  0x82   : > { %3392 = dma.done.wait (%p5220_p5), %s274_s8, 4096  }
  0x83   : > { %3394 = vsyncadd (%p5220_p5), %s274_s8, 4294963200  ;;  %p5221_p11 = scmp.eq.s32.totalorder %s3496_s25, 0 }
  0x85   : > { %3396 = dma.done.wait (%p5221_p11), [#allocation7], 32   ;;  %p5222_p9 = pmov %p5221_p11 }
  0x87   : > { %3398 = vsyncadd (%p5222_p9), [#allocation7], 4294967264  ;;  %p5223_p12 = pmov %p5222_p9 }
  0x88   : > { %p5224_p2 = pmov %p5222_p9 }
  0x89   : > { %3400 = dma.done.wait (%p5223_p12), [#allocation10], 18432  }
  0x8a   : > { %3402 = vsyncadd (%p5224_p2), [#allocation10], 4294948864  ;;  %vm657_vm0 = vcmask 1046528   ;;  %v5140_v0 = vmov 0.0|0.0   ;;  %v3434_v1 = vmov 0.0   ;;  %v917_v3 = vld [vmem:[#allocation9] sm:$0xff] }
  0x8b   : > { %2683 = vmatprep.subr.bf16.mxu1 %v5140_v0  ;;  %2731 = vmatprep.subr.bf16.mxu0 %v5140_v0  ;;  %468 = vst [vmem:[#allocation2] sm:$0xff] %v3434_v1  ;;  %v3698_v2 = vrot.slane %v3434_v1, 1  ;;  %470 = vst [vmem:[#allocation2 + $0x10] sm:$0x3] %v3434_v1  ;;  %v918_v4 = vld [vmem:[#allocation9 + $0x8] sm:$0xff]  ;;  %v949_v5 = vld [vmem:[#allocation9 + $0x100] sm:$0xff] }
  0x8c   : > { %471 = vst [vmem:[#allocation2 + $0x18] sm:$0xff] %v3434_v1  ;;  %472 = vst [vmem:[#allocation2 + $0x20] sm:$0xff] %v3434_v1  ;;  %v2684_v6 = vpack.c.bf16 %v918_v4, %v917_v3  ;;  %v950_v7 = vld [vmem:[#allocation9 + $0x108] sm:$0xff]  ;;  %v919_v8 = vld [vmem:[#allocation9 + $0x10] sm:$0xff]  ;;  %vm770_vm1 = vcmask 1045504   ;;  %s4781_s27 = scalar_lea.vmem [#allocation11], %s2539_s20 }
  0x8d   : > { %473 = vst [vmem:[#allocation2 + $0x28] sm:$0x3] %v3434_v1  ;;  %474 = vst [vmem:[#allocation2 + $0x30] sm:$0xff] %v3434_v1  ;;  %1125 = vmatprep.mubr.f32.mxu1 %v3698_v2  ;;  %v920_v9 = vld [vmem:[#allocation9 + $0x18] sm:$0xff]  ;;  %v2732_v10 = vpack.c.bf16 %v950_v7, %v949_v5  ;;  %v951_v11 = vld [vmem:[#allocation9 + $0x110] sm:$0xff]  ;;  %s2554_s29 = sshll.u32 %s3496_s25, 12 }
  0x8e   : > { %475 = vst [vmem:[#allocation2 + $0x38] sm:$0xff] %v3434_v1  ;;  %476 = vst [vmem:[#allocation2 + $0x40] sm:$0x3] %v3434_v1  ;;  %v952_v12 = vld [vmem:[#allocation9 + $0x118] sm:$0xff]  ;;  %2685 = vmatpush1.bf16.msra.mxu1 %v2684_v6  ;;  %v2687_v13 = vpack.c.bf16 %v920_v9, %v919_v8  ;;  %v921_v15 = vld [vmem:[#allocation9 + $0x20] sm:$0xff]  ;;  %s2348_s7 = sshll.u32 %s4781_s27, 4  ;;  %s4936_s11 = scalar_lea.hbm %s5132_s4, %s2554_s29  ;;  %s4938_s7 = int_to_ptr.vmem [resolvable:$true] %s2348_s7 }
  0x8f   : > { %477 = vst [vmem:[#allocation2 + $0x48] sm:$0xff] %v3434_v1  ;;  %478 = vst [vmem:[#allocation2 + $0x50] sm:$0xff] %v3434_v1  ;;  %2733 = vmatpush1.bf16.msra.mxu0 %v2732_v10  ;;  %2686 = vmatprep.subr.bf16.mxu1 %v5140_v0  ;;  %v2735_v14 = vpack.c.bf16 %v952_v12, %v951_v11  ;;  %v922_v16 = vld [vmem:[#allocation9 + $0x28] sm:$0xff]  ;;  %v953_v17 = vld [vmem:[#allocation9 + $0x120] sm:$0xff]  ;;  %s2327_s15 = scalar_lea.sflag [#allocation5], %s3674_s26  ;;  %s3291_s17 = scalar_lea.vmem %s4938_s7, 4096 }
  0x90   : > { %479 = vst [vmem:[#allocation2 + $0x58] sm:$0x3] %v3434_v1  ;;  %480 = vst [vmem:[#allocation2 + $0x60] sm:$0xff] %v3434_v1  ;;  %2734 = vmatprep.subr.bf16.mxu0 %v5140_v0  ;;  %v954_v18 = vld [vmem:[#allocation9 + $0x128] sm:$0xff]  ;;  %v2690_v19 = vpack.c.bf16 %v922_v16, %v921_v15  ;;  %v923_v21 = vld [vmem:[#allocation9 + $0x30] sm:$0xff]  ;;  %p3292_p1 = scmp.ne.s32.totalorder %s4938_s7, %s3291_s17  ;;  %s3435_s19 = smov [#allocation11]  }
  0x91   : > { %481 = vst [vmem:[#allocation2 + $0x68] sm:$0xff] %v3434_v1  ;;  %482 = vst [vmem:[#allocation2 + $0x70] sm:$0x3] %v3434_v1  ;;  %v2738_v20 = vpack.c.bf16 %v954_v18, %v953_v17  ;;  %v924_v22 = vld [vmem:[#allocation9 + $0x38] sm:$0xff]  ;;  %v955_v23 = vld [vmem:[#allocation9 + $0x130] sm:$0xff]  ;;  %s3295_s12 = sshll.u32 %s3435_s19, 4  ;;  %s3296_s12 = int_to_ptr.vmem [resolvable:$false] %s3295_s12 }
  0x92   : > { %483 = vst [vmem:[#allocation2 + $0x78] sm:$0xff] %v3434_v1  ;;  %484 = vst [vmem:[#allocation2 + $0x80] sm:$0xff] %v3434_v1  ;;  %2688 = vmatpush1.bf16.msra.mxu1 %v2687_v13  ;;  %v956_v24 = vld [vmem:[#allocation9 + $0x138] sm:$0xff]  ;;  %v2693_v25 = vpack.c.bf16 %v924_v22, %v923_v21  ;;  %v925_v27 = vld [vmem:[#allocation9 + $0x40] sm:$0xff]  ;;  %p3293_p4 = pnand %p3292_p1, %p3623_p6  ;;  %s3297_s30 = scalar_lea.vmem %s3296_s12, 8192 }
  0x93   : > { %485 = vst [vmem:[#allocation2 + $0x88] sm:$0x3] %v3434_v1  ;;  %486 = vst [vmem:[#allocation2 + $0x90] sm:$0xff] %v3434_v1  ;;  %2736 = vmatpush1.bf16.msra.mxu0 %v2735_v14  ;;  %2689 = vmatprep.subr.bf16.mxu1 %v5140_v0  ;;  %v2741_v26 = vpack.c.bf16 %v956_v24, %v955_v23  ;;  %v926_v28 = vld [vmem:[#allocation9 + $0x48] sm:$0xff]  ;;  %v957_v29 = vld [vmem:[#allocation9 + $0x140] sm:$0xff]  ;;  %p3298_p3 = scmp.lt.s32.totalorder %s4938_s7, %s3296_s12  ;;  %p3299_p7 = scmp.lt.s32.totalorder %s3297_s30, %s3291_s17 }
  0x94   : > { %487 = vst [vmem:[#allocation2 + $0x98] sm:$0xff] %v3434_v1  ;;  %488 = vst [vmem:[#allocation2 + $0xa0] sm:$0x3] %v3434_v1  ;;  %2737 = vmatprep.subr.bf16.mxu0 %v5140_v0  ;;  %v958_v30 = vld [vmem:[#allocation9 + $0x148] sm:$0xff]  ;;  %v2696_v31 = vpack.c.bf16 %v926_v28, %v925_v27  ;;  %v927_v33 = vld [vmem:[#allocation9 + $0x50] sm:$0xff]  ;;  %p3294_p8 = pneg %p3293_p4 }
  0x95   : > { %489 = vst [vmem:[#allocation2 + $0xa8] sm:$0xff] %v3434_v1  ;;  %490 = vst [vmem:[#allocation2 + $0xb0] sm:$0xff] %v3434_v1  ;;  %v2744_v32 = vpack.c.bf16 %v958_v30, %v957_v29  ;;  %v928_v34 = vld [vmem:[#allocation9 + $0x58] sm:$0xff]  ;;  %v959_v35 = vld [vmem:[#allocation9 + $0x150] sm:$0xff]  ;;  %p3300_p10 = por %p3299_p7, %p3298_p3 }
  0x96   : > { %491 = vst [vmem:[#allocation2 + $0xb8] sm:$0x3] %v3434_v1  ;;  %492 = vst [vmem:[#allocation2 + $0xc0] sm:$0xff] %v3434_v1  ;;  %2691 = vmatpush1.bf16.msra.mxu1 %v2690_v19  ;;  %v960_v36 = vld [vmem:[#allocation9 + $0x158] sm:$0xff]  ;;  %v2699_v37 = vpack.c.bf16 %v928_v34, %v927_v33  ;;  %v929_v39 = vld [vmem:[#allocation9 + $0x60] sm:$0xff] }
  0x97   : > { %493 = vst [vmem:[#allocation2 + $0xc8] sm:$0xff] %v3434_v1  ;;  %494 = vst [vmem:[#allocation2 + $0xd0] sm:$0x3] %v3434_v1  ;;  %2739 = vmatpush1.bf16.msra.mxu0 %v2738_v20  ;;  %2692 = vmatprep.subr.bf16.mxu1 %v5140_v0  ;;  %v2747_v38 = vpack.c.bf16 %v960_v36, %v959_v35  ;;  %v930_v40 = vld [vmem:[#allocation9 + $0x68] sm:$0xff]  ;;  %v961_v41 = vld [vmem:[#allocation9 + $0x160] sm:$0xff]  ;;  %p3301_p13 = pnand %p3300_p10, %p3294_p8 }
  0x98   : > { %495 = vst [vmem:[#allocation2 + $0xd8] sm:$0xff] %v3434_v1  ;;  %496 = vst [vmem:[#allocation2 + $0xe0] sm:$0xff] %v3434_v1  ;;  %2740 = vmatprep.subr.bf16.mxu0 %v5140_v0  ;;  %v962_v42 = vld [vmem:[#allocation9 + $0x168] sm:$0xff]  ;;  %v326_v43 = vld [vmem:[%s3680_s14] sm:$0xff]  ;;  %v2702_v47 = vpack.c.bf16 %v930_v40, %v929_v39 }
  0x99   : > { %497 = vst [vmem:[#allocation2 + $0xe8] sm:$0x3] %v3434_v1  ;;  %498 = vst [vmem:[#allocation2 + $0xf0] sm:$0xff] %v3434_v1  ;;  %v3762_v44 = vld [vmem:[#allocation6] ss:$0 sm:$0xff]  ;;  %v327_v48 = vld [vmem:[%s3680_s14 + $0x8] sm:$0xff]  ;;  %v2750_v50 = vpack.c.bf16 %v962_v42, %v961_v41 }
  0x9a   : > { %499 = vst [vmem:[#allocation2 + $0xf8] sm:$0xff] %v3434_v1  ;;  %500 = vst [vmem:[#allocation2 + $0x100] sm:$0x3] %v3434_v1  ;;  %2694 = vmatpush1.bf16.msra.mxu1 %v2693_v25  ;;  %v365_v45 = vmul.f32 %v3762_v44, %v326_v43  ;;  %v3765_v46 = vld [vmem:[#allocation8] ss:$0 sm:$0xff]  ;;  %v328_v49 = vld [vmem:[%s3680_s14 + $0x10] sm:$0xff]  ;;  %v366_v54 = vmul.f32 %v3762_v44, %v327_v48 }
  0x9b   : > { %501 = vst [vmem:[#allocation2 + $0x108] sm:$0xff] %v3434_v1  ;;  %502 = vst [vmem:[#allocation2 + $0x110] sm:$0xff] %v3434_v1  ;;  %2742 = vmatpush1.bf16.msra.mxu0 %v2741_v26  ;;  %2695 = vmatprep.subr.bf16.mxu1 %v5140_v0  ;;  %v931_v51 = vld [vmem:[#allocation9 + $0x70] sm:$0xff]  ;;  %v932_v52 = vld [vmem:[#allocation9 + $0x78] sm:$0xff]  ;;  %v367_v58 = vmul.f32 %v3762_v44, %v328_v49 }
  0x9c   : > { %503 = vst [vmem:[#allocation2 + $0x118] sm:$0x3] %v3434_v1  ;;  %504 = vst [vmem:[#allocation2 + $0x120] sm:$0xff] %v3434_v1  ;;  %2743 = vmatprep.subr.bf16.mxu0 %v5140_v0  ;;  %v404_v53 = vadd.f32 %v3765_v46, %v365_v45  ;;  %v329_v55 = vld [vmem:[%s3680_s14 + $0x18] sm:$0xff]  ;;  %v330_v60 = vld [vmem:[%s3680_s14 + $0x20] sm:$0xff]  ;;  %v405_v63 = vadd.f32 %v3765_v46, %v366_v54  ;;  %v2705_v5 = vpack.c.bf16 %v932_v52, %v931_v51 }
  0x9d   : > { %505 = vst [vmem:[#allocation2 + $0x128] sm:$0xff] %v3434_v1  ;;  %506 = vst [vmem:[#allocation2 + $0x130] sm:$0x3] %v3434_v1  ;;  %v963_v56 = vld [vmem:[#allocation9 + $0x170] sm:$0xff]  ;;  %v964_v57 = vld [vmem:[#allocation9 + $0x178] sm:$0xff]  ;;  %v368_v59 = vmul.f32 %v3762_v44, %v329_v55  ;;  %v406_v7 = vadd.f32 %v3765_v46, %v367_v58  ;;  %v369_v9 = vmul.f32 %v3762_v44, %v330_v60 }
  0x9e   : > { %507 = vst [vmem:[#allocation2 + $0x138] sm:$0xff] %v3434_v1  ;;  %508 = vst [vmem:[#allocation2 + $0x140] sm:$0xff] %v3434_v1  ;;  %2697 = vmatpush1.bf16.msra.mxu1 %v2696_v31  ;;  %v933_v61 = vld [vmem:[#allocation9 + $0x80] sm:$0xff]  ;;  %v436_v62 = vmax.f32 %v404_v53, 0.0  ;;  %v332_v4 = vld [vmem:[%s3680_s14 + $0x30] sm:$0xff]  ;;  %v2753_v12 = vpack.c.bf16 %v964_v57, %v963_v56  ;;  %v437_v13 = vmax.f32 %v405_v63, 0.0 }
  0x9f   : > { %509 = vst [vmem:[#allocation2 + $0x148] sm:$0x3] %v3434_v1  ;;  %510 = vst [vmem:[#allocation2 + $0x150] sm:$0xff] %v3434_v1  ;;  %2745 = vmatpush1.bf16.msra.mxu0 %v2744_v32  ;;  %2698 = vmatprep.subr.bf16.mxu1 %v5140_v0  ;;  %v331_v3 = vld [vmem:[%s3680_s14 + $0x28] sm:$0xff]  ;;  %v407_v8 = vadd.f32 %v3765_v46, %v368_v59  ;;  %v333_v10 = vld [vmem:[%s3680_s14 + $0x38] sm:$0xff]  ;;  %v371_v15 = vmul.f32 %v3762_v44, %v332_v4  ;;  %v438_v19 = vmax.f32 %v406_v7, 0.0 }
  0xa0   : > { %511 = vst [vmem:[#allocation2 + $0x158] sm:$0xff] %v3434_v1  ;;  %512 = vst [vmem:[#allocation2 + $0x160] sm:$0x3] %v3434_v1  ;;  %2746 = vmatprep.subr.bf16.mxu0 %v5140_v0  ;;  %v934_v6 = vld [vmem:[#allocation9 + $0x88] sm:$0xff]  ;;  %v334_v11 = vld [vmem:[%s3680_s14 + $0x40] sm:$0xff]  ;;  %v370_v14 = vmul.f32 %v3762_v44, %v331_v3  ;;  %v408_v21 = vadd.f32 %v3765_v46, %v369_v9  ;;  %v372_v22 = vmul.f32 %v3762_v44, %v333_v10 }
  0xa1   : > { %513 = vst [vmem:[#allocation2 + $0x168] sm:$0xff] %v3434_v1  ;;  %514 = vst [vmem:[#allocation2 + $0x170] sm:$0xff] %v3434_v1  ;;  %v335_v16 = vld [vmem:[%s3680_s14 + $0x48] sm:$0xff]  ;;  %v439_v20 = vmax.f32 %v407_v8, 0.0  ;;  %v336_v23 = vld [vmem:[%s3680_s14 + $0x50] sm:$0xff]  ;;  %v2708_v24 = vpack.c.bf16 %v934_v6, %v933_v61  ;;  %v410_v26 = vadd.f32 %v3765_v46, %v371_v15  ;;  %v373_v27 = vmul.f32 %v3762_v44, %v334_v11 }
  0xa2   : > { %515 = vst [vmem:[#allocation2 + $0x178] sm:$0x3] %v3434_v1  ;;  %516 = vst [vmem:[#allocation2 + $0x180] sm:$0xff] %v3434_v1  ;;  %2700 = vmatpush1.bf16.msra.mxu1 %v2699_v37  ;;  %v965_v17 = vld [vmem:[#allocation9 + $0x180] sm:$0xff]  ;;  %v966_v18 = vld [vmem:[#allocation9 + $0x188] sm:$0xff]  ;;  %v409_v25 = vadd.f32 %v3765_v46, %v370_v14  ;;  %v440_v29 = vmax.f32 %v408_v21, 0.0  ;;  %v411_v30 = vadd.f32 %v3765_v46, %v372_v22 }
  0xa3   : > { %517 = vst [vmem:[#allocation2 + $0x188] sm:$0xff] %v3434_v1  ;;  %518 = vst [vmem:[#allocation2 + $0x190] sm:$0x3] %v3434_v1  ;;  %2748 = vmatpush1.bf16.msra.mxu0 %v2747_v38  ;;  %2701 = vmatprep.subr.bf16.mxu1 %v5140_v0  ;;  %v337_v28 = vld [vmem:[%s3680_s14 + $0x58] sm:$0xff]  ;;  %v374_v31 = vmul.f32 %v3762_v44, %v335_v16  ;;  %v375_v32 = vmul.f32 %v3762_v44, %v336_v23  ;;  %v442_v37 = vmax.f32 %v410_v26, 0.0  ;;  %v937_v54 = vld [vmem:[#allocation9 + $0xa0] sm:$0xff] }
  0xa4   : > { %521 = vst [vmem:[#allocation2 + $0x1a8] sm:$0x3] %v3434_v1  ;;  %2749 = vmatprep.subr.bf16.mxu0 %v5140_v0  ;;  %523 = vst [vmem:[#allocation2 + $0x19] sm:$0xff] %v436_v62  ;;  %v2756_v33 = vpack.c.bf16 %v966_v18, %v965_v17  ;;  %v935_v34 = vld [vmem:[#allocation9 + $0x90] sm:$0xff]  ;;  %v936_v35 = vld [vmem:[#allocation9 + $0x98] sm:$0xff]  ;;  %v441_v36 = vmax.f32 %v409_v25, 0.0  ;;  %v412_v38 = vadd.f32 %v3765_v46, %v373_v27 }
  0xa5   : > { %524 = vst [vmem:[#allocation2 + $0x21] sm:$0xff] %v437_v13  ;;  %525 = vst [vmem:[#allocation2 + $0x31] sm:$0xff] %v438_v19  ;;  %v967_v39 = vld [vmem:[#allocation9 + $0x190] sm:$0xff]  ;;  %v968_v40 = vld [vmem:[#allocation9 + $0x198] sm:$0xff]  ;;  %v443_v41 = vmax.f32 %v411_v30, 0.0  ;;  %v413_v42 = vadd.f32 %v3765_v46, %v374_v31  ;;  %v414_v43 = vadd.f32 %v3765_v46, %v375_v32  ;;  %v376_v45 = vmul.f32 %v3762_v44, %v337_v28 }
  0xa6   : > { %2703 = vmatpush1.bf16.msra.mxu1 %v2702_v47  ;;  %526 = vst [vmem:[#allocation2 + $0x39] sm:$0xff] %v439_v20  ;;  %527 = vst [vmem:[#allocation2 + $0x49] sm:$0xff] %v440_v29  ;;  %v444_v47 = vmax.f32 %v412_v38, 0.0  ;;  %v2711_v48 = vpack.c.bf16 %v936_v35, %v935_v34  ;;  %v2759_v53 = vpack.c.bf16 %v968_v40, %v967_v39  ;;  %v938_v55 = vld [vmem:[#allocation9 + $0xa8] sm:$0xff]  ;;  %v969_v56 = vld [vmem:[#allocation9 + $0x1a0] sm:$0xff] }
  0xa7   : > { %2751 = vmatpush1.bf16.msra.mxu0 %v2750_v50  ;;  %2704 = vmatprep.subr.bf16.mxu1 %v5140_v0  ;;  %528 = vst [vmem:[#allocation2 + $0x51] sm:$0xff] %v441_v36  ;;  %529 = vst [vmem:[#allocation2 + $0x61] sm:$0xff] %v442_v37  ;;  %v445_v50 = vmax.f32 %v413_v42, 0.0  ;;  %v446_v51 = vmax.f32 %v414_v43, 0.0  ;;  %v415_v52 = vadd.f32 %v3765_v46, %v376_v45  ;;  %v970_v57 = vld [vmem:[#allocation9 + $0x1a8] sm:$0xff]  ;;  %v338_v60 = vld [vmem:[%s3680_s14 + $0x60] sm:$0xff] }
  0xa8   : > { %2752 = vmatprep.subr.bf16.mxu0 %v5140_v0  ;;  %530 = vst [vmem:[#allocation2 + $0x69] sm:$0xff] %v443_v41  ;;  %531 = vst [vmem:[#allocation2 + $0x79] sm:$0xff] %v444_v47  ;;  %v2714_v59 = vpack.c.bf16 %v938_v55, %v937_v54  ;;  %v2762_v61 = vpack.c.bf16 %v970_v57, %v969_v56  ;;  %v939_v62 = vld [vmem:[#allocation9 + $0xb0] sm:$0xff]  ;;  %v940_v63 = vld [vmem:[#allocation9 + $0xb8] sm:$0xff]  ;;  %v377_v6 = vmul.f32 %v3762_v44, %v338_v60 }
  0xa9   : > { %532 = vst [vmem:[#allocation2 + $0x81] sm:$0xff] %v445_v50  ;;  %533 = vst [vmem:[#allocation2 + $0x91] sm:$0xff] %v446_v51  ;;  %v447_v58 = vmax.f32 %v415_v52, 0.0  ;;  %v339_v3 = vld [vmem:[%s3680_s14 + $0x68] sm:$0xff]  ;;  %v971_v4 = vld [vmem:[#allocation9 + $0x1b0] sm:$0xff]  ;;  %v2717_v7 = vpack.c.bf16 %v940_v63, %v939_v62 }
  0xaa   : > { %2706 = vmatpush1.bf16.msra.mxu1 %v2705_v5  ;;  %v972_v5 = vld [vmem:[#allocation9 + $0x1b8] sm:$0xff]  ;;  %v378_v8 = vmul.f32 %v3762_v44, %v339_v3  ;;  %v941_v10 = vld [vmem:[#allocation9 + $0xc0] sm:$0xff]  ;;  %v942_v11 = vld [vmem:[#allocation9 + $0xc8] sm:$0xff]  ;;  %v416_v15 = vadd.f32 %v3765_v46, %v377_v6  ;;  %v771_v3 = vrot.slane %v3434_v1, 2 }
  0xab   : > { %2754 = vmatpush1.bf16.msra.mxu0 %v2753_v12  ;;  %2707 = vmatprep.subr.bf16.mxu1 %v5140_v0  ;;  %v3806_v49 = vld [vmem:[#allocation2 + $0x18] sm:$0xff]  ;;  %534 = vst [vmem:[#allocation2 + $0x99] sm:$0xff] %v447_v58  ;;  %v2765_v9 = vpack.c.bf16 %v972_v5, %v971_v4  ;;  %v340_v14 = vld [vmem:[%s3680_s14 + $0x70] sm:$0xff]  ;;  %v2720_v16 = vpack.c.bf16 %v942_v11, %v941_v10  ;;  %v944_v20 = vld [vmem:[#allocation9 + $0xd8] sm:$0xff] }
  0xac   : > { %2755 = vmatprep.subr.bf16.mxu0 %v5140_v0  ;;  %1350 = vmatprep.mubr.f32.mxu0 %v3806_v49  ;;  %v973_v12 = vld [vmem:[#allocation9 + $0x1c0] sm:$0xff]  ;;  %v974_v13 = vld [vmem:[#allocation9 + $0x1c8] sm:$0xff]  ;;  %v943_v17 = vld [vmem:[#allocation9 + $0xd0] sm:$0xff]  ;;  %v417_v18 = vadd.f32 %v3765_v46, %v378_v8  ;;  %v379_v23 = vmul.f32 %v3762_v44, %v340_v14  ;;  %v448_v26 = vmax.f32 %v416_v15, 0.0 }
  0xad   : > { %v2768_v19 = vpack.c.bf16 %v974_v13, %v973_v12  ;;  %v975_v21 = vld [vmem:[#allocation9 + $0x1d0] sm:$0xff]  ;;  %v976_v22 = vld [vmem:[#allocation9 + $0x1d8] sm:$0xff]  ;;  %v2723_v27 = vpack.c.bf16 %v944_v20, %v943_v17  ;;  %v945_v29 = vld [vmem:[#allocation9 + $0xe0] sm:$0xff] }
  0xae   : > { %2709 = vmatpush1.bf16.msra.mxu1 %v2708_v24  ;;  %v341_v24 = vld [vmem:[%s3680_s14 + $0x78] sm:$0xff]  ;;  %v342_v25 = vld [vmem:[%s3680_s14 + $0x80] sm:$0xff]  ;;  %v2771_v28 = vpack.c.bf16 %v976_v22, %v975_v21  ;;  %v946_v30 = vld [vmem:[#allocation9 + $0xe8] sm:$0xff]  ;;  %v449_v32 = vmax.f32 %v417_v18, 0.0  ;;  %535 = vst [vmem:[#allocation2 + $0xa9] sm:$0xff] %v448_v26  ;;  %v418_v34 = vadd.f32 %v3765_v46, %v379_v23  ;;  %v663_v26 = vrot.slane %v3806_v49, 1 }
  0xaf   : > { %2757 = vmatpush1.bf16.msra.mxu0 %v2756_v33  ;;  %2710 = vmatprep.subr.bf16.mxu1 %v5140_v0  ;;  %v977_v31 = vld [vmem:[#allocation9 + $0x1e0] sm:$0xff]  ;;  %v978_v33 = vld [vmem:[#allocation9 + $0x1e8] sm:$0xff]  ;;  %v380_v35 = vmul.f32 %v3762_v44, %v341_v24  ;;  %v381_v36 = vmul.f32 %v3762_v44, %v342_v25  ;;  %v345_v39 = vld [vmem:[%s3680_s14 + $0x98] sm:$0xff]  ;;  %v2726_v45 = vpack.c.bf16 %v946_v30, %v945_v29 }
  0xb0   : > { %2758 = vmatprep.subr.bf16.mxu0 %v5140_v0  ;;  %v343_v37 = vld [vmem:[%s3680_s14 + $0x88] sm:$0xff]  ;;  %v344_v38 = vld [vmem:[%s3680_s14 + $0x90] sm:$0xff]  ;;  %536 = vst [vmem:[#allocation2 + $0xb1] sm:$0xff] %v449_v32  ;;  %v346_v40 = vld [vmem:[%s3680_s14 + $0xa0] sm:$0xff]  ;;  %v450_v41 = vmax.f32 %v418_v34, 0.0  ;;  %v2774_v47 = vpack.c.bf16 %v978_v33, %v977_v31  ;;  %v384_v56 = vmul.f32 %v3762_v44, %v345_v39 }
  0xb1   : > { %v419_v42 = vadd.f32 %v3765_v46, %v380_v35  ;;  %v420_v43 = vadd.f32 %v3765_v46, %v381_v36  ;;  %v383_v50 = vmul.f32 %v3762_v44, %v344_v38  ;;  %v347_v51 = vld [vmem:[%s3680_s14 + $0xa8] sm:$0xff]  ;;  %v947_v52 = vld [vmem:[#allocation9 + $0xf0] sm:$0xff]  ;;  %v385_v57 = vmul.f32 %v3762_v44, %v346_v40  ;;  %v980_v60 = vld [vmem:[#allocation9 + $0x1f8] sm:$0xff] }
  0xb2   : > { %2712 = vmatpush1.bf16.msra.mxu1 %v2711_v48  ;;  %v382_v48 = vmul.f32 %v3762_v44, %v343_v37  ;;  %537 = vst [vmem:[#allocation2 + $0xc1] sm:$0xff] %v450_v41  ;;  %v348_v58 = vld [vmem:[%s3680_s14 + $0xb0] sm:$0xff]  ;;  %v423_v4 = vadd.f32 %v3765_v46, %v384_v56  ;;  %v386_v6 = vmul.f32 %v3762_v44, %v347_v51  ;;  %v981_v12 = vld [vmem:[#allocation9 + $0x200] sm:$0xff]  ;;  %v984_v29 = vld [vmem:[#allocation9 + $0x218] sm:$0xff]  ;;  %v776_v37 = vrot.slane %v3806_v49, 2 }
  0xb3   : > { %2760 = vmatpush1.bf16.msra.mxu0 %v2759_v53  ;;  %2713 = vmatprep.subr.bf16.mxu1 %v5140_v0  ;;  %v948_v53 = vld [vmem:[#allocation9 + $0xf8] sm:$0xff]  ;;  %v451_v54 = vmax.f32 %v419_v42, 0.0  ;;  %v452_v55 = vmax.f32 %v420_v43, 0.0  ;;  %v422_v63 = vadd.f32 %v3765_v46, %v383_v50  ;;  %v424_v5 = vadd.f32 %v3765_v46, %v385_v57  ;;  %v982_v13 = vld [vmem:[#allocation9 + $0x208] sm:$0xff]  ;;  %v1013_v18 = vld [vmem:[#allocation9 + $0x300] sm:$0xff] }
  0xb4   : > { %2761 = vmatprep.subr.bf16.mxu0 %v5140_v0  ;;  %v421_v62 = vadd.f32 %v3765_v46, %v382_v48  ;;  %v387_v10 = vmul.f32 %v3762_v44, %v348_v58  ;;  %v455_v15 = vmax.f32 %v423_v4, 0.0  ;;  %v3857_v17 = vld [vmem:[#allocation2 + $0x20] sm:$0xff]  ;;  %v2780_v23 = vpack.c.bf16 %v982_v13, %v981_v12  ;;  %v349_v31 = vld [vmem:[%s3680_s14 + $0xb8] sm:$0xff]  ;;  %v350_v34 = vld [vmem:[%s3680_s14 + $0xc0] sm:$0xff] }
  0xb5   : > { %538 = vst [vmem:[#allocation2 + $0xc9] sm:$0xff] %v451_v54  ;;  %539 = vst [vmem:[#allocation2 + $0xd9] sm:$0xff] %v452_v55  ;;  %v456_v20 = vmax.f32 %v424_v5, 0.0  ;;  %v3867_v32 = vld [vmem:[#allocation2 + $0x28] sm:$0x3]  ;;  %v1016_v35 = vld [vmem:[#allocation9 + $0x318] sm:$0xff]  ;;  %v388_v39 = vmul.f32 %v3762_v44, %v349_v31 }
  0xb6   : > { %2715 = vmatpush1.bf16.msra.mxu1 %v2714_v59  ;;  %v979_v59 = vld [vmem:[#allocation9 + $0x1f0] sm:$0xff]  ;;  %v453_v8 = vmax.f32 %v421_v62, 0.0  ;;  %542 = vst [vmem:[#allocation2 + $0xf9] sm:$0xff] %v455_v15  ;;  %v426_v22 = vadd.f32 %v3765_v46, %v387_v10  ;;  %v777_v41 = vrot.slane %v3857_v17, 2  ;;  %v666_v42 = vrot.slane %v3867_v32, 1  ;;  %v985_v43 = vld [vmem:[#allocation9 + $0x220] sm:$0xff] }
  0xb7   : > { %2763 = vmatpush1.bf16.msra.mxu0 %v2762_v61  ;;  %2716 = vmatprep.subr.bf16.mxu1 %v5140_v0  ;;  %v557_v61 = vld [vmem:[#allocation2 + $0x10] sm:$0x3]  ;;  %v2777_v11 = vpack.c.bf16 %v980_v60, %v979_v59  ;;  %543 = vst [vmem:[#allocation2 + $0x109] sm:$0xff] %v456_v20  ;;  %v3886_v50 = vld [vmem:[#allocation2 + $0x38] sm:$0xff]  ;;  %v779_v54 = vrot.slane %v3867_v32, 2  ;;  %v427_v57 = vadd.f32 %v3765_v46, %v388_v39  ;;  %v3924_v12 = vld [vmem:[#allocation9 + $0x250] sm:$0xff] }
  0xb8   : > { %2764 = vmatprep.subr.bf16.mxu0 %v5140_v0  ;;  %v661_v14 = vrot.slane %v557_v61, 1  ;;  %540 = vst [vmem:[#allocation2 + $0xe1] sm:$0xff] %v453_v8  ;;  %v774_v24 = vrot.slane %v557_v61, 2  ;;  %v458_v30 = vmax.f32 %v426_v22, 0.0  ;;  %v3883_v48 = vld [vmem:[#allocation2 + $0x30] sm:$0xff]  ;;  %v3899_v58 = vsel %vm770_vm1, %v776_v37, %v777_v41  ;;  %v987_v61 = vld [vmem:[#allocation9 + $0x230] sm:$0xff] }
  0xb9   : > { %v668_v55 = vrot.slane %v3883_v48, 1  ;;  %v669_v59 = vrot.slane %v3886_v50, 1  ;;  %v3905_v60 = vld [vmem:[#allocation2 + $0x40] sm:$0x3]  ;;  %v1019_v8 = vld [vmem:[#allocation9 + $0x330] sm:$0xff]  ;;  %v351_v10 = vld [vmem:[%s3680_s14 + $0xc8] sm:$0xff]  ;;  %v3931_v15 = vsel %vm770_vm1, %v777_v41, %v779_v54 }
  0xba   : > { %2718 = vmatpush1.bf16.msra.mxu1 %v2717_v7  ;;  %v2729_v7 = vpack.c.bf16 %v948_v53, %v947_v52  ;;  %v662_v25 = vsel %vm657_vm0, %v3698_v2, %v661_v14  ;;  %v1015_v2 = vld [vmem:[#allocation9 + $0x310] sm:$0xff]  ;;  %545 = vst [vmem:[#allocation2 + $0x121] sm:$0xff] %v458_v30  ;;  %v775_v36 = vsel %vm770_vm1, %v771_v3, %v774_v24  ;;  %v1017_v52 = vld [vmem:[#allocation9 + $0x320] sm:$0xff]  ;;  %v1018_v53 = vld [vmem:[#allocation9 + $0x328] sm:$0xff] }
  0xbb   : > { %2766 = vmatpush1.bf16.msra.mxu0 %v2765_v9  ;;  %2719 = vmatprep.subr.bf16.mxu1 %v5140_v0  ;;  %v454_v9 = vmax.f32 %v422_v63, 0.0  ;;  %v3889_v51 = vpack.c.bf16 %v1016_v35, %v1015_v2  ;;  %v988_v63 = vld [vmem:[#allocation9 + $0x238] sm:$0xff]  ;;  %v3911_v4 = vld [vmem:[#allocation9 + $0x248] sm:$0xff]  ;;  %v3914_v5 = vpack.c.bf16 %v1018_v53, %v1017_v52  ;;  %v1021_v30 = vld [vmem:[#allocation9 + $0x340] sm:$0xff] }
  0xbc   : > { %2767 = vmatprep.subr.bf16.mxu0 %v5140_v0  ;;  %v3926_v13 = vld [vmem:[#allocation9 + $0x258] sm:$0xff]  ;;  %v352_v14 = vld [vmem:[%s3680_s14 + $0xd0] sm:$0xff]  ;;  %v3971_v41 = vld [vmem:[#allocation2 + $0x58] sm:$0x3] }
  0xbd   : > { %541 = vst [vmem:[#allocation2 + $0xf1] sm:$0xff] %v454_v9  ;;  %v1020_v9 = vld [vmem:[#allocation9 + $0x338] sm:$0xff]  ;;  %v1022_v31 = vld [vmem:[#allocation9 + $0x348] sm:$0xff]  ;;  %v391_v32 = vmul.f32 %v3762_v44, %v352_v14 }
  0xbe   : > { %2721 = vmatpush1.bf16.msra.mxu1 %v2720_v16  ;;  %v425_v16 = vadd.f32 %v3765_v46, %v386_v6  ;;  %v781_v6 = vrot.slane %v3883_v48, 2  ;;  %v353_v20 = vld [vmem:[%s3680_s14 + $0xd8] sm:$0xff]  ;;  %v3939_v22 = vld [vmem:[#allocation2 + $0x50] sm:$0xff]  ;;  %v3945_v24 = vpack.c.bf16 %v1020_v9, %v1019_v8  ;;  %v356_v37 = vld [vmem:[%s3680_s14 + $0xf0] sm:$0xff] }
  0xbf   : > { %2769 = vmatpush1.bf16.msra.mxu0 %v2768_v19  ;;  %2722 = vmatprep.subr.bf16.mxu1 %v5140_v0  ;;  %v1014_v19 = vld [vmem:[#allocation9 + $0x308] sm:$0xff]  ;;  %v357_v54 = vld [vmem:[%s3680_s14 + $0xf8] sm:$0xff] }
  0xc0   : > { %2770 = vmatprep.subr.bf16.mxu0 %v5140_v0  ;;  %v457_v21 = vmax.f32 %v425_v16, 0.0  ;;  %v3869_v33 = vpack.c.bf16 %v1014_v19, %v1013_v18  ;;  %v3934_v16 = vsel %vm657_vm0, %v668_v55, %v669_v59  ;;  %v2789_v18 = vpack.c.bf16 %v988_v63, %v987_v61 }
  0xc1   : > { %v395_v61 = vmul.f32 %v3762_v44, %v356_v37 }
  0xc2   : > { %2724 = vmatpush1.bf16.msra.mxu1 %v2723_v27  ;;  %v664_v27 = vrot.slane %v3857_v17, 1  ;;  %544 = vst [vmem:[#allocation2 + $0x111] sm:$0xff] %v457_v21  ;;  %v3937_v21 = vld [vmem:[#allocation2 + $0x48] sm:$0xff] }
  0xc3   : > { %2772 = vmatpush1.bf16.msra.mxu0 %v2771_v28  ;;  %2725 = vmatprep.subr.bf16.mxu1 %v5140_v0  ;;  %v983_v28 = vld [vmem:[#allocation9 + $0x210] sm:$0xff]  ;;  %v673_v2 = vrot.slane %v3937_v21, 1  ;;  %v786_v39 = vrot.slane %v3937_v21, 2  ;;  %v434_v9 = vadd.f32 %v3765_v46, %v395_v61 }
  0xc4   : > { %2773 = vmatprep.subr.bf16.mxu0 %v5140_v0  ;;  %v2783_v38 = vpack.c.bf16 %v984_v29, %v983_v28  ;;  %v3878_v40 = vsel %vm657_vm0, %v663_v26, %v664_v27  ;;  %v354_v26 = vld [vmem:[%s3680_s14 + $0xe0] sm:$0xff]  ;;  %v784_v28 = vrot.slane %v3905_v60, 2  ;;  %v2795_v29 = vpack.c.bf16 %v3926_v13, %v3924_v12 }
  0xc5   : > { %v1028_v12 = vld [vmem:[#allocation9 + $0x378] sm:$0xff] }
  0xc6   : > { %2727 = vmatpush1.bf16.msra.mxu1 %v2726_v45  ;;  %v986_v45 = vld [vmem:[#allocation9 + $0x228] sm:$0xff] }
  0xc7   : > { %2775 = vmatpush1.bf16.msra.mxu0 %v2774_v47  ;;  %2728 = vmatprep.subr.bf16.mxu1 %v5140_v0  ;;  %v389_v47 = vmul.f32 %v3762_v44, %v350_v34  ;;  %v2786_v56 = vpack.c.bf16 %v986_v45, %v985_v43  ;;  %v355_v34 = vld [vmem:[%s3680_s14 + $0xe8] sm:$0xff]  ;;  %v393_v43 = vmul.f32 %v3762_v44, %v354_v26 }
  0xc8   : > { %2776 = vmatprep.subr.bf16.mxu0 %v5140_v0  ;;  %v3977_v45 = vpack.c.bf16 %v1022_v31, %v1021_v30  ;;  %v394_v53 = vmul.f32 %v3762_v44, %v355_v34  ;;  %v995_v31 = vld [vmem:[#allocation9 + $0x270] sm:$0xff] }
  0xc9   : > { %v428_v62 = vadd.f32 %v3765_v46, %v389_v47 }
  0xca   : > { %2730 = vmatpush1.bf16.msra.mxu1 %v2729_v7  ;;  %v782_v7 = vrot.slane %v3886_v50, 2 }
  0xcb   : > { %2778 = vmatpush1.bf16.msra.mxu0 %v2777_v11  ;;  %2907 = vmatprep.subr.bf16.mxu1 %v5140_v0  ;;  %v671_v11 = vrot.slane %v3905_v60, 1  ;;  %v460_v19 = vmax.f32 %v428_v62, 0.0  ;;  %v432_v60 = vadd.f32 %v3765_v46, %v393_v43  ;;  %v787_v62 = vrot.slane %v3939_v22, 2  ;;  %v4045_v43 = vld [vmem:[#allocation2 + $0x80] sm:$0xff] }
  0xcc   : > { %2779 = vmatprep.subr.bf16.mxu0 %v5140_v0  ;;  %v3984_v55 = vsel %vm770_vm1, %v782_v7, %v784_v28 }
  0xcd   : > { %1126 = vmatmul.mubr.f32.vlgmr.msra.gmra.mrb[0].mxu1 %v3434_v1  ;;  %547 = vst [vmem:[#allocation2 + $0x139] sm:$0xff] %v460_v19  ;;  %v464_v8 = vmax.f32 %v432_v60, 0.0  ;;  %v1026_v19 = vld [vmem:[#allocation9 + $0x368] sm:$0xff] }
  0xce   : > { %1351 = vmatmul.mubr.f32.vlgmr.msra.gmra.mrb[0].mxu0 %v771_v3  ;;  %1130 = vmatprep.mubr.f32.mxu1 %v662_v25  ;;  %v3909_v3 = vld [vmem:[#allocation9 + $0x240] sm:$0xff]  ;;  %v390_v25 = vmul.f32 %v3762_v44, %v351_v10  ;;  %v396_v10 = vmul.f32 %v3762_v44, %v357_v54  ;;  %v1030_v54 = vld [vmem:[#allocation9 + $0x388] sm:$0xff] }
  0xcf   : > { %2781 = vmatpush1.bf16.msra.mxu0 %v2780_v23  ;;  %1355 = vmatprep.mubr.f32.mxu0 %v3857_v17  ;;  %v2792_v23 = vpack.c.bf16 %v3911_v4, %v3909_v3  ;;  %v433_v3 = vadd.f32 %v3765_v46, %v394_v53  ;;  %551 = vst [vmem:[#allocation2 + $0x169] sm:$0xff] %v464_v8  ;;  %v1029_v53 = vld [vmem:[#allocation9 + $0x380] sm:$0xff] }
  0xd0   : > { %2782 = vmatprep.subr.bf16.mxu0 %v5140_v0  ;;  %2923 = vmatpush1.bf16.msra.mxu1 %v3869_v33  ;;  %v429_v35 = vadd.f32 %v3765_v46, %v390_v25  ;;  %v435_v34 = vadd.f32 %v3765_v46, %v396_v10 }
  0xd1   : > { %1131 = vmatmul.mubr.f32.gmra.mrb[2].mxu1 %v3434_v1  ;;  %2908 = vmatprep.subr.bf16.mxu1 %v5140_v0  ;;  %v3902_v1 = vsel %vm657_vm0, %v664_v27, %v666_v42  ;;  %v3951_v27 = vsel %vm770_vm1, %v781_v6, %v782_v7  ;;  %v430_v42 = vadd.f32 %v3765_v46, %v391_v32  ;;  %v993_v6 = vld [vmem:[#allocation9 + $0x260] sm:$0xff]  ;;  %v994_v7 = vld [vmem:[#allocation9 + $0x268] sm:$0xff]  ;;  %v996_v32 = vld [vmem:[#allocation9 + $0x278] sm:$0xff] }
  0xd2   : > { %1356 = vmatmul.mubr.f32.gmra.mrb[2].mxu0 %v775_v36  ;;  %1135 = vmatprep.mubr.f32.mxu1 %v3878_v40  ;;  %v392_v36 = vmul.f32 %v3762_v44, %v353_v20  ;;  %v461_v47 = vmax.f32 %v429_v35, 0.0  ;;  %v465_v20 = vmax.f32 %v433_v3, 0.0  ;;  %v466_v44 = vmax.f32 %v434_v9, 0.0 }
  0xd3   : > { %1360 = vmatprep.mubr.f32.mxu0 %v3883_v48  ;;  %2784 = vmatpush1.bf16.msra.mxu0 %v2783_v38  ;;  %v674_v38 = vrot.slane %v3939_v22, 1  ;;  %v2798_v26 = vpack.c.bf16 %v994_v7, %v993_v6  ;;  %v467_v13 = vmax.f32 %v435_v34, 0.0  ;;  %v4066_v3 = vpack.c.bf16 %v1030_v54, %v1029_v53  ;;  %v1031_v6 = vld [vmem:[#allocation9 + $0x390] sm:$0xff]  ;;  %v1032_v7 = vld [vmem:[#allocation9 + $0x398] sm:$0xff] }
  0xd4   : > { %2785 = vmatprep.subr.bf16.mxu0 %v5140_v0  ;;  %2924 = vmatpush1.bf16.msra.mxu1 %v3889_v51  ;;  %v431_v52 = vadd.f32 %v3765_v46, %v392_v36  ;;  %548 = vst [vmem:[#allocation2 + $0x141] sm:$0xff] %v461_v47  ;;  %552 = vst [vmem:[#allocation2 + $0x171] sm:$0xff] %v465_v20  ;;  %v1027_v36 = vld [vmem:[#allocation9 + $0x370] sm:$0xff]  ;;  %v998_v47 = vld [vmem:[#allocation9 + $0x288] sm:$0xff]  ;;  %v797_v9 = vrot.slane %v4045_v43, 2 }
  0xd5   : > { %1136 = vmatmul.mubr.f32.gmra.mrb[4].mxu1 %v3806_v49  ;;  %2909 = vmatprep.subr.bf16.mxu1 %v5140_v0  ;;  %v459_v49 = vmax.f32 %v427_v57, 0.0  ;;  %v1024_v57 = vld [vmem:[#allocation9 + $0x358] sm:$0xff]  ;;  %v3996_v4 = vsel %vm657_vm0, %v673_v2, %v674_v38  ;;  %553 = vst [vmem:[#allocation2 + $0x181] sm:$0xff] %v466_v44  ;;  %554 = vst [vmem:[#allocation2 + $0x189] sm:$0xff] %v467_v13  ;;  %v4083_v44 = vld [vmem:[#allocation2 + $0x98] sm:$0xff] }
  0xd6   : > { %1361 = vmatmul.mubr.f32.gmra.mrb[4].mxu0 %v3899_v58  ;;  %1140 = vmatprep.mubr.f32.mxu1 %v3902_v1  ;;  %v463_v63 = vmax.f32 %v431_v52, 0.0  ;;  %v569_v2 = vld [vmem:[#allocation2 + $0x70] sm:$0x3]  ;;  %v4049_v52 = vpack.c.bf16 %v1028_v12, %v1027_v36  ;;  %5225 = vst [vmem:[#allocation20_spill] sm:$0xff] %v4066_v3  ;;  %v575_v13 = vld [vmem:[#allocation2 + $0xa0] sm:$0x3] }
  0xd7   : > { %1365 = vmatprep.mubr.f32.mxu0 %v3886_v50  ;;  %2787 = vmatpush1.bf16.msra.mxu0 %v2786_v56  ;;  %546 = vst [vmem:[#allocation2 + $0x129] sm:$0xff] %v459_v49  ;;  %v1023_v56 = vld [vmem:[#allocation9 + $0x350] sm:$0xff]  ;;  %v802_v53 = vrot.slane %v4083_v44, 2 }
  0xd8   : > { %2788 = vmatprep.subr.bf16.mxu0 %v5140_v0  ;;  %2925 = vmatpush1.bf16.msra.mxu1 %v3914_v5  ;;  %v4002_v49 = vld [vmem:[#allocation2 + $0x68] sm:$0xff]  ;;  %v4006_v14 = vpack.c.bf16 %v1024_v57, %v1023_v56  ;;  %550 = vst [vmem:[#allocation2 + $0x159] sm:$0xff] %v463_v63  ;;  %v794_v56 = vrot.slane %v569_v2, 2 }
  0xd9   : > { %1141 = vmatmul.mubr.f32.gmra.mrb[6].mxu1 %v3857_v17  ;;  %2910 = vmatprep.subr.bf16.mxu1 %v5140_v0  ;;  %v3962_v17 = vsel %vm657_vm0, %v669_v59, %v671_v11  ;;  %v462_v59 = vmax.f32 %v430_v42, 0.0  ;;  %v4000_v11 = vld [vmem:[#allocation2 + $0x60] sm:$0xff]  ;;  %v679_v30 = vrot.slane %v4002_v49, 1  ;;  %v4043_v42 = vld [vmem:[#allocation2 + $0x78] sm:$0xff]  ;;  %v1000_v63 = vld [vmem:[#allocation9 + $0x298] sm:$0xff] }
  0xda   : > { %1366 = vmatmul.mubr.f32.gmra.mrb[6].mxu0 %v3931_v15  ;;  %1145 = vmatprep.mubr.f32.mxu1 %v3934_v16  ;;  %v678_v25 = vrot.slane %v4000_v11, 1  ;;  %v791_v46 = vrot.slane %v4000_v11, 2  ;;  %v683_v57 = vrot.slane %v4043_v42, 1  ;;  %v796_v8 = vrot.slane %v4043_v42, 2 }
  0xdb   : > { %1370 = vmatprep.mubr.f32.mxu0 %v3937_v21  ;;  %2790 = vmatpush1.bf16.msra.mxu0 %v2789_v18  ;;  %549 = vst [vmem:[#allocation2 + $0x151] sm:$0xff] %v462_v59  ;;  %v1025_v18 = vld [vmem:[#allocation9 + $0x360] sm:$0xff] }
  0xdc   : > { %2791 = vmatprep.subr.bf16.mxu0 %v5140_v0  ;;  %2926 = vmatpush1.bf16.msra.mxu1 %v3945_v24  ;;  %v4028_v35 = vpack.c.bf16 %v1026_v19, %v1025_v18 }
  0xdd   : > { %1146 = vmatmul.mubr.f32.gmra.mrb[8].mxu1 %v3883_v48  ;;  %2911 = vmatprep.subr.bf16.mxu1 %v5140_v0  ;;  %v676_v48 = vrot.slane %v3971_v41, 1 }
  0xde   : > { %1371 = vmatmul.mubr.f32.gmra.mrb[8].mxu0 %v3951_v27  ;;  %1150 = vmatprep.mubr.f32.mxu1 %v3962_v17 }
  0xdf   : > { %1375 = vmatprep.mubr.f32.mxu0 %v3939_v22  ;;  %2793 = vmatpush1.bf16.msra.mxu0 %v2792_v23  ;;  %v789_v23 = vrot.slane %v3971_v41, 2  ;;  %v4019_v28 = vsel %vm657_vm0, %v674_v38, %v676_v48  ;;  %v4040_v38 = vsel %vm657_vm0, %v678_v25, %v679_v30  ;;  %v997_v41 = vld [vmem:[#allocation9 + $0x280] sm:$0xff]  ;;  %v999_v48 = vld [vmem:[#allocation9 + $0x290] sm:$0xff]  ;;  %v1002_v25 = vld [vmem:[#allocation9 + $0x2a8] sm:$0xff] }
  0xe0   : > { %2794 = vmatprep.subr.bf16.mxu0 %v5140_v0  ;;  %2927 = vmatpush1.bf16.msra.mxu1 %v3977_v45  ;;  %v2804_v61 = vpack.c.bf16 %v998_v47, %v997_v41  ;;  %v2807_v20 = vpack.c.bf16 %v1000_v63, %v999_v48  ;;  %v1036_v41 = vld [vmem:[#allocation9 + $0x3b8] sm:$0xff]  ;;  %v1006_v48 = vld [vmem:[#allocation9 + $0x2c8] sm:$0xff] }
  0xe1   : > { %1151 = vmatmul.mubr.f32.gmra.mrb[10].mxu1 %v3886_v50  ;;  %2912 = vmatprep.subr.bf16.mxu1 %v5140_v0  ;;  %v4016_v50 = vsel %vm770_vm1, %v786_v39, %v787_v62  ;;  %v4037_v37 = vsel %vm770_vm1, %v787_v62, %v789_v23  ;;  %v681_v39 = vrot.slane %v569_v2, 1  ;;  %v572_v62 = vld [vmem:[#allocation2 + $0x88] sm:$0x3]  ;;  %v1001_v23 = vld [vmem:[#allocation9 + $0x2a0] sm:$0xff] }
  0xe2   : > { %1376 = vmatmul.mubr.f32.gmra.mrb[10].mxu0 %v3984_v55  ;;  %1155 = vmatprep.mubr.f32.mxu1 %v3996_v4  ;;  %v686_v19 = vrot.slane %v572_v62, 1  ;;  %v799_v34 = vrot.slane %v572_v62, 2  ;;  %v2810_v12 = vpack.c.bf16 %v1002_v25, %v1001_v23  ;;  %v4121_v62 = vld [vmem:[#allocation2 + $0xb0] sm:$0xff]  ;;  %v578_v25 = vld [vmem:[#allocation2 + $0xb8] sm:$0x3] }
  0xe3   : > { %1380 = vmatprep.mubr.f32.mxu0 %v4000_v11  ;;  %2796 = vmatpush1.bf16.msra.mxu0 %v2795_v29  ;;  %v2801_v29 = vpack.c.bf16 %v996_v32, %v995_v31  ;;  %v4061_v60 = vsel %vm657_vm0, %v679_v30, %v681_v39  ;;  %v1033_v30 = vld [vmem:[#allocation9 + $0x3a0] sm:$0xff]  ;;  %v1034_v31 = vld [vmem:[#allocation9 + $0x3a8] sm:$0xff]  ;;  %v4094_v32 = vsel %vm770_vm1, %v796_v8, %v797_v9  ;;  %v1035_v39 = vld [vmem:[#allocation9 + $0x3b0] sm:$0xff] }
  0xe4   : > { %2797 = vmatprep.subr.bf16.mxu0 %v5140_v0  ;;  %2928 = vmatpush1.bf16.msra.mxu1 %v4006_v14  ;;  %v4114_v54 = vsel %vm770_vm1, %v797_v9, %v799_v34  ;;  %v4125_v63 = vpack.c.bf16 %v1036_v41, %v1035_v39  ;;  %v804_v9 = vrot.slane %v575_v13, 2  ;;  %v696_v39 = vrot.slane %v578_v25, 1 }
  0xe5   : > { %1156 = vmatmul.mubr.f32.gmra.mrb[12].mxu1 %v3937_v21  ;;  %2913 = vmatprep.subr.bf16.mxu1 %v5140_v0  ;;  %v792_v21 = vrot.slane %v4002_v49, 2  ;;  %5229 = vst [vmem:[#allocation24_spill] sm:$0xff] %v4114_v54 }
  0xe6   : > { %1381 = vmatmul.mubr.f32.gmra.mrb[12].mxu0 %v4016_v50  ;;  %1160 = vmatprep.mubr.f32.mxu1 %v4019_v28  ;;  %5230 = vst [vmem:[#allocation25_spill] sm:$0xff] %v4125_v63 }
  0xe7   : > { %1385 = vmatprep.mubr.f32.mxu0 %v4002_v49  ;;  %2799 = vmatpush1.bf16.msra.mxu0 %v2798_v26  ;;  %v4058_v59 = vsel %vm770_vm1, %v791_v46, %v792_v21  ;;  %v4076_v10 = vsel %vm770_vm1, %v792_v21, %v794_v56  ;;  %v4087_v26 = vpack.c.bf16 %v1032_v7, %v1031_v6  ;;  %v1003_v46 = vld [vmem:[#allocation9 + $0x2b0] sm:$0xff]  ;;  %v1037_v6 = vld [vmem:[#allocation9 + $0x3c0] sm:$0xff]  ;;  %v1038_v7 = vld [vmem:[#allocation9 + $0x3c8] sm:$0xff] }
  0xe8   : > { %2800 = vmatprep.subr.bf16.mxu0 %v5140_v0  ;;  %2929 = vmatpush1.bf16.msra.mxu1 %v4028_v35  ;;  %v4104_v21 = vpack.c.bf16 %v1034_v31, %v1033_v30  ;;  %v1007_v30 = vld [vmem:[#allocation9 + $0x2d0] sm:$0xff]  ;;  %v1008_v31 = vld [vmem:[#allocation9 + $0x2d8] sm:$0xff]  ;;  %v4142_v34 = vpack.c.bf16 %v1038_v7, %v1037_v6  ;;  %v1042_v6 = vld [vmem:[#allocation9 + $0x3e8] sm:$0xff] }
  0xe9   : > { %1161 = vmatmul.mubr.f32.gmra.mrb[14].mxu1 %v3939_v22  ;;  %2914 = vmatprep.subr.bf16.mxu1 %v5140_v0  ;;  %v684_v22 = vrot.slane %v4045_v43, 1  ;;  %5226 = vst [vmem:[#allocation21_spill] sm:$0xff] %v4087_v26  ;;  %v2819_v41 = vpack.c.bf16 %v1008_v31, %v1007_v30 }
  0xea   : > { %1386 = vmatmul.mubr.f32.gmra.mrb[14].mxu0 %v4037_v37  ;;  %1165 = vmatprep.mubr.f32.mxu1 %v4040_v38  ;;  %5228 = vst [vmem:[#allocation23_spill] sm:$0xff] %v4104_v21  ;;  %5232 = vst [vmem:[#allocation27_spill] sm:$0xff] %v4142_v34 }
  0xeb   : > { %1390 = vmatprep.mubr.f32.mxu0 %v4043_v42  ;;  %2802 = vmatpush1.bf16.msra.mxu0 %v2801_v29  ;;  %v4079_v18 = vsel %vm657_vm0, %v683_v57, %v684_v22  ;;  %v4098_v2 = vsel %vm657_vm0, %v684_v22, %v686_v19  ;;  %v1004_v29 = vld [vmem:[#allocation9 + $0x2b8] sm:$0xff]  ;;  %v1005_v22 = vld [vmem:[#allocation9 + $0x2c0] sm:$0xff] }
  0xec   : > { %2803 = vmatprep.subr.bf16.mxu0 %v5140_v0  ;;  %2930 = vmatpush1.bf16.msra.mxu1 %v4049_v52  ;;  %5227 = vst [vmem:[#allocation22_spill] sm:$0xff] %v4098_v2  ;;  %v2813_v57 = vpack.c.bf16 %v1004_v29, %v1003_v46  ;;  %v2816_v23 = vpack.c.bf16 %v1006_v48, %v1005_v22  ;;  %v1010_v22 = vld [vmem:[#allocation9 + $0x2e8] sm:$0xff] }
  0xed   : > { %1166 = vmatmul.mubr.f32.gmra.mrb[16].mxu1 %v4000_v11  ;;  %2915 = vmatprep.subr.bf16.mxu1 %v5140_v0  ;;  %v4081_v11 = vld [vmem:[#allocation2 + $0x90] sm:$0xff]  ;;  %v4152_v46 = vsel %vm770_vm1, %v802_v53, %v804_v9  ;;  %v809_v9 = vrot.slane %v578_v25, 2 }
  0xee   : > { %1391 = vmatmul.mubr.f32.gmra.mrb[16].mxu0 %v4058_v59  ;;  %1170 = vmatprep.mubr.f32.mxu1 %v4061_v60  ;;  %v688_v36 = vrot.slane %v4081_v11, 1  ;;  %v801_v47 = vrot.slane %v4081_v11, 2  ;;  %5233 = vst [vmem:[#allocation28_spill] sm:$0xff] %v4152_v46  ;;  %v1044_v25 = vld [vmem:[#allocation9 + $0x3f8] sm:$0xff] }
  0xef   : > { %1395 = vmatprep.mubr.f32.mxu0 %v4045_v43  ;;  %2805 = vmatpush1.bf16.msra.mxu0 %v2804_v61  ;;  %v4119_v61 = vld [vmem:[#allocation2 + $0xa8] sm:$0xff] }
  0xf0   : > { %2806 = vmatprep.subr.bf16.mxu0 %v5140_v0  ;;  %2931 = vmatpush1.bf16.msra.mxu1 %v4066_v3  ;;  %v4132_v8 = vsel %vm770_vm1, %v801_v47, %v802_v53  ;;  %v1009_v47 = vld [vmem:[#allocation9 + $0x2e0] sm:$0xff]  ;;  %v4291_v3 = vld [vmem:[#allocation2 + $0x128] sm:$0xff] }
  0xf1   : > { %1171 = vmatmul.mubr.f32.gmra.mrb[18].mxu1 %v4002_v49  ;;  %2916 = vmatprep.subr.bf16.mxu1 %v5140_v0  ;;  %v689_v49 = vrot.slane %v4083_v44, 1  ;;  %5231 = vst [vmem:[#allocation26_spill] sm:$0xff] %v4132_v8  ;;  %v1041_v53 = vld [vmem:[#allocation9 + $0x3e0] sm:$0xff]  ;;  %v2822_v31 = vpack.c.bf16 %v1010_v22, %v1009_v47  ;;  %v1046_v22 = vld [vmem:[#allocation9 + $0x408] sm:$0xff]  ;;  %5252 = vst [vmem:[#allocation46_spill] sm:$0xff] %v4291_v3 }
  0xf2   : > { %1396 = vmatmul.mubr.f32.gmra.mrb[18].mxu0 %v4076_v10  ;;  %1175 = vmatprep.mubr.f32.mxu1 %v4079_v18  ;;  %v1045_v47 = vld [vmem:[#allocation9 + $0x400] sm:$0xff] }
  0xf3   : > { %1400 = vmatprep.mubr.f32.mxu0 %v4081_v11  ;;  %2808 = vmatpush1.bf16.msra.mxu0 %v2807_v20  ;;  %v4117_v56 = vsel %vm657_vm0, %v688_v36, %v689_v49  ;;  %v693_v20 = vrot.slane %v4119_v61, 1  ;;  %v1039_v36 = vld [vmem:[#allocation9 + $0x3d0] sm:$0xff] }
  0xf4   : > { %2809 = vmatprep.subr.bf16.mxu0 %v5140_v0  ;;  %2932 = vmatpush1.bf16.msra.mxu1 %v4087_v26 }
  0xf5   : > { %1176 = vmatmul.mubr.f32.gmra.mrb[20].mxu1 %v4043_v42  ;;  %2917 = vmatprep.subr.bf16.mxu1 %v5140_v0  ;;  %v691_v42 = vrot.slane %v575_v13, 1  ;;  %v807_v13 = vrot.slane %v4121_v62, 2 }
  0xf6   : > { %1401 = vmatmul.mubr.f32.gmra.mrb[20].mxu0 %v4094_v32  ;;  %1180 = vmatprep.mubr.f32.mxu1 %v4098_v2  ;;  %v4289_v2 = vld [vmem:[#allocation2 + $0x120] sm:$0xff] }
  0xf7   : > { %1405 = vmatprep.mubr.f32.mxu0 %v4083_v44  ;;  %2811 = vmatpush1.bf16.msra.mxu0 %v2810_v12  ;;  %v4136_v19 = vsel %vm657_vm0, %v689_v49, %v691_v42  ;;  %v1040_v49 = vld [vmem:[#allocation9 + $0x3d8] sm:$0xff]  ;;  %v806_v12 = vrot.slane %v4119_v61, 2  ;;  %v4157_v42 = vld [vmem:[#allocation2 + $0xc0] sm:$0xff]  ;;  %5251 = vst [vmem:[#allocation45_spill] sm:$0xff] %v4289_v2 }
  0xf8   : > { %2812 = vmatprep.subr.bf16.mxu0 %v5140_v0  ;;  %2933 = vmatpush1.bf16.msra.mxu1 %v4104_v21  ;;  %v4163_v48 = vpack.c.bf16 %v1040_v49, %v1039_v36  ;;  %v581_v36 = vld [vmem:[#allocation2 + $0xd0] sm:$0x3]  ;;  %v1011_v49 = vld [vmem:[#allocation9 + $0x2f0] sm:$0xff] }
  0xf9   : > { %1181 = vmatmul.mubr.f32.gmra.mrb[22].mxu1 %v4045_v43  ;;  %2918 = vmatprep.subr.bf16.mxu1 %v5140_v0  ;;  %v694_v43 = vrot.slane %v4121_v62, 1  ;;  %v4170_v7 = vsel %vm770_vm1, %v806_v12, %v807_v13  ;;  %v1012_v12 = vld [vmem:[#allocation9 + $0x2f8] sm:$0xff] }
  0xfa   : > { %1406 = vmatmul.mubr.f32.gmra.mrb[22].mxu0 %v4114_v54  ;;  %1185 = vmatprep.mubr.f32.mxu1 %v4117_v56  ;;  %5234 = vst [vmem:[#allocation29_spill] sm:$0xff] %v4163_v48  ;;  %5235 = vst [vmem:[#allocation30_spill] sm:$0xff] %v4170_v7  ;;  %v4261_v21 = vld [vmem:[#allocation2 + $0x108] sm:$0xff]  ;;  %v719_v54 = vrot.slane %v4291_v3, 1 }
  0xfb   : > { %1410 = vmatprep.mubr.f32.mxu0 %v4119_v61  ;;  %2814 = vmatpush1.bf16.msra.mxu0 %v2813_v57  ;;  %v4155_v29 = vsel %vm657_vm0, %v693_v20, %v694_v43  ;;  %v4159_v57 = vld [vmem:[#allocation2 + $0xc8] sm:$0xff]  ;;  %v4174_v20 = vsel %vm657_vm0, %v694_v43, %v696_v39  ;;  %v4187_v39 = vsel %vm770_vm1, %v807_v13, %v809_v9  ;;  %v5238_v13 = vmov 0.0|0.0  }
  0xfc   : > { %2815 = vmatprep.subr.bf16.mxu0 %v5140_v0  ;;  %2934 = vmatpush1.bf16.msra.mxu1 %v4125_v63  ;;  %v699_v30 = vrot.slane %v4159_v57, 1  ;;  %v1043_v43 = vld [vmem:[#allocation9 + $0x3f0] sm:$0xff]  ;;  %5237 = vst [vmem:[#allocation32_spill] sm:$0xff] %v4187_v39  ;;  %v4195_v63 = vld [vmem:[#allocation2 + $0xd8] sm:$0xff]  ;;  %5245 = vst [vmem:[#allocation39_spill] sm:$0xff] %v4261_v21 }
  0xfd   : > { %1186 = vmatmul.mubr.f32.gmra.mrb[24].mxu1 %v4081_v11  ;;  %2919 = vmatprep.subr.bf16.mxu1 %v5140_v0  ;;  %v4201_v9 = vpack.c.bf16 %v1044_v25, %v1043_v43  ;;  %v703_v43 = vrot.slane %v4195_v63, 1 }
  0xfe   : > { %1411 = vmatmul.mubr.f32.gmra.mrb[24].mxu0 %v4132_v8  ;;  %1190 = vmatprep.mubr.f32.mxu1 %v4136_v19  ;;  %v590_v8 = vld [vmem:[#allocation2 + $0x118] sm:$0x3] }
  0xff   : > { %1415 = vmatprep.mubr.f32.mxu0 %v4121_v62  ;;  %2817 = vmatpush1.bf16.msra.mxu0 %v2816_v23  ;;  %v698_v23 = vrot.slane %v4157_v42, 1  ;;  %5239 = vst [vmem:[#allocation33_spill] sm:$0xff] %v4201_v9 }
 0x100   : > { %2818 = vmatprep.subr.bf16.mxu0 %v5140_v0  ;;  %2935 = vmatpush1.bf16.msra.mxu1 %v4142_v34  ;;  %v4180_v34 = vpack.c.bf16 %v1042_v6, %v1041_v53  ;;  %v812_v6 = vrot.slane %v4159_v57, 2 }
 0x101   : > { %1191 = vmatmul.mubr.f32.gmra.mrb[26].mxu1 %v4083_v44  ;;  %2920 = vmatprep.subr.bf16.mxu1 %v5140_v0  ;;  %v4192_v53 = vsel %vm657_vm0, %v698_v23, %v699_v30  ;;  %v4205_v23 = vpack.c.bf16 %v1046_v22, %v1045_v47  ;;  %v584_v47 = vld [vmem:[#allocation2 + $0xe8] sm:$0x3]  ;;  %v4233_v22 = vld [vmem:[#allocation2 + $0xf0] sm:$0xff] }
 0x102   : > { %1416 = vmatmul.mubr.f32.gmra.mrb[26].mxu0 %v4152_v46  ;;  %1195 = vmatprep.mubr.f32.mxu1 %v4155_v29  ;;  %5236 = vst [vmem:[#allocation31_spill] sm:$0xff] %v4180_v34  ;;  %v4263_v46 = vld [vmem:[#allocation2 + $0x110] sm:$0xff] }
 0x103   : > { %1420 = vmatprep.mubr.f32.mxu0 %v4157_v42  ;;  %2820 = vmatpush1.bf16.msra.mxu0 %v2819_v41  ;;  %v811_v41 = vrot.slane %v4157_v42, 2  ;;  %5246 = vst [vmem:[#allocation40_spill] sm:$0xff] %v4263_v46  ;;  %v714_v26 = vrot.slane %v4263_v46, 1 }
 0x104   : > { %2821 = vmatprep.subr.bf16.mxu0 %v5140_v0  ;;  %2936 = vmatpush1.bf16.msra.mxu1 %v4163_v48  ;;  %v2825_v48 = vpack.c.bf16 %v1012_v12, %v1011_v49 }
 0x105   : > { %1196 = vmatmul.mubr.f32.gmra.mrb[28].mxu1 %v4119_v61  ;;  %2921 = vmatprep.subr.bf16.mxu1 %v5140_v0  ;;  %v701_v0 = vrot.slane %v581_v36, 1  ;;  %v4211_v49 = vsel %vm770_vm1, %v811_v41, %v812_v6  ;;  %v706_v41 = vrot.slane %v584_v47, 1 }
 0x106   : > { %1421 = vmatmul.mubr.f32.gmra.mrb[28].mxu0 %v4170_v7  ;;  %1200 = vmatprep.mubr.f32.mxu1 %v4174_v20  ;;  %v4197_v7 = vld [vmem:[#allocation2 + $0xe0] sm:$0xff]  ;;  %5240 = vst [vmem:[#allocation34_spill] sm:$0xff] %v4211_v49 }
 0x107   : > { %1425 = vmatprep.mubr.f32.mxu0 %v4159_v57  ;;  %2823 = vmatpush1.bf16.msra.mxu0 %v2822_v31  ;;  %v814_v31 = vrot.slane %v581_v36, 2  ;;  %v4214_v12 = vsel %vm657_vm0, %v699_v30, %v701_v0  ;;  %v704_v25 = vrot.slane %v4197_v7, 1  ;;  %v816_v0 = vrot.slane %v4195_v63, 2 }
 0x108   : > { %2824 = vmatprep.subr.bf16.mxu0 %v5238_v13  ;;  %2937 = vmatpush1.bf16.msra.mxu1 %v4180_v34  ;;  %v817_v36 = vrot.slane %v4197_v7, 2  ;;  %v819_v34 = vrot.slane %v584_v47, 2  ;;  %v821_v47 = vrot.slane %v4233_v22, 2 }
 0x109   : > { %1201 = vmatmul.mubr.f32.gmra.mrb[30].mxu1 %v4121_v62  ;;  %2922 = vmatprep.subr.bf16.mxu1 %v5238_v13  ;;  %v4227_v30 = vsel %vm770_vm1, %v812_v6, %v814_v31  ;;  %v4245_v31 = vsel %vm657_vm0, %v704_v25, %v706_v41 }
 0x10a   : > { %1426 = vmatmul.mubr.f32.gmra.mrb[30].mxu0 %v4187_v39  ;;  %1205 = vmatprep.mubr.f32.mxu1 %v4192_v53  ;;  %5241 = vst [vmem:[#allocation35_spill] sm:$0xff] %v4227_v30  ;;  %v4242_v6 = vsel %vm770_vm1, %v816_v0, %v817_v36  ;;  %v587_v39 = vld [vmem:[#allocation2 + $0x100] sm:$0x3]  ;;  %v4255_v0 = vsel %vm770_vm1, %v817_v36, %v819_v34 }
 0x10b   : > { %1430 = vmatprep.mubr.f32.mxu0 %v4195_v63  ;;  %2826 = vmatpush1.bf16.msra.mxu0 %v2825_v48  ;;  %v4230_v48 = vsel %vm657_vm0, %v703_v43, %v704_v25  ;;  %5243 = vst [vmem:[#allocation37_spill] sm:$0xff] %v4242_v6  ;;  %v708_v43 = vrot.slane %v4233_v22, 1  ;;  %5244 = vst [vmem:[#allocation38_spill] sm:$0xff] %v4255_v0 }
 0x10c   : > { %2938 = vmatpush1.bf16.msra.mxu1 %v4201_v9  ;;  %2827 = vmatprep.subr.bf16.mxu0 %v5238_v13  ;;  %v4235_v9 = vld [vmem:[#allocation2 + $0xf8] sm:$0xff] }
 0x10d   : > { %1206 = vmatmul.mubr.f32.gmra.mrb[32].mxu1 %v4157_v42  ;;  %2876 = vmatprep.subr.bf16.mxu1 %v4205_v23  ;;  %5242 = vst [vmem:[#allocation36_spill] sm:$0xff] %v4235_v9  ;;  %v822_v41 = vrot.slane %v4235_v9, 2 }
 0x10e   : > { %1431 = vmatmul.mubr.f32.gmra.mrb[32].mxu0 %v4211_v49  ;;  %1210 = vmatprep.mubr.f32.mxu1 %v4214_v12  ;;  %v709_v49 = vrot.slane %v4235_v9, 1 }
 0x10f   : > { %1435 = vmatprep.mubr.f32.mxu0 %v4197_v7  ;;  %v4270_v34 = vsel %vm770_vm1, %v821_v47, %v822_v41 }
 0x110   : > { %v4258_v25 = vsel %vm657_vm0, %v708_v43, %v709_v49  ;;  %5247 = vst [vmem:[#allocation41_spill] sm:$0xff] %v4270_v34  ;;  %v713_v43 = vrot.slane %v4261_v21, 1 }
 0x111   : > { %1211 = vmatmul.mubr.f32.gmra.mrb[34].mxu1 %v4159_v57 }
 0x112   : > { %1436 = vmatmul.mubr.f32.gmra.mrb[34].mxu0 %v4227_v30  ;;  %1215 = vmatprep.mubr.f32.mxu1 %v4230_v48  ;;  %v711_v30 = vrot.slane %v587_v39, 1 }
 0x113   : > { %1440 = vmatprep.mubr.f32.mxu0 %v4233_v22 }
 0x114   : > { %v4273_v36 = vsel %vm657_vm0, %v709_v49, %v711_v30  ;;  %v4286_v49 = vsel %vm657_vm0, %v713_v43, %v714_v26  ;;  %v827_v30 = vrot.slane %v4263_v46, 2  ;;  %v718_v43 = vrot.slane %v4289_v2, 1 }
 0x115   : > { %1216 = vmatmul.mubr.f32.gmra.mrb[36].mxu1 %v4195_v63  ;;  %5248 = vst [vmem:[#allocation42_spill] sm:$0xff] %v4273_v36  ;;  %5250 = vst [vmem:[#allocation44_spill] sm:$0xff] %v4286_v49 }
 0x116   : > { %1441 = vmatmul.mubr.f32.gmra.mrb[36].mxu0 %v4242_v6  ;;  %1220 = vmatprep.mubr.f32.mxu1 %v4245_v31  ;;  %v824_v6 = vrot.slane %v587_v39, 2  ;;  %v826_v39 = vrot.slane %v4261_v21, 2 }
 0x117   : > { %1445 = vmatprep.mubr.f32.mxu0 %v4235_v9 }
 0x118   : > { %v4283_v47 = vsel %vm770_vm1, %v822_v41, %v824_v6  ;;  %v4298_v6 = vsel %vm770_vm1, %v826_v39, %v827_v30 }
 0x119   : > { %1221 = vmatmul.mubr.f32.gmra.mrb[38].mxu1 %v4197_v7  ;;  %5249 = vst [vmem:[#allocation43_spill] sm:$0xff] %v4283_v47  ;;  %5253 = vst [vmem:[#allocation47_spill] sm:$0xff] %v4298_v6 }
 0x11a   : > { %1446 = vmatmul.mubr.f32.gmra.mrb[38].mxu0 %v4255_v0  ;;  %1225 = vmatprep.mubr.f32.mxu1 %v4258_v25  ;;  %v716_v0 = vrot.slane %v590_v8, 1 }
 0x11b   : > { %1450 = vmatprep.mubr.f32.mxu0 %v4261_v21 }
 0x11c   : > { %v4301_v41 = vsel %vm657_vm0, %v714_v26, %v716_v0  ;;  %v4314_v26 = vsel %vm657_vm0, %v718_v43, %v719_v54  ;;  %v832_v0 = vrot.slane %v4291_v3, 2 }
 0x11d   : > { %1226 = vmatmul.mubr.f32.gmra.mrb[40].mxu1 %v4233_v22  ;;  %5254 = vst [vmem:[#allocation48_spill] sm:$0xff] %v4301_v41  ;;  %5256 = vst [vmem:[#allocation50_spill] sm:$0xff] %v4314_v26 }
 0x11e   : > { %1451 = vmatmul.mubr.f32.gmra.mrb[40].mxu0 %v4270_v34  ;;  %1230 = vmatprep.mubr.f32.mxu1 %v4273_v36  ;;  %v829_v34 = vrot.slane %v590_v8, 2  ;;  %v593_v36 = vld [vmem:[#allocation2 + $0x130] sm:$0x3]  ;;  %v831_v8 = vrot.slane %v4289_v2, 2 }
 0x11f   : > { %1455 = vmatprep.mubr.f32.mxu0 %v4263_v46 }
 0x120   : > { %v4311_v39 = vsel %vm770_vm1, %v827_v30, %v829_v34  ;;  %v4326_v34 = vsel %vm770_vm1, %v831_v8, %v832_v0 }
 0x121   : > { %1231 = vmatmul.mubr.f32.gmra.mrb[42].mxu1 %v4235_v9  ;;  %5255 = vst [vmem:[#allocation49_spill] sm:$0xff] %v4311_v39  ;;  %5258 = vst [vmem:[#allocation52_spill] sm:$0xff] %v4326_v34  ;;  %v596_v9 = vld [vmem:[#allocation2 + $0x148] sm:$0x3] }
 0x122   : > { %1456 = vmatmul.mubr.f32.gmra.mrb[42].mxu0 %v4283_v47  ;;  %1235 = vmatprep.mubr.f32.mxu1 %v4286_v49  ;;  %v721_v47 = vrot.slane %v593_v36, 1  ;;  %v4317_v49 = vld [vmem:[#allocation2 + $0x138] sm:$0xff] }
 0x123   : > { %1460 = vmatprep.mubr.f32.mxu0 %v4289_v2  ;;  %5257 = vst [vmem:[#allocation51_spill] sm:$0xff] %v4317_v49  ;;  %v723_v43 = vrot.slane %v4317_v49, 1 }
 0x124   : > { %v4329_v30 = vsel %vm657_vm0, %v719_v54, %v721_v47 }
 0x125   : > { %1236 = vmatmul.mubr.f32.gmra.mrb[44].mxu1 %v4261_v21  ;;  %v4319_v21 = vld [vmem:[#allocation2 + $0x140] sm:$0xff]  ;;  %5259 = vst [vmem:[#allocation53_spill] sm:$0xff] %v4329_v30 }
 0x126   : > { %1461 = vmatmul.mubr.f32.gmra.mrb[44].mxu0 %v4298_v6  ;;  %1240 = vmatprep.mubr.f32.mxu1 %v4301_v41  ;;  %v834_v6 = vrot.slane %v593_v36, 2  ;;  %v724_v41 = vrot.slane %v4319_v21, 1  ;;  %v836_v36 = vrot.slane %v4317_v49, 2  ;;  %v837_v47 = vrot.slane %v4319_v21, 2 }
 0x127   : > { %1465 = vmatprep.mubr.f32.mxu0 %v4291_v3 }
 0x128   : > { %v4339_v8 = vsel %vm770_vm1, %v832_v0, %v834_v6  ;;  %v4342_v54 = vsel %vm657_vm0, %v723_v43, %v724_v41  ;;  %v4354_v6 = vsel %vm770_vm1, %v836_v36, %v837_v47 }
 0x129   : > { %1241 = vmatmul.mubr.f32.gmra.mrb[46].mxu1 %v4263_v46  ;;  %5260 = vst [vmem:[#allocation54_spill] sm:$0xff] %v4339_v8  ;;  %5261 = vst [vmem:[#allocation55_spill] sm:$0xff] %v4342_v54  ;;  %v599_v46 = vld [vmem:[#allocation2 + $0x160] sm:$0x3] }
 0x12a   : > { %1466 = vmatmul.mubr.f32.gmra.mrb[46].mxu0 %v4311_v39  ;;  %1245 = vmatprep.mubr.f32.mxu1 %v4314_v26  ;;  %v726_v39 = vrot.slane %v596_v9, 1  ;;  %v4345_v26 = vld [vmem:[#allocation2 + $0x150] sm:$0xff]  ;;  %5262 = vst [vmem:[#allocation56_spill] sm:$0xff] %v4354_v6 }
 0x12b   : > { %1470 = vmatprep.mubr.f32.mxu0 %v4317_v49  ;;  %v728_v43 = vrot.slane %v4345_v26, 1 }
 0x12c   : > { %v4357_v0 = vsel %vm657_vm0, %v724_v41, %v726_v39 }
 0x12d   : > { %1246 = vmatmul.mubr.f32.gmra.mrb[48].mxu1 %v4289_v2  ;;  %v4347_v2 = vld [vmem:[#allocation2 + $0x158] sm:$0xff]  ;;  %5263 = vst [vmem:[#allocation57_spill] sm:$0xff] %v4357_v0 }
 0x12e   : > { %1471 = vmatmul.mubr.f32.gmra.mrb[48].mxu0 %v4326_v34  ;;  %1250 = vmatprep.mubr.f32.mxu1 %v4329_v30  ;;  %v839_v34 = vrot.slane %v596_v9, 2  ;;  %v729_v30 = vrot.slane %v4347_v2, 1  ;;  %v841_v9 = vrot.slane %v4345_v26, 2  ;;  %v842_v39 = vrot.slane %v4347_v2, 2 }
 0x12f   : > { %1475 = vmatprep.mubr.f32.mxu0 %v4319_v21 }
 0x130   : > { %v4367_v36 = vsel %vm770_vm1, %v837_v47, %v839_v34  ;;  %v4370_v41 = vsel %vm657_vm0, %v728_v43, %v729_v30  ;;  %v4382_v34 = vsel %vm770_vm1, %v841_v9, %v842_v39 }
 0x131   : > { %1251 = vmatmul.mubr.f32.gmra.mrb[50].mxu1 %v4291_v3  ;;  %5264 = vst [vmem:[#allocation58_spill] sm:$0xff] %v4367_v36  ;;  %5265 = vst [vmem:[#allocation59_spill] sm:$0xff] %v4370_v41  ;;  %v602_v3 = vld [vmem:[#allocation2 + $0x178] sm:$0x3] }
 0x132   : > { %1476 = vmatmul.mubr.f32.gmra.mrb[50].mxu0 %v4339_v8  ;;  %1255 = vmatprep.mubr.f32.mxu1 %v4342_v54  ;;  %v731_v8 = vrot.slane %v599_v46, 1  ;;  %v4373_v54 = vld [vmem:[#allocation2 + $0x168] sm:$0xff]  ;;  %5266 = vst [vmem:[#allocation60_spill] sm:$0xff] %v4382_v34 }
 0x133   : > { %1480 = vmatprep.mubr.f32.mxu0 %v4345_v26  ;;  %v733_v43 = vrot.slane %v4373_v54, 1 }
 0x134   : > { %v4385_v47 = vsel %vm657_vm0, %v729_v30, %v731_v8 }
 0x135   : > { %1256 = vmatmul.mubr.f32.gmra.mrb[52].mxu1 %v4317_v49  ;;  %v4375_v49 = vld [vmem:[#allocation2 + $0x170] sm:$0xff] }
 0x136   : > { %1481 = vmatmul.mubr.f32.gmra.mrb[52].mxu0 %v4354_v6  ;;  %1260 = vmatprep.mubr.f32.mxu1 %v4357_v0  ;;  %v844_v6 = vrot.slane %v599_v46, 2  ;;  %v734_v0 = vrot.slane %v4375_v49, 1  ;;  %v846_v46 = vrot.slane %v4373_v54, 2  ;;  %v847_v8 = vrot.slane %v4375_v49, 2 }
 0x137   : > { %1485 = vmatprep.mubr.f32.mxu0 %v4347_v2 }
 0x138   : > { %v4395_v9 = vsel %vm770_vm1, %v842_v39, %v844_v6  ;;  %v4398_v30 = vsel %vm657_vm0, %v733_v43, %v734_v0  ;;  %v849_v39 = vrot.slane %v602_v3, 2  ;;  %v4413_v43 = vld [vmem:[#allocation2 + $0x188] sm:$0xff] }
 0x139   : > { %1261 = vmatmul.mubr.f32.gmra.mrb[54].mxu1 %v4319_v21  ;;  %5267 = vst [vmem:[#allocation61_spill] sm:$0xff] %v4395_v9 }
 0x13a   : > { %1486 = vmatmul.mubr.f32.gmra.mrb[54].mxu0 %v4367_v36  ;;  %1265 = vmatprep.mubr.f32.mxu1 %v4370_v41  ;;  %v736_v36 = vrot.slane %v602_v3, 1  ;;  %v4401_v41 = vld [vmem:[#allocation2 + $0x180] sm:$0xff] }
 0x13b   : > { %1490 = vmatprep.mubr.f32.mxu0 %v4373_v54  ;;  %v1047_v3 = vld [vmem:[#allocation9 + $0x410] sm:$0xff] }
 0x13c   : > { %v4411_v6 = vsel %vm657_vm0, %v734_v0, %v736_v36  ;;  %v1048_v0 = vld [vmem:[#allocation9 + $0x418] sm:$0xff] }
 0x13d   : > { %1266 = vmatmul.mubr.f32.gmra.mrb[56].mxu1 %v4345_v26  ;;  %v2879_v36 = vpack.c.bf16 %v1048_v0, %v1047_v3  ;;  %v5274_v3 = vld [vmem:[#allocation26_spill] sm:$0xff]  ;;  %v5275_v0 = vld [vmem:[#allocation21_spill] sm:$0xff] }
 0x13e   : > { %1491 = vmatmul.mubr.f32.gmra.mrb[56].mxu0 %v4382_v34  ;;  %1270 = vmatprep.mubr.f32.mxu1 %v4385_v47  ;;  %v4408_v34 = vsel %vm770_vm1, %v846_v46, %v847_v8  ;;  %v1049_v46 = vld [vmem:[#allocation9 + $0x420] sm:$0xff] }
 0x13f   : > { %1495 = vmatprep.mubr.f32.mxu0 %v4375_v49 }
 0x141   : > { %1271 = vmatmul.mubr.f32.gmra.mrb[58].mxu1 %v4347_v2 }
 0x142   : > { %1496 = vmatmul.mubr.f32.gmra.mrb[58].mxu0 %v4395_v9  ;;  %1275 = vmatprep.mubr.f32.mxu1 %v4398_v30  ;;  %v4420_v9 = vsel %vm770_vm1, %v847_v8, %v849_v39  ;;  %v1050_v8 = vld [vmem:[#allocation9 + $0x428] sm:$0xff]  ;;  %v1060_v39 = vld [vmem:[#allocation9 + $0x478] sm:$0xff] }
 0x143   : > { %1500 = vmatprep.mubr.f32.mxu0 %v4401_v41 }
 0x145   : > { %1276 = vmatmul.mubr.f32.gmra.mrb[60].mxu1 %v4373_v54 }
 0x146   : > { %1501 = vmatmul.mubr.f32.gmra.mrb[60].mxu0 %v4408_v34  ;;  %1280 = vmatprep.mubr.f32.mxu1 %v4411_v6 }
 0x147   : > { %1505 = vmatprep.mubr.f32.mxu0 %v4413_v43 }
 0x149   : > { %1281 = vmatmul.mubr.f32.gmra.mrb[62].mxu1 %v4375_v49 }
 0x14a   : > { %1506 = vmatmul.mubr.f32.gmra.mrb[62].mxu0 %v4420_v9  ;;  %1840 = vmatprep.mubr.f32.mxu1 %v4117_v56 }
 0x14b   : > { %1575 = vmatprep.mubr.f32.mxu0 %v3899_v58  ;;  %v2883_v58 = vpack.c.bf16 %v1050_v8, %v1049_v46  ;;  %v5278_v46 = vld [vmem:[#allocation28_spill] sm:$0xff]  ;;  %v5279_v8 = vld [vmem:[#allocation23_spill] sm:$0xff] }
 0x14d   : > { %1841 = vmatmul.mubr.f32.vlgmr.msra.gmra.mrb[64].mxu1 %v4081_v11  ;;  %v1052_v11 = vld [vmem:[#allocation9 + $0x438] sm:$0xff] }
 0x14e   : > { %1576 = vmatmul.mubr.f32.vlgmr.msra.gmra.mrb[0].mxu0 %v3878_v40  ;;  %1845 = vmatprep.mubr.f32.mxu1 %v4136_v19  ;;  %v1051_v40 = vld [vmem:[#allocation9 + $0x430] sm:$0xff] }
 0x14f   : > { %2829 = vmatpush1.bf16.msra.mxu0 %v3869_v33  ;;  %1580 = vmatprep.mubr.f32.mxu0 %v3931_v15  ;;  %v2887_v33 = vpack.c.bf16 %v1052_v11, %v1051_v40  ;;  %v1054_v15 = vld [vmem:[#allocation9 + $0x448] sm:$0xff]  ;;  %v5281_v40 = vld [vmem:[#allocation50_spill] sm:$0xff] }
 0x150   : > { %2830 = vmatprep.subr.bf16.mxu0 %v5238_v13  ;;  %2878 = vmatpush3.bf16.msra.mxu1 %v4205_v23  ;;  %v1058_v23 = vld [vmem:[#allocation9 + $0x468] sm:$0xff]  ;;  %v5282_v11 = vld [vmem:[#allocation30_spill] sm:$0xff] }
 0x151   : > { %1846 = vmatmul.mubr.f32.gmra.mrb[66].mxu1 %v4083_v44  ;;  %2880 = vmatprep.subr.bf16.mxu1 %v2879_v36  ;;  %v1055_v44 = vld [vmem:[#allocation9 + $0x450] sm:$0xff] }
 0x152   : > { %1581 = vmatmul.mubr.f32.gmra.mrb[2].mxu0 %v3902_v1  ;;  %1850 = vmatprep.mubr.f32.mxu1 %v4155_v29  ;;  %v1053_v1 = vld [vmem:[#allocation9 + $0x440] sm:$0xff] }
 0x153   : > { %1585 = vmatprep.mubr.f32.mxu0 %v3951_v27  ;;  %2832 = vmatpush1.bf16.msra.mxu0 %v3889_v51  ;;  %v2891_v51 = vpack.c.bf16 %v1054_v15, %v1053_v1  ;;  %v5285_v1 = vld [vmem:[#allocation53_spill] sm:$0xff]  ;;  %v5286_v15 = vld [vmem:[#allocation32_spill] sm:$0xff] }
 0x154   : > { %2833 = vmatprep.subr.bf16.mxu0 %v5238_v13  ;;  %2882 = vmatpush3.bf16.msra.mxu1 %v2879_v36  ;;  %v5277_v36 = vld [vmem:[#allocation48_spill] sm:$0xff] }
 0x155   : > { %1851 = vmatmul.mubr.f32.gmra.mrb[68].mxu1 %v4119_v61  ;;  %2884 = vmatprep.subr.bf16.mxu1 %v2883_v58  ;;  %v1056_v61 = vld [vmem:[#allocation9 + $0x458] sm:$0xff] }
 0x156   : > { %1586 = vmatmul.mubr.f32.gmra.mrb[4].mxu0 %v3934_v16  ;;  %1855 = vmatprep.mubr.f32.mxu1 %v4174_v20 }
 0x157   : > { %1590 = vmatprep.mubr.f32.mxu0 %v3984_v55  ;;  %2835 = vmatpush1.bf16.msra.mxu0 %v3914_v5  ;;  %v2895_v5 = vpack.c.bf16 %v1056_v61, %v1055_v44  ;;  %v5289_v44 = vld [vmem:[#allocation55_spill] sm:$0xff]  ;;  %v5290_v61 = vld [vmem:[#allocation34_spill] sm:$0xff] }
 0x158   : > { %2836 = vmatprep.subr.bf16.mxu0 %v5238_v13  ;;  %2886 = vmatpush3.bf16.msra.mxu1 %v2883_v58  ;;  %v5280_v58 = vld [vmem:[#allocation40_spill] sm:$0xff] }
 0x159   : > { %1856 = vmatmul.mubr.f32.gmra.mrb[70].mxu1 %v4121_v62  ;;  %2888 = vmatprep.subr.bf16.mxu1 %v2887_v33  ;;  %v1057_v62 = vld [vmem:[#allocation9 + $0x460] sm:$0xff] }
 0x15a   : > { %1591 = vmatmul.mubr.f32.gmra.mrb[6].mxu0 %v3962_v17  ;;  %1860 = vmatprep.mubr.f32.mxu1 %v4192_v53 }
 0x15b   : > { %1595 = vmatprep.mubr.f32.mxu0 %v4016_v50  ;;  %2838 = vmatpush1.bf16.msra.mxu0 %v3945_v24  ;;  %v2899_v24 = vpack.c.bf16 %v1058_v23, %v1057_v62  ;;  %v5293_v62 = vld [vmem:[#allocation57_spill] sm:$0xff]  ;;  %v5294_v23 = vld [vmem:[#allocation35_spill] sm:$0xff] }
 0x15c   : > { %2839 = vmatprep.subr.bf16.mxu0 %v5238_v13  ;;  %2890 = vmatpush3.bf16.msra.mxu1 %v2887_v33  ;;  %v5283_v33 = vld [vmem:[#allocation25_spill] sm:$0xff] }
 0x15d   : > { %1861 = vmatmul.mubr.f32.gmra.mrb[72].mxu1 %v4157_v42  ;;  %2892 = vmatprep.subr.bf16.mxu1 %v2891_v51  ;;  %v1059_v42 = vld [vmem:[#allocation9 + $0x470] sm:$0xff] }
 0x15e   : > { %1596 = vmatmul.mubr.f32.gmra.mrb[8].mxu0 %v3996_v4  ;;  %1865 = vmatprep.mubr.f32.mxu1 %v4214_v12 }
 0x15f   : > { %1600 = vmatprep.mubr.f32.mxu0 %v4037_v37  ;;  %2841 = vmatpush1.bf16.msra.mxu0 %v3977_v45  ;;  %v2903_v45 = vpack.c.bf16 %v1060_v39, %v1059_v42  ;;  %v5297_v42 = vld [vmem:[#allocation37_spill] sm:$0xff] }
 0x160   : > { %2842 = vmatprep.subr.bf16.mxu0 %v5238_v13  ;;  %2894 = vmatpush3.bf16.msra.mxu1 %v2891_v51  ;;  %v5287_v51 = vld [vmem:[#allocation27_spill] sm:$0xff]  ;;  %v5298_v39 = vld [vmem:[#allocation33_spill] sm:$0xff] }
 0x161   : > { %1866 = vmatmul.mubr.f32.gmra.mrb[74].mxu1 %v4159_v57  ;;  %2896 = vmatprep.subr.bf16.mxu1 %v2895_v5  ;;  %v5271_v57 = vld [vmem:[#allocation36_spill] sm:$0xff] }
 0x162   : > { %1601 = vmatmul.mubr.f32.gmra.mrb[10].mxu0 %v4019_v28  ;;  %1870 = vmatprep.mubr.f32.mxu1 %v4230_v48 }
 0x163   : > { %1605 = vmatprep.mubr.f32.mxu0 %v4058_v59  ;;  %2844 = vmatpush1.bf16.msra.mxu0 %v4006_v14  ;;  %v5268_v14 = vld [vmem:[#allocation42_spill] sm:$0xff] }
 0x164   : > { %2845 = vmatprep.subr.bf16.mxu0 %v5238_v13  ;;  %2898 = vmatpush3.bf16.msra.mxu1 %v2895_v5  ;;  %v5291_v5 = vld [vmem:[#allocation29_spill] sm:$0xff] }
 0x165   : > { %1871 = vmatmul.mubr.f32.gmra.mrb[76].mxu1 %v4195_v63  ;;  %2900 = vmatprep.subr.bf16.mxu1 %v2899_v24  ;;  %v5270_v63 = vld [vmem:[#allocation20_spill] sm:$0xff] }
 0x166   : > { %1606 = vmatmul.mubr.f32.gmra.mrb[12].mxu0 %v4040_v38  ;;  %1875 = vmatprep.mubr.f32.mxu1 %v4245_v31 }
 0x167   : > { %1610 = vmatprep.mubr.f32.mxu0 %v4076_v10  ;;  %2847 = vmatpush1.bf16.msra.mxu0 %v4028_v35  ;;  %v5269_v35 = vld [vmem:[#allocation24_spill] sm:$0xff] }
 0x168   : > { %2848 = vmatprep.subr.bf16.mxu0 %v5238_v13  ;;  %2902 = vmatpush3.bf16.msra.mxu1 %v2899_v24  ;;  %v5295_v24 = vld [vmem:[#allocation31_spill] sm:$0xff] }
 0x169   : > { %1876 = vmatmul.mubr.f32.gmra.mrb[78].mxu1 %v4197_v7  ;;  %2904 = vmatprep.subr.bf16.mxu1 %v2903_v45  ;;  %v5272_v7 = vld [vmem:[#allocation22_spill] sm:$0xff] }
 0x16a   : > { %1611 = vmatmul.mubr.f32.gmra.mrb[14].mxu0 %v4061_v60  ;;  %1880 = vmatprep.mubr.f32.mxu1 %v4258_v25 }
 0x16b   : > { %1615 = vmatprep.mubr.f32.mxu0 %v4094_v32  ;;  %2850 = vmatpush1.bf16.msra.mxu0 %v4049_v52  ;;  %v5273_v52 = vld [vmem:[#allocation44_spill] sm:$0xff] }
 0x16c   : > { %2851 = vmatprep.subr.bf16.mxu0 %v5238_v13  ;;  %2906 = vmatpush3.bf16.msra.mxu1 %v2903_v45  ;;  %v4532_v45 = vld [vmem:[#allocation2 + $0x190] sm:$0x3] }
 0x16d   : > { %1881 = vmatmul.mubr.f32.gmra.mrb[80].mxu1 %v4233_v22  ;;  %v5276_v22 = vld [vmem:[#allocation39_spill] sm:$0xff] }
 0x16e   : > { %1616 = vmatmul.mubr.f32.gmra.mrb[16].mxu0 %v4079_v18  ;;  %1885 = vmatprep.mubr.f32.mxu1 %v5268_v14 }
 0x16f   : > { %1620 = vmatprep.mubr.f32.mxu0 %v5269_v35  ;;  %2853 = vmatpush1.bf16.msra.mxu0 %v5270_v63 }
 0x170   : > { %2854 = vmatprep.subr.bf16.mxu0 %v5238_v13 }
 0x171   : > { %1886 = vmatmul.mubr.f32.gmra.mrb[82].mxu1 %v5271_v57  ;;  %v4552_v57 = vld [vmem:[#allocation2 + $0x1a8] sm:$0x3] }
 0x172   : > { %1621 = vmatmul.mubr.f32.gmra.mrb[18].mxu0 %v5272_v7  ;;  %1890 = vmatprep.mubr.f32.mxu1 %v5273_v52 }
 0x173   : > { %1625 = vmatprep.mubr.f32.mxu0 %v5274_v3  ;;  %2856 = vmatpush1.bf16.msra.mxu0 %v5275_v0 }
 0x174   : > { %2857 = vmatprep.subr.bf16.mxu0 %v5238_v13 }
 0x175   : > { %1891 = vmatmul.mubr.f32.gmra.mrb[84].mxu1 %v5276_v22 }
 0x176   : > { %1626 = vmatmul.mubr.f32.gmra.mrb[20].mxu0 %v4117_v56  ;;  %1895 = vmatprep.mubr.f32.mxu1 %v5277_v36  ;;  %v5284_v56 = vld [vmem:[#allocation45_spill] sm:$0xff] }
 0x177   : > { %1630 = vmatprep.mubr.f32.mxu0 %v5278_v46  ;;  %2859 = vmatpush1.bf16.msra.mxu0 %v5279_v8  ;;  %v5304_v8 = vld [vmem:[#allocation52_spill] sm:$0xff] }
 0x178   : > { %2860 = vmatprep.subr.bf16.mxu0 %v5238_v13 }
 0x179   : > { %1896 = vmatmul.mubr.f32.gmra.mrb[86].mxu1 %v5280_v58 }
 0x17a   : > { %1631 = vmatmul.mubr.f32.gmra.mrb[22].mxu0 %v4136_v19  ;;  %1900 = vmatprep.mubr.f32.mxu1 %v5281_v40  ;;  %v5288_v19 = vld [vmem:[#allocation46_spill] sm:$0xff] }
 0x17b   : > { %1635 = vmatprep.mubr.f32.mxu0 %v5282_v11  ;;  %2862 = vmatpush1.bf16.msra.mxu0 %v5283_v33 }
 0x17c   : > { %2863 = vmatprep.subr.bf16.mxu0 %v5238_v13 }
 0x17d   : > { %1901 = vmatmul.mubr.f32.gmra.mrb[88].mxu1 %v5284_v56  ;;  %v5305_v56 = vld [vmem:[#allocation54_spill] sm:$0xff] }
 0x17e   : > { %1636 = vmatmul.mubr.f32.gmra.mrb[24].mxu0 %v4155_v29  ;;  %1905 = vmatprep.mubr.f32.mxu1 %v5285_v1  ;;  %v5292_v29 = vld [vmem:[#allocation51_spill] sm:$0xff] }
 0x17f   : > { %1640 = vmatprep.mubr.f32.mxu0 %v5286_v15  ;;  %2865 = vmatpush1.bf16.msra.mxu0 %v5287_v51 }
 0x180   : > { %2866 = vmatprep.subr.bf16.mxu0 %v5238_v13 }
 0x181   : > { %1906 = vmatmul.mubr.f32.gmra.mrb[90].mxu1 %v5288_v19  ;;  %v5306_v19 = vld [vmem:[#allocation56_spill] sm:$0xff] }
 0x182   : > { %1641 = vmatmul.mubr.f32.gmra.mrb[26].mxu0 %v4174_v20  ;;  %1910 = vmatprep.mubr.f32.mxu1 %v5289_v44  ;;  %v5296_v20 = vld [vmem:[#allocation59_spill] sm:$0xff] }
 0x183   : > { %1645 = vmatprep.mubr.f32.mxu0 %v5290_v61  ;;  %2868 = vmatpush1.bf16.msra.mxu0 %v5291_v5 }
 0x184   : > { %2869 = vmatprep.subr.bf16.mxu0 %v5238_v13 }
 0x185   : > { %1911 = vmatmul.mubr.f32.gmra.mrb[92].mxu1 %v5292_v29 }
 0x186   : > { %1646 = vmatmul.mubr.f32.gmra.mrb[28].mxu0 %v4192_v53  ;;  %1915 = vmatprep.mubr.f32.mxu1 %v5293_v62  ;;  %v5299_v53 = vld [vmem:[#allocation38_spill] sm:$0xff] }
 0x187   : > { %1650 = vmatprep.mubr.f32.mxu0 %v5294_v23  ;;  %2871 = vmatpush1.bf16.msra.mxu0 %v5295_v24 }
 0x188   : > { %2872 = vmatprep.subr.bf16.mxu0 %v5238_v13  ;;  %v886_v13 = vrot.slane %v4401_v41, 1 }
 0x189   : > { %1916 = vmatmul.mubr.f32.gmra.mrb[94].mxu1 %v4319_v21  ;;  %v5300_v21 = vld [vmem:[#allocation41_spill] sm:$0xff] }
 0x18a   : > { %1651 = vmatmul.mubr.f32.gmra.mrb[30].mxu0 %v4214_v12  ;;  %1920 = vmatprep.mubr.f32.mxu1 %v5296_v20  ;;  %v887_v12 = vrot.slane %v4413_v43, 1 }
 0x18b   : > { %1655 = vmatprep.mubr.f32.mxu0 %v5297_v42  ;;  %2874 = vmatpush1.bf16.msra.mxu0 %v5298_v39 }
 0x18d   : > { %1921 = vmatmul.mubr.f32.gmra.mrb[96].mxu1 %v4345_v26  ;;  %v5302_v26 = vld [vmem:[#allocation47_spill] sm:$0xff] }
 0x18e   : > { %1656 = vmatmul.mubr.f32.gmra.mrb[32].mxu0 %v4230_v48  ;;  %1925 = vmatprep.mubr.f32.mxu1 %v4385_v47  ;;  %v5301_v48 = vld [vmem:[#allocation43_spill] sm:$0xff] }
 0x18f   : > { %1660 = vmatprep.mubr.f32.mxu0 %v5299_v53 }
 0x191   : > { %1926 = vmatmul.mubr.f32.gmra.mrb[98].mxu1 %v4347_v2  ;;  %v4539_v2 = vsel %vm657_vm0, %v886_v13, %v887_v12  ;;  %v3171_v13 = vld [vmem:[#allocation2 + $0x48] sm:$0xff] }
 0x192   : > { %1661 = vmatmul.mubr.f32.gmra.mrb[34].mxu0 %v4245_v31  ;;  %1930 = vmatprep.mubr.f32.mxu1 %v4398_v30  ;;  %v889_v31 = vrot.slane %v4532_v45, 1 }
 0x193   : > { %1665 = vmatprep.mubr.f32.mxu0 %v5300_v21 }
 0x195   : > { %1931 = vmatmul.mubr.f32.gmra.mrb[100].mxu1 %v4373_v54  ;;  %v4547_v54 = vsel %vm657_vm0, %v887_v12, %v889_v31 }
 0x196   : > { %1666 = vmatmul.mubr.f32.gmra.mrb[36].mxu0 %v4258_v25  ;;  %1935 = vmatprep.mubr.f32.mxu1 %v4411_v6  ;;  %v4549_v25 = vld [vmem:[#allocation2] sm:$0xff] }
 0x197   : > { %1670 = vmatprep.mubr.f32.mxu0 %v5301_v48  ;;  %v903_v63 = vrot.slane %v4549_v25, 1 }
 0x199   : > { %1936 = vmatmul.mubr.f32.gmra.mrb[102].mxu1 %v4375_v49  ;;  %v5303_v49 = vld [vmem:[#allocation49_spill] sm:$0xff] }
 0x19a   : > { %1671 = vmatmul.mubr.f32.gmra.mrb[38].mxu0 %v5268_v14  ;;  %1940 = vmatprep.mubr.f32.mxu1 %v4539_v2  ;;  %v906_v14 = vrot.slane %v4552_v57, 1 }
 0x19b   : > { %1675 = vmatprep.mubr.f32.mxu0 %v5302_v26 }
 0x19c   : > { %v907_v58 = vsel %vm657_vm0, %v903_v63, %v906_v14  ;;  %v3176_v14 = vld [vmem:[#allocation2 + $0x80] sm:$0xff] }
 0x19d   : > { %1941 = vmatmul.mubr.f32.gmra.mrb[104].mxu1 %v4401_v41 }
 0x19e   : > { %1676 = vmatmul.mubr.f32.gmra.mrb[40].mxu0 %v5273_v52  ;;  %1945 = vmatprep.mubr.f32.mxu1 %v4547_v54 }
 0x19f   : > { %1680 = vmatprep.mubr.f32.mxu0 %v5303_v49 }
 0x1a0   : > { %v4559_v0 = vpop.f32.mrb[0].mxu1 }
 0x1a1   : > { %1946 = vmatmul.mubr.f32.gmra.mrb[106].mxu1 %v4413_v43  ;;  %v1129_v22 = vpop.f32.mrb[1].mxu1 }
 0x1a2   : > { %1681 = vmatmul.mubr.f32.gmra.mrb[42].mxu0 %v5277_v36  ;;  %1950 = vmatprep.mubr.f32.mxu1 %v903_v63 }
 0x1a3   : > { %1685 = vmatprep.mubr.f32.mxu0 %v5304_v8 }
 0x1a4   : > { %v4565_v33 = vpop.f32.mrb[2].mxu1 }
 0x1a5   : > { %1951 = vmatmul.mubr.f32.gmra.mrb[108].mxu1 %v4549_v25  ;;  %v1134_v52 = vpop.f32.mrb[3].mxu1 }
 0x1a6   : > { %1686 = vmatmul.mubr.f32.gmra.mrb[44].mxu0 %v5281_v40  ;;  %1955 = vmatprep.mubr.f32.mxu1 %v907_v58  ;;  %v5307_v40 = vld [vmem:[#allocation58_spill] sm:$0xff] }
 0x1a7   : > { %1690 = vmatprep.mubr.f32.mxu0 %v5305_v56 }
 0x1a8   : > { %v4570_v51 = vpop.f32.mrb[4].mxu1 }
 0x1a9   : > { %1956 = vmatmul.mubr.f32.gmra.mrb[110].mxu1 %v4549_v25  ;;  %v1139_v36 = vpop.f32.mrb[5].mxu1 }
 0x1aa   : > { %1691 = vmatmul.mubr.f32.gmra.mrb[46].mxu0 %v5285_v1  ;;  %2635 = vmatprep.mubr.f32.mxu1 %v3951_v27  ;;  %v5308_v27 = vld [vmem:[#allocation60_spill] sm:$0xff] }
 0x1ab   : > { %1695 = vmatprep.mubr.f32.mxu0 %v5306_v19 }
 0x1ac   : > { %v4576_v5 = vpop.f32.mrb[6].mxu1 }
 0x1ad   : > { %2636 = vmatmul.mubr.f32.vlgmr.msra.gmra.mrb[112].mxu1 %v3984_v55  ;;  %v1144_v29 = vpop.f32.mrb[7].mxu1 }
 0x1ae   : > { %1696 = vmatmul.mubr.f32.gmra.mrb[48].mxu0 %v5289_v44  ;;  %2638 = vmatprep.mubr.f32.mxu1 %v4016_v50  ;;  %v5309_v50 = vld [vmem:[#allocation61_spill] sm:$0xff] }
 0x1af   : > { %1700 = vmatprep.mubr.f32.mxu0 %v5307_v40 }
 0x1b0   : > { %v4582_v24 = vpop.f32.mrb[8].mxu1 }
 0x1b1   : > { %2639 = vmatmul.mubr.f32.gmra.mrb[114].mxu1 %v4037_v37  ;;  %v1149_v1 = vpop.f32.mrb[9].mxu1 }
 0x1b2   : > { %1701 = vmatmul.mubr.f32.gmra.mrb[50].mxu0 %v5293_v62  ;;  %2641 = vmatprep.mubr.f32.mxu1 %v4058_v59  ;;  %v893_v59 = vrot.slane %v4401_v41, 2 }
 0x1b3   : > { %1705 = vmatprep.mubr.f32.mxu0 %v5308_v27 }
 0x1b4   : > { %v4588_v39 = vpop.f32.mrb[10].mxu1 }
 0x1b5   : > { %2642 = vmatmul.mubr.f32.gmra.mrb[116].mxu1 %v4076_v10  ;;  %v1154_v55 = vpop.f32.mrb[11].mxu1  ;;  %v894_v10 = vrot.slane %v4413_v43, 2 }
 0x1b6   : > { %1706 = vmatmul.mubr.f32.gmra.mrb[52].mxu0 %v5296_v20  ;;  %2644 = vmatprep.mubr.f32.mxu1 %v4094_v32 }
 0x1b7   : > { %1710 = vmatprep.mubr.f32.mxu0 %v5309_v50 }
 0x1b8   : > { %v4594_v44 = vpop.f32.mrb[12].mxu1 }
 0x1b9   : > { %2645 = vmatmul.mubr.f32.gmra.mrb[118].mxu1 %v5269_v35  ;;  %v1159_v37 = vpop.f32.mrb[13].mxu1  ;;  %v896_v35 = vrot.slane %v4532_v45, 2  ;;  %v3172_v45 = vld [vmem:[#allocation2 + $0x50] sm:$0xff] }
 0x1ba   : > { %1711 = vmatmul.mubr.f32.gmra.mrb[54].mxu0 %v4385_v47  ;;  %2647 = vmatprep.mubr.f32.mxu1 %v5274_v3  ;;  %v895_v47 = vsel %vm770_vm1, %v893_v59, %v894_v10 }
 0x1bb   : > { %1715 = vmatprep.mubr.f32.mxu0 %v4408_v34 }
 0x1bc   : > { %v4602_v62 = vpop.f32.mrb[14].mxu1 }
 0x1bd   : > { %2648 = vmatmul.mubr.f32.gmra.mrb[120].mxu1 %v5278_v46  ;;  %v1164_v32 = vpop.f32.mrb[15].mxu1 }
 0x1be   : > { %1716 = vmatmul.mubr.f32.gmra.mrb[56].mxu0 %v4398_v30  ;;  %2650 = vmatprep.mubr.f32.mxu1 %v5282_v11  ;;  %v897_v30 = vsel %vm770_vm1, %v894_v10, %v896_v35 }
 0x1bf   : > { %1720 = vmatprep.mubr.f32.mxu0 %v4420_v9 }
 0x1c0   : > { %v4610_v3 = vpop.f32.mrb[16].mxu1 }
 0x1c1   : > { %2651 = vmatmul.mubr.f32.gmra.mrb[122].mxu1 %v5286_v15  ;;  %v1169_v41 = vpop.f32.mrb[17].mxu1 }
 0x1c2   : > { %1721 = vmatmul.mubr.f32.gmra.mrb[58].mxu0 %v4411_v6  ;;  %2653 = vmatprep.mubr.f32.mxu1 %v5290_v61 }
 0x1c3   : > { %1725 = vmatprep.mubr.f32.mxu0 %v895_v47 }
 0x1c4   : > { %v4616_v43 = vpop.f32.mrb[18].mxu1 }
 0x1c5   : > { %2654 = vmatmul.mubr.f32.gmra.mrb[124].mxu1 %v5294_v23  ;;  %v1174_v46 = vpop.f32.mrb[19].mxu1  ;;  %v3169_v23 = vld [vmem:[#allocation2 + $0x30] sm:$0xff] }
 0x1c6   : > { %1726 = vmatmul.mubr.f32.gmra.mrb[60].mxu0 %v4539_v2  ;;  %2656 = vmatprep.mubr.f32.mxu1 %v5297_v42  ;;  %v3173_v2 = vld [vmem:[#allocation2 + $0x60] sm:$0xff] }
 0x1c7   : > { %1730 = vmatprep.mubr.f32.mxu0 %v897_v30 }
 0x1c8   : > { %v4621_v11 = vpop.f32.mrb[20].mxu1 }
 0x1c9   : > { %2657 = vmatmul.mubr.f32.gmra.mrb[126].mxu1 %v5299_v53  ;;  %v1179_v6 = vpop.f32.mrb[21].mxu1  ;;  %v3170_v53 = vld [vmem:[#allocation2 + $0x38] sm:$0xff] }
 0x1ca   : > { %1731 = vmatmul.mubr.f32.gmra.mrb[62].mxu0 %v4547_v54  ;;  %2659 = vmatprep.mubr.f32.mxu1 %v5300_v21  ;;  %v3174_v54 = vld [vmem:[#allocation2 + $0x68] sm:$0xff] }
 0x1cb   : > { %1800 = vmatprep.mubr.f32.mxu0 %v3934_v16 }
 0x1cc   : > { %v4627_v15 = vpop.f32.mrb[22].mxu1 }
 0x1cd   : > { %2660 = vmatmul.mubr.f32.gmra.mrb[128].mxu1 %v5301_v48  ;;  %v1184_v61 = vpop.f32.mrb[23].mxu1 }
 0x1ce   : > { %1801 = vmatmul.mubr.f32.vlgmr.msra.gmra.mrb[0].mxu0 %v3169_v23  ;;  %2662 = vmatprep.mubr.f32.mxu1 %v5302_v26 }
 0x1cf   : > { %1805 = vmatprep.mubr.f32.mxu0 %v3962_v17 }
 0x1d0   : > { %v4632_v20 = vpop.f32.mrb[24].mxu1 }
 0x1d1   : > { %2663 = vmatmul.mubr.f32.gmra.mrb[130].mxu1 %v5303_v49  ;;  %v1189_v42 = vpop.f32.mrb[25].mxu1  ;;  %v3175_v49 = vld [vmem:[#allocation2 + $0x78] sm:$0xff] }
 0x1d2   : > { %1806 = vmatmul.mubr.f32.gmra.mrb[2].mxu0 %v3170_v53  ;;  %2665 = vmatprep.mubr.f32.mxu1 %v5304_v8 }
 0x1d3   : > { %1810 = vmatprep.mubr.f32.mxu0 %v3996_v4 }
 0x1d4   : > { %v4637_v16 = vpop.f32.mrb[26].mxu1 }
 0x1d5   : > { %2666 = vmatmul.mubr.f32.gmra.mrb[132].mxu1 %v5305_v56  ;;  %v1194_v21 = vpop.f32.mrb[27].mxu1 }
 0x1d6   : > { %1811 = vmatmul.mubr.f32.gmra.mrb[4].mxu0 %v3171_v13  ;;  %2668 = vmatprep.mubr.f32.mxu1 %v5306_v19 }
 0x1d7   : > { %1815 = vmatprep.mubr.f32.mxu0 %v4019_v28  ;;  %v910_v28 = vrot.slane %v4549_v25, 2 }
 0x1d8   : > { %v4642_v17 = vpop.f32.mrb[28].mxu1 }
 0x1d9   : > { %2669 = vmatmul.mubr.f32.gmra.mrb[134].mxu1 %v5307_v40  ;;  %v1199_v12 = vpop.f32.mrb[29].mxu1 }
 0x1da   : > { %1816 = vmatmul.mubr.f32.gmra.mrb[6].mxu0 %v3172_v45  ;;  %2671 = vmatprep.mubr.f32.mxu1 %v5308_v27 }
 0x1db   : > { %1820 = vmatprep.mubr.f32.mxu0 %v4040_v38  ;;  %v913_v38 = vrot.slane %v4552_v57, 2 }
 0x1dc   : > { %v4647_v4 = vpop.f32.mrb[30].mxu1 }
 0x1dd   : > { %2672 = vmatmul.mubr.f32.gmra.mrb[136].mxu1 %v5309_v50  ;;  %v1204_v48 = vpop.f32.mrb[31].mxu1 }
 0x1de   : > { %1821 = vmatmul.mubr.f32.gmra.mrb[8].mxu0 %v3173_v2  ;;  %2674 = vmatprep.mubr.f32.mxu1 %v4408_v34 }
 0x1df   : > { %1825 = vmatprep.mubr.f32.mxu0 %v4061_v60  ;;  %v914_v60 = vsel %vm770_vm1, %v910_v28, %v913_v38 }
 0x1e0   : > { %v4653_v31 = vpop.f32.mrb[32].mxu1 }
 0x1e1   : > { %2675 = vmatmul.mubr.f32.gmra.mrb[138].mxu1 %v4420_v9  ;;  %v1209_v26 = vpop.f32.mrb[33].mxu1 }
 0x1e2   : > { %1826 = vmatmul.mubr.f32.gmra.mrb[10].mxu0 %v3174_v54  ;;  %2677 = vmatprep.mubr.f32.mxu1 %v895_v47 }
 0x1e3   : > { %1830 = vmatprep.mubr.f32.mxu0 %v4079_v18 }
 0x1e4   : > { %v4658_v63 = vpop.f32.mrb[34].mxu1 }
 0x1e5   : > { %2678 = vmatmul.mubr.f32.gmra.mrb[140].mxu1 %v897_v30  ;;  %v1214_v34 = vpop.f32.mrb[35].mxu1 }
 0x1e6   : > { %1831 = vmatmul.mubr.f32.gmra.mrb[12].mxu0 %v3175_v49  ;;  %2680 = vmatprep.mubr.f32.mxu1 %v910_v28 }
 0x1e7   : > { %1835 = vmatprep.mubr.f32.mxu0 %v5272_v7 }
 0x1e8   : > { %v4662_v9 = vpop.f32.mrb[36].mxu1 }
 0x1e9   : > { %2681 = vmatmul.mubr.f32.gmra.mrb[142].mxu1 %v914_v60  ;;  %v1219_v25 = vpop.f32.mrb[37].mxu1 }
 0x1ea   : > { %1836 = vmatmul.mubr.f32.gmra.mrb[14].mxu0 %v3176_v14 }
 0x1ec   : > { %v4664_v57 = vpop.f32.mrb[38].mxu1 }
 0x1ed   : > { %v1224_v18 = vpop.f32.mrb[39].mxu1 }
 0x1f0   : > { %v4666_v22 = vpop.f32.mrb[40].mxu1 }
 0x1f1   : > { %v1229_v8 = vpop.f32.mrb[41].mxu1 }
 0x1f4   : > { %v4668_v58 = vpop.f32.mrb[42].mxu1 }
 0x1f5   : > { %v1234_v52 = vpop.f32.mrb[43].mxu1 }
 0x1f8   : > { %v4670_v56 = vpop.f32.mrb[44].mxu1 }
 0x1f9   : > { %v1239_v36 = vpop.f32.mrb[45].mxu1 }
 0x1fc   : > { %v4672_v19 = vpop.f32.mrb[46].mxu1 }
 0x1fd   : > { %v1244_v7 = vpop.f32.mrb[47].mxu1 }
 0x200   : > { %v4674_v29 = vpop.f32.mrb[48].mxu1 }
 0x201   : > { %v1249_v40 = vpop.f32.mrb[49].mxu1 }
 0x204   : > { %v4676_v1 = vpop.f32.mrb[50].mxu1 }
 0x205   : > { %v1254_v27 = vpop.f32.mrb[51].mxu1 }
 0x208   : > { %v4678_v55 = vpop.f32.mrb[52].mxu1 }
 0x209   : > { %v1259_v50 = vpop.f32.mrb[53].mxu1 }
 0x20c   : > { %v4680_v37 = vpop.f32.mrb[54].mxu1 }
 0x20d   : > { %v1264_v59 = vpop.f32.mrb[55].mxu1 }
 0x210   : > { %v4682_v10 = vpop.f32.mrb[56].mxu1 }
 0x211   : > { %v1269_v32 = vpop.f32.mrb[57].mxu1 }
 0x214   : > { %v4684_v47 = vpop.f32.mrb[58].mxu1 }
 0x215   : > { %v1274_v35 = vpop.f32.mrb[59].mxu1 }
 0x218   : > { %v4686_v41 = vpop.f32.mrb[60].mxu1 }
 0x219   : > { %v1279_v30 = vpop.f32.mrb[61].mxu1 }
 0x21c   : > { %v4688_v46 = vpop.f32.mrb[62].mxu1 }
 0x21d   : > { %v1284_v6 = vpop.f32.mrb[63].mxu1 }
 0x220   : > { %v1842_v61 = vpop.f32.mrb[64].mxu1 }
 0x221   : > { %v1844_v23 = vpop.f32.mrb[65].mxu1 }
 0x224   : > { %v1847_v42 = vpop.f32.mrb[66].mxu1 }
 0x225   : > { %v1849_v53 = vpop.f32.mrb[67].mxu1 }
 0x228   : > { %v1852_v21 = vpop.f32.mrb[68].mxu1 }
 0x229   : > { %v1854_v13 = vpop.f32.mrb[69].mxu1 }
 0x22c   : > { %v1857_v12 = vpop.f32.mrb[70].mxu1 }
 0x22d   : > { %v1859_v45 = vpop.f32.mrb[71].mxu1 }
 0x230   : > { %v1862_v48 = vpop.f32.mrb[72].mxu1 }
 0x231   : > { %v1864_v2 = vpop.f32.mrb[73].mxu1 }
 0x234   : > { %v1867_v28 = vpop.f32.mrb[74].mxu1 }
 0x235   : > { %v1869_v26 = vpop.f32.mrb[75].mxu1 }
 0x238   : > { %v1872_v54 = vpop.f32.mrb[76].mxu1 }
 0x239   : > { %v1874_v38 = vpop.f32.mrb[77].mxu1 }
 0x23c   : > { %v1877_v34 = vpop.f32.mrb[78].mxu1 }
 0x23d   : > { %v1879_v49 = vpop.f32.mrb[79].mxu1 }
 0x240   : > { %v1882_v60 = vpop.f32.mrb[80].mxu1 }
 0x241   : > { %v1617_v25 = vpop.f32.mrb[16].mxu0  ;;  %v1884_v14 = vpop.f32.mrb[81].mxu1 }
 0x242   : > { %v2947_v18 = vadd.f32 %v1617_v25, %v4610_v3  ;;  %v1619_v8 = vpop.f32.mrb[17].mxu0 }
 0x244   : > { %v4691_v52 = vadd.f32 %v2947_v18, %v1842_v61  ;;  %v1887_v36 = vpop.f32.mrb[82].mxu1 }
 0x245   : > { %v1622_v7 = vpop.f32.mrb[18].mxu0  ;;  %v1889_v40 = vpop.f32.mrb[83].mxu1 }
 0x246   : > { %v2949_v27 = vadd.f32 %v1622_v7, %v4616_v43  ;;  %v1624_v50 = vpop.f32.mrb[19].mxu0 }
 0x248   : > { %v4694_v59 = vadd.f32 %v2949_v27, %v1847_v42  ;;  %v1892_v32 = vpop.f32.mrb[84].mxu1 }
 0x249   : > { %v1627_v35 = vpop.f32.mrb[20].mxu0  ;;  %v1894_v30 = vpop.f32.mrb[85].mxu1 }
 0x24a   : > { %v2951_v6 = vadd.f32 %v1627_v35, %v4621_v11  ;;  %v1629_v23 = vpop.f32.mrb[21].mxu0 }
 0x24c   : > { %v4697_v53 = vadd.f32 %v2951_v6, %v1852_v21  ;;  %v1897_v3 = vpop.f32.mrb[86].mxu1 }
 0x24d   : > { %v1632_v13 = vpop.f32.mrb[22].mxu0  ;;  %v1899_v61 = vpop.f32.mrb[87].mxu1 }
 0x24e   : > { %v2953_v45 = vadd.f32 %v1632_v13, %v4627_v15  ;;  %v1634_v2 = vpop.f32.mrb[23].mxu0 }
 0x250   : > { %v4700_v26 = vadd.f32 %v2953_v45, %v1857_v12  ;;  %v1902_v43 = vpop.f32.mrb[88].mxu1 }
 0x251   : > { %v1637_v38 = vpop.f32.mrb[24].mxu0  ;;  %v1904_v42 = vpop.f32.mrb[89].mxu1 }
 0x252   : > { %v2955_v49 = vadd.f32 %v1637_v38, %v4632_v20  ;;  %v1639_v25 = vpop.f32.mrb[25].mxu0 }
 0x254   : > { %v4703_v14 = vadd.f32 %v2955_v49, %v1862_v48  ;;  %v1907_v11 = vpop.f32.mrb[90].mxu1 }
 0x255   : > { %v1642_v18 = vpop.f32.mrb[26].mxu0  ;;  %v1909_v21 = vpop.f32.mrb[91].mxu1 }
 0x256   : > { %v2957_v8 = vadd.f32 %v1642_v18, %v4637_v16  ;;  %v1644_v7 = vpop.f32.mrb[27].mxu0 }
 0x258   : > { %v4706_v40 = vadd.f32 %v2957_v8, %v1867_v28  ;;  %v1912_v15 = vpop.f32.mrb[92].mxu1 }
 0x259   : > { %v1647_v27 = vpop.f32.mrb[28].mxu0  ;;  %v1914_v12 = vpop.f32.mrb[93].mxu1 }
 0x25a   : > { %v2959_v50 = vadd.f32 %v1647_v27, %v4642_v17  ;;  %v1649_v35 = vpop.f32.mrb[29].mxu0 }
 0x25c   : > { %v4709_v30 = vadd.f32 %v2959_v50, %v1872_v54  ;;  %v1917_v20 = vpop.f32.mrb[94].mxu1 }
 0x25d   : > { %v1652_v6 = vpop.f32.mrb[30].mxu0  ;;  %v1919_v48 = vpop.f32.mrb[95].mxu1 }
 0x25e   : > { %v2961_v23 = vadd.f32 %v1652_v6, %v4647_v4  ;;  %v1654_v13 = vpop.f32.mrb[31].mxu0 }
 0x260   : > { %v4712_v61 = vadd.f32 %v2961_v23, %v1877_v34  ;;  %v1922_v16 = vpop.f32.mrb[96].mxu1 }
 0x261   : > { %v1657_v45 = vpop.f32.mrb[32].mxu0  ;;  %v1924_v28 = vpop.f32.mrb[97].mxu1 }
 0x262   : > { %v2963_v2 = vadd.f32 %v1657_v45, %v4653_v31  ;;  %v1659_v38 = vpop.f32.mrb[33].mxu0 }
 0x264   : > { %v4715_v42 = vadd.f32 %v2963_v2, %v1882_v60  ;;  %v1927_v17 = vpop.f32.mrb[98].mxu1 }
 0x265   : > { %v1662_v49 = vpop.f32.mrb[34].mxu0  ;;  %v1929_v54 = vpop.f32.mrb[99].mxu1 }
 0x266   : > { %v2965_v25 = vadd.f32 %v1662_v49, %v4658_v63  ;;  %v1664_v18 = vpop.f32.mrb[35].mxu0 }
 0x268   : > { %v4718_v21 = vadd.f32 %v2965_v25, %v1887_v36  ;;  %v1932_v4 = vpop.f32.mrb[100].mxu1 }
 0x269   : > { %v1667_v8 = vpop.f32.mrb[36].mxu0  ;;  %v1934_v34 = vpop.f32.mrb[101].mxu1 }
 0x26a   : > { %v2967_v7 = vadd.f32 %v1667_v8, %v4662_v9  ;;  %v1669_v27 = vpop.f32.mrb[37].mxu0 }
 0x26c   : > { %v4721_v12 = vadd.f32 %v2967_v7, %v1892_v32  ;;  %v1937_v31 = vpop.f32.mrb[102].mxu1 }
 0x26d   : > { %v1672_v50 = vpop.f32.mrb[38].mxu0  ;;  %v1939_v60 = vpop.f32.mrb[103].mxu1 }
 0x26e   : > { %v2969_v35 = vadd.f32 %v1672_v50, %v4664_v57  ;;  %v1674_v6 = vpop.f32.mrb[39].mxu0 }
 0x270   : > { %v4724_v48 = vadd.f32 %v2969_v35, %v1897_v3  ;;  %v1942_v63 = vpop.f32.mrb[104].mxu1 }
 0x271   : > { %v1677_v23 = vpop.f32.mrb[40].mxu0  ;;  %v1944_v36 = vpop.f32.mrb[105].mxu1 }
 0x272   : > { %v2971_v13 = vadd.f32 %v1677_v23, %v4666_v22  ;;  %v1679_v45 = vpop.f32.mrb[41].mxu0 }
 0x274   : > { %v4727_v28 = vadd.f32 %v2971_v13, %v1902_v43  ;;  %v4729_v9 = vpop.f32.mrb[106].mxu1 }
 0x275   : > { %v1682_v32 = vpop.f32.mrb[42].mxu0  ;;  %v1949_v2 = vpop.f32.mrb[107].mxu1 }
 0x276   : > { %v2973_v38 = vadd.f32 %v1682_v32, %v4668_v58  ;;  %v1684_v49 = vpop.f32.mrb[43].mxu0 }
 0x278   : > { %v4732_v54 = vpop.f32.mrb[108].mxu1  ;;  %v4734_v57 = vadd.f32 %v2973_v38, %v1907_v11 }
 0x279   : > { %v1687_v3 = vpop.f32.mrb[44].mxu0  ;;  %v1954_v25 = vpop.f32.mrb[109].mxu1 }
 0x27a   : > { %v2975_v18 = vadd.f32 %v1687_v3, %v4670_v56  ;;  %v1689_v8 = vpop.f32.mrb[45].mxu0 }
 0x27c   : > { %v4737_v22 = vpop.f32.mrb[110].mxu1  ;;  %v4739_v43 = vadd.f32 %v2975_v18, %v1912_v15 }
 0x27d   : > { %v1692_v34 = vpop.f32.mrb[46].mxu0  ;;  %v1959_v7 = vpop.f32.mrb[111].mxu1 }
 0x27e   : > { %v2977_v27 = vadd.f32 %v1692_v34, %v4672_v19  ;;  %v1694_v50 = vpop.f32.mrb[47].mxu0 }
 0x280   : > { %v4742_v58 = vpop.f32.mrb[112].mxu1  ;;  %v4744_v60 = vadd.f32 %v2977_v27, %v1917_v20 }
 0x281   : > { %v1697_v11 = vpop.f32.mrb[48].mxu0  ;;  %v4746_v35 = vpop.f32.mrb[113].mxu1 }
 0x282   : > { %v2979_v6 = vadd.f32 %v1697_v11, %v4674_v29  ;;  %v1699_v56 = vpop.f32.mrb[49].mxu0 }
 0x284   : > { %v4749_v23 = vpop.f32.mrb[114].mxu1  ;;  %v4751_v36 = vadd.f32 %v2979_v6, %v1922_v16 }
 0x285   : > { %v1702_v15 = vpop.f32.mrb[50].mxu0  ;;  %v4753_v13 = vpop.f32.mrb[115].mxu1 }
 0x286   : > { %v2981_v19 = vadd.f32 %v1702_v15, %v4676_v1  ;;  %v1704_v45 = vpop.f32.mrb[51].mxu0 }
 0x288   : > { %v4756_v32 = vpop.f32.mrb[116].mxu1  ;;  %v4758_v20 = vadd.f32 %v2981_v19, %v1927_v17 }
 0x289   : > { %v1707_v2 = vpop.f32.mrb[52].mxu0  ;;  %v4760_v38 = vpop.f32.mrb[117].mxu1 }
 0x28a   : > { %v2983_v29 = vadd.f32 %v1707_v2, %v4678_v55  ;;  %v1709_v49 = vpop.f32.mrb[53].mxu0 }
 0x28c   : > { %v4763_v3 = vpop.f32.mrb[118].mxu1  ;;  %v4765_v16 = vadd.f32 %v2983_v29, %v1932_v4 }
 0x28d   : > { %v1712_v25 = vpop.f32.mrb[54].mxu0  ;;  %v4767_v18 = vpop.f32.mrb[119].mxu1 }
 0x28e   : > { %v2985_v1 = vadd.f32 %v1712_v25, %v4680_v37  ;;  %v1714_v8 = vpop.f32.mrb[55].mxu0 }
 0x290   : > { %v2649_v34 = vpop.f32.mrb[120].mxu1  ;;  %v4770_v17 = vadd.f32 %v2985_v1, %v1937_v31 }
 0x291   : > { %v1717_v7 = vpop.f32.mrb[56].mxu0  ;;  %v4773_v27 = vadd.f32 %v4694_v59, %v2649_v34  ;;  %v2067_v55 = vpop.f32.mrb[121].mxu1 }
 0x292   : > { %v2987_v50 = vadd.f32 %v1717_v7, %v4682_v10  ;;  %v1719_v11 = vpop.f32.mrb[57].mxu0  ;;  %v4777_v4 = vadd.f32 %v4691_v52, %v2067_v55 }
 0x293   : > { %2195 = vst [vmem:[%s4781_s27 + $0x48] sm:$0xff] %v4773_v27 }
 0x294   : > { %2194 = vst [vmem:[%s4781_s27 + $0x40] sm:$0xff] %v4777_v4  ;;  %v2652_v37 = vpop.f32.mrb[122].mxu1  ;;  %v4787_v59 = vadd.f32 %v2987_v50, %v1942_v63 }
 0x295   : > { %v1722_v31 = vpop.f32.mrb[58].mxu0  ;;  %v4790_v10 = vadd.f32 %v4700_v26, %v2652_v37  ;;  %v2077_v52 = vpop.f32.mrb[123].mxu1 }
 0x296   : > { %v2989_v6 = vadd.f32 %v1722_v31, %v4684_v47  ;;  %v1724_v56 = vpop.f32.mrb[59].mxu0  ;;  %v4794_v15 = vadd.f32 %v4697_v53, %v2077_v52 }
 0x297   : > { %2197 = vst [vmem:[%s4781_s27 + $0x58] sm:$0xff] %v4790_v10 }
 0x298   : > { %2196 = vst [vmem:[%s4781_s27 + $0x50] sm:$0xff] %v4794_v15  ;;  %v2655_v19 = vpop.f32.mrb[124].mxu1  ;;  %v4801_v63 = vadd.f32 %v2989_v6, %v4729_v9 }
 0x299   : > { %v1727_v45 = vpop.f32.mrb[60].mxu0  ;;  %v4804_v26 = vadd.f32 %v4706_v40, %v2655_v19  ;;  %v2087_v2 = vpop.f32.mrb[125].mxu1 }
 0x29a   : > { %v2991_v47 = vadd.f32 %v1727_v45, %v4686_v41  ;;  %v1729_v29 = vpop.f32.mrb[61].mxu0  ;;  %v4808_v53 = vadd.f32 %v4703_v14, %v2087_v2 }
 0x29b   : > { %2199 = vst [vmem:[%s4781_s27 + $0x68] sm:$0xff] %v4804_v26 }
 0x29c   : > { %2198 = vst [vmem:[%s4781_s27 + $0x60] sm:$0xff] %v4808_v53  ;;  %v2658_v49 = vpop.f32.mrb[126].mxu1  ;;  %v4815_v9 = vadd.f32 %v2991_v47, %v4732_v54 }
 0x29d   : > { %v1732_v25 = vpop.f32.mrb[62].mxu0  ;;  %v4818_v40 = vadd.f32 %v4712_v61, %v2658_v49  ;;  %v2097_v1 = vpop.f32.mrb[127].mxu1 }
 0x29e   : > { %v2993_v41 = vadd.f32 %v1732_v25, %v4688_v46  ;;  %v1734_v8 = vpop.f32.mrb[63].mxu0  ;;  %v4822_v14 = vadd.f32 %v4709_v30, %v2097_v1 }
 0x29f   : > { %2201 = vst [vmem:[%s4781_s27 + $0x78] sm:$0xff] %v4818_v40 }
 0x2a0   : > { %2200 = vst [vmem:[%s4781_s27 + $0x70] sm:$0xff] %v4822_v14  ;;  %v2661_v54 = vpop.f32.mrb[128].mxu1  ;;  %v4829_v34 = vadd.f32 %v2993_v41, %v4737_v22 }
 0x2a1   : > { %v1802_v7 = vpop.f32.mrb[0].mxu0  ;;  %v4832_v61 = vadd.f32 %v4718_v21, %v2661_v54  ;;  %v2107_v55 = vpop.f32.mrb[129].mxu1 }
 0x2a2   : > { %v2939_v46 = vadd.f32 %v1802_v7, %v4559_v0  ;;  %v1804_v30 = vpop.f32.mrb[1].mxu0  ;;  %v4836_v50 = vadd.f32 %v4715_v42, %v2107_v55 }
 0x2a3   : > { %2203 = vst [vmem:[%s4781_s27 + $0x88] sm:$0xff] %v4832_v61 }
 0x2a4   : > { %v2028_v11 = vadd.f32 %v2939_v46, %v4746_v35  ;;  %2202 = vst [vmem:[%s4781_s27 + $0x80] sm:$0xff] %v4836_v50  ;;  %v2664_v22 = vpop.f32.mrb[130].mxu1 }
 0x2a5   : > { %v1807_v37 = vpop.f32.mrb[2].mxu0  ;;  %v4844_v21 = vadd.f32 %v4724_v48, %v2664_v22  ;;  %v2117_v31 = vpop.f32.mrb[131].mxu1 }
 0x2a6   : > { %2186 = vst [vmem:[%s4781_s27] sm:$0xff] %v2028_v11  ;;  %v2940_v0 = vadd.f32 %v1807_v37, %v4565_v33  ;;  %v1809_v52 = vpop.f32.mrb[3].mxu0  ;;  %v4849_v42 = vadd.f32 %v4721_v12, %v2117_v31  ;;  %v2256_v56 = vmul.f32 %v2028_v11, %v2028_v11 }
 0x2a7   : > { %2205 = vst [vmem:[%s4781_s27 + $0x98] sm:$0xff] %v4844_v21 }
 0x2a8   : > { %v2033_v35 = vadd.f32 %v2940_v0, %v4742_v58  ;;  %2204 = vst [vmem:[%s4781_s27 + $0x90] sm:$0xff] %v4849_v42  ;;  %v2667_v6 = vpop.f32.mrb[132].mxu1 }
 0x2a9   : > { %v1812_v48 = vpop.f32.mrb[4].mxu0  ;;  %v4857_v19 = vadd.f32 %v4734_v57, %v2667_v6  ;;  %v2127_v33 = vpop.f32.mrb[133].mxu1 }
 0x2aa   : > { %2187 = vst [vmem:[%s4781_s27 + $0x8] sm:$0xff] %v2033_v35  ;;  %v2218_v45 = vadd.f32 %v2033_v35, %v2028_v11  ;;  %v2257_v2 = vmul.f32 %v2033_v35, %v2033_v35  ;;  %v2941_v12 = vadd.f32 %v1812_v48, %v4570_v51  ;;  %v1814_v47 = vpop.f32.mrb[5].mxu0  ;;  %v4862_v58 = vadd.f32 %v4727_v28, %v2127_v33 }
 0x2ab   : > { %2207 = vst [vmem:[%s4781_s27 + $0xa8] sm:$0xff] %v4857_v19 }
 0x2ac   : > { %v2288_v29 = vadd.f32 %v2257_v2, %v2256_v56  ;;  %v2038_v49 = vadd.f32 %v2941_v12, %v4753_v13  ;;  %2206 = vst [vmem:[%s4781_s27 + $0xa0] sm:$0xff] %v4862_v58  ;;  %v2670_v57 = vpop.f32.mrb[134].mxu1 }
 0x2ad   : > { %v1817_v25 = vpop.f32.mrb[6].mxu0  ;;  %v4870_v1 = vadd.f32 %v4744_v60, %v2670_v57  ;;  %v2137_v51 = vpop.f32.mrb[135].mxu1 }
 0x2ae   : > { %2188 = vst [vmem:[%s4781_s27 + $0x10] sm:$0xff] %v2038_v49  ;;  %v2219_v41 = vadd.f32 %v2218_v45, %v2038_v49  ;;  %v2258_v8 = vmul.f32 %v2038_v49, %v2038_v49  ;;  %v2942_v28 = vadd.f32 %v1817_v25, %v4576_v5  ;;  %v1819_v54 = vpop.f32.mrb[7].mxu0  ;;  %v4875_v7 = vadd.f32 %v4739_v43, %v2137_v51 }
 0x2af   : > { %2209 = vst [vmem:[%s4781_s27 + $0xb8] sm:$0xff] %v4870_v1 }
 0x2b0   : > { %v2289_v13 = vadd.f32 %v2288_v29, %v2258_v8  ;;  %v2043_v55 = vadd.f32 %v2942_v28, %v4749_v23  ;;  %2208 = vst [vmem:[%s4781_s27 + $0xb0] sm:$0xff] %v4875_v7  ;;  %v2673_v60 = vpop.f32.mrb[136].mxu1 }
 0x2b1   : > { %v1822_v46 = vpop.f32.mrb[8].mxu0  ;;  %v4883_v30 = vadd.f32 %v4758_v20, %v2673_v60  ;;  %v2147_v5 = vpop.f32.mrb[137].mxu1 }
 0x2b2   : > { %2189 = vst [vmem:[%s4781_s27 + $0x18] sm:$0xff] %v2043_v55  ;;  %v2220_v11 = vadd.f32 %v2219_v41, %v2043_v55  ;;  %v2259_v22 = vmul.f32 %v2043_v55, %v2043_v55  ;;  %v2943_v43 = vadd.f32 %v1822_v46, %v4582_v24  ;;  %v1824_v37 = vpop.f32.mrb[9].mxu0  ;;  %v4888_v31 = vadd.f32 %v4751_v36, %v2147_v5 }
 0x2b3   : > { %2211 = vst [vmem:[%s4781_s27 + $0xc8] sm:$0xff] %v4883_v30 }
 0x2b4   : > { %v2290_v23 = vadd.f32 %v2289_v13, %v2259_v22  ;;  %v2048_v0 = vadd.f32 %v2943_v43, %v4760_v38  ;;  %2210 = vst [vmem:[%s4781_s27 + $0xc0] sm:$0xff] %v4888_v31  ;;  %v2676_v20 = vpop.f32.mrb[138].mxu1 }
 0x2b5   : > { %v1827_v52 = vpop.f32.mrb[10].mxu0  ;;  %v4896_v35 = vadd.f32 %v4770_v17, %v2676_v20  ;;  %v2157_v24 = vpop.f32.mrb[139].mxu1 }
 0x2b6   : > { %2190 = vst [vmem:[%s4781_s27 + $0x20] sm:$0xff] %v2048_v0  ;;  %v2221_v6 = vadd.f32 %v2220_v11, %v2048_v0  ;;  %v2260_v56 = vmul.f32 %v2048_v0, %v2048_v0  ;;  %v2944_v36 = vadd.f32 %v1827_v52, %v4588_v39  ;;  %v1829_v48 = vpop.f32.mrb[11].mxu0  ;;  %v4901_v33 = vadd.f32 %v4765_v16, %v2157_v24 }
 0x2b7   : > { %2213 = vst [vmem:[%s4781_s27 + $0xd8] sm:$0xff] %v4896_v35 }
 0x2b8   : > { %v2291_v38 = vadd.f32 %v2290_v23, %v2260_v56  ;;  %v2053_v45 = vadd.f32 %v2944_v36, %v4756_v32  ;;  %2212 = vst [vmem:[%s4781_s27 + $0xd0] sm:$0xff] %v4901_v33  ;;  %v2679_v17 = vpop.f32.mrb[140].mxu1 }
 0x2b9   : > { %v1832_v2 = vpop.f32.mrb[12].mxu0  ;;  %v4909_v12 = vadd.f32 %v4801_v63, %v2679_v17  ;;  %v2167_v39 = vpop.f32.mrb[141].mxu1 }
 0x2ba   : > { %2191 = vst [vmem:[%s4781_s27 + $0x28] sm:$0xff] %v2053_v45  ;;  %v2222_v16 = vadd.f32 %v2221_v6, %v2053_v45  ;;  %v2261_v47 = vmul.f32 %v2053_v45, %v2053_v45  ;;  %v2945_v29 = vadd.f32 %v1832_v2, %v4594_v44  ;;  %v1834_v49 = vpop.f32.mrb[13].mxu0  ;;  %v4914_v57 = vadd.f32 %v4787_v59, %v2167_v39 }
 0x2bb   : > { %2215 = vst [vmem:[%s4781_s27 + $0xe8] sm:$0xff] %v4909_v12 }
 0x2bc   : > { %v2292_v32 = vadd.f32 %v2291_v38, %v2261_v47  ;;  %v2058_v25 = vadd.f32 %v2945_v29, %v4767_v18  ;;  %2214 = vst [vmem:[%s4781_s27 + $0xe0] sm:$0xff] %v4914_v57  ;;  %v2682_v63 = vpop.f32.mrb[142].mxu1 }
 0x2bd   : > { %v1837_v51 = vpop.f32.mrb[14].mxu0  ;;  %v4924_v44 = vadd.f32 %v4829_v34, %v2682_v63  ;;  %v2177_v41 = vpop.f32.mrb[143].mxu1 }
 0x2be   : > { %2192 = vst [vmem:[%s4781_s27 + $0x30] sm:$0xff] %v2058_v25  ;;  %v2223_v59 = vadd.f32 %v2222_v16, %v2058_v25  ;;  %v2262_v8 = vmul.f32 %v2058_v25, %v2058_v25  ;;  %v2946_v28 = vadd.f32 %v1837_v51, %v4602_v62  ;;  %v1839_v18 = vpop.f32.mrb[15].mxu0  ;;  %v4929_v54 = vadd.f32 %v4815_v9, %v2177_v41 }
 0x2bf   : > { %2217 = vst [vmem:[%s4781_s27 + $0xf8] sm:$0xff] %v4924_v44 }
 0x2c0   : > { %v2293_v34 = vadd.f32 %v2292_v32, %v2262_v8  ;;  %v2063_v13 = vadd.f32 %v2946_v28, %v4763_v3  ;;  %2216 = vst [vmem:[%s4781_s27 + $0xf0] sm:$0xff] %v4929_v54 }
 0x2c2   : > { %2193 = vst [vmem:[%s4781_s27 + $0x38] sm:$0xff] %v2063_v13  ;;  %v2224_v62 = vadd.f32 %v2223_v59, %v2063_v13  ;;  %v2263_v9 = vmul.f32 %v2063_v13, %v2063_v13 }
 0x2c3   : > { %3304 = shalt.err (!%p3301_p13)
}
 0x2c4   : > { %s3305_s20 = scalar_lea.hbm %s4936_s11, 4096  ;;  %s3309_s27 = scalar_lea.hbm %s5132_s4, 8192 }
 0x2c5   : > { %p3306_p0 = scmp.ne.s32.totalorder %s4936_s11, %s3305_s20  ;;  %p3310_p9 = scmp.lt.u32.totalorder %s4936_s11, %s5132_s4 }
 0x2c6   : > { %p3311_p12 = scmp.lt.u32.totalorder %s3309_s27, %s3305_s20  ;;  %p3313_p1 = scmp.lt.u32.totalorder %s3305_s20, %s4936_s11 }
 0x2c7   : > { %p3307_p5 = pnand %p3306_p0, %p3623_p6 }
 0x2c8   : > { %p3312_p2 = por %p3311_p12, %p3310_p9 }
 0x2c9   : > { %p3308_p11 = pneg %p3307_p5 }
 0x2ca   : > { %p3314_p4 = por %p3313_p1, %p3312_p2 }
 0x2cc   : > { %p3315_p8 = pnand %p3314_p4, %p3308_p11 }
 0x2ce   : > { %3318 = shalt.err (!%p3315_p8)
}
 0x2cf   : > { %s3436_s9 = smov 128   ;;  %s3437_s17 = smov 8   ;;  %v2264_v3 = vmul.f32 %v4777_v4, %v4777_v4  ;;  %v2225_v55 = vadd.f32 %v2224_v62, %v4777_v4  ;;  %v2294_v60 = vadd.f32 %v2293_v34, %v2263_v9  ;;  %v2265_v46 = vmul.f32 %v4773_v27, %v4773_v27 }
 0x2d0   : > { %3089 = dma.vmem_to_hbm [thread:$0]  (%p3623_p6), %s4938_s7, 4096, %s4936_s11, %s2327_s15, %s3436_s9, %s3436_s9, %s3437_s17   ;;  %v2266_v22 = vmul.f32 %v4794_v15, %v4794_v15  ;;  %v2267_v23 = vmul.f32 %v4790_v10, %v4790_v10  ;;  %v2268_v4 = vmul.f32 %v4808_v53, %v4808_v53 }
 0x2d1   : > { %v2226_v5 = vadd.f32 %v2225_v55, %v4773_v27  ;;  %v2295_v11 = vadd.f32 %v2294_v60, %v2264_v3  ;;  %v2269_v27 = vmul.f32 %v4804_v26, %v4804_v26  ;;  %s2331_s7 = sand.u32 1, %s3496_s25   ;;  %s2549_s11 = sshll.u32 %s3496_s25, 4 }
 0x2d2   : > { %s319_s15 = scalar_lea.vmem [#allocation12], %s3674_s26  ;;  %s325_s12 = scalar_lea.vmem [#allocation14], %s3674_s26 }
 0x2d3   : > { %v2227_v43 = vadd.f32 %v2226_v5, %v4794_v15  ;;  %v2296_v37 = vadd.f32 %v2295_v11, %v2265_v46  ;;  %v2270_v15 = vmul.f32 %v4822_v14, %v4822_v14  ;;  %s2364_s19 = sshll.u32 %s319_s15, 4  ;;  %s2377_s30 = sshll.u32 %s325_s12, 4  ;;  %s5051_s19 = int_to_ptr.vmem [resolvable:$true] %s2364_s19  ;;  %s5058_s30 = int_to_ptr.vmem [resolvable:$true] %s2377_s30 }
 0x2d4   : > { %s5049_s14 = scalar_lea.hbm %s5133_s5, %s2549_s11  ;;  %s5056_s29 = scalar_lea.hbm %s5134_s6, %s2549_s11 }
 0x2d5   : > { %v2228_v0 = vadd.f32 %v2227_v43, %v4790_v10  ;;  %v2297_v20 = vadd.f32 %v2296_v37, %v2266_v22  ;;  %v2271_v10 = vmul.f32 %v4818_v40, %v4818_v40  ;;  %s5060_s18 = scalar_lea.sflag [#allocation13], %s2331_s7  ;;  %s3319_s9 = scalar_lea.vmem %s5051_s19, 16 }
 0x2d6   : > { %p3320_p3 = scmp.ne.s32.totalorder %s5051_s19, %s3319_s9  ;;  %s3438_s17 = smov [#allocation12]  }
 0x2d7   : > { %v2229_v52 = vadd.f32 %v2228_v0, %v4808_v53  ;;  %v2298_v24 = vadd.f32 %v2297_v20, %v2267_v23  ;;  %v2272_v53 = vmul.f32 %v4836_v50, %v4836_v50  ;;  %v2287_v23 = vmul.f32 %v4924_v44, %v4924_v44  ;;  %s3323_s20 = sshll.u32 %s3438_s17, 4  ;;  %s3324_s20 = int_to_ptr.vmem [resolvable:$false] %s3323_s20 }
 0x2d8   : > { %p3321_p7 = pnand %p3320_p3, %p3623_p6  ;;  %s3325_s8 = scalar_lea.vmem %s3324_s20, 32 }
 0x2d9   : > { %v2230_v6 = vadd.f32 %v2229_v52, %v4804_v26  ;;  %v2299_v56 = vadd.f32 %v2298_v24, %v2268_v4  ;;  %v2273_v26 = vmul.f32 %v4832_v61, %v4832_v61  ;;  %p3326_p13 = scmp.lt.s32.totalorder %s5051_s19, %s3324_s20  ;;  %p3327_p0 = scmp.lt.s32.totalorder %s3325_s8, %s3319_s9 }
 0x2da   : > { %p3322_p10 = pneg %p3321_p7 }
 0x2db   : > { %v2231_v36 = vadd.f32 %v2230_v6, %v4822_v14  ;;  %v2300_v48 = vadd.f32 %v2299_v56, %v2269_v27  ;;  %v2274_v14 = vmul.f32 %v4849_v42, %v4849_v42  ;;  %p3328_p5 = por %p3327_p0, %p3326_p13 }
 0x2dd   : > { %v2232_v38 = vadd.f32 %v2231_v36, %v4818_v40  ;;  %v2301_v45 = vadd.f32 %v2300_v48, %v2270_v15  ;;  %v2275_v40 = vmul.f32 %v4844_v21, %v4844_v21  ;;  %p3329_p11 = pnand %p3328_p5, %p3322_p10 }
 0x2df   : > { %v2233_v17 = vadd.f32 %v2232_v38, %v4836_v50  ;;  %v2302_v2 = vadd.f32 %v2301_v45, %v2271_v10  ;;  %v2276_v50 = vmul.f32 %v4862_v58, %v4862_v58 }
 0x2e1   : > { %v2234_v39 = vadd.f32 %v2233_v17, %v4832_v61  ;;  %v2303_v16 = vadd.f32 %v2302_v2, %v2272_v53  ;;  %v2277_v61 = vmul.f32 %v4857_v19, %v4857_v19 }
 0x2e3   : > { %v2304_v47 = vadd.f32 %v2303_v16, %v2273_v26  ;;  %v2235_v29 = vadd.f32 %v2234_v39, %v4849_v42  ;;  %v2278_v42 = vmul.f32 %v4875_v7, %v4875_v7 }
 0x2e5   : > { %v2236_v49 = vadd.f32 %v2235_v29, %v4844_v21  ;;  %v2305_v32 = vadd.f32 %v2304_v47, %v2274_v14  ;;  %v2279_v21 = vmul.f32 %v4870_v1, %v4870_v1 }
 0x2e7   : > { %v2237_v25 = vadd.f32 %v2236_v49, %v4862_v58  ;;  %v2306_v63 = vadd.f32 %v2305_v32, %v2275_v40  ;;  %v2280_v58 = vmul.f32 %v4888_v31, %v4888_v31 }
 0x2e9   : > { %v2238_v51 = vadd.f32 %v2237_v25, %v4857_v19  ;;  %v2307_v41 = vadd.f32 %v2306_v63, %v2276_v50  ;;  %v2281_v19 = vmul.f32 %v4883_v30, %v4883_v30 }
 0x2eb   : > { %v2239_v59 = vadd.f32 %v2238_v51, %v4875_v7  ;;  %v2308_v8 = vadd.f32 %v2307_v41, %v2277_v61  ;;  %v2282_v7 = vmul.f32 %v4901_v33, %v4901_v33 }
 0x2ed   : > { %v2240_v28 = vadd.f32 %v2239_v59, %v4870_v1  ;;  %v2309_v18 = vadd.f32 %v2308_v8, %v2278_v42  ;;  %v2283_v1 = vmul.f32 %v4896_v35, %v4896_v35 }
 0x2ef   : > { %v2241_v34 = vadd.f32 %v2240_v28, %v4888_v31  ;;  %v2310_v13 = vadd.f32 %v2309_v18, %v2279_v21  ;;  %v2284_v31 = vmul.f32 %v4914_v57, %v4914_v57 }
 0x2f1   : > { %v2242_v62 = vadd.f32 %v2241_v34, %v4883_v30  ;;  %v2311_v9 = vadd.f32 %v2310_v13, %v2280_v58  ;;  %v2285_v30 = vmul.f32 %v4909_v12, %v4909_v12 }
 0x2f3   : > { %v2243_v3 = vadd.f32 %v2242_v62, %v4901_v33  ;;  %v2312_v55 = vadd.f32 %v2311_v9, %v2281_v19 }
 0x2f5   : > { %v2244_v60 = vadd.f32 %v2243_v3, %v4896_v35  ;;  %v2313_v46 = vadd.f32 %v2312_v55, %v2282_v7  ;;  %v2286_v35 = vmul.f32 %v4929_v54, %v4929_v54 }
 0x2f7   : > { %v2245_v5 = vadd.f32 %v2244_v60, %v4914_v57  ;;  %v2314_v11 = vadd.f32 %v2313_v46, %v2283_v1 }
 0x2f9   : > { %v2246_v22 = vadd.f32 %v2245_v5, %v4909_v12  ;;  %v2315_v33 = vadd.f32 %v2314_v11, %v2284_v31 }
 0x2fb   : > { %v2247_v43 = vadd.f32 %v2246_v22, %v4929_v54  ;;  %v2316_v37 = vadd.f32 %v2315_v33, %v2285_v30 }
 0x2fd   : > { %v2248_v57 = vadd.f32 %v2247_v43, %v4924_v44  ;;  %v2317_v0 = vadd.f32 %v2316_v37, %v2286_v35 }
 0x2ff   : > { %v2249_v20 = vrot.slane %v2248_v57, 4  ;;  %v2318_v12 = vadd.f32 %v2317_v0, %v2287_v23 }
 0x301   : > { %v2250_v4 = vadd.f32 %v2249_v20, %v2248_v57  ;;  %v2319_v52 = vrot.slane %v2318_v12, 4 }
 0x303   : > { %v2251_v24 = vrot.slane %v2250_v4, 2  ;;  %v2320_v27 = vadd.f32 %v2319_v52, %v2318_v12 }
 0x305   : > { %v2252_v6 = vadd.f32 %v2251_v24, %v2250_v4  ;;  %v2321_v56 = vrot.slane %v2320_v27, 2 }
 0x307   : > { %v2322_v54 = vadd.f32 %v2321_v56, %v2320_v27  ;;  %v2253_v15 = vrot.slane %v2252_v6, 1 }
 0x309   : > { %v2254_v44 = vadd.f32 %v2253_v15, %v2252_v6  ;;  %v2323_v36 = vrot.slane %v2322_v54, 1 }
 0x30b   : > { %2255 = vst [vmem:[%s319_s15] sm:$0x1] %v2254_v44  ;;  %v2324_v48 = vadd.f32 %v2323_v36, %v2322_v54 }
 0x30c   : > { %3332 = shalt.err (!%p3329_p11)
}
 0x30d   : > { %s3333_s7 = scalar_lea.hbm %s5049_s14, 16  ;;  %s3337_s25 = scalar_lea.hbm %s5133_s5, 32 }
 0x30e   : > { %p3334_p9 = scmp.ne.s32.totalorder %s5049_s14, %s3333_s7  ;;  %p3338_p1 = scmp.lt.u32.totalorder %s5049_s14, %s5133_s5 }
 0x30f   : > { %p3339_p4 = scmp.lt.u32.totalorder %s3337_s25, %s3333_s7  ;;  %p3341_p3 = scmp.lt.u32.totalorder %s3333_s7, %s5049_s14 }
 0x310   : > { %p3335_p12 = pnand %p3334_p9, %p3623_p6 }
 0x311   : > { %p3340_p8 = por %p3339_p4, %p3338_p1 }
 0x312   : > { %p3336_p2 = pneg %p3335_p12 }
 0x313   : > { %p3342_p7 = por %p3341_p3, %p3340_p8 }
 0x315   : > { %p3343_p10 = pnand %p3342_p7, %p3336_p2 }
 0x317   : > { %3346 = shalt.err (!%p3343_p10)
}
 0x318   : > { %3090 = dma.vmem_to_hbm [thread:$0]  (%p3623_p6), %s5051_s19, 16, %s5049_s14, %s5060_s18   ;;  %2325 = vst [vmem:[%s325_s12] sm:$0x1] %v2324_v48 }
 0x319   : > { %s3347_s9 = scalar_lea.vmem %s5058_s30, 16  ;;  %s3439_s20 = smov [#allocation14]  }
 0x31a   : > { %p3348_p13 = scmp.ne.s32.totalorder %s5058_s30, %s3347_s9  ;;  %s3351_s8 = sshll.u32 %s3439_s20, 4  ;;  %s3352_s8 = int_to_ptr.vmem [resolvable:$false] %s3351_s8 }
 0x31b   : > { %s3353_s7 = scalar_lea.vmem %s3352_s8, 32  ;;  %p3354_p11 = scmp.lt.s32.totalorder %s5058_s30, %s3352_s8 }
 0x31c   : > { %p3349_p0 = pnand %p3348_p13, %p3623_p6  ;;  %p3355_p9 = scmp.lt.s32.totalorder %s3353_s7, %s3347_s9 }
 0x31e   : > { %p3350_p5 = pneg %p3349_p0  ;;  %p3356_p12 = por %p3355_p9, %p3354_p11 }
 0x320   : > { %p3357_p2 = pnand %p3356_p12, %p3350_p5 }
 0x322   : > { %3360 = shalt.err (!%p3357_p2)
}
 0x323   : > { %s3361_s26 = scalar_lea.hbm %s5056_s29, 16  ;;  %s3365_s14 = scalar_lea.hbm %s5134_s6, 32 }
 0x324   : > { %p3362_p1 = scmp.ne.s32.totalorder %s5056_s29, %s3361_s26  ;;  %p3366_p3 = scmp.lt.u32.totalorder %s5056_s29, %s5134_s6 }
 0x325   : > { %p3367_p7 = scmp.lt.u32.totalorder %s3365_s14, %s3361_s26  ;;  %p3369_p13 = scmp.lt.u32.totalorder %s3361_s26, %s5056_s29 }
 0x326   : > { %p3363_p4 = pnand %p3362_p1, %p3623_p6 }
 0x327   : > { %p3368_p10 = por %p3367_p7, %p3366_p3 }
 0x328   : > { %p3364_p8 = pneg %p3363_p4 }
 0x329   : > { %p3370_p0 = por %p3369_p13, %p3368_p10 }
 0x32b   : > { %p3371_p5 = pnand %p3370_p0, %p3364_p8 }
 0x32d   : > { %3374 = shalt.err (!%p3371_p5)
}
 0x32e   : > { %3091 = dma.vmem_to_hbm [thread:$0]  (%p3623_p6), %s5058_s30, 16, %s5056_s29, %s5060_s18  }
 0x32f PF: > { %s2389_s25 = sand.u32 1, %s3413_s21   ;;  %p5310_p11 = scmp.ne.s32.totalorder %s5212_s28, 0 }
 0x330   : > { %p5311_p9 = scmp.ge.s32.totalorder %s3425_s24, 2  ;;  %s2390_s27 = scalar_lea.sflag [#allocation5], %s2389_s25 }
 0x332   : > { %p3110_p12 = pnand %p5311_p9, %p5310_p11 }
 0x334   : > { %3404 = dma.done.wait (!%p3110_p12), %s2390_s27, 4096  }
 0x335   : > { %3406 = vsyncadd (!%p3110_p12), %s2390_s27, 4294963200  ;;  %s5312_s17 = sadd.s32 4294967294, %s3425_s24  }
 0x336   : > { %s2398_s9 = sand.u32 1, %s5312_s17  }
 0x337   : > { %s2399_s20 = scalar_lea.sflag [#allocation13], %s2398_s9 }
 0x338   : > { %3408 = dma.done.wait (!%p3110_p12), %s2399_s20, 32  }
 0x339   : > { %3410 = vsyncadd (!%p3110_p12), %s2399_s20, 4294967264  ;;  %p25_p6 = scmp.ge.s32.totalorder %s3609_s13, 4   ;;  %s5313_s21 = smov %s3417_s22 }
 0x33a   : > { %s5314_s22 = smov %s3421_s23  ;;  %s5315_s23 = smov %s3619_s16 }
 0x33b   : > { %s5316_s24 = smov %s3609_s13  ;;  %27 = sbr.rel (!%p25_p6) target bundleno = 9 (0x9), region = 126 }
 0x342   :  { %2411 = vsyncpa [#allocation4], 1 }
 0x343   :  { %2413 = vsyncpa [#allocation4 + $0x1], 1 }
 0x344   :  { %2414 = vsyncpa [#allocation7], 1 }
 0x345   :  { %2415 = vsyncpa [#allocation10], 1 }
 0x346   :  { %2416 = vsyncpa [#allocation5], 1 }
 0x347   :  { %2418 = vsyncpa [#allocation5 + $0x1], 1 }
 0x348   :  { %2419 = vsyncpa [#allocation13], 1 }
 0x349   :  { %2421 = vsyncpa [#allocation13 + $0x1], 1 }

</bundles_post_ra>
